<compile_context>
chip_gen: v7x
topology: tpu7x:2x2x1
jax: 0.10.0
libtpu: 0.0.40
codegen_flags: <defaults>
</compile_context>

<pallas_src>
import functools

import jax
import jax.numpy as jnp
from jax.experimental import pallas as pl
from jax.experimental.pallas import tpu as pltpu


# ----------------------------------------------------------------------------
# Fused residual-block kernel.
# ----------------------------------------------------------------------------
def _residual_block_kernel(x_ref, w1_ref, g1_ref, b1_ref, w2_ref, g2_ref,
                           b2_ref, o_ref, pad_ref, col_ref, *, N, H, W, C,
                           eps):
    NHW = N * H * W
    inv_cnt = 1.0 / float(NHW)

    # Zero the halo once; the interior is overwritten before each conv, the
    # 1-pixel zero border is shared by both convs.
    pad_ref[...] = jnp.zeros_like(pad_ref)

    def conv3x3(act_nhwc, w_ref):
        # act_nhwc: (N, H, W, C) value.  Returns (N*H*W, C) f32.
        # Conv bias is intentionally omitted: it is cancelled exactly by the
        # BatchNorm mean subtraction that always follows.
        pad_ref[:, 1:H + 1, 1:W + 1, :] = act_nhwc
        # Build the im2col slab (N, H, W, 9*C) in VMEM, then one MXU matmul.
        for dh in range(3):
            for dw in range(3):
                tap = dh * 3 + dw
                col_ref[:, :, :, tap * C:(tap + 1) * C] = \
                    pad_ref[:, dh:dh + H, dw:dw + W, :]
        col = col_ref[...].reshape(NHW, 9 * C)
        return jnp.dot(col, w_ref[...], preferred_element_type=jnp.float32)

    def bn_train(y, g_ref, b_ref):
        # Training-mode BatchNorm2d: biased batch stats over N*H*W, eps=1e-5.
        mean = jnp.sum(y, axis=0, keepdims=True) * inv_cnt          # (1, C)
        d = y - mean
        var = jnp.sum(d * d, axis=0, keepdims=True) * inv_cnt       # (1, C)
        scale = g_ref[...] * jax.lax.rsqrt(var + eps)               # (1, C)
        return d * scale + b_ref[...]

    x = x_ref[...]                                                  # (N,H,W,C)

    # conv1 -> bn1 -> relu
    y1 = conv3x3(x, w1_ref)
    h1 = jnp.maximum(bn_train(y1, g1_ref, b1_ref), 0.0)

    # conv2 -> bn2 -> + residual -> relu
    y2 = conv3x3(h1.reshape(N, H, W, C), w2_ref)
    out = jnp.maximum(bn_train(y2, g2_ref, b2_ref) + x.reshape(NHW, C), 0.0)

    o_ref[...] = out.reshape(N, H, W, C)


def residual_block(x_nchw, params, *, eps=1e-5):
    """Forward pass of the PyTorch ResidualBlock (training-mode BN).

    x_nchw: (N, C, H, W) float32.  Conv weights are stored HWIO (3,3,C,C);
    a PyTorch (Cout,Cin,3,3) weight maps via transpose(2,3,1,0).
    """
    N, C, H, W = x_nchw.shape
    x = jnp.transpose(x_nchw, (0, 2, 3, 1)).astype(jnp.float32)     # NHWC

    w1 = params["w1"].reshape(9 * C, C)     # (3,3,C,C) -> (9C, C), tap-major
    w2 = params["w2"].reshape(9 * C, C)

    full = pl.BlockSpec((N, H, W, C), lambda i: (0, 0, 0, 0))
    wspec = pl.BlockSpec((9 * C, C), lambda i: (0, 0))
    vspec = pl.BlockSpec((1, C), lambda i: (0, 0))

    out = pl.pallas_call(
        functools.partial(_residual_block_kernel, N=N, H=H, W=W, C=C, eps=eps),
        out_shape=jax.ShapeDtypeStruct((N, H, W, C), jnp.float32),
        grid=(1,),
        in_specs=[full, wspec, vspec, vspec, wspec, vspec, vspec],
        out_specs=full,
        scratch_shapes=[
            pltpu.VMEM((N, H + 2, W + 2, C), jnp.float32),   # zero-halo buffer
            pltpu.VMEM((N, H, W, 9 * C), jnp.float32),       # im2col slab
        ],
        compiler_params=pltpu.CompilerParams(
            dimension_semantics=("arbitrary",)),
    )(x, w1,
      params["g1"].reshape(1, C), params["be1"].reshape(1, C),
      w2,
      params["g2"].reshape(1, C), params["be2"].reshape(1, C))

    return jnp.transpose(out, (0, 3, 1, 2))


# ----------------------------------------------------------------------------
# Pure-JAX reference (same math) for a correctness check.
# ----------------------------------------------------------------------------
def residual_block_ref(x_nchw, params, *, eps=1e-5):
    x = jnp.transpose(x_nchw, (0, 2, 3, 1)).astype(jnp.float32)

    def conv(h, w):
        return jax.lax.conv_general_dilated(
            h, w, window_strides=(1, 1), padding="SAME",
            dimension_numbers=("NHWC", "HWIO", "NHWC"))

    def bn(h, g, b):
        mean = jnp.mean(h, axis=(0, 1, 2), keepdims=True)
        var = jnp.mean((h - mean) ** 2, axis=(0, 1, 2), keepdims=True)
        return (h - mean) * jax.lax.rsqrt(var + eps) * g + b

    h = jax.nn.relu(bn(conv(x, params["w1"]), params["g1"], params["be1"]))
    h = bn(conv(h, params["w2"]), params["g2"], params["be2"]) + x
    return jnp.transpose(jax.nn.relu(h), (0, 3, 1, 2))


# ----------------------------------------------------------------------------
# Parameter init (deterministic).  Conv biases are omitted on purpose: with
# training-mode BatchNorm directly after each conv they have no effect.
# ----------------------------------------------------------------------------
def init_params(key, filters):
    kw1, kw2, kg1, kb1, kg2, kb2 = jax.random.split(key, 6)
    c = filters
    return dict(
        w1=0.1 * jax.random.normal(kw1, (3, 3, c, c), jnp.float32),
        g1=1.0 + 0.1 * jax.random.normal(kg1, (c,), jnp.float32),
        be1=0.1 * jax.random.normal(kb1, (c,), jnp.float32),
        w2=0.1 * jax.random.normal(kw2, (3, 3, c, c), jnp.float32),
        g2=1.0 + 0.1 * jax.random.normal(kg2, (c,), jnp.float32),
        be2=0.1 * jax.random.normal(kb2, (c,), jnp.float32),
    )


if __name__ == "__main__":
    key = jax.random.PRNGKey(0)
    k_x, k_p = jax.random.split(key)

    N, C, H, W = 2, 4, 16, 16
    x = jax.random.normal(k_x, (N, C, H, W), jnp.float32)   # NCHW like PyTorch
    params = init_params(k_p, C)

    fwd = jax.jit(residual_block)
    out = jax.block_until_ready(fwd(x, params))

    assert out.shape == (N, C, H, W), out.shape
    assert bool(jnp.all(jnp.isfinite(out)))

    ref = residual_block_ref(x, params)
    max_err = float(jnp.max(jnp.abs(out - ref)))
    assert max_err < 2e-3, f"max abs err vs reference = {max_err}"

    print("KERNEL_OK")
</pallas_src>

<mosaic_0001>
module attributes {stable_mosaic.version = 11 : i64} {
  func.func @_residual_block_kernel(%arg0: i32, %arg1: memref<2x16x16x4xf32, #tpu.memory_space<vmem>>, %arg2: memref<36x4xf32, #tpu.memory_space<vmem>>, %arg3: memref<1x4xf32, #tpu.memory_space<vmem>>, %arg4: memref<1x4xf32, #tpu.memory_space<vmem>>, %arg5: memref<36x4xf32, #tpu.memory_space<vmem>>, %arg6: memref<1x4xf32, #tpu.memory_space<vmem>>, %arg7: memref<1x4xf32, #tpu.memory_space<vmem>>, %arg8: memref<2x16x16x4xf32, #tpu.memory_space<vmem>>, %arg9: memref<2x18x18x4xf32, #tpu.memory_space<vmem>>, %arg10: memref<2x16x16x36xf32, #tpu.memory_space<vmem>>) attributes {dimension_semantics = [#tpu.dimension_semantics<arbitrary>], iteration_bounds = array<i64: 1>, scalar_prefetch = 0 : i64, scratch_operands = 2 : i64, tpu.core_type = #tpu.core_type<tc>, window_params = [{pipeline_mode = #tpu.pipeline_mode<synchronous>, transform_indices = @transform_0, window_bounds = array<i64: 2, 16, 16, 4>}, {pipeline_mode = #tpu.pipeline_mode<synchronous>, transform_indices = @transform_1, window_bounds = array<i64: 36, 4>}, {pipeline_mode = #tpu.pipeline_mode<synchronous>, transform_indices = @transform_2, window_bounds = array<i64: 1, 4>}, {pipeline_mode = #tpu.pipeline_mode<synchronous>, transform_indices = @transform_3, window_bounds = array<i64: 1, 4>}, {pipeline_mode = #tpu.pipeline_mode<synchronous>, transform_indices = @transform_4, window_bounds = array<i64: 36, 4>}, {pipeline_mode = #tpu.pipeline_mode<synchronous>, transform_indices = @transform_5, window_bounds = array<i64: 1, 4>}, {pipeline_mode = #tpu.pipeline_mode<synchronous>, transform_indices = @transform_6, window_bounds = array<i64: 1, 4>}, {pipeline_mode = #tpu.pipeline_mode<synchronous>, transform_indices = @transform_7, window_bounds = array<i64: 2, 16, 16, 4>}]} {
    %cst = arith.constant 0.000000e+00 : f32
    %0 = vector.broadcast %cst : f32 to vector<2x18x18x4xf32>
    %c0 = arith.constant 0 : index
    %c0_0 = arith.constant 0 : index
    %c0_1 = arith.constant 0 : index
    %c0_2 = arith.constant 0 : index
    %1 = vector.load %arg9[%c0, %c0_0, %c0_1, %c0_2] : memref<2x18x18x4xf32, #tpu.memory_space<vmem>>, vector<2x18x18x4xf32>
    tpu.vector_store %arg9[%c0, %c0_0, %c0_1, %c0_2], %0 {strides = array<i32>} : memref<2x18x18x4xf32, #tpu.memory_space<vmem>>, vector<2x18x18x4xf32>,
    %c0_3 = arith.constant 0 : index
    %c0_4 = arith.constant 0 : index
    %c0_5 = arith.constant 0 : index
    %c0_6 = arith.constant 0 : index
    %2 = vector.load %arg1[%c0_3, %c0_4, %c0_5, %c0_6] : memref<2x16x16x4xf32, #tpu.memory_space<vmem>>, vector<2x16x16x4xf32>
    %c0_7 = arith.constant 0 : index
    %c1 = arith.constant 1 : index
    %c1_8 = arith.constant 1 : index
    %c0_9 = arith.constant 0 : index
    %3 = vector.load %arg9[%c0_7, %c1, %c1_8, %c0_9] : memref<2x18x18x4xf32, #tpu.memory_space<vmem>>, vector<2x16x16x4xf32>
    tpu.vector_store %arg9[%c0_7, %c1, %c1_8, %c0_9], %2 {strides = array<i32>} : memref<2x18x18x4xf32, #tpu.memory_space<vmem>>, vector<2x16x16x4xf32>,
    %c0_10 = arith.constant 0 : index
    %c0_11 = arith.constant 0 : index
    %c0_12 = arith.constant 0 : index
    %c0_13 = arith.constant 0 : index
    %4 = vector.load %arg9[%c0_10, %c0_11, %c0_12, %c0_13] : memref<2x18x18x4xf32, #tpu.memory_space<vmem>>, vector<2x16x16x4xf32>
    %c0_14 = arith.constant 0 : index
    %c0_15 = arith.constant 0 : index
    %c0_16 = arith.constant 0 : index
    %c0_17 = arith.constant 0 : index
    %5 = vector.load %arg10[%c0_14, %c0_15, %c0_16, %c0_17] : memref<2x16x16x36xf32, #tpu.memory_space<vmem>>, vector<2x16x16x4xf32>
    tpu.vector_store %arg10[%c0_14, %c0_15, %c0_16, %c0_17], %4 {strides = array<i32>} : memref<2x16x16x36xf32, #tpu.memory_space<vmem>>, vector<2x16x16x4xf32>,
    %c0_18 = arith.constant 0 : index
    %c0_19 = arith.constant 0 : index
    %c1_20 = arith.constant 1 : index
    %c0_21 = arith.constant 0 : index
    %6 = vector.load %arg9[%c0_18, %c0_19, %c1_20, %c0_21] : memref<2x18x18x4xf32, #tpu.memory_space<vmem>>, vector<2x16x16x4xf32>
    %c0_22 = arith.constant 0 : index
    %c0_23 = arith.constant 0 : index
    %c0_24 = arith.constant 0 : index
    %c4 = arith.constant 4 : index
    %7 = vector.load %arg10[%c0_22, %c0_23, %c0_24, %c4] : memref<2x16x16x36xf32, #tpu.memory_space<vmem>>, vector<2x16x16x4xf32>
    tpu.vector_store %arg10[%c0_22, %c0_23, %c0_24, %c4], %6 {strides = array<i32>} : memref<2x16x16x36xf32, #tpu.memory_space<vmem>>, vector<2x16x16x4xf32>,
    %c0_25 = arith.constant 0 : index
    %c0_26 = arith.constant 0 : index
    %c2 = arith.constant 2 : index
    %c0_27 = arith.constant 0 : index
    %8 = vector.load %arg9[%c0_25, %c0_26, %c2, %c0_27] : memref<2x18x18x4xf32, #tpu.memory_space<vmem>>, vector<2x16x16x4xf32>
    %c0_28 = arith.constant 0 : index
    %c0_29 = arith.constant 0 : index
    %c0_30 = arith.constant 0 : index
    %c8 = arith.constant 8 : index
    %9 = vector.load %arg10[%c0_28, %c0_29, %c0_30, %c8] : memref<2x16x16x36xf32, #tpu.memory_space<vmem>>, vector<2x16x16x4xf32>
    tpu.vector_store %arg10[%c0_28, %c0_29, %c0_30, %c8], %8 {strides = array<i32>} : memref<2x16x16x36xf32, #tpu.memory_space<vmem>>, vector<2x16x16x4xf32>,
    %c0_31 = arith.constant 0 : index
    %c1_32 = arith.constant 1 : index
    %c0_33 = arith.constant 0 : index
    %c0_34 = arith.constant 0 : index
    %10 = vector.load %arg9[%c0_31, %c1_32, %c0_33, %c0_34] : memref<2x18x18x4xf32, #tpu.memory_space<vmem>>, vector<2x16x16x4xf32>
    %c0_35 = arith.constant 0 : index
    %c0_36 = arith.constant 0 : index
    %c0_37 = arith.constant 0 : index
    %c12 = arith.constant 12 : index
    %11 = vector.load %arg10[%c0_35, %c0_36, %c0_37, %c12] : memref<2x16x16x36xf32, #tpu.memory_space<vmem>>, vector<2x16x16x4xf32>
    tpu.vector_store %arg10[%c0_35, %c0_36, %c0_37, %c12], %10 {strides = array<i32>} : memref<2x16x16x36xf32, #tpu.memory_space<vmem>>, vector<2x16x16x4xf32>,
    %c0_38 = arith.constant 0 : index
    %c1_39 = arith.constant 1 : index
    %c1_40 = arith.constant 1 : index
    %c0_41 = arith.constant 0 : index
    %12 = vector.load %arg9[%c0_38, %c1_39, %c1_40, %c0_41] : memref<2x18x18x4xf32, #tpu.memory_space<vmem>>, vector<2x16x16x4xf32>
    %c0_42 = arith.constant 0 : index
    %c0_43 = arith.constant 0 : index
    %c0_44 = arith.constant 0 : index
    %c16 = arith.constant 16 : index
    %13 = vector.load %arg10[%c0_42, %c0_43, %c0_44, %c16] : memref<2x16x16x36xf32, #tpu.memory_space<vmem>>, vector<2x16x16x4xf32>
    tpu.vector_store %arg10[%c0_42, %c0_43, %c0_44, %c16], %12 {strides = array<i32>} : memref<2x16x16x36xf32, #tpu.memory_space<vmem>>, vector<2x16x16x4xf32>,
    %c0_45 = arith.constant 0 : index
    %c1_46 = arith.constant 1 : index
    %c2_47 = arith.constant 2 : index
    %c0_48 = arith.constant 0 : index
    %14 = vector.load %arg9[%c0_45, %c1_46, %c2_47, %c0_48] : memref<2x18x18x4xf32, #tpu.memory_space<vmem>>, vector<2x16x16x4xf32>
    %c0_49 = arith.constant 0 : index
    %c0_50 = arith.constant 0 : index
    %c0_51 = arith.constant 0 : index
    %c20 = arith.constant 20 : index
    %15 = vector.load %arg10[%c0_49, %c0_50, %c0_51, %c20] : memref<2x16x16x36xf32, #tpu.memory_space<vmem>>, vector<2x16x16x4xf32>
    tpu.vector_store %arg10[%c0_49, %c0_50, %c0_51, %c20], %14 {strides = array<i32>} : memref<2x16x16x36xf32, #tpu.memory_space<vmem>>, vector<2x16x16x4xf32>,
    %c0_52 = arith.constant 0 : index
    %c2_53 = arith.constant 2 : index
    %c0_54 = arith.constant 0 : index
    %c0_55 = arith.constant 0 : index
    %16 = vector.load %arg9[%c0_52, %c2_53, %c0_54, %c0_55] : memref<2x18x18x4xf32, #tpu.memory_space<vmem>>, vector<2x16x16x4xf32>
    %c0_56 = arith.constant 0 : index
    %c0_57 = arith.constant 0 : index
    %c0_58 = arith.constant 0 : index
    %c24 = arith.constant 24 : index
    %17 = vector.load %arg10[%c0_56, %c0_57, %c0_58, %c24] : memref<2x16x16x36xf32, #tpu.memory_space<vmem>>, vector<2x16x16x4xf32>
    tpu.vector_store %arg10[%c0_56, %c0_57, %c0_58, %c24], %16 {strides = array<i32>} : memref<2x16x16x36xf32, #tpu.memory_space<vmem>>, vector<2x16x16x4xf32>,
    %c0_59 = arith.constant 0 : index
    %c2_60 = arith.constant 2 : index
    %c1_61 = arith.constant 1 : index
    %c0_62 = arith.constant 0 : index
    %18 = vector.load %arg9[%c0_59, %c2_60, %c1_61, %c0_62] : memref<2x18x18x4xf32, #tpu.memory_space<vmem>>, vector<2x16x16x4xf32>
    %c0_63 = arith.constant 0 : index
    %c0_64 = arith.constant 0 : index
    %c0_65 = arith.constant 0 : index
    %c28 = arith.constant 28 : index
    %19 = vector.load %arg10[%c0_63, %c0_64, %c0_65, %c28] : memref<2x16x16x36xf32, #tpu.memory_space<vmem>>, vector<2x16x16x4xf32>
    tpu.vector_store %arg10[%c0_63, %c0_64, %c0_65, %c28], %18 {strides = array<i32>} : memref<2x16x16x36xf32, #tpu.memory_space<vmem>>, vector<2x16x16x4xf32>,
    %c0_66 = arith.constant 0 : index
    %c2_67 = arith.constant 2 : index
    %c2_68 = arith.constant 2 : index
    %c0_69 = arith.constant 0 : index
    %20 = vector.load %arg9[%c0_66, %c2_67, %c2_68, %c0_69] : memref<2x18x18x4xf32, #tpu.memory_space<vmem>>, vector<2x16x16x4xf32>
    %c0_70 = arith.constant 0 : index
    %c0_71 = arith.constant 0 : index
    %c0_72 = arith.constant 0 : index
    %c32 = arith.constant 32 : index
    %21 = vector.load %arg10[%c0_70, %c0_71, %c0_72, %c32] : memref<2x16x16x36xf32, #tpu.memory_space<vmem>>, vector<2x16x16x4xf32>
    tpu.vector_store %arg10[%c0_70, %c0_71, %c0_72, %c32], %20 {strides = array<i32>} : memref<2x16x16x36xf32, #tpu.memory_space<vmem>>, vector<2x16x16x4xf32>,
    %c0_73 = arith.constant 0 : index
    %c0_74 = arith.constant 0 : index
    %c0_75 = arith.constant 0 : index
    %c0_76 = arith.constant 0 : index
    %22 = vector.load %arg10[%c0_73, %c0_74, %c0_75, %c0_76] : memref<2x16x16x36xf32, #tpu.memory_space<vmem>>, vector<2x16x16x36xf32>
    %23 = vector.shape_cast %22 : vector<2x16x16x36xf32> to vector<512x36xf32>
    %c0_77 = arith.constant 0 : index
    %c0_78 = arith.constant 0 : index
    %24 = vector.load %arg2[%c0_77, %c0_78] : memref<36x4xf32, #tpu.memory_space<vmem>>, vector<36x4xf32>
    %cst_79 = arith.constant dense<0.000000e+00> : vector<512x4xf32>
    %25 = tpu.matmul %23, %24, %cst_79 {dimension_numbers = #tpu.dot_dimension_numbers<[1], [0], [0], [1], [0, 0, 1, 1], [], []>} : vector<512x36xf32>, vector<36x4xf32>, vector<512x4xf32> -> vector<512x4xf32>
    %cst_80 = arith.constant dense<0.000000e+00> : vector<4xf32>
    %26 = vector.multi_reduction <add>, %25, %cst_80 [0] : vector<512x4xf32> to vector<4xf32>
    %27 = vector.shape_cast %26 : vector<4xf32> to vector<1x4xf32>
    %cst_81 = arith.constant 0.001953125 : f32
    %28 = vector.broadcast %cst_81 : f32 to vector<1x4xf32>
    %29 = arith.mulf %27, %28 : vector<1x4xf32>
    %30 = vector.broadcast %29 : vector<1x4xf32> to vector<512x4xf32>
    %31 = arith.subf %25, %30 : vector<512x4xf32>
    %32 = arith.mulf %31, %31 : vector<512x4xf32>
    %cst_82 = arith.constant dense<0.000000e+00> : vector<4xf32>
    %33 = vector.multi_reduction <add>, %32, %cst_82 [0] : vector<512x4xf32> to vector<4xf32>
    %34 = vector.shape_cast %33 : vector<4xf32> to vector<1x4xf32>
    %cst_83 = arith.constant 0.001953125 : f32
    %35 = vector.broadcast %cst_83 : f32 to vector<1x4xf32>
    %36 = arith.mulf %34, %35 : vector<1x4xf32>
    %c0_84 = arith.constant 0 : index
    %c0_85 = arith.constant 0 : index
    %37 = vector.load %arg3[%c0_84, %c0_85] : memref<1x4xf32, #tpu.memory_space<vmem>>, vector<1x4xf32>
    %cst_86 = arith.constant 9.99999974E-6 : f32
    %38 = vector.broadcast %cst_86 : f32 to vector<1x4xf32>
    %39 = arith.addf %36, %38 : vector<1x4xf32>
    %40 = math.rsqrt %39 : vector<1x4xf32>
    %41 = arith.mulf %37, %40 : vector<1x4xf32>
    %42 = vector.broadcast %41 : vector<1x4xf32> to vector<512x4xf32>
    %43 = arith.mulf %31, %42 : vector<512x4xf32>
    %c0_87 = arith.constant 0 : index
    %c0_88 = arith.constant 0 : index
    %44 = vector.load %arg4[%c0_87, %c0_88] : memref<1x4xf32, #tpu.memory_space<vmem>>, vector<1x4xf32>
    %45 = vector.broadcast %44 : vector<1x4xf32> to vector<512x4xf32>
    %46 = arith.addf %43, %45 : vector<512x4xf32>
    %cst_89 = arith.constant 0.000000e+00 : f32
    %47 = vector.broadcast %cst_89 : f32 to vector<512x4xf32>
    %48 = arith.maximumf %46, %47 : vector<512x4xf32>
    %49 = vector.shape_cast %48 : vector<512x4xf32> to vector<2x16x16x4xf32>
    %c0_90 = arith.constant 0 : index
    %c1_91 = arith.constant 1 : index
    %c1_92 = arith.constant 1 : index
    %c0_93 = arith.constant 0 : index
    %50 = vector.load %arg9[%c0_90, %c1_91, %c1_92, %c0_93] : memref<2x18x18x4xf32, #tpu.memory_space<vmem>>, vector<2x16x16x4xf32>
    tpu.vector_store %arg9[%c0_90, %c1_91, %c1_92, %c0_93], %49 {strides = array<i32>} : memref<2x18x18x4xf32, #tpu.memory_space<vmem>>, vector<2x16x16x4xf32>,
    %c0_94 = arith.constant 0 : index
    %c0_95 = arith.constant 0 : index
    %c0_96 = arith.constant 0 : index
    %c0_97 = arith.constant 0 : index
    %51 = vector.load %arg9[%c0_94, %c0_95, %c0_96, %c0_97] : memref<2x18x18x4xf32, #tpu.memory_space<vmem>>, vector<2x16x16x4xf32>
    %c0_98 = arith.constant 0 : index
    %c0_99 = arith.constant 0 : index
    %c0_100 = arith.constant 0 : index
    %c0_101 = arith.constant 0 : index
    %52 = vector.load %arg10[%c0_98, %c0_99, %c0_100, %c0_101] : memref<2x16x16x36xf32, #tpu.memory_space<vmem>>, vector<2x16x16x4xf32>
    tpu.vector_store %arg10[%c0_98, %c0_99, %c0_100, %c0_101], %51 {strides = array<i32>} : memref<2x16x16x36xf32, #tpu.memory_space<vmem>>, vector<2x16x16x4xf32>,
    %c0_102 = arith.constant 0 : index
    %c0_103 = arith.constant 0 : index
    %c1_104 = arith.constant 1 : index
    %c0_105 = arith.constant 0 : index
    %53 = vector.load %arg9[%c0_102, %c0_103, %c1_104, %c0_105] : memref<2x18x18x4xf32, #tpu.memory_space<vmem>>, vector<2x16x16x4xf32>
    %c0_106 = arith.constant 0 : index
    %c0_107 = arith.constant 0 : index
    %c0_108 = arith.constant 0 : index
    %c4_109 = arith.constant 4 : index
    %54 = vector.load %arg10[%c0_106, %c0_107, %c0_108, %c4_109] : memref<2x16x16x36xf32, #tpu.memory_space<vmem>>, vector<2x16x16x4xf32>
    tpu.vector_store %arg10[%c0_106, %c0_107, %c0_108, %c4_109], %53 {strides = array<i32>} : memref<2x16x16x36xf32, #tpu.memory_space<vmem>>, vector<2x16x16x4xf32>,
    %c0_110 = arith.constant 0 : index
    %c0_111 = arith.constant 0 : index
    %c2_112 = arith.constant 2 : index
    %c0_113 = arith.constant 0 : index
    %55 = vector.load %arg9[%c0_110, %c0_111, %c2_112, %c0_113] : memref<2x18x18x4xf32, #tpu.memory_space<vmem>>, vector<2x16x16x4xf32>
    %c0_114 = arith.constant 0 : index
    %c0_115 = arith.constant 0 : index
    %c0_116 = arith.constant 0 : index
    %c8_117 = arith.constant 8 : index
    %56 = vector.load %arg10[%c0_114, %c0_115, %c0_116, %c8_117] : memref<2x16x16x36xf32, #tpu.memory_space<vmem>>, vector<2x16x16x4xf32>
    tpu.vector_store %arg10[%c0_114, %c0_115, %c0_116, %c8_117], %55 {strides = array<i32>} : memref<2x16x16x36xf32, #tpu.memory_space<vmem>>, vector<2x16x16x4xf32>,
    %c0_118 = arith.constant 0 : index
    %c1_119 = arith.constant 1 : index
    %c0_120 = arith.constant 0 : index
    %c0_121 = arith.constant 0 : index
    %57 = vector.load %arg9[%c0_118, %c1_119, %c0_120, %c0_121] : memref<2x18x18x4xf32, #tpu.memory_space<vmem>>, vector<2x16x16x4xf32>
    %c0_122 = arith.constant 0 : index
    %c0_123 = arith.constant 0 : index
    %c0_124 = arith.constant 0 : index
    %c12_125 = arith.constant 12 : index
    %58 = vector.load %arg10[%c0_122, %c0_123, %c0_124, %c12_125] : memref<2x16x16x36xf32, #tpu.memory_space<vmem>>, vector<2x16x16x4xf32>
    tpu.vector_store %arg10[%c0_122, %c0_123, %c0_124, %c12_125], %57 {strides = array<i32>} : memref<2x16x16x36xf32, #tpu.memory_space<vmem>>, vector<2x16x16x4xf32>,
    %c0_126 = arith.constant 0 : index
    %c1_127 = arith.constant 1 : index
    %c1_128 = arith.constant 1 : index
    %c0_129 = arith.constant 0 : index
    %59 = vector.load %arg9[%c0_126, %c1_127, %c1_128, %c0_129] : memref<2x18x18x4xf32, #tpu.memory_space<vmem>>, vector<2x16x16x4xf32>
    %c0_130 = arith.constant 0 : index
    %c0_131 = arith.constant 0 : index
    %c0_132 = arith.constant 0 : index
    %c16_133 = arith.constant 16 : index
    %60 = vector.load %arg10[%c0_130, %c0_131, %c0_132, %c16_133] : memref<2x16x16x36xf32, #tpu.memory_space<vmem>>, vector<2x16x16x4xf32>
    tpu.vector_store %arg10[%c0_130, %c0_131, %c0_132, %c16_133], %59 {strides = array<i32>} : memref<2x16x16x36xf32, #tpu.memory_space<vmem>>, vector<2x16x16x4xf32>,
    %c0_134 = arith.constant 0 : index
    %c1_135 = arith.constant 1 : index
    %c2_136 = arith.constant 2 : index
    %c0_137 = arith.constant 0 : index
    %61 = vector.load %arg9[%c0_134, %c1_135, %c2_136, %c0_137] : memref<2x18x18x4xf32, #tpu.memory_space<vmem>>, vector<2x16x16x4xf32>
    %c0_138 = arith.constant 0 : index
    %c0_139 = arith.constant 0 : index
    %c0_140 = arith.constant 0 : index
    %c20_141 = arith.constant 20 : index
    %62 = vector.load %arg10[%c0_138, %c0_139, %c0_140, %c20_141] : memref<2x16x16x36xf32, #tpu.memory_space<vmem>>, vector<2x16x16x4xf32>
    tpu.vector_store %arg10[%c0_138, %c0_139, %c0_140, %c20_141], %61 {strides = array<i32>} : memref<2x16x16x36xf32, #tpu.memory_space<vmem>>, vector<2x16x16x4xf32>,
    %c0_142 = arith.constant 0 : index
    %c2_143 = arith.constant 2 : index
    %c0_144 = arith.constant 0 : index
    %c0_145 = arith.constant 0 : index
    %63 = vector.load %arg9[%c0_142, %c2_143, %c0_144, %c0_145] : memref<2x18x18x4xf32, #tpu.memory_space<vmem>>, vector<2x16x16x4xf32>
    %c0_146 = arith.constant 0 : index
    %c0_147 = arith.constant 0 : index
    %c0_148 = arith.constant 0 : index
    %c24_149 = arith.constant 24 : index
    %64 = vector.load %arg10[%c0_146, %c0_147, %c0_148, %c24_149] : memref<2x16x16x36xf32, #tpu.memory_space<vmem>>, vector<2x16x16x4xf32>
    tpu.vector_store %arg10[%c0_146, %c0_147, %c0_148, %c24_149], %63 {strides = array<i32>} : memref<2x16x16x36xf32, #tpu.memory_space<vmem>>, vector<2x16x16x4xf32>,
    %c0_150 = arith.constant 0 : index
    %c2_151 = arith.constant 2 : index
    %c1_152 = arith.constant 1 : index
    %c0_153 = arith.constant 0 : index
    %65 = vector.load %arg9[%c0_150, %c2_151, %c1_152, %c0_153] : memref<2x18x18x4xf32, #tpu.memory_space<vmem>>, vector<2x16x16x4xf32>
    %c0_154 = arith.constant 0 : index
    %c0_155 = arith.constant 0 : index
    %c0_156 = arith.constant 0 : index
    %c28_157 = arith.constant 28 : index
    %66 = vector.load %arg10[%c0_154, %c0_155, %c0_156, %c28_157] : memref<2x16x16x36xf32, #tpu.memory_space<vmem>>, vector<2x16x16x4xf32>
    tpu.vector_store %arg10[%c0_154, %c0_155, %c0_156, %c28_157], %65 {strides = array<i32>} : memref<2x16x16x36xf32, #tpu.memory_space<vmem>>, vector<2x16x16x4xf32>,
    %c0_158 = arith.constant 0 : index
    %c2_159 = arith.constant 2 : index
    %c2_160 = arith.constant 2 : index
    %c0_161 = arith.constant 0 : index
    %67 = vector.load %arg9[%c0_158, %c2_159, %c2_160, %c0_161] : memref<2x18x18x4xf32, #tpu.memory_space<vmem>>, vector<2x16x16x4xf32>
    %c0_162 = arith.constant 0 : index
    %c0_163 = arith.constant 0 : index
    %c0_164 = arith.constant 0 : index
    %c32_165 = arith.constant 32 : index
    %68 = vector.load %arg10[%c0_162, %c0_163, %c0_164, %c32_165] : memref<2x16x16x36xf32, #tpu.memory_space<vmem>>, vector<2x16x16x4xf32>
    tpu.vector_store %arg10[%c0_162, %c0_163, %c0_164, %c32_165], %67 {strides = array<i32>} : memref<2x16x16x36xf32, #tpu.memory_space<vmem>>, vector<2x16x16x4xf32>,
    %c0_166 = arith.constant 0 : index
    %c0_167 = arith.constant 0 : index
    %c0_168 = arith.constant 0 : index
    %c0_169 = arith.constant 0 : index
    %69 = vector.load %arg10[%c0_166, %c0_167, %c0_168, %c0_169] : memref<2x16x16x36xf32, #tpu.memory_space<vmem>>, vector<2x16x16x36xf32>
    %70 = vector.shape_cast %69 : vector<2x16x16x36xf32> to vector<512x36xf32>
    %c0_170 = arith.constant 0 : index
    %c0_171 = arith.constant 0 : index
    %71 = vector.load %arg5[%c0_170, %c0_171] : memref<36x4xf32, #tpu.memory_space<vmem>>, vector<36x4xf32>
    %cst_172 = arith.constant dense<0.000000e+00> : vector<512x4xf32>
    %72 = tpu.matmul %70, %71, %cst_172 {dimension_numbers = #tpu.dot_dimension_numbers<[1], [0], [0], [1], [0, 0, 1, 1], [], []>} : vector<512x36xf32>, vector<36x4xf32>, vector<512x4xf32> -> vector<512x4xf32>
    %cst_173 = arith.constant dense<0.000000e+00> : vector<4xf32>
    %73 = vector.multi_reduction <add>, %72, %cst_173 [0] : vector<512x4xf32> to vector<4xf32>
    %74 = vector.shape_cast %73 : vector<4xf32> to vector<1x4xf32>
    %cst_174 = arith.constant 0.001953125 : f32
    %75 = vector.broadcast %cst_174 : f32 to vector<1x4xf32>
    %76 = arith.mulf %74, %75 : vector<1x4xf32>
    %77 = vector.broadcast %76 : vector<1x4xf32> to vector<512x4xf32>
    %78 = arith.subf %72, %77 : vector<512x4xf32>
    %79 = arith.mulf %78, %78 : vector<512x4xf32>
    %cst_175 = arith.constant dense<0.000000e+00> : vector<4xf32>
    %80 = vector.multi_reduction <add>, %79, %cst_175 [0] : vector<512x4xf32> to vector<4xf32>
    %81 = vector.shape_cast %80 : vector<4xf32> to vector<1x4xf32>
    %cst_176 = arith.constant 0.001953125 : f32
    %82 = vector.broadcast %cst_176 : f32 to vector<1x4xf32>
    %83 = arith.mulf %81, %82 : vector<1x4xf32>
    %c0_177 = arith.constant 0 : index
    %c0_178 = arith.constant 0 : index
    %84 = vector.load %arg6[%c0_177, %c0_178] : memref<1x4xf32, #tpu.memory_space<vmem>>, vector<1x4xf32>
    %cst_179 = arith.constant 9.99999974E-6 : f32
    %85 = vector.broadcast %cst_179 : f32 to vector<1x4xf32>
    %86 = arith.addf %83, %85 : vector<1x4xf32>
    %87 = math.rsqrt %86 : vector<1x4xf32>
    %88 = arith.mulf %84, %87 : vector<1x4xf32>
    %89 = vector.broadcast %88 : vector<1x4xf32> to vector<512x4xf32>
    %90 = arith.mulf %78, %89 : vector<512x4xf32>
    %c0_180 = arith.constant 0 : index
    %c0_181 = arith.constant 0 : index
    %91 = vector.load %arg7[%c0_180, %c0_181] : memref<1x4xf32, #tpu.memory_space<vmem>>, vector<1x4xf32>
    %92 = vector.broadcast %91 : vector<1x4xf32> to vector<512x4xf32>
    %93 = arith.addf %90, %92 : vector<512x4xf32>
    %94 = vector.shape_cast %2 : vector<2x16x16x4xf32> to vector<512x4xf32>
    %95 = arith.addf %93, %94 : vector<512x4xf32>
    %cst_182 = arith.constant 0.000000e+00 : f32
    %96 = vector.broadcast %cst_182 : f32 to vector<512x4xf32>
    %97 = arith.maximumf %95, %96 : vector<512x4xf32>
    %98 = vector.shape_cast %97 : vector<512x4xf32> to vector<2x16x16x4xf32>
    %c0_183 = arith.constant 0 : index
    %c0_184 = arith.constant 0 : index
    %c0_185 = arith.constant 0 : index
    %c0_186 = arith.constant 0 : index
    %99 = vector.load %arg8[%c0_183, %c0_184, %c0_185, %c0_186] : memref<2x16x16x4xf32, #tpu.memory_space<vmem>>, vector<2x16x16x4xf32>
    tpu.vector_store %arg8[%c0_183, %c0_184, %c0_185, %c0_186], %98 {strides = array<i32>} : memref<2x16x16x4xf32, #tpu.memory_space<vmem>>, vector<2x16x16x4xf32>,
    return
  }
  func.func @transform_0(%arg0: i32) -> (i32, i32, i32, i32) {
    %c0_i32 = arith.constant 0 : i32
    %c0_i32_0 = arith.constant 0 : i32
    %c0_i32_1 = arith.constant 0 : i32
    %c0_i32_2 = arith.constant 0 : i32
    %c0_i32_3 = arith.constant 0 : i32
    return %c0_i32, %c0_i32_0, %c0_i32_1, %c0_i32_2 : i32, i32, i32, i32
  }
  func.func @transform_1(%arg0: i32) -> (i32, i32) {
    %c0_i32 = arith.constant 0 : i32
    %c0_i32_0 = arith.constant 0 : i32
    %c0_i32_1 = arith.constant 0 : i32
    return %c0_i32, %c0_i32_0 : i32, i32
  }
  func.func @transform_2(%arg0: i32) -> (i32, i32) {
    %c0_i32 = arith.constant 0 : i32
    %c0_i32_0 = arith.constant 0 : i32
    %c0_i32_1 = arith.constant 0 : i32
    return %c0_i32, %c0_i32_0 : i32, i32
  }
  func.func @transform_3(%arg0: i32) -> (i32, i32) {
    %c0_i32 = arith.constant 0 : i32
    %c0_i32_0 = arith.constant 0 : i32
    %c0_i32_1 = arith.constant 0 : i32
    return %c0_i32, %c0_i32_0 : i32, i32
  }
  func.func @transform_4(%arg0: i32) -> (i32, i32) {
    %c0_i32 = arith.constant 0 : i32
    %c0_i32_0 = arith.constant 0 : i32
    %c0_i32_1 = arith.constant 0 : i32
    return %c0_i32, %c0_i32_0 : i32, i32
  }
  func.func @transform_5(%arg0: i32) -> (i32, i32) {
    %c0_i32 = arith.constant 0 : i32
    %c0_i32_0 = arith.constant 0 : i32
    %c0_i32_1 = arith.constant 0 : i32
    return %c0_i32, %c0_i32_0 : i32, i32
  }
  func.func @transform_6(%arg0: i32) -> (i32, i32) {
    %c0_i32 = arith.constant 0 : i32
    %c0_i32_0 = arith.constant 0 : i32
    %c0_i32_1 = arith.constant 0 : i32
    return %c0_i32, %c0_i32_0 : i32, i32
  }
  func.func @transform_7(%arg0: i32) -> (i32, i32, i32, i32) {
    %c0_i32 = arith.constant 0 : i32
    %c0_i32_0 = arith.constant 0 : i32
    %c0_i32_1 = arith.constant 0 : i32
    %c0_i32_2 = arith.constant 0 : i32
    %c0_i32_3 = arith.constant 0 : i32
    return %c0_i32, %c0_i32_0, %c0_i32_1, %c0_i32_2 : i32, i32, i32, i32
  }
}

</mosaic_0001>

<bundles_post_ra>
// kernel: residual_block.1
= control target key start
LH: loop header
LB: loop body
LE: loop exit
PB: predicated region body
PF: predicated region fallthrough
CT: control target
= control target key end

     0   :  { %vm26_vm0 = vcmask 31744   ;;  %vm29_vm1 = vcmask 25600   ;;  %v9891_v0 = vmov 0.0   ;;  %s9892_s22 = smov 4   ;;  %vm713_vm2 = vcmask 64544   ;;  %s9893_s10 = smov 8   ;;  %s16663_s0 = inlined_call_operand.vmem [shape: f32[2,16,16,4], index: 0, kind: input, shape index: {}]   ;;  %s16664_s1 = inlined_call_operand.vmem [shape: f32[36,4], index: 1, kind: input, shape index: {}]   ;;  %s16665_s2 = inlined_call_operand.vmem [shape: f32[1,4], index: 2, kind: input, shape index: {}]   ;;  %s16666_s3 = inlined_call_operand.vmem [shape: f32[1,4], index: 3, kind: input, shape index: {}]   ;;  %s16667_s4 = inlined_call_operand.vmem [shape: f32[36,4], index: 4, kind: input, shape index: {}]   ;;  %s16668_s5 = inlined_call_operand.vmem [shape: f32[1,4], index: 5, kind: input, shape index: {}]   ;;  %s16669_s6 = inlined_call_operand.vmem [shape: f32[1,4], index: 6, kind: input, shape index: {}]   ;;  %s16670_s7 = inlined_call_operand.vmem [shape: f32[2,16,16,4], index: 7, kind: output, shape index: {}]  }
   0x1   :  { %27 = vst.msk [vmem:[#allocation2] sm:$0xff] %vm26_vm0, %v9891_v0  ;;  %28 = vst.msk [vmem:[#allocation2 + $0x8] sm:$0xff] %vm26_vm0, %v9891_v0  ;;  %v10087_v1 = vld [vmem:[%s16663_s0] sm:$0xff]  ;;  %v10164_v2 = vld [vmem:[%s16663_s0 + $0x8] sm:$0xff]  ;;  %vm1098_vm3 = vcmask 97344   ;;  %vm1483_vm4 = vcmask 130144  }
   0x2   :  { %31 = vst.msk [vmem:[#allocation2 + $0x18] sm:$0xff] %vm26_vm0, %v9891_v0  ;;  %32 = vst.msk [vmem:[#allocation2 + $0x20] sm:$0xff] %vm26_vm0, %v9891_v0  ;;  %v10169_v3 = vld [vmem:[%s16663_s0 + $0x10] sm:$0xff]  ;;  %v10180_v4 = vld [vmem:[%s16663_s0 + $0x18] sm:$0xff]  ;;  %s9895_s19 = smov 16   ;;  %vm1868_vm5 = vcmask 162944  }
   0x3   :  { %34 = vst.msk [vmem:[#allocation2 + $0x30] sm:$0xff] %vm26_vm0, %v9891_v0  ;;  %35 = vst.msk [vmem:[#allocation2 + $0x38] sm:$0xff] %vm26_vm0, %v9891_v0  ;;  %v10185_v5 = vld [vmem:[%s16663_s0 + $0x20] sm:$0xff]  ;;  %v10190_v6 = vld [vmem:[%s16663_s0 + $0x28] sm:$0xff]  ;;  %s9896_s20 = smov 20   ;;  %vm2253_vm6 = vcmask 195744  }
   0x4   :  { %37 = vst.msk [vmem:[#allocation2 + $0x48] sm:$0xff] %vm26_vm0, %v9891_v0  ;;  %38 = vst.msk [vmem:[#allocation2 + $0x50] sm:$0xff] %vm26_vm0, %v9891_v0  ;;  %v10201_v7 = vld [vmem:[%s16663_s0 + $0x30] sm:$0xff]  ;;  %v10206_v8 = vld [vmem:[%s16663_s0 + $0x38] sm:$0xff]  ;;  %s9897_s21 = smov 24   ;;  %vm2639_vm7 = vcmask 228544  }
   0x5   :  { %40 = vst.msk [vmem:[#allocation2 + $0x60] sm:$0xff] %vm26_vm0, %v9891_v0  ;;  %41 = vst.msk [vmem:[#allocation2 + $0x68] sm:$0xff] %vm26_vm0, %v9891_v0  ;;  %v10211_v9 = vld [vmem:[%s16663_s0 + $0x40] sm:$0xff]  ;;  %v10222_v10 = vld [vmem:[%s16663_s0 + $0x48] sm:$0xff]  ;;  %s9898_s23 = smov 28   ;;  %vm3736_vm8 = vcmask 1043456  }
   0x6   :  { %43 = vst.msk [vmem:[#allocation2 + $0x78] sm:$0xff] %vm26_vm0, %v9891_v0  ;;  %44 = vst.msk [vmem:[#allocation2 + $0x80] sm:$0xff] %vm26_vm0, %v9891_v0  ;;  %v10227_v11 = vld [vmem:[%s16663_s0 + $0x50] sm:$0xff]  ;;  %v10232_v12 = vld [vmem:[%s16663_s0 + $0x58] sm:$0xff]  ;;  %vm3024_vm9 = vcmask 261344   ;;  %vm3409_vm10 = vcmask 294144  }
   0x7   :  { %46 = vst.msk [vmem:[#allocation2 + $0x90] sm:$0xff] %vm26_vm0, %v9891_v0  ;;  %47 = vst.msk [vmem:[#allocation2 + $0x98] sm:$0xff] %vm26_vm0, %v9891_v0  ;;  %v10243_v13 = vld [vmem:[%s16663_s0 + $0x60] sm:$0xff]  ;;  %v10248_v14 = vld [vmem:[%s16663_s0 + $0x68] sm:$0xff]  ;;  %vm3543_vm11 = vcmask 293888  }
   0x8   :  { %49 = vst.msk [vmem:[#allocation2 + $0xa8] sm:$0xff] %vm26_vm0, %v9891_v0  ;;  %50 = vst.msk [vmem:[#allocation2 + $0xb0] sm:$0xff] %vm26_vm0, %v9891_v0  ;;  %v10253_v15 = vld [vmem:[%s16663_s0 + $0x70] sm:$0xff]  ;;  %v10264_v16 = vld [vmem:[%s16663_s0 + $0x78] sm:$0xff] }
   0x9   :  { %52 = vst.msk [vmem:[#allocation2 + $0xc0] sm:$0xff] %vm26_vm0, %v9891_v0  ;;  %53 = vst.msk [vmem:[#allocation2 + $0xc8] sm:$0xff] %vm26_vm0, %v9891_v0  ;;  %v10269_v17 = vld [vmem:[%s16663_s0 + $0x80] sm:$0xff]  ;;  %v10274_v18 = vld [vmem:[%s16663_s0 + $0x88] sm:$0xff] }
   0xa   :  { %55 = vst.msk [vmem:[#allocation2 + $0xd8] sm:$0xff] %vm26_vm0, %v9891_v0  ;;  %56 = vst.msk [vmem:[#allocation2 + $0xe0] sm:$0xff] %vm26_vm0, %v9891_v0  ;;  %v10285_v19 = vld [vmem:[%s16663_s0 + $0x90] sm:$0xff]  ;;  %v10290_v20 = vld [vmem:[%s16663_s0 + $0x98] sm:$0xff] }
   0xb   :  { %58 = vst.msk [vmem:[#allocation2 + $0xf0] sm:$0xff] %vm26_vm0, %v9891_v0  ;;  %59 = vst.msk [vmem:[#allocation2 + $0xf8] sm:$0xff] %vm26_vm0, %v9891_v0  ;;  %v10295_v21 = vld [vmem:[%s16663_s0 + $0xa0] sm:$0xff]  ;;  %v10306_v23 = vld [vmem:[%s16663_s0 + $0xa8] sm:$0xff] }
   0xc   :  { %61 = vst.msk [vmem:[#allocation2 + $0x108] sm:$0xff] %vm26_vm0, %v9891_v0  ;;  %62 = vst.msk [vmem:[#allocation2 + $0x110] sm:$0xff] %vm26_vm0, %v9891_v0  ;;  %v393_v22 = vld [vmem:[#allocation2 + $0x1] sm:$0xff]  ;;  %v10317_v30 = vld [vmem:[%s16663_s0 + $0xb0] sm:$0xff] }
   0xd   :  { %64 = vst.msk [vmem:[#allocation2 + $0x120] sm:$0xff] %vm26_vm0, %v9891_v0  ;;  %65 = vst.msk [vmem:[#allocation2 + $0x128] sm:$0xff] %vm26_vm0, %v9891_v0  ;;  %521 = vrot.lane.b32.xlu0 %v393_v22, %s9892_s22  ;;  %v10322_v31 = vld [vmem:[%s16663_s0 + $0xb8] sm:$0xff]  ;;  %v10332_v32 = vld [vmem:[%s16663_s0 + $0xc0] sm:$0xff] }
   0xe   :  { %67 = vst.msk [vmem:[#allocation2 + $0x138] sm:$0xff] %vm26_vm0, %v9891_v0  ;;  %68 = vst.msk [vmem:[#allocation2 + $0x140] sm:$0xff] %vm26_vm0, %v9891_v0  ;;  %v10337_v33 = vld [vmem:[%s16663_s0 + $0xc8] sm:$0xff]  ;;  %v10342_v34 = vld [vmem:[%s16663_s0 + $0xd0] sm:$0xff] }
   0xf   :  { %70 = vst.msk [vmem:[#allocation2 + $0x150] sm:$0xff] %vm26_vm0, %v9891_v0  ;;  %71 = vst.msk [vmem:[#allocation2 + $0x158] sm:$0xff] %vm26_vm0, %v9891_v0  ;;  %v10354_v35 = vld [vmem:[%s16663_s0 + $0xd8] sm:$0xff]  ;;  %v10359_v36 = vld [vmem:[%s16663_s0 + $0xe0] sm:$0xff] }
  0x10   :  { %73 = vst.msk [vmem:[#allocation2 + $0x168] sm:$0xff] %vm26_vm0, %v9891_v0  ;;  %74 = vst.msk [vmem:[#allocation2 + $0x170] sm:$0xff] %vm26_vm0, %v9891_v0  ;;  %v10364_v37 = vld [vmem:[%s16663_s0 + $0xe8] sm:$0xff]  ;;  %v10375_v39 = vld [vmem:[%s16663_s0 + $0x100] sm:$0xff] }
  0x11   :  { %76 = vst.msk [vmem:[#allocation2 + $0x180] sm:$0xff] %vm26_vm0, %v9891_v0  ;;  %77 = vst.msk [vmem:[#allocation2 + $0x188] sm:$0xff] %vm26_vm0, %v9891_v0  ;;  %v10382_v41 = vld [vmem:[%s16663_s0 + $0x108] sm:$0xff]  ;;  %v10387_v42 = vld [vmem:[%s16663_s0 + $0x110] sm:$0xff] }
  0x12   :  { %79 = vst.msk [vmem:[#allocation2 + $0x198] sm:$0xff] %vm26_vm0, %v9891_v0  ;;  %80 = vst.msk [vmem:[#allocation2 + $0x1a0] sm:$0xff] %vm26_vm0, %v9891_v0  ;;  %v10392_v43 = vld [vmem:[%s16663_s0 + $0x118] sm:$0xff]  ;;  %v10404_v45 = vld [vmem:[%s16663_s0 + $0x120] sm:$0xff] }
  0x13   :  { %82 = vst.msk [vmem:[#allocation2 + $0x1b0] sm:$0xff] %vm26_vm0, %v9891_v0  ;;  %83 = vst.msk [vmem:[#allocation2 + $0x1b8] sm:$0xff] %vm26_vm0, %v9891_v0  ;;  %v10409_v46 = vld [vmem:[%s16663_s0 + $0x128] sm:$0xff]  ;;  %v10414_v47 = vld [vmem:[%s16663_s0 + $0x130] sm:$0xff] }
  0x14   :  { %85 = vst.msk [vmem:[#allocation2 + $0x1c8] sm:$0xff] %vm26_vm0, %v9891_v0  ;;  %86 = vst.msk [vmem:[#allocation2 + $0x1d0] sm:$0xff] %vm26_vm0, %v9891_v0  ;;  %v10426_v48 = vld [vmem:[%s16663_s0 + $0x138] sm:$0xff]  ;;  %v10431_v49 = vld [vmem:[%s16663_s0 + $0x140] sm:$0xff] }
  0x15   :  { %88 = vst.msk [vmem:[#allocation2 + $0x1e0] sm:$0xff] %vm26_vm0, %v9891_v0  ;;  %89 = vst.msk [vmem:[#allocation2 + $0x1e8] sm:$0xff] %vm26_vm0, %v9891_v0  ;;  %v10436_v50 = vld [vmem:[%s16663_s0 + $0x148] sm:$0xff]  ;;  %v10447_v51 = vld [vmem:[%s16663_s0 + $0x150] sm:$0xff] }
  0x16   :  { %91 = vst.msk [vmem:[#allocation2 + $0x1f8] sm:$0xff] %vm26_vm0, %v9891_v0  ;;  %92 = vst.msk [vmem:[#allocation2 + $0x200] sm:$0xff] %vm26_vm0, %v9891_v0  ;;  %v10452_v52 = vld [vmem:[%s16663_s0 + $0x158] sm:$0xff]  ;;  %v10457_v53 = vld [vmem:[%s16663_s0 + $0x160] sm:$0xff] }
  0x17   :  { %94 = vst.msk [vmem:[#allocation2 + $0x210] sm:$0xff] %vm26_vm0, %v9891_v0  ;;  %95 = vst.msk [vmem:[#allocation2 + $0x218] sm:$0xff] %vm26_vm0, %v9891_v0  ;;  %v10468_v54 = vld [vmem:[%s16663_s0 + $0x168] sm:$0xff]  ;;  %v10477_v57 = vld [vmem:[%s16663_s0 + $0x170] sm:$0xff] }
  0x18   :  { %97 = vst.msk [vmem:[#allocation2 + $0x228] sm:$0xff] %vm26_vm0, %v9891_v0  ;;  %98 = vst.msk [vmem:[#allocation2 + $0x230] sm:$0xff] %vm26_vm0, %v9891_v0  ;;  %v10482_v58 = vld [vmem:[%s16663_s0 + $0x178] sm:$0xff]  ;;  %v10493_v62 = vld [vmem:[%s16663_s0 + $0x180] sm:$0xff] }
  0x19   :  { %100 = vst.msk [vmem:[#allocation2 + $0x240] sm:$0xff] %vm26_vm0, %v9891_v0  ;;  %101 = vst.msk [vmem:[#allocation2 + $0x248] sm:$0xff] %vm26_vm0, %v9891_v0  ;;  %v10498_v63 = vld [vmem:[%s16663_s0 + $0x188] sm:$0xff]  ;;  %v10513_v22 = vld [vmem:[%s16663_s0 + $0x198] sm:$0xff] }
  0x1a   :  { %103 = vst.msk [vmem:[#allocation2 + $0x258] sm:$0xff] %vm26_vm0, %v9891_v0  ;;  %104 = vst.msk [vmem:[#allocation2 + $0x260] sm:$0xff] %vm26_vm0, %v9891_v0 }
  0x1b   :  { %106 = vst.msk [vmem:[#allocation2 + $0x270] sm:$0xff] %vm26_vm0, %v9891_v0  ;;  %107 = vst.msk [vmem:[#allocation2 + $0x278] sm:$0xff] %vm26_vm0, %v9891_v0 }
  0x1c   :  { %109 = vst.msk [vmem:[#allocation2 + $0x288] sm:$0xff] %vm26_vm0, %v9891_v0  ;;  %110 = vst.msk [vmem:[#allocation2 + $0x290] sm:$0xff] %vm26_vm0, %v9891_v0 }
  0x1d   :  { %112 = vst.msk [vmem:[#allocation2 + $0x2a0] sm:$0xff] %vm26_vm0, %v9891_v0  ;;  %113 = vst.msk [vmem:[#allocation2 + $0x2a8] sm:$0xff] %vm26_vm0, %v9891_v0 }
  0x1e   :  { %115 = vst.msk [vmem:[#allocation2 + $0x2b8] sm:$0xff] %vm26_vm0, %v9891_v0  ;;  %116 = vst.msk [vmem:[#allocation2 + $0x2c0] sm:$0xff] %vm26_vm0, %v9891_v0 }
  0x1f   :  { %118 = vst.msk [vmem:[#allocation2 + $0x2d0] sm:$0xff] %vm26_vm0, %v9891_v0  ;;  %119 = vst.msk [vmem:[#allocation2 + $0x2d8] sm:$0xff] %vm26_vm0, %v9891_v0 }
  0x20   :  { %121 = vst.msk [vmem:[#allocation2 + $0x2e8] sm:$0xff] %vm26_vm0, %v9891_v0  ;;  %122 = vst.msk [vmem:[#allocation2 + $0x2f0] sm:$0xff] %vm26_vm0, %v9891_v0 }
  0x21   :  { %124 = vst.msk [vmem:[#allocation2 + $0x300] sm:$0xff] %vm26_vm0, %v9891_v0  ;;  %125 = vst.msk [vmem:[#allocation2 + $0x308] sm:$0xff] %vm26_vm0, %v9891_v0 }
  0x22   :  { %127 = vst.msk [vmem:[#allocation2 + $0x318] sm:$0xff] %vm26_vm0, %v9891_v0  ;;  %128 = vst.msk [vmem:[#allocation2 + $0x320] sm:$0xff] %vm26_vm0, %v9891_v0 }
  0x23   :  { %130 = vst.msk [vmem:[#allocation2 + $0x330] sm:$0xff] %vm26_vm0, %v9891_v0  ;;  %131 = vst.msk [vmem:[#allocation2 + $0x338] sm:$0xff] %vm26_vm0, %v9891_v0 }
  0x24   :  { %133 = vst.msk [vmem:[#allocation2 + $0x348] sm:$0xff] %vm26_vm0, %v9891_v0  ;;  %134 = vst.msk [vmem:[#allocation2 + $0x350] sm:$0xff] %vm26_vm0, %v9891_v0 }
  0x25   :  { %16819 = vst [vmem:[#allocation4_spill] sm:$0xff] %v10087_v1  ;;  %30 = vst.msk [vmem:[#allocation2 + $0x10] sm:$0x3] %vm29_vm1, %v9891_v0 }
  0x26   :  { %33 = vst.msk [vmem:[#allocation2 + $0x28] sm:$0x3] %vm29_vm1, %v9891_v0  ;;  %36 = vst.msk [vmem:[#allocation2 + $0x40] sm:$0x3] %vm29_vm1, %v9891_v0 }
  0x27   :  { %39 = vst.msk [vmem:[#allocation2 + $0x58] sm:$0x3] %vm29_vm1, %v9891_v0  ;;  %42 = vst.msk [vmem:[#allocation2 + $0x70] sm:$0x3] %vm29_vm1, %v9891_v0 }
  0x28   :  { %45 = vst.msk [vmem:[#allocation2 + $0x88] sm:$0x3] %vm29_vm1, %v9891_v0  ;;  %48 = vst.msk [vmem:[#allocation2 + $0xa0] sm:$0x3] %vm29_vm1, %v9891_v0 }
  0x29   :  { %51 = vst.msk [vmem:[#allocation2 + $0xb8] sm:$0x3] %vm29_vm1, %v9891_v0  ;;  %54 = vst.msk [vmem:[#allocation2 + $0xd0] sm:$0x3] %vm29_vm1, %v9891_v0 }
  0x2a   :  { %57 = vst.msk [vmem:[#allocation2 + $0xe8] sm:$0x3] %vm29_vm1, %v9891_v0  ;;  %60 = vst.msk [vmem:[#allocation2 + $0x100] sm:$0x3] %vm29_vm1, %v9891_v0 }
  0x2b   :  { %63 = vst.msk [vmem:[#allocation2 + $0x118] sm:$0x3] %vm29_vm1, %v9891_v0  ;;  %66 = vst.msk [vmem:[#allocation2 + $0x130] sm:$0x3] %vm29_vm1, %v9891_v0 }
  0x2c   :  { %69 = vst.msk [vmem:[#allocation2 + $0x148] sm:$0x3] %vm29_vm1, %v9891_v0  ;;  %72 = vst.msk [vmem:[#allocation2 + $0x160] sm:$0x3] %vm29_vm1, %v9891_v0  ;;  %v394_v25 = vld [vmem:[#allocation2 + $0x9] sm:$0xff] }
  0x2d   :  { %75 = vst.msk [vmem:[#allocation2 + $0x178] sm:$0x3] %vm29_vm1, %v9891_v0  ;;  %78 = vst.msk [vmem:[#allocation2 + $0x190] sm:$0x3] %vm29_vm1, %v9891_v0  ;;  %523 = vrot.lane.b32.xlu0 %v394_v25, %s9892_s22  ;;  %v10530_v25 = vld [vmem:[%s16663_s0 + $0x1a8] sm:$0xff] }
  0x2e   :  { %81 = vst.msk [vmem:[#allocation2 + $0x1a8] sm:$0x3] %vm29_vm1, %v9891_v0  ;;  %84 = vst.msk [vmem:[#allocation2 + $0x1c0] sm:$0x3] %vm29_vm1, %v9891_v0 }
  0x2f   :  { %87 = vst.msk [vmem:[#allocation2 + $0x1d8] sm:$0x3] %vm29_vm1, %v9891_v0  ;;  %90 = vst.msk [vmem:[#allocation2 + $0x1f0] sm:$0x3] %vm29_vm1, %v9891_v0 }
  0x30   :  { %93 = vst.msk [vmem:[#allocation2 + $0x208] sm:$0x3] %vm29_vm1, %v9891_v0  ;;  %96 = vst.msk [vmem:[#allocation2 + $0x220] sm:$0x3] %vm29_vm1, %v9891_v0 }
  0x31   :  { %99 = vst.msk [vmem:[#allocation2 + $0x238] sm:$0x3] %vm29_vm1, %v9891_v0  ;;  %102 = vst.msk [vmem:[#allocation2 + $0x250] sm:$0x3] %vm29_vm1, %v9891_v0 }
  0x32   :  { %105 = vst.msk [vmem:[#allocation2 + $0x268] sm:$0x3] %vm29_vm1, %v9891_v0  ;;  %108 = vst.msk [vmem:[#allocation2 + $0x280] sm:$0x3] %vm29_vm1, %v9891_v0 }
  0x33   :  { %111 = vst.msk [vmem:[#allocation2 + $0x298] sm:$0x3] %vm29_vm1, %v9891_v0  ;;  %114 = vst.msk [vmem:[#allocation2 + $0x2b0] sm:$0x3] %vm29_vm1, %v9891_v0 }
  0x34   :  { %117 = vst.msk [vmem:[#allocation2 + $0x2c8] sm:$0x3] %vm29_vm1, %v9891_v0  ;;  %120 = vst.msk [vmem:[#allocation2 + $0x2e0] sm:$0x3] %vm29_vm1, %v9891_v0 }
  0x35   :  { %123 = vst.msk [vmem:[#allocation2 + $0x2f8] sm:$0x3] %vm29_vm1, %v9891_v0  ;;  %126 = vst.msk [vmem:[#allocation2 + $0x310] sm:$0x3] %vm29_vm1, %v9891_v0 }
  0x36   :  { %129 = vst.msk [vmem:[#allocation2 + $0x328] sm:$0x3] %vm29_vm1, %v9891_v0  ;;  %132 = vst.msk [vmem:[#allocation2 + $0x340] sm:$0x3] %vm29_vm1, %v9891_v0 }
  0x37   :  { %135 = vst.msk [vmem:[#allocation2 + $0x358] sm:$0x3] %vm29_vm1, %v9891_v0  ;;  %16820 = vst [vmem:[#allocation5_spill] sm:$0xff] %v10164_v2  ;;  %v10508_v0 = vld [vmem:[%s16663_s0 + $0x190] sm:$0xff] }
  0x38   :  { %16821 = vst [vmem:[#allocation6_spill] sm:$0xff] %v10169_v3  ;;  %201 = vst.msk [vmem:[#allocation2 + $0x19] sm:$0xff] %vm26_vm0, %v10087_v1 }
  0x39   :  { %202 = vst.msk [vmem:[#allocation2 + $0x21] sm:$0xff] %vm26_vm0, %v10164_v2  ;;  %203 = vst.msk [vmem:[#allocation2 + $0x31] sm:$0xff] %vm26_vm0, %v10169_v3 }
  0x3a   :  { %16822 = vst [vmem:[#allocation7_spill] sm:$0xff] %v10180_v4  ;;  %16823 = vst [vmem:[#allocation8_spill] sm:$0xff] %v10185_v5 }
  0x3b   :  { %16824 = vst [vmem:[#allocation9_spill] sm:$0xff] %v10190_v6  ;;  %204 = vst.msk [vmem:[#allocation2 + $0x39] sm:$0xff] %vm26_vm0, %v10180_v4 }
  0x3c   :  { %205 = vst.msk [vmem:[#allocation2 + $0x49] sm:$0xff] %vm26_vm0, %v10185_v5  ;;  %206 = vst.msk [vmem:[#allocation2 + $0x51] sm:$0xff] %vm26_vm0, %v10190_v6 }
  0x3d   :  { %16825 = vst [vmem:[#allocation10_spill] sm:$0xff] %v10201_v7  ;;  %16826 = vst [vmem:[#allocation11_spill] sm:$0xff] %v10206_v8 }
  0x3e   :  { %16827 = vst [vmem:[#allocation12_spill] sm:$0xff] %v10211_v9  ;;  %207 = vst.msk [vmem:[#allocation2 + $0x61] sm:$0xff] %vm26_vm0, %v10201_v7 }
  0x3f   :  { %208 = vst.msk [vmem:[#allocation2 + $0x69] sm:$0xff] %vm26_vm0, %v10206_v8  ;;  %209 = vst.msk [vmem:[#allocation2 + $0x79] sm:$0xff] %vm26_vm0, %v10211_v9  ;;  %v395_v24 = vld [vmem:[#allocation2 + $0x19] sm:$0xff] }
  0x40   :  { %16828 = vst [vmem:[#allocation13_spill] sm:$0xff] %v10222_v10  ;;  %16829 = vst [vmem:[#allocation14_spill] sm:$0xff] %v10227_v11  ;;  %525 = vrot.lane.b32.xlu1 %v395_v24, %s9892_s22  ;;  %v396_v26 = vld [vmem:[#allocation2 + $0x21] sm:$0xff]  ;;  %v397_v27 = vld [vmem:[#allocation2 + $0x31] sm:$0xff] }
  0x41   :  { %16830 = vst [vmem:[#allocation15_spill] sm:$0xff] %v10232_v12  ;;  %210 = vst.msk [vmem:[#allocation2 + $0x81] sm:$0xff] %vm26_vm0, %v10222_v10  ;;  %529 = vrot.lane.b32.xlu0 %v397_v27, %s9892_s22  ;;  %v10518_v24 = vld [vmem:[%s16663_s0 + $0x1a0] sm:$0xff]  ;;  %v10540_v27 = vld [vmem:[%s16663_s0 + $0x1b8] sm:$0xff] }
  0x42   :  { %211 = vst.msk [vmem:[#allocation2 + $0x91] sm:$0xff] %vm26_vm0, %v10227_v11  ;;  %212 = vst.msk [vmem:[#allocation2 + $0x99] sm:$0xff] %vm26_vm0, %v10232_v12  ;;  %v398_v28 = vld [vmem:[#allocation2 + $0x39] sm:$0xff] }
  0x43   :  { %16831 = vst [vmem:[#allocation16_spill] sm:$0xff] %v10243_v13  ;;  %16832 = vst [vmem:[#allocation17_spill] sm:$0xff] %v10248_v14  ;;  %v399_v29 = vld [vmem:[#allocation2 + $0x49] sm:$0xff]  ;;  %v400_v38 = vld [vmem:[#allocation2 + $0x51] sm:$0xff] }
  0x44   :  { %16833 = vst [vmem:[#allocation18_spill] sm:$0xff] %v10253_v15  ;;  %213 = vst.msk [vmem:[#allocation2 + $0xa9] sm:$0xff] %vm26_vm0, %v10243_v13  ;;  %527 = vrot.lane.b32.xlu1 %v396_v26, %s9892_s22  ;;  %v10535_v26 = vld [vmem:[%s16663_s0 + $0x1b0] sm:$0xff] }
  0x45   :  { %214 = vst.msk [vmem:[#allocation2 + $0xb1] sm:$0xff] %vm26_vm0, %v10248_v14  ;;  %215 = vst.msk [vmem:[#allocation2 + $0xc1] sm:$0xff] %vm26_vm0, %v10253_v15  ;;  %v401_v40 = vld [vmem:[#allocation2 + $0x61] sm:$0xff]  ;;  %533 = vrot.lane.b32.xlu0 %v399_v29, %s9892_s22 }
  0x46   :  { %16834 = vst [vmem:[#allocation19_spill] sm:$0xff] %v10264_v16  ;;  %16835 = vst [vmem:[#allocation20_spill] sm:$0xff] %v10269_v17  ;;  %v402_v44 = vld [vmem:[#allocation2 + $0x69] sm:$0xff]  ;;  %v403_v55 = vld [vmem:[#allocation2 + $0x79] sm:$0xff] }
  0x47   :  { %16836 = vst [vmem:[#allocation21_spill] sm:$0xff] %v10274_v18  ;;  %216 = vst.msk [vmem:[#allocation2 + $0xc9] sm:$0xff] %vm26_vm0, %v10264_v16  ;;  %v265_v29 = vld [vmem:[#allocation2] sm:$0xff] }
  0x48   :  { %217 = vst.msk [vmem:[#allocation2 + $0xd9] sm:$0xff] %vm26_vm0, %v10269_v17  ;;  %218 = vst.msk [vmem:[#allocation2 + $0xe1] sm:$0xff] %vm26_vm0, %v10274_v18  ;;  %531 = vrot.lane.b32.xlu1 %v398_v28, %s9892_s22  ;;  %v404_v56 = vld [vmem:[#allocation2 + $0x81] sm:$0xff] }
  0x49   :  { %16837 = vst [vmem:[#allocation22_spill] sm:$0xff] %v10285_v19  ;;  %16838 = vst [vmem:[#allocation23_spill] sm:$0xff] %v10290_v20  ;;  %537 = vrot.lane.b32.xlu0 %v401_v40, %s9892_s22  ;;  %v405_v59 = vld [vmem:[#allocation2 + $0x91] sm:$0xff]  ;;  %v406_v60 = vld [vmem:[#allocation2 + $0x99] sm:$0xff] }
  0x4a   :  { %16839 = vst [vmem:[#allocation24_spill] sm:$0xff] %v10295_v21  ;;  %219 = vst.msk [vmem:[#allocation2 + $0xf1] sm:$0xff] %vm26_vm0, %v10285_v19  ;;  %v10549_v40 = vld [vmem:[#allocation2 + $0x18] sm:$0xff] }
  0x4b   :  { %220 = vst.msk [vmem:[#allocation2 + $0xf9] sm:$0xff] %vm26_vm0, %v10290_v20  ;;  %221 = vst.msk [vmem:[#allocation2 + $0x109] sm:$0xff] %vm26_vm0, %v10295_v21  ;;  %v407_v61 = vld [vmem:[#allocation2 + $0xa9] sm:$0xff] }
  0x4c   :  { %16840 = vst [vmem:[#allocation25_spill] sm:$0xff] %v10306_v23  ;;  %222 = vst.msk [vmem:[#allocation2 + $0x111] sm:$0xff] %vm26_vm0, %v10306_v23  ;;  %535 = vrot.lane.b32.xlu1 %v400_v38, %s9892_s22  ;;  %v408_v28 = vld [vmem:[#allocation2 + $0xb1] sm:$0xff]  ;;  %v409_v38 = vld [vmem:[#allocation2 + $0xc1] sm:$0xff] }
  0x4d   :  { %16841 = vst [vmem:[#allocation26_spill] sm:$0xff] %v10317_v30  ;;  %16842 = vst [vmem:[#allocation27_spill] sm:$0xff] %v10322_v31  ;;  %541 = vrot.lane.b32.xlu0 %v403_v55, %s9892_s22  ;;  %v10559_v55 = vld [vmem:[%s16663_s0 + $0x1c8] sm:$0xff] }
  0x4e   :  { %223 = vst.msk [vmem:[#allocation2 + $0x121] sm:$0xff] %vm26_vm0, %v10317_v30  ;;  %224 = vst.msk [vmem:[#allocation2 + $0x129] sm:$0xff] %vm26_vm0, %v10322_v31 }
  0x4f   :  { %16843 = vst [vmem:[#allocation28_spill] sm:$0xff] %v10332_v32  ;;  %16844 = vst [vmem:[#allocation29_spill] sm:$0xff] %v10337_v33 }
  0x50   :  { %16845 = vst [vmem:[#allocation30_spill] sm:$0xff] %v10342_v34  ;;  %225 = vst.msk [vmem:[#allocation2 + $0x139] sm:$0xff] %vm26_vm0, %v10332_v32  ;;  %539 = vrot.lane.b32.xlu1 %v402_v44, %s9892_s22  ;;  %v10554_v44 = vld [vmem:[%s16663_s0 + $0x1c0] sm:$0xff] }
  0x51   :  { %226 = vst.msk [vmem:[#allocation2 + $0x141] sm:$0xff] %vm26_vm0, %v10337_v33  ;;  %227 = vst.msk [vmem:[#allocation2 + $0x151] sm:$0xff] %vm26_vm0, %v10342_v34  ;;  %545 = vrot.lane.b32.xlu0 %v405_v59, %s9892_s22  ;;  %v266_v59 = vld [vmem:[#allocation2 + $0x8] sm:$0xff]  ;;  %v425_v33 = vld [vmem:[#allocation2 + $0x1b1] sm:$0xff] }
  0x52   :  { %16846 = vst [vmem:[#allocation31_spill] sm:$0xff] %v10354_v35  ;;  %16847 = vst [vmem:[#allocation32_spill] sm:$0xff] %v10359_v36 }
  0x53   :  { %16848 = vst [vmem:[#allocation33_spill] sm:$0xff] %v10364_v37  ;;  %228 = vst.msk [vmem:[#allocation2 + $0x159] sm:$0xff] %vm26_vm0, %v10354_v35 }
  0x54   :  { %229 = vst.msk [vmem:[#allocation2 + $0x169] sm:$0xff] %vm26_vm0, %v10359_v36  ;;  %230 = vst.msk [vmem:[#allocation2 + $0x171] sm:$0xff] %vm26_vm0, %v10364_v37  ;;  %543 = vrot.lane.b32.xlu1 %v404_v56, %s9892_s22  ;;  %v410_v56 = vld [vmem:[#allocation2 + $0xc9] sm:$0xff]  ;;  %v298_v37 = vld [vmem:[#allocation2 + $0x1b8] sm:$0xff] }
  0x55   :  { %16849 = vst [vmem:[#allocation34_spill] sm:$0xff] %v10375_v39  ;;  %233 = vst.msk [vmem:[#allocation2 + $0x1c9] sm:$0xff] %vm26_vm0, %v10375_v39  ;;  %549 = vrot.lane.b32.xlu0 %v407_v61, %s9892_s22  ;;  %v10584_v61 = vld [vmem:[%s16663_s0 + $0x1d8] sm:$0xff] }
  0x56   :  { %16850 = vst [vmem:[#allocation35_spill] sm:$0xff] %v10382_v41  ;;  %16851 = vst [vmem:[#allocation36_spill] sm:$0xff] %v10387_v42 }
  0x57   :  { %16852 = vst [vmem:[#allocation37_spill] sm:$0xff] %v10392_v43  ;;  %234 = vst.msk [vmem:[#allocation2 + $0x1d1] sm:$0xff] %vm26_vm0, %v10382_v41  ;;  %v297_v41 = vld [vmem:[#allocation2 + $0x1b0] sm:$0xff] }
  0x58   :  { %235 = vst.msk [vmem:[#allocation2 + $0x1e1] sm:$0xff] %vm26_vm0, %v10387_v42  ;;  %236 = vst.msk [vmem:[#allocation2 + $0x1e9] sm:$0xff] %vm26_vm0, %v10392_v43  ;;  %547 = vrot.lane.b32.xlu1 %v406_v60, %s9892_s22  ;;  %v10568_v60 = vld [vmem:[#allocation2 + $0x20] sm:$0xff]  ;;  %v421_v39 = vld [vmem:[#allocation2 + $0x151] sm:$0xff] }
  0x59   :  { %16853 = vst [vmem:[#allocation38_spill] sm:$0xff] %v10404_v45  ;;  %16854 = vst [vmem:[#allocation39_spill] sm:$0xff] %v10409_v46  ;;  %553 = vrot.lane.b32.xlu0 %v409_v38, %s9892_s22  ;;  %v413_v38 = vld [vmem:[#allocation2 + $0xf1] sm:$0xff] }
  0x5a   :  { %16855 = vst [vmem:[#allocation40_spill] sm:$0xff] %v10414_v47  ;;  %237 = vst.msk [vmem:[#allocation2 + $0x1f9] sm:$0xff] %vm26_vm0, %v10404_v45  ;;  %v420_v45 = vld [vmem:[#allocation2 + $0x141] sm:$0xff]  ;;  %v10710_v43 = vld [vmem:[#allocation2 + $0x158] sm:$0xff] }
  0x5b   :  { %238 = vst.msk [vmem:[#allocation2 + $0x201] sm:$0xff] %vm26_vm0, %v10409_v46  ;;  %239 = vst.msk [vmem:[#allocation2 + $0x211] sm:$0xff] %vm26_vm0, %v10414_v47  ;;  %v419_v47 = vld [vmem:[#allocation2 + $0x139] sm:$0xff]  ;;  %v10718_v42 = vld [vmem:[#allocation2 + $0x170] sm:$0xff] }
  0x5c   :  { %16856 = vst [vmem:[#allocation41_spill] sm:$0xff] %v10426_v48  ;;  %16857 = vst [vmem:[#allocation42_spill] sm:$0xff] %v10431_v49  ;;  %551 = vrot.lane.b32.xlu1 %v408_v28, %s9892_s22  ;;  %v10599_v28 = vld [vmem:[%s16663_s0 + $0x1e0] sm:$0xff]  ;;  %v10728_v35 = vld [vmem:[#allocation2 + $0x1c8] sm:$0xff] }
  0x5d   :  { %16858 = vst [vmem:[#allocation43_spill] sm:$0xff] %v10436_v50  ;;  %240 = vst.msk [vmem:[#allocation2 + $0x219] sm:$0xff] %vm26_vm0, %v10426_v48  ;;  %v10699_v48 = vld [vmem:[#allocation2 + $0x138] sm:$0xff]  ;;  %v10704_v46 = vld [vmem:[#allocation2 + $0x140] sm:$0xff] }
  0x5e   :  { %241 = vst.msk [vmem:[#allocation2 + $0x229] sm:$0xff] %vm26_vm0, %v10431_v49  ;;  %242 = vst.msk [vmem:[#allocation2 + $0x231] sm:$0xff] %vm26_vm0, %v10436_v50  ;;  %v10684_v50 = vld [vmem:[#allocation2 + $0x110] sm:$0xff]  ;;  %v10692_v49 = vld [vmem:[#allocation2 + $0x128] sm:$0xff] }
  0x5f   :  { %16859 = vst [vmem:[#allocation44_spill] sm:$0xff] %v10447_v51  ;;  %16860 = vst [vmem:[#allocation45_spill] sm:$0xff] %v10452_v52  ;;  %v422_v36 = vld [vmem:[#allocation2 + $0x159] sm:$0xff]  ;;  %v10730_v34 = vld [vmem:[#allocation2 + $0x1d0] sm:$0xff] }
  0x60   :  { %16861 = vst [vmem:[#allocation46_spill] sm:$0xff] %v10457_v53  ;;  %243 = vst.msk [vmem:[#allocation2 + $0x241] sm:$0xff] %vm26_vm0, %v10447_v51  ;;  %555 = vrot.lane.b32.xlu1 %v410_v56, %s9892_s22  ;;  %v10632_v56 = vld [vmem:[#allocation2 + $0x80] sm:$0xff]  ;;  %v418_v51 = vld [vmem:[#allocation2 + $0x129] sm:$0xff] }
  0x61   :  { %244 = vst.msk [vmem:[#allocation2 + $0x249] sm:$0xff] %vm26_vm0, %v10452_v52  ;;  %245 = vst.msk [vmem:[#allocation2 + $0x259] sm:$0xff] %vm26_vm0, %v10457_v53  ;;  %v417_v53 = vld [vmem:[#allocation2 + $0x121] sm:$0xff]  ;;  %v10678_v52 = vld [vmem:[#allocation2 + $0xf8] sm:$0xff] }
  0x62   :  { %16862 = vst [vmem:[#allocation47_spill] sm:$0xff] %v10468_v54  ;;  %246 = vst.msk [vmem:[#allocation2 + $0x261] sm:$0xff] %vm26_vm0, %v10468_v54  ;;  %v10673_v54 = vld [vmem:[#allocation2 + $0xf0] sm:$0xff]  ;;  %v10752_v32 = vld [vmem:[#allocation2 + $0x200] sm:$0xff] }
  0x63   :  { %16863 = vst [vmem:[#allocation48_spill] sm:$0xff] %v10477_v57  ;;  %16864 = vst [vmem:[#allocation49_spill] sm:$0xff] %v10482_v58  ;;  %v427_v31 = vld [vmem:[#allocation2 + $0x1c9] sm:$0xff]  ;;  %v429_v23 = vld [vmem:[#allocation2 + $0x1e1] sm:$0xff] }
  0x64   :  { %247 = vst.msk [vmem:[#allocation2 + $0x271] sm:$0xff] %vm26_vm0, %v10477_v57  ;;  %248 = vst.msk [vmem:[#allocation2 + $0x279] sm:$0xff] %vm26_vm0, %v10482_v58  ;;  %v10658_v58 = vld [vmem:[#allocation2 + $0xc8] sm:$0xff]  ;;  %v10666_v57 = vld [vmem:[#allocation2 + $0xe0] sm:$0xff] }
  0x65   :  { %16865 = vst [vmem:[#allocation50_spill] sm:$0xff] %v10493_v62  ;;  %16866 = vst [vmem:[#allocation51_spill] sm:$0xff] %v10498_v63  ;;  %v10762_v30 = vld [vmem:[#allocation2 + $0x218] sm:$0xff]  ;;  %v10772_v21 = vld [vmem:[#allocation2 + $0x230] sm:$0xff] }
  0x66   :  { %249 = vst.msk [vmem:[#allocation2 + $0x289] sm:$0xff] %vm26_vm0, %v10493_v62  ;;  %250 = vst.msk [vmem:[#allocation2 + $0x291] sm:$0xff] %vm26_vm0, %v10498_v63  ;;  %v10652_v63 = vld [vmem:[#allocation2 + $0xb0] sm:$0xff]  ;;  %v431_v20 = vld [vmem:[#allocation2 + $0x1f9] sm:$0xff] }
  0x67   :  { %16867 = vst [vmem:[#allocation52_spill] sm:$0xff] %v10508_v0  ;;  %16868 = vst [vmem:[#allocation53_spill] sm:$0xff] %v10513_v22  ;;  %v416_v62 = vld [vmem:[#allocation2 + $0x111] sm:$0xff]  ;;  %v435_v16 = vld [vmem:[#allocation2 + $0x229] sm:$0xff] }
  0x68   :  { %16869 = vst [vmem:[#allocation54_spill] sm:$0xff] %v10518_v24  ;;  %251 = vst.msk [vmem:[#allocation2 + $0x2a1] sm:$0xff] %vm26_vm0, %v10508_v0  ;;  %v415_v0 = vld [vmem:[#allocation2 + $0x109] sm:$0xff]  ;;  %v433_v18 = vld [vmem:[#allocation2 + $0x211] sm:$0xff] }
  0x69   :  { %252 = vst.msk [vmem:[#allocation2 + $0x2a9] sm:$0xff] %vm26_vm0, %v10513_v22  ;;  %253 = vst.msk [vmem:[#allocation2 + $0x2b9] sm:$0xff] %vm26_vm0, %v10518_v24  ;;  %v414_v24 = vld [vmem:[#allocation2 + $0xf9] sm:$0xff]  ;;  %v10638_v22 = vld [vmem:[#allocation2 + $0x90] sm:$0xff] }
  0x6a   :  { %16870 = vst [vmem:[#allocation55_spill] sm:$0xff] %v10530_v25  ;;  %16871 = vst [vmem:[#allocation56_spill] sm:$0xff] %v10535_v26  ;;  %v10782_v19 = vld [vmem:[#allocation2 + $0x248] sm:$0xff]  ;;  %v10792_v17 = vld [vmem:[#allocation2 + $0x260] sm:$0xff] }
  0x6b   :  { %16872 = vst [vmem:[#allocation57_spill] sm:$0xff] %v10540_v27  ;;  %254 = vst.msk [vmem:[#allocation2 + $0x2c1] sm:$0xff] %vm26_vm0, %v10530_v25  ;;  %v10620_v25 = vld [vmem:[#allocation2 + $0x60] sm:$0xff]  ;;  %v10802_v15 = vld [vmem:[#allocation2 + $0x278] sm:$0xff] }
  0x6c   :  { %255 = vst.msk [vmem:[#allocation2 + $0x2d1] sm:$0xff] %vm26_vm0, %v10535_v26  ;;  %256 = vst.msk [vmem:[#allocation2 + $0x2d9] sm:$0xff] %vm26_vm0, %v10540_v27  ;;  %v411_v27 = vld [vmem:[#allocation2 + $0xd9] sm:$0xff]  ;;  %v412_v26 = vld [vmem:[#allocation2 + $0xe1] sm:$0xff] }
  0x6d   :  { %329 = vst.msk [vmem:[#allocation3] sm:$0xff] %vm26_vm0, %v265_v29  ;;  %16873 = vst [vmem:[#allocation58_spill] sm:$0xff] %v10554_v44  ;;  %v10573_v29 = vld [vmem:[%s16663_s0 + $0x1d0] sm:$0xff]  ;;  %557 = vrot.lane.b32.xlu0 %v411_v27, %s9892_s22  ;;  %559 = vrot.lane.b32.xlu1 %v412_v26, %s9892_s22  ;;  %v10640_v27 = vld [vmem:[#allocation2 + $0x98] sm:$0xff] }
  0x6e   :  { %16874 = vst [vmem:[#allocation59_spill] sm:$0xff] %v10559_v55  ;;  %331 = vst.msk [vmem:[#allocation3 + $0x10] sm:$0xff] %vm26_vm0, %v10549_v40  ;;  %v10647_v26 = vld [vmem:[#allocation2 + $0xa8] sm:$0xff]  ;;  %v10812_v13 = vld [vmem:[#allocation2 + $0x290] sm:$0xff] }
  0x6f   :  { %257 = vst.msk [vmem:[#allocation2 + $0x2e9] sm:$0xff] %vm26_vm0, %v10554_v44  ;;  %258 = vst.msk [vmem:[#allocation2 + $0x2f1] sm:$0xff] %vm26_vm0, %v10559_v55  ;;  %v10586_v55 = vld [vmem:[#allocation2 + $0x30] sm:$0xff]  ;;  %v10588_v44 = vld [vmem:[#allocation2 + $0x38] sm:$0xff] }
  0x70   :  { %16875 = vst [vmem:[#allocation60_spill] sm:$0xff] %v10573_v29  ;;  %330 = vst.msk [vmem:[#allocation3 + $0x8] sm:$0xff] %vm26_vm0, %v266_v59  ;;  %v10604_v59 = vld [vmem:[%s16663_s0 + $0x1e8] sm:$0xff]  ;;  %v439_v12 = vld [vmem:[#allocation2 + $0x259] sm:$0xff] }
  0x71   :  { %332 = vst.msk [vmem:[#allocation3 + $0x18] sm:$0xff] %vm26_vm0, %v10568_v60  ;;  %259 = vst.msk [vmem:[#allocation2 + $0x301] sm:$0xff] %vm26_vm0, %v10573_v29  ;;  %v10606_v29 = vld [vmem:[#allocation2 + $0x48] sm:$0xff]  ;;  %561 = vrot.lane.b32.xlu0 %v413_v38, %s9892_s22  ;;  %563 = vrot.lane.b32.xlu1 %v414_v24, %s9892_s22  ;;  %v10656_v38 = vld [vmem:[#allocation2 + $0xc0] sm:$0xff] }
  0x72   :  { %16876 = vst [vmem:[#allocation61_spill] sm:$0xff] %v10584_v61  ;;  %260 = vst.msk [vmem:[#allocation2 + $0x309] sm:$0xff] %vm26_vm0, %v10584_v61  ;;  %v10614_v61 = vld [vmem:[#allocation2 + $0x50] sm:$0xff]  ;;  %v10664_v24 = vld [vmem:[#allocation2 + $0xd8] sm:$0xff] }
  0x73   :  { %333 = vst.msk [vmem:[#allocation3 + $0x20] sm:$0xff] %vm26_vm0, %v10586_v55  ;;  %334 = vst.msk [vmem:[#allocation3 + $0x28] sm:$0xff] %vm26_vm0, %v10588_v44  ;;  %v437_v14 = vld [vmem:[#allocation2 + $0x241] sm:$0xff]  ;;  %v441_v10 = vld [vmem:[#allocation2 + $0x271] sm:$0xff] }
  0x74   :  { %16877 = vst [vmem:[#allocation62_spill] sm:$0xff] %v10599_v28  ;;  %16878 = vst [vmem:[#allocation63_spill] sm:$0xff] %v10604_v59  ;;  %v10822_v11 = vld [vmem:[#allocation2 + $0x2a8] sm:$0xff]  ;;  %v10832_v9 = vld [vmem:[#allocation2 + $0x2c0] sm:$0xff] }
  0x75   :  { %261 = vst.msk [vmem:[#allocation2 + $0x319] sm:$0xff] %vm26_vm0, %v10599_v28  ;;  %262 = vst.msk [vmem:[#allocation2 + $0x321] sm:$0xff] %vm26_vm0, %v10604_v59  ;;  %v10624_v59 = vld [vmem:[#allocation2 + $0x68] sm:$0xff]  ;;  %v10630_v28 = vld [vmem:[#allocation2 + $0x78] sm:$0xff]  ;;  %565 = vrot.lane.b32.xlu0 %v415_v0, %s9892_s22  ;;  %567 = vrot.lane.b32.xlu1 %v416_v62, %s9892_s22 }
  0x76   :  { %335 = vst.msk [vmem:[#allocation3 + $0x30] sm:$0xff] %vm26_vm0, %v10606_v29  ;;  %336 = vst.msk [vmem:[#allocation3 + $0x38] sm:$0xff] %vm26_vm0, %v10614_v61  ;;  %v10682_v0 = vld [vmem:[#allocation2 + $0x108] sm:$0xff]  ;;  %v10690_v62 = vld [vmem:[#allocation2 + $0x120] sm:$0xff] }
  0x77   :  { %337 = vst.msk [vmem:[#allocation3 + $0x40] sm:$0xff] %vm26_vm0, %v10620_v25  ;;  %338 = vst.msk [vmem:[#allocation3 + $0x48] sm:$0xff] %vm26_vm0, %v10624_v59  ;;  %v443_v8 = vld [vmem:[#allocation2 + $0x289] sm:$0xff]  ;;  %v10842_v7 = vld [vmem:[#allocation2 + $0x2d8] sm:$0xff] }
  0x78   :  { %339 = vst.msk [vmem:[#allocation3 + $0x50] sm:$0xff] %vm26_vm0, %v10630_v28  ;;  %340 = vst.msk [vmem:[#allocation3 + $0x58] sm:$0xff] %vm26_vm0, %v10632_v56  ;;  %v445_v6 = vld [vmem:[#allocation2 + $0x2a1] sm:$0xff]  ;;  %v10852_v5 = vld [vmem:[#allocation2 + $0x2f0] sm:$0xff] }
  0x79   :  { %341 = vst.msk [vmem:[#allocation3 + $0x60] sm:$0xff] %vm26_vm0, %v10638_v22  ;;  %342 = vst.msk [vmem:[#allocation3 + $0x68] sm:$0xff] %vm26_vm0, %v10640_v27  ;;  %569 = vrot.lane.b32.xlu0 %v417_v53, %s9892_s22  ;;  %571 = vrot.lane.b32.xlu1 %v418_v51, %s9892_s22  ;;  %v10708_v53 = vld [vmem:[#allocation2 + $0x150] sm:$0xff]  ;;  %v10716_v51 = vld [vmem:[#allocation2 + $0x168] sm:$0xff] }
  0x7a   :  { %343 = vst.msk [vmem:[#allocation3 + $0x70] sm:$0xff] %vm26_vm0, %v10647_v26  ;;  %344 = vst.msk [vmem:[#allocation3 + $0x78] sm:$0xff] %vm26_vm0, %v10652_v63  ;;  %v447_v4 = vld [vmem:[#allocation2 + $0x2b9] sm:$0xff]  ;;  %v10862_v3 = vld [vmem:[#allocation2 + $0x308] sm:$0xff] }
  0x7b   :  { %345 = vst.msk [vmem:[#allocation3 + $0x80] sm:$0xff] %vm26_vm0, %v10656_v38  ;;  %346 = vst.msk [vmem:[#allocation3 + $0x88] sm:$0xff] %vm26_vm0, %v10658_v58  ;;  %v449_v2 = vld [vmem:[#allocation2 + $0x2d1] sm:$0xff] }
  0x7c   :  { %347 = vst.msk [vmem:[#allocation3 + $0x90] sm:$0xff] %vm26_vm0, %v10664_v24  ;;  %348 = vst.msk [vmem:[#allocation3 + $0x98] sm:$0xff] %vm26_vm0, %v10666_v57  ;;  %v10872_v1 = vld [vmem:[#allocation2 + $0x320] sm:$0xff] }
  0x7d   :  { %349 = vst.msk [vmem:[#allocation3 + $0xa0] sm:$0xff] %vm26_vm0, %v10673_v54  ;;  %350 = vst.msk [vmem:[#allocation3 + $0xa8] sm:$0xff] %vm26_vm0, %v10678_v52  ;;  %573 = vrot.lane.b32.xlu0 %v419_v47, %s9892_s22  ;;  %575 = vrot.lane.b32.xlu1 %v420_v45, %s9892_s22  ;;  %v423_v45 = vld [vmem:[#allocation2 + $0x169] sm:$0xff]  ;;  %v424_v47 = vld [vmem:[#allocation2 + $0x171] sm:$0xff] }
  0x7e   :  { %351 = vst.msk [vmem:[#allocation3 + $0xb0] sm:$0xff] %vm26_vm0, %v10682_v0  ;;  %352 = vst.msk [vmem:[#allocation3 + $0xb8] sm:$0xff] %vm26_vm0, %v10684_v50 }
  0x7f   :  { %353 = vst.msk [vmem:[#allocation3 + $0xc0] sm:$0xff] %vm26_vm0, %v10690_v62  ;;  %354 = vst.msk [vmem:[#allocation3 + $0xc8] sm:$0xff] %vm26_vm0, %v10692_v49 }
  0x80   :  { %355 = vst.msk [vmem:[#allocation3 + $0xd0] sm:$0xff] %vm26_vm0, %v10699_v48  ;;  %356 = vst.msk [vmem:[#allocation3 + $0xd8] sm:$0xff] %vm26_vm0, %v10704_v46 }
  0x81   :  { %357 = vst.msk [vmem:[#allocation3 + $0xe0] sm:$0xff] %vm26_vm0, %v10708_v53  ;;  %358 = vst.msk [vmem:[#allocation3 + $0xe8] sm:$0xff] %vm26_vm0, %v10710_v43  ;;  %577 = vrot.lane.b32.xlu0 %v421_v39, %s9892_s22  ;;  %579 = vrot.lane.b32.xlu1 %v422_v36, %s9892_s22  ;;  %v10748_v39 = vld [vmem:[#allocation2 + $0x1f8] sm:$0xff] }
  0x82   :  { %359 = vst.msk [vmem:[#allocation3 + $0xf0] sm:$0xff] %vm26_vm0, %v10716_v51  ;;  %360 = vst.msk [vmem:[#allocation3 + $0xf8] sm:$0xff] %vm26_vm0, %v10718_v42  ;;  %v426_v36 = vld [vmem:[#allocation2 + $0x1b9] sm:$0xff] }
  0x83   :  { %361 = vst.msk [vmem:[#allocation3 + $0x100] sm:$0xff] %vm26_vm0, %v297_v41  ;;  %362 = vst.msk [vmem:[#allocation3 + $0x108] sm:$0xff] %vm26_vm0, %v298_v37  ;;  %v10738_v41 = vld [vmem:[#allocation2 + $0x1e0] sm:$0xff]  ;;  %v10742_v37 = vld [vmem:[#allocation2 + $0x1e8] sm:$0xff] }
  0x84   :  { %363 = vst.msk [vmem:[#allocation3 + $0x110] sm:$0xff] %vm26_vm0, %v10728_v35  ;;  %364 = vst.msk [vmem:[#allocation3 + $0x118] sm:$0xff] %vm26_vm0, %v10730_v34 }
  0x85   :  { %365 = vst.msk [vmem:[#allocation3 + $0x120] sm:$0xff] %vm26_vm0, %v10738_v41  ;;  %366 = vst.msk [vmem:[#allocation3 + $0x128] sm:$0xff] %vm26_vm0, %v10742_v37  ;;  %581 = vrot.lane.b32.xlu0 %v423_v45, %s9892_s22  ;;  %583 = vrot.lane.b32.xlu1 %v424_v47, %s9892_s22  ;;  %v10758_v45 = vld [vmem:[#allocation2 + $0x210] sm:$0xff] }
  0x86   :  { %367 = vst.msk [vmem:[#allocation3 + $0x130] sm:$0xff] %vm26_vm0, %v10748_v39  ;;  %368 = vst.msk [vmem:[#allocation3 + $0x138] sm:$0xff] %vm26_vm0, %v10752_v32  ;;  %v428_v47 = vld [vmem:[#allocation2 + $0x1d1] sm:$0xff] }
  0x87   :  { %369 = vst.msk [vmem:[#allocation3 + $0x140] sm:$0xff] %vm26_vm0, %v10758_v45  ;;  %370 = vst.msk [vmem:[#allocation3 + $0x148] sm:$0xff] %vm26_vm0, %v10762_v30 }
  0x88   :  { %372 = vst.msk [vmem:[#allocation3 + $0x158] sm:$0xff] %vm26_vm0, %v10772_v21  ;;  %374 = vst.msk [vmem:[#allocation3 + $0x168] sm:$0xff] %vm26_vm0, %v10782_v19 }
  0x89   :  { %585 = vrot.lane.b32.xlu0 %v425_v33, %s9892_s22  ;;  %587 = vrot.lane.b32.xlu1 %v426_v36, %s9892_s22  ;;  %v10768_v33 = vld [vmem:[#allocation2 + $0x228] sm:$0xff]  ;;  %376 = vst.msk [vmem:[#allocation3 + $0x178] sm:$0xff] %vm26_vm0, %v10792_v17  ;;  %378 = vst.msk [vmem:[#allocation3 + $0x188] sm:$0xff] %vm26_vm0, %v10802_v15 }
  0x8a   :  { %v430_v36 = vld [vmem:[#allocation2 + $0x1e9] sm:$0xff]  ;;  %371 = vst.msk [vmem:[#allocation3 + $0x150] sm:$0xff] %vm26_vm0, %v10768_v33  ;;  %380 = vst.msk [vmem:[#allocation3 + $0x198] sm:$0xff] %vm26_vm0, %v10812_v13 }
  0x8b   :  { %382 = vst.msk [vmem:[#allocation3 + $0x1a8] sm:$0xff] %vm26_vm0, %v10822_v11  ;;  %384 = vst.msk [vmem:[#allocation3 + $0x1b8] sm:$0xff] %vm26_vm0, %v10832_v9 }
  0x8c   :  { %386 = vst.msk [vmem:[#allocation3 + $0x1c8] sm:$0xff] %vm26_vm0, %v10842_v7  ;;  %16880 = vst [vmem:[#allocation65_spill] sm:$0xff] %v10852_v5 }
  0x8d   :  { %589 = vrot.lane.b32.xlu0 %v427_v31, %s9892_s22  ;;  %591 = vrot.lane.b32.xlu1 %v428_v47, %s9892_s22  ;;  %v10778_v31 = vld [vmem:[#allocation2 + $0x240] sm:$0xff]  ;;  %388 = vst.msk [vmem:[#allocation3 + $0x1d8] sm:$0xff] %vm26_vm0, %v10852_v5  ;;  %16882 = vst [vmem:[#allocation67_spill] sm:$0xff] %v10862_v3 }
  0x8e   :  { %v432_v47 = vld [vmem:[#allocation2 + $0x201] sm:$0xff]  ;;  %373 = vst.msk [vmem:[#allocation3 + $0x160] sm:$0xff] %vm26_vm0, %v10778_v31  ;;  %390 = vst.msk [vmem:[#allocation3 + $0x1e8] sm:$0xff] %vm26_vm0, %v10862_v3  ;;  %v522_v3 = vpop.permute.xlu0 %521 }
  0x8f   :  { %16884 = vst [vmem:[#allocation69_spill] sm:$0xff] %v10872_v1  ;;  %392 = vst.msk [vmem:[#allocation3 + $0x1f8] sm:$0xff] %vm26_vm0, %v10872_v1  ;;  %v454_v1 = vld [vmem:[#allocation2 + $0x309] sm:$0xff] }
  0x90   :  { %714 = vst.msk [vmem:[#allocation3] sm:$0xff] %vm713_vm2, %v522_v3  ;;  %v455_v3 = vld [vmem:[#allocation2 + $0x319] sm:$0xff] }
  0x91   :  { %593 = vrot.lane.b32.xlu0 %v429_v23, %s9892_s22  ;;  %595 = vrot.lane.b32.xlu1 %v430_v36, %s9892_s22  ;;  %v10788_v23 = vld [vmem:[#allocation2 + $0x258] sm:$0xff] }
  0x92   :  { %v434_v36 = vld [vmem:[#allocation2 + $0x219] sm:$0xff]  ;;  %375 = vst.msk [vmem:[#allocation3 + $0x170] sm:$0xff] %vm26_vm0, %v10788_v23 }
  0x95   :  { %597 = vrot.lane.b32.xlu0 %v431_v20, %s9892_s22  ;;  %599 = vrot.lane.b32.xlu1 %v432_v47, %s9892_s22  ;;  %v10798_v20 = vld [vmem:[#allocation2 + $0x270] sm:$0xff] }
  0x96   :  { %v436_v47 = vld [vmem:[#allocation2 + $0x231] sm:$0xff]  ;;  %377 = vst.msk [vmem:[#allocation3 + $0x180] sm:$0xff] %vm26_vm0, %v10798_v20 }
  0x99   :  { %601 = vrot.lane.b32.xlu0 %v433_v18, %s9892_s22  ;;  %603 = vrot.lane.b32.xlu1 %v434_v36, %s9892_s22  ;;  %v10808_v18 = vld [vmem:[#allocation2 + $0x288] sm:$0xff] }
  0x9a   :  { %v438_v36 = vld [vmem:[#allocation2 + $0x249] sm:$0xff]  ;;  %379 = vst.msk [vmem:[#allocation3 + $0x190] sm:$0xff] %vm26_vm0, %v10808_v18 }
  0x9d   :  { %605 = vrot.lane.b32.xlu0 %v435_v16, %s9892_s22  ;;  %607 = vrot.lane.b32.xlu1 %v436_v47, %s9892_s22  ;;  %v10818_v16 = vld [vmem:[#allocation2 + $0x2a0] sm:$0xff] }
  0x9e   :  { %v440_v47 = vld [vmem:[#allocation2 + $0x261] sm:$0xff]  ;;  %381 = vst.msk [vmem:[#allocation3 + $0x1a0] sm:$0xff] %vm26_vm0, %v10818_v16 }
  0x9f   :  { %v524_v5 = vpop.permute.xlu0 %523 }
  0xa0   :  { %715 = vst.msk [vmem:[#allocation3 + $0x8] sm:$0xff] %vm713_vm2, %v524_v5  ;;  %v778_v5 = vld [vmem:[#allocation2 + $0x2] sm:$0xff] }
  0xa1   :  { %609 = vrot.lane.b32.xlu0 %v437_v14, %s9892_s22  ;;  %611 = vrot.lane.b32.xlu1 %v438_v36, %s9892_s22  ;;  %v10828_v14 = vld [vmem:[#allocation2 + $0x2b8] sm:$0xff] }
  0xa2   :  { %v442_v36 = vld [vmem:[#allocation2 + $0x279] sm:$0xff]  ;;  %383 = vst.msk [vmem:[#allocation3 + $0x1b0] sm:$0xff] %vm26_vm0, %v10828_v14 }
  0xa5   :  { %613 = vrot.lane.b32.xlu0 %v439_v12, %s9892_s22  ;;  %615 = vrot.lane.b32.xlu1 %v440_v47, %s9892_s22  ;;  %v10838_v12 = vld [vmem:[#allocation2 + $0x2d0] sm:$0xff] }
  0xa6   :  { %v444_v47 = vld [vmem:[#allocation2 + $0x291] sm:$0xff]  ;;  %385 = vst.msk [vmem:[#allocation3 + $0x1c0] sm:$0xff] %vm26_vm0, %v10838_v12 }
  0xa9   :  { %617 = vrot.lane.b32.xlu0 %v441_v10, %s9892_s22  ;;  %619 = vrot.lane.b32.xlu1 %v442_v36, %s9892_s22  ;;  %v10848_v10 = vld [vmem:[#allocation2 + $0x2e8] sm:$0xff] }
  0xaa   :  { %16879 = vst [vmem:[#allocation64_spill] sm:$0xff] %v10848_v10  ;;  %v446_v36 = vld [vmem:[#allocation2 + $0x2a9] sm:$0xff]  ;;  %387 = vst.msk [vmem:[#allocation3 + $0x1d0] sm:$0xff] %vm26_vm0, %v10848_v10  ;;  %v456_v10 = vld [vmem:[#allocation2 + $0x321] sm:$0xff] }
  0xad   :  { %621 = vrot.lane.b32.xlu0 %v443_v8, %s9892_s22  ;;  %623 = vrot.lane.b32.xlu1 %v444_v47, %s9892_s22  ;;  %v10858_v8 = vld [vmem:[#allocation2 + $0x300] sm:$0xff] }
  0xae   :  { %16881 = vst [vmem:[#allocation66_spill] sm:$0xff] %v10858_v8  ;;  %v448_v47 = vld [vmem:[#allocation2 + $0x2c1] sm:$0xff]  ;;  %389 = vst.msk [vmem:[#allocation3 + $0x1e0] sm:$0xff] %vm26_vm0, %v10858_v8 }
  0xb1   :  { %625 = vrot.lane.b32.xlu0 %v445_v6, %s9892_s22  ;;  %627 = vrot.lane.b32.xlu1 %v446_v36, %s9892_s22  ;;  %v10868_v6 = vld [vmem:[#allocation2 + $0x318] sm:$0xff] }
  0xb2   :  { %16883 = vst [vmem:[#allocation68_spill] sm:$0xff] %v10868_v6  ;;  %v450_v36 = vld [vmem:[#allocation2 + $0x2d9] sm:$0xff]  ;;  %391 = vst.msk [vmem:[#allocation3 + $0x1f0] sm:$0xff] %vm26_vm0, %v10868_v6  ;;  %v526_v8 = vpop.permute.xlu1 %525  ;;  %v453_v6 = vld [vmem:[#allocation2 + $0x301] sm:$0xff] }
  0xb3   :  { %716 = vst.msk [vmem:[#allocation3 + $0x10] sm:$0xff] %vm713_vm2, %v526_v8 }
  0xb5   :  { %629 = vrot.lane.b32.xlu0 %v447_v4, %s9892_s22  ;;  %631 = vrot.lane.b32.xlu1 %v448_v47, %s9892_s22  ;;  %v451_v4 = vld [vmem:[#allocation2 + $0x2e9] sm:$0xff]  ;;  %v452_v47 = vld [vmem:[#allocation2 + $0x2f1] sm:$0xff] }
  0xb9   :  { %633 = vrot.lane.b32.xlu0 %v449_v2, %s9892_s22  ;;  %635 = vrot.lane.b32.xlu1 %v450_v36, %s9892_s22  ;;  %v528_v2 = vpop.permute.xlu1 %527  ;;  %v530_v36 = vpop.permute.xlu0 %529 }
  0xba   :  { %717 = vst.msk [vmem:[#allocation3 + $0x18] sm:$0xff] %vm713_vm2, %v528_v2  ;;  %718 = vst.msk [vmem:[#allocation3 + $0x20] sm:$0xff] %vm713_vm2, %v530_v36  ;;  %v781_v36 = vld [vmem:[#allocation2 + $0x22] sm:$0xff] }
  0xbd   :  { %637 = vrot.lane.b32.xlu0 %v451_v4, %s9892_s22  ;;  %639 = vrot.lane.b32.xlu1 %v452_v47, %s9892_s22  ;;  %v532_v8 = vpop.permute.xlu1 %531  ;;  %v534_v4 = vpop.permute.xlu0 %533  ;;  %v779_v47 = vld [vmem:[#allocation2 + $0xa] sm:$0xff] }
  0xbe   :  { %719 = vst.msk [vmem:[#allocation3 + $0x28] sm:$0xff] %vm713_vm2, %v532_v8  ;;  %720 = vst.msk [vmem:[#allocation3 + $0x30] sm:$0xff] %vm713_vm2, %v534_v4  ;;  %v783_v4 = vld [vmem:[#allocation2 + $0x3a] sm:$0xff] }
  0xc1   :  { %641 = vrot.lane.b32.xlu0 %v453_v6, %s9892_s22  ;;  %643 = vrot.lane.b32.xlu1 %v454_v1, %s9892_s22  ;;  %v536_v6 = vpop.permute.xlu1 %535  ;;  %v780_v1 = vld [vmem:[#allocation2 + $0x1a] sm:$0xff]  ;;  %v538_v2 = vpop.permute.xlu0 %537 }
  0xc2   :  { %721 = vst.msk [vmem:[#allocation3 + $0x38] sm:$0xff] %vm713_vm2, %v536_v6  ;;  %722 = vst.msk [vmem:[#allocation3 + $0x40] sm:$0xff] %vm713_vm2, %v538_v2  ;;  %v785_v2 = vld [vmem:[#allocation2 + $0x52] sm:$0xff] }
  0xc5   :  { %645 = vrot.lane.b32.xlu0 %v455_v3, %s9892_s22  ;;  %647 = vrot.lane.b32.xlu1 %v456_v10, %s9892_s22  ;;  %v540_v3 = vpop.permute.xlu1 %539  ;;  %v782_v10 = vld [vmem:[#allocation2 + $0x32] sm:$0xff]  ;;  %v542_v8 = vpop.permute.xlu0 %541 }
  0xc6   :  { %723 = vst.msk [vmem:[#allocation3 + $0x48] sm:$0xff] %vm713_vm2, %v540_v3  ;;  %724 = vst.msk [vmem:[#allocation3 + $0x50] sm:$0xff] %vm713_vm2, %v542_v8  ;;  %v787_v8 = vld [vmem:[#allocation2 + $0x6a] sm:$0xff] }
  0xc9   :  { %906 = vrot.lane.b32.xlu0 %v778_v5, %s9893_s10  ;;  %908 = vrot.lane.b32.xlu1 %v779_v47, %s9893_s10  ;;  %v544_v5 = vpop.permute.xlu1 %543  ;;  %v784_v47 = vld [vmem:[#allocation2 + $0x4a] sm:$0xff]  ;;  %v546_v6 = vpop.permute.xlu0 %545 }
  0xca   :  { %725 = vst.msk [vmem:[#allocation3 + $0x58] sm:$0xff] %vm713_vm2, %v544_v5  ;;  %726 = vst.msk [vmem:[#allocation3 + $0x60] sm:$0xff] %vm713_vm2, %v546_v6  ;;  %v789_v6 = vld [vmem:[#allocation2 + $0x82] sm:$0xff] }
  0xcd   :  { %910 = vrot.lane.b32.xlu0 %v780_v1, %s9893_s10  ;;  %912 = vrot.lane.b32.xlu1 %v781_v36, %s9893_s10  ;;  %v548_v1 = vpop.permute.xlu1 %547  ;;  %v786_v36 = vld [vmem:[#allocation2 + $0x62] sm:$0xff]  ;;  %v550_v3 = vpop.permute.xlu0 %549 }
  0xce   :  { %727 = vst.msk [vmem:[#allocation3 + $0x68] sm:$0xff] %vm713_vm2, %v548_v1  ;;  %728 = vst.msk [vmem:[#allocation3 + $0x70] sm:$0xff] %vm713_vm2, %v550_v3  ;;  %v791_v3 = vld [vmem:[#allocation2 + $0x9a] sm:$0xff] }
  0xd1   :  { %914 = vrot.lane.b32.xlu0 %v782_v10, %s9893_s10  ;;  %916 = vrot.lane.b32.xlu1 %v783_v4, %s9893_s10  ;;  %v552_v10 = vpop.permute.xlu1 %551  ;;  %v788_v4 = vld [vmem:[#allocation2 + $0x7a] sm:$0xff]  ;;  %v554_v5 = vpop.permute.xlu0 %553 }
  0xd2   :  { %729 = vst.msk [vmem:[#allocation3 + $0x78] sm:$0xff] %vm713_vm2, %v552_v10  ;;  %730 = vst.msk [vmem:[#allocation3 + $0x80] sm:$0xff] %vm713_vm2, %v554_v5  ;;  %v793_v5 = vld [vmem:[#allocation2 + $0xb2] sm:$0xff] }
  0xd5   :  { %918 = vrot.lane.b32.xlu0 %v784_v47, %s9893_s10  ;;  %920 = vrot.lane.b32.xlu1 %v785_v2, %s9893_s10  ;;  %v556_v47 = vpop.permute.xlu1 %555  ;;  %v790_v2 = vld [vmem:[#allocation2 + $0x92] sm:$0xff] }
  0xd6   :  { %731 = vst.msk [vmem:[#allocation3 + $0x88] sm:$0xff] %vm713_vm2, %v556_v47 }
  0xd9   :  { %922 = vrot.lane.b32.xlu0 %v786_v36, %s9893_s10  ;;  %924 = vrot.lane.b32.xlu1 %v787_v8, %s9893_s10  ;;  %v792_v8 = vld [vmem:[#allocation2 + $0xaa] sm:$0xff] }
  0xdd   :  { %926 = vrot.lane.b32.xlu0 %v788_v4, %s9893_s10  ;;  %928 = vrot.lane.b32.xlu1 %v789_v6, %s9893_s10  ;;  %v794_v6 = vld [vmem:[#allocation2 + $0xc2] sm:$0xff] }
  0xdf   :  { %v558_v1 = vpop.permute.xlu0 %557  ;;  %v560_v36 = vpop.permute.xlu1 %559 }
  0xe0   :  { %732 = vst.msk [vmem:[#allocation3 + $0x90] sm:$0xff] %vm713_vm2, %v558_v1  ;;  %733 = vst.msk [vmem:[#allocation3 + $0x98] sm:$0xff] %vm713_vm2, %v560_v36  ;;  %v795_v1 = vld [vmem:[#allocation2 + $0xca] sm:$0xff] }
  0xe1   :  { %930 = vrot.lane.b32.xlu0 %v790_v2, %s9893_s10  ;;  %932 = vrot.lane.b32.xlu1 %v791_v3, %s9893_s10  ;;  %v796_v3 = vld [vmem:[#allocation2 + $0xda] sm:$0xff] }
  0xe3   :  { %v562_v10 = vpop.permute.xlu0 %561  ;;  %v564_v4 = vpop.permute.xlu1 %563 }
  0xe4   :  { %734 = vst.msk [vmem:[#allocation3 + $0xa0] sm:$0xff] %vm713_vm2, %v562_v10  ;;  %735 = vst.msk [vmem:[#allocation3 + $0xa8] sm:$0xff] %vm713_vm2, %v564_v4  ;;  %v797_v10 = vld [vmem:[#allocation2 + $0xe2] sm:$0xff] }
  0xe5   :  { %934 = vrot.lane.b32.xlu0 %v792_v8, %s9893_s10  ;;  %936 = vrot.lane.b32.xlu1 %v793_v5, %s9893_s10  ;;  %v798_v5 = vld [vmem:[#allocation2 + $0xf2] sm:$0xff] }
  0xe7   :  { %v566_v47 = vpop.permute.xlu0 %565  ;;  %v568_v2 = vpop.permute.xlu1 %567 }
  0xe8   :  { %736 = vst.msk [vmem:[#allocation3 + $0xb0] sm:$0xff] %vm713_vm2, %v566_v47  ;;  %737 = vst.msk [vmem:[#allocation3 + $0xb8] sm:$0xff] %vm713_vm2, %v568_v2  ;;  %v799_v47 = vld [vmem:[#allocation2 + $0xfa] sm:$0xff] }
  0xe9   :  { %938 = vrot.lane.b32.xlu0 %v794_v6, %s9893_s10  ;;  %940 = vrot.lane.b32.xlu1 %v795_v1, %s9893_s10  ;;  %v800_v1 = vld [vmem:[#allocation2 + $0x10a] sm:$0xff] }
  0xeb   :  { %v570_v36 = vpop.permute.xlu0 %569  ;;  %v572_v8 = vpop.permute.xlu1 %571 }
  0xec   :  { %738 = vst.msk [vmem:[#allocation3 + $0xc0] sm:$0xff] %vm713_vm2, %v570_v36  ;;  %739 = vst.msk [vmem:[#allocation3 + $0xc8] sm:$0xff] %vm713_vm2, %v572_v8  ;;  %v801_v36 = vld [vmem:[#allocation2 + $0x112] sm:$0xff] }
  0xed   :  { %942 = vrot.lane.b32.xlu0 %v796_v3, %s9893_s10  ;;  %944 = vrot.lane.b32.xlu1 %v797_v10, %s9893_s10  ;;  %v802_v10 = vld [vmem:[#allocation2 + $0x122] sm:$0xff] }
  0xef   :  { %v574_v4 = vpop.permute.xlu0 %573  ;;  %v576_v6 = vpop.permute.xlu1 %575 }
  0xf0   :  { %740 = vst.msk [vmem:[#allocation3 + $0xd0] sm:$0xff] %vm713_vm2, %v574_v4  ;;  %741 = vst.msk [vmem:[#allocation3 + $0xd8] sm:$0xff] %vm713_vm2, %v576_v6  ;;  %v803_v4 = vld [vmem:[#allocation2 + $0x12a] sm:$0xff] }
  0xf1   :  { %946 = vrot.lane.b32.xlu0 %v798_v5, %s9893_s10  ;;  %948 = vrot.lane.b32.xlu1 %v799_v47, %s9893_s10  ;;  %v804_v47 = vld [vmem:[#allocation2 + $0x13a] sm:$0xff] }
  0xf3   :  { %v578_v2 = vpop.permute.xlu0 %577  ;;  %v580_v3 = vpop.permute.xlu1 %579 }
  0xf4   :  { %742 = vst.msk [vmem:[#allocation3 + $0xe0] sm:$0xff] %vm713_vm2, %v578_v2  ;;  %743 = vst.msk [vmem:[#allocation3 + $0xe8] sm:$0xff] %vm713_vm2, %v580_v3  ;;  %v805_v2 = vld [vmem:[#allocation2 + $0x142] sm:$0xff]  ;;  %v10955_v3 = vld [vmem:[%s16663_s0 + $0xf8] sm:$0xff] }
  0xf5   :  { %950 = vrot.lane.b32.xlu0 %v800_v1, %s9893_s10  ;;  %952 = vrot.lane.b32.xlu1 %v801_v36, %s9893_s10  ;;  %v10946_v36 = vld [vmem:[%s16663_s0 + $0xf0] sm:$0xff]  ;;  %16886 = vst [vmem:[#allocation71_spill] sm:$0xff] %v10955_v3  ;;  %232 = vst.msk [vmem:[#allocation2 + $0x189] sm:$0xff] %vm26_vm0, %v10955_v3 }
  0xf6   :  { %16885 = vst [vmem:[#allocation70_spill] sm:$0xff] %v10946_v36  ;;  %231 = vst.msk [vmem:[#allocation2 + $0x181] sm:$0xff] %vm26_vm0, %v10946_v36  ;;  %v811_v36 = vld [vmem:[#allocation2 + $0x1ba] sm:$0xff] }
  0xf7   :  { %v582_v8 = vpop.permute.xlu0 %581  ;;  %v584_v5 = vpop.permute.xlu1 %583 }
  0xf8   :  { %744 = vst.msk [vmem:[#allocation3 + $0xf0] sm:$0xff] %vm713_vm2, %v582_v8  ;;  %745 = vst.msk [vmem:[#allocation3 + $0xf8] sm:$0xff] %vm713_vm2, %v584_v5 }
  0xf9   :  { %954 = vrot.lane.b32.xlu0 %v802_v10, %s9893_s10  ;;  %956 = vrot.lane.b32.xlu1 %v803_v4, %s9893_s10  ;;  %v806_v10 = vld [vmem:[#allocation2 + $0x152] sm:$0xff]  ;;  %v807_v4 = vld [vmem:[#allocation2 + $0x15a] sm:$0xff] }
  0xfb   :  { %v586_v6 = vpop.permute.xlu0 %585  ;;  %v588_v1 = vpop.permute.xlu1 %587 }
  0xfc   :  { %746 = vst.msk [vmem:[#allocation3 + $0x100] sm:$0xff] %vm713_vm2, %v586_v6  ;;  %747 = vst.msk [vmem:[#allocation3 + $0x108] sm:$0xff] %vm713_vm2, %v588_v1  ;;  %v809_v1 = vld [vmem:[#allocation2 + $0x172] sm:$0xff] }
  0xfd   :  { %958 = vrot.lane.b32.xlu0 %v804_v47, %s9893_s10  ;;  %960 = vrot.lane.b32.xlu1 %v805_v2, %s9893_s10  ;;  %v808_v47 = vld [vmem:[#allocation2 + $0x16a] sm:$0xff] }
  0xff   :  { %v590_v8 = vpop.permute.xlu0 %589  ;;  %v592_v5 = vpop.permute.xlu1 %591 }
 0x100   :  { %748 = vst.msk [vmem:[#allocation3 + $0x110] sm:$0xff] %vm713_vm2, %v590_v8  ;;  %749 = vst.msk [vmem:[#allocation3 + $0x118] sm:$0xff] %vm713_vm2, %v592_v5  ;;  %v810_v8 = vld [vmem:[#allocation2 + $0x1b2] sm:$0xff] }
 0x101   :  { %962 = vrot.lane.b32.xlu0 %v806_v10, %s9893_s10  ;;  %964 = vrot.lane.b32.xlu1 %v807_v4, %s9893_s10  ;;  %v812_v4 = vld [vmem:[#allocation2 + $0x1ca] sm:$0xff] }
 0x103   :  { %v594_v6 = vpop.permute.xlu0 %593  ;;  %v596_v2 = vpop.permute.xlu1 %595 }
 0x104   :  { %750 = vst.msk [vmem:[#allocation3 + $0x120] sm:$0xff] %vm713_vm2, %v594_v6  ;;  %751 = vst.msk [vmem:[#allocation3 + $0x128] sm:$0xff] %vm713_vm2, %v596_v2  ;;  %v813_v6 = vld [vmem:[#allocation2 + $0x1d2] sm:$0xff]  ;;  %v815_v2 = vld [vmem:[#allocation2 + $0x1ea] sm:$0xff] }
 0x105   :  { %966 = vrot.lane.b32.xlu0 %v808_v47, %s9893_s10  ;;  %968 = vrot.lane.b32.xlu1 %v809_v1, %s9893_s10 }
 0x107   :  { %v598_v3 = vpop.permute.xlu0 %597  ;;  %v600_v10 = vpop.permute.xlu1 %599 }
 0x108   :  { %752 = vst.msk [vmem:[#allocation3 + $0x130] sm:$0xff] %vm713_vm2, %v598_v3  ;;  %753 = vst.msk [vmem:[#allocation3 + $0x138] sm:$0xff] %vm713_vm2, %v600_v10  ;;  %v814_v3 = vld [vmem:[#allocation2 + $0x1e2] sm:$0xff] }
 0x109   :  { %970 = vrot.lane.b32.xlu0 %v810_v8, %s9893_s10  ;;  %972 = vrot.lane.b32.xlu1 %v811_v36, %s9893_s10  ;;  %v816_v36 = vld [vmem:[#allocation2 + $0x1fa] sm:$0xff] }
 0x10b   :  { %v602_v5 = vpop.permute.xlu0 %601  ;;  %v604_v47 = vpop.permute.xlu1 %603 }
 0x10c   :  { %754 = vst.msk [vmem:[#allocation3 + $0x140] sm:$0xff] %vm713_vm2, %v602_v5  ;;  %755 = vst.msk [vmem:[#allocation3 + $0x148] sm:$0xff] %vm713_vm2, %v604_v47  ;;  %v817_v5 = vld [vmem:[#allocation2 + $0x202] sm:$0xff] }
 0x10d   :  { %974 = vrot.lane.b32.xlu0 %v812_v4, %s9893_s10  ;;  %976 = vrot.lane.b32.xlu1 %v813_v6, %s9893_s10  ;;  %v818_v6 = vld [vmem:[#allocation2 + $0x212] sm:$0xff] }
 0x10f   :  { %v606_v1 = vpop.permute.xlu0 %605  ;;  %v608_v8 = vpop.permute.xlu1 %607 }
 0x110   :  { %756 = vst.msk [vmem:[#allocation3 + $0x150] sm:$0xff] %vm713_vm2, %v606_v1  ;;  %757 = vst.msk [vmem:[#allocation3 + $0x158] sm:$0xff] %vm713_vm2, %v608_v8  ;;  %v819_v1 = vld [vmem:[#allocation2 + $0x21a] sm:$0xff] }
 0x111   :  { %978 = vrot.lane.b32.xlu0 %v814_v3, %s9893_s10  ;;  %980 = vrot.lane.b32.xlu1 %v815_v2, %s9893_s10  ;;  %v820_v2 = vld [vmem:[#allocation2 + $0x22a] sm:$0xff] }
 0x113   :  { %v610_v10 = vpop.permute.xlu0 %609  ;;  %v612_v4 = vpop.permute.xlu1 %611 }
 0x114   :  { %758 = vst.msk [vmem:[#allocation3 + $0x160] sm:$0xff] %vm713_vm2, %v610_v10  ;;  %759 = vst.msk [vmem:[#allocation3 + $0x168] sm:$0xff] %vm713_vm2, %v612_v4  ;;  %v821_v10 = vld [vmem:[#allocation2 + $0x232] sm:$0xff] }
 0x115   :  { %982 = vrot.lane.b32.xlu0 %v816_v36, %s9893_s10  ;;  %984 = vrot.lane.b32.xlu1 %v817_v5, %s9893_s10  ;;  %v822_v5 = vld [vmem:[#allocation2 + $0x242] sm:$0xff] }
 0x117   :  { %v614_v47 = vpop.permute.xlu0 %613  ;;  %v616_v3 = vpop.permute.xlu1 %615 }
 0x118   :  { %760 = vst.msk [vmem:[#allocation3 + $0x170] sm:$0xff] %vm713_vm2, %v614_v47  ;;  %761 = vst.msk [vmem:[#allocation3 + $0x178] sm:$0xff] %vm713_vm2, %v616_v3  ;;  %v823_v47 = vld [vmem:[#allocation2 + $0x24a] sm:$0xff] }
 0x119   :  { %986 = vrot.lane.b32.xlu0 %v818_v6, %s9893_s10  ;;  %988 = vrot.lane.b32.xlu1 %v819_v1, %s9893_s10  ;;  %v824_v1 = vld [vmem:[#allocation2 + $0x25a] sm:$0xff] }
 0x11b   :  { %v618_v8 = vpop.permute.xlu0 %617  ;;  %v620_v36 = vpop.permute.xlu1 %619 }
 0x11c   :  { %762 = vst.msk [vmem:[#allocation3 + $0x180] sm:$0xff] %vm713_vm2, %v618_v8  ;;  %763 = vst.msk [vmem:[#allocation3 + $0x188] sm:$0xff] %vm713_vm2, %v620_v36  ;;  %v825_v8 = vld [vmem:[#allocation2 + $0x262] sm:$0xff] }
 0x11d   :  { %990 = vrot.lane.b32.xlu0 %v820_v2, %s9893_s10  ;;  %992 = vrot.lane.b32.xlu1 %v821_v10, %s9893_s10  ;;  %v826_v10 = vld [vmem:[#allocation2 + $0x272] sm:$0xff] }
 0x11f   :  { %v622_v4 = vpop.permute.xlu0 %621  ;;  %v624_v6 = vpop.permute.xlu1 %623 }
 0x120   :  { %764 = vst.msk [vmem:[#allocation3 + $0x190] sm:$0xff] %vm713_vm2, %v622_v4  ;;  %765 = vst.msk [vmem:[#allocation3 + $0x198] sm:$0xff] %vm713_vm2, %v624_v6  ;;  %v827_v4 = vld [vmem:[#allocation2 + $0x27a] sm:$0xff] }
 0x121   :  { %994 = vrot.lane.b32.xlu0 %v822_v5, %s9893_s10  ;;  %996 = vrot.lane.b32.xlu1 %v823_v47, %s9893_s10  ;;  %v828_v47 = vld [vmem:[#allocation2 + $0x28a] sm:$0xff] }
 0x123   :  { %v626_v3 = vpop.permute.xlu0 %625  ;;  %v628_v2 = vpop.permute.xlu1 %627 }
 0x124   :  { %766 = vst.msk [vmem:[#allocation3 + $0x1a0] sm:$0xff] %vm713_vm2, %v626_v3  ;;  %767 = vst.msk [vmem:[#allocation3 + $0x1a8] sm:$0xff] %vm713_vm2, %v628_v2  ;;  %v829_v3 = vld [vmem:[#allocation2 + $0x292] sm:$0xff] }
 0x125   :  { %998 = vrot.lane.b32.xlu0 %v824_v1, %s9893_s10  ;;  %1000 = vrot.lane.b32.xlu1 %v825_v8, %s9893_s10  ;;  %v830_v8 = vld [vmem:[#allocation2 + $0x2a2] sm:$0xff] }
 0x127   :  { %v630_v36 = vpop.permute.xlu0 %629  ;;  %v632_v5 = vpop.permute.xlu1 %631 }
 0x128   :  { %768 = vst.msk [vmem:[#allocation3 + $0x1b0] sm:$0xff] %vm713_vm2, %v630_v36  ;;  %769 = vst.msk [vmem:[#allocation3 + $0x1b8] sm:$0xff] %vm713_vm2, %v632_v5  ;;  %v831_v36 = vld [vmem:[#allocation2 + $0x2aa] sm:$0xff] }
 0x129   :  { %1002 = vrot.lane.b32.xlu0 %v826_v10, %s9893_s10  ;;  %1004 = vrot.lane.b32.xlu1 %v827_v4, %s9893_s10  ;;  %v832_v4 = vld [vmem:[#allocation2 + $0x2ba] sm:$0xff] }
 0x12b   :  { %v634_v6 = vpop.permute.xlu0 %633  ;;  %v636_v1 = vpop.permute.xlu1 %635 }
 0x12c   :  { %770 = vst.msk [vmem:[#allocation3 + $0x1c0] sm:$0xff] %vm713_vm2, %v634_v6  ;;  %771 = vst.msk [vmem:[#allocation3 + $0x1c8] sm:$0xff] %vm713_vm2, %v636_v1  ;;  %v833_v6 = vld [vmem:[#allocation2 + $0x2c2] sm:$0xff] }
 0x12d   :  { %1006 = vrot.lane.b32.xlu0 %v828_v47, %s9893_s10  ;;  %1008 = vrot.lane.b32.xlu1 %v829_v3, %s9893_s10  ;;  %v834_v3 = vld [vmem:[#allocation2 + $0x2d2] sm:$0xff] }
 0x12f   :  { %v638_v2 = vpop.permute.xlu0 %637  ;;  %v640_v10 = vpop.permute.xlu1 %639 }
 0x130   :  { %772 = vst.msk [vmem:[#allocation3 + $0x1d0] sm:$0xff] %vm713_vm2, %v638_v2  ;;  %773 = vst.msk [vmem:[#allocation3 + $0x1d8] sm:$0xff] %vm713_vm2, %v640_v10  ;;  %v835_v2 = vld [vmem:[#allocation2 + $0x2da] sm:$0xff] }
 0x131   :  { %1010 = vrot.lane.b32.xlu0 %v830_v8, %s9893_s10  ;;  %1012 = vrot.lane.b32.xlu1 %v831_v36, %s9893_s10  ;;  %v836_v36 = vld [vmem:[#allocation2 + $0x2ea] sm:$0xff] }
 0x133   :  { %v642_v5 = vpop.permute.xlu0 %641  ;;  %v644_v47 = vpop.permute.xlu1 %643 }
 0x134   :  { %774 = vst.msk [vmem:[#allocation3 + $0x1e0] sm:$0xff] %vm713_vm2, %v642_v5  ;;  %775 = vst.msk [vmem:[#allocation3 + $0x1e8] sm:$0xff] %vm713_vm2, %v644_v47  ;;  %v837_v5 = vld [vmem:[#allocation2 + $0x2f2] sm:$0xff] }
 0x135   :  { %1014 = vrot.lane.b32.xlu0 %v832_v4, %s9893_s10  ;;  %1016 = vrot.lane.b32.xlu1 %v833_v6, %s9893_s10  ;;  %v11024_v6 = vld [vmem:[%s16663_s0 + $0x1f0] sm:$0xff]  ;;  %v11033_v47 = vld [vmem:[%s16663_s0 + $0x1f8] sm:$0xff]  ;;  %s9894_s0 = smov 12  }
 0x136   :  { %16887 = vst [vmem:[#allocation72_spill] sm:$0xff] %v11024_v6  ;;  %263 = vst.msk [vmem:[#allocation2 + $0x331] sm:$0xff] %vm26_vm0, %v11024_v6 }
 0x137   :  { %v646_v1 = vpop.permute.xlu0 %645  ;;  %v648_v8 = vpop.permute.xlu1 %647  ;;  %16888 = vst [vmem:[#allocation73_spill] sm:$0xff] %v11033_v47  ;;  %264 = vst.msk [vmem:[#allocation2 + $0x339] sm:$0xff] %vm26_vm0, %v11033_v47 }
 0x138   :  { %776 = vst.msk [vmem:[#allocation3 + $0x1f0] sm:$0xff] %vm713_vm2, %v646_v1  ;;  %777 = vst.msk [vmem:[#allocation3 + $0x1f8] sm:$0xff] %vm713_vm2, %v648_v8 }
 0x139   :  { %1018 = vrot.lane.b32.xlu0 %v834_v3, %s9893_s10  ;;  %1020 = vrot.lane.b32.xlu1 %v835_v2, %s9893_s10  ;;  %v838_v3 = vld [vmem:[#allocation2 + $0x302] sm:$0xff]  ;;  %v839_v2 = vld [vmem:[#allocation2 + $0x30a] sm:$0xff] }
 0x13b   :  { %v907_v10 = vpop.permute.xlu0 %906  ;;  %v909_v4 = vpop.permute.xlu1 %908 }
 0x13c   :  { %1099 = vst.msk [vmem:[#allocation3] sm:$0xff] %vm1098_vm3, %v907_v10  ;;  %1100 = vst.msk [vmem:[#allocation3 + $0x8] sm:$0xff] %vm1098_vm3, %v909_v4  ;;  %v841_v4 = vld [vmem:[#allocation2 + $0x322] sm:$0xff] }
 0x13d   :  { %1022 = vrot.lane.b32.xlu0 %v836_v36, %s9893_s10  ;;  %1024 = vrot.lane.b32.xlu1 %v837_v5, %s9893_s10  ;;  %v840_v36 = vld [vmem:[#allocation2 + $0x31a] sm:$0xff] }
 0x13f   :  { %v911_v1 = vpop.permute.xlu0 %910  ;;  %v913_v8 = vpop.permute.xlu1 %912 }
 0x140   :  { %1101 = vst.msk [vmem:[#allocation3 + $0x10] sm:$0xff] %vm1098_vm3, %v911_v1  ;;  %1102 = vst.msk [vmem:[#allocation3 + $0x18] sm:$0xff] %vm1098_vm3, %v913_v8 }
 0x141   :  { %1026 = vrot.lane.b32.xlu0 %v838_v3, %s9893_s10  ;;  %1028 = vrot.lane.b32.xlu1 %v839_v2, %s9893_s10 }
 0x143   :  { %v915_v10 = vpop.permute.xlu0 %914  ;;  %v917_v5 = vpop.permute.xlu1 %916 }
 0x144   :  { %1103 = vst.msk [vmem:[#allocation3 + $0x20] sm:$0xff] %vm1098_vm3, %v915_v10  ;;  %1104 = vst.msk [vmem:[#allocation3 + $0x28] sm:$0xff] %vm1098_vm3, %v917_v5 }
 0x145   :  { %1030 = vrot.lane.b32.xlu0 %v840_v36, %s9893_s10  ;;  %1032 = vrot.lane.b32.xlu1 %v841_v4, %s9893_s10  ;;  %v1194_v4 = vld [vmem:[#allocation2 + $0x188] sm:$0xff] }
 0x147   :  { %v919_v1 = vpop.permute.xlu0 %918  ;;  %v921_v8 = vpop.permute.xlu1 %920 }
 0x148   :  { %1105 = vst.msk [vmem:[#allocation3 + $0x30] sm:$0xff] %vm1098_vm3, %v919_v1  ;;  %1106 = vst.msk [vmem:[#allocation3 + $0x38] sm:$0xff] %vm1098_vm3, %v921_v8 }
 0x149   :  { %1291 = vrot.lane.b32.xlu0 %v10549_v40, %s9894_s0  ;;  %1293 = vrot.lane.b32.xlu1 %v10568_v60, %s9894_s0 }
 0x14b   :  { %v923_v3 = vpop.permute.xlu0 %922  ;;  %v925_v2 = vpop.permute.xlu1 %924 }
 0x14c   :  { %1107 = vst.msk [vmem:[#allocation3 + $0x40] sm:$0xff] %vm1098_vm3, %v923_v3  ;;  %1108 = vst.msk [vmem:[#allocation3 + $0x48] sm:$0xff] %vm1098_vm3, %v925_v2  ;;  %v16892_v2 = vld [vmem:[#allocation67_spill] sm:$0xff] }
 0x14d   :  { %1295 = vrot.lane.b32.xlu0 %v10586_v55, %s9894_s0  ;;  %1297 = vrot.lane.b32.xlu1 %v10588_v44, %s9894_s0 }
 0x14f   :  { %v927_v36 = vpop.permute.xlu0 %926  ;;  %v929_v10 = vpop.permute.xlu1 %928 }
 0x150   :  { %1109 = vst.msk [vmem:[#allocation3 + $0x50] sm:$0xff] %vm1098_vm3, %v927_v36  ;;  %1110 = vst.msk [vmem:[#allocation3 + $0x58] sm:$0xff] %vm1098_vm3, %v929_v10 }
 0x151   :  { %1299 = vrot.lane.b32.xlu0 %v10606_v29, %s9894_s0  ;;  %1301 = vrot.lane.b32.xlu1 %v10614_v61, %s9894_s0 }
 0x153   :  { %v931_v40 = vpop.permute.xlu0 %930  ;;  %v933_v60 = vpop.permute.xlu1 %932 }
 0x154   :  { %1111 = vst.msk [vmem:[#allocation3 + $0x60] sm:$0xff] %vm1098_vm3, %v931_v40  ;;  %1112 = vst.msk [vmem:[#allocation3 + $0x68] sm:$0xff] %vm1098_vm3, %v933_v60  ;;  %v16893_v40 = vld [vmem:[#allocation68_spill] sm:$0xff]  ;;  %v16894_v60 = vld [vmem:[#allocation69_spill] sm:$0xff] }
 0x155   :  { %1303 = vrot.lane.b32.xlu0 %v10620_v25, %s9894_s0  ;;  %1305 = vrot.lane.b32.xlu1 %v10624_v59, %s9894_s0 }
 0x157   :  { %v935_v44 = vpop.permute.xlu0 %934  ;;  %v937_v55 = vpop.permute.xlu1 %936 }
 0x158   :  { %1113 = vst.msk [vmem:[#allocation3 + $0x70] sm:$0xff] %vm1098_vm3, %v935_v44  ;;  %1114 = vst.msk [vmem:[#allocation3 + $0x78] sm:$0xff] %vm1098_vm3, %v937_v55  ;;  %v1225_v44 = vld [vmem:[#allocation2 + $0x330] sm:$0xff] }
 0x159   :  { %1307 = vrot.lane.b32.xlu0 %v10630_v28, %s9894_s0  ;;  %1309 = vrot.lane.b32.xlu1 %v10632_v56, %s9894_s0 }
 0x15b   :  { %v939_v29 = vpop.permute.xlu0 %938  ;;  %v941_v61 = vpop.permute.xlu1 %940 }
 0x15c   :  { %1115 = vst.msk [vmem:[#allocation3 + $0x80] sm:$0xff] %vm1098_vm3, %v939_v29  ;;  %1116 = vst.msk [vmem:[#allocation3 + $0x88] sm:$0xff] %vm1098_vm3, %v941_v61  ;;  %v1226_v29 = vld [vmem:[#allocation2 + $0x338] sm:$0xff] }
 0x15d   :  { %1311 = vrot.lane.b32.xlu0 %v10638_v22, %s9894_s0  ;;  %1313 = vrot.lane.b32.xlu1 %v10640_v27, %s9894_s0 }
 0x15f   :  { %v943_v25 = vpop.permute.xlu0 %942  ;;  %v945_v59 = vpop.permute.xlu1 %944 }
 0x160   :  { %1117 = vst.msk [vmem:[#allocation3 + $0x90] sm:$0xff] %vm1098_vm3, %v943_v25  ;;  %1118 = vst.msk [vmem:[#allocation3 + $0x98] sm:$0xff] %vm1098_vm3, %v945_v59  ;;  %v1548_v25 = vld [vmem:[#allocation2 + $0x19] sm:$0xff] }
 0x161   :  { %1315 = vrot.lane.b32.xlu0 %v10647_v26, %s9894_s0  ;;  %1317 = vrot.lane.b32.xlu1 %v10652_v63, %s9894_s0 }
 0x163   :  { %v947_v28 = vpop.permute.xlu0 %946  ;;  %v949_v56 = vpop.permute.xlu1 %948 }
 0x164   :  { %1119 = vst.msk [vmem:[#allocation3 + $0xa0] sm:$0xff] %vm1098_vm3, %v947_v28  ;;  %1120 = vst.msk [vmem:[#allocation3 + $0xa8] sm:$0xff] %vm1098_vm3, %v949_v56  ;;  %v1549_v28 = vld [vmem:[#allocation2 + $0x21] sm:$0xff] }
 0x165   :  { %1319 = vrot.lane.b32.xlu0 %v10656_v38, %s9894_s0  ;;  %1321 = vrot.lane.b32.xlu1 %v10658_v58, %s9894_s0 }
 0x167   :  { %v951_v22 = vpop.permute.xlu0 %950  ;;  %v953_v27 = vpop.permute.xlu1 %952 }
 0x168   :  { %1121 = vst.msk [vmem:[#allocation3 + $0xb0] sm:$0xff] %vm1098_vm3, %v951_v22  ;;  %1122 = vst.msk [vmem:[#allocation3 + $0xb8] sm:$0xff] %vm1098_vm3, %v953_v27  ;;  %v1550_v22 = vld [vmem:[#allocation2 + $0x31] sm:$0xff] }
 0x169   :  { %1323 = vrot.lane.b32.xlu0 %v10664_v24, %s9894_s0  ;;  %1325 = vrot.lane.b32.xlu1 %v10666_v57, %s9894_s0 }
 0x16b   :  { %v955_v63 = vpop.permute.xlu0 %954  ;;  %v957_v26 = vpop.permute.xlu1 %956 }
 0x16c   :  { %1123 = vst.msk [vmem:[#allocation3 + $0xc0] sm:$0xff] %vm1098_vm3, %v955_v63  ;;  %1124 = vst.msk [vmem:[#allocation3 + $0xc8] sm:$0xff] %vm1098_vm3, %v957_v26  ;;  %v1551_v63 = vld [vmem:[#allocation2 + $0x39] sm:$0xff] }
 0x16d   :  { %1327 = vrot.lane.b32.xlu0 %v10673_v54, %s9894_s0  ;;  %1329 = vrot.lane.b32.xlu1 %v10678_v52, %s9894_s0 }
 0x16f   :  { %v959_v58 = vpop.permute.xlu0 %958  ;;  %v961_v38 = vpop.permute.xlu1 %960 }
 0x170   :  { %1125 = vst.msk [vmem:[#allocation3 + $0xd0] sm:$0xff] %vm1098_vm3, %v959_v58  ;;  %1126 = vst.msk [vmem:[#allocation3 + $0xd8] sm:$0xff] %vm1098_vm3, %v961_v38  ;;  %v1552_v58 = vld [vmem:[#allocation2 + $0x49] sm:$0xff] }
 0x171   :  { %1331 = vrot.lane.b32.xlu0 %v10682_v0, %s9894_s0  ;;  %1333 = vrot.lane.b32.xlu1 %v10684_v50, %s9894_s0 }
 0x173   :  { %v963_v57 = vpop.permute.xlu0 %962  ;;  %v965_v24 = vpop.permute.xlu1 %964 }
 0x174   :  { %1127 = vst.msk [vmem:[#allocation3 + $0xe0] sm:$0xff] %vm1098_vm3, %v963_v57  ;;  %1128 = vst.msk [vmem:[#allocation3 + $0xe8] sm:$0xff] %vm1098_vm3, %v965_v24  ;;  %v1553_v57 = vld [vmem:[#allocation2 + $0x51] sm:$0xff] }
 0x175   :  { %1335 = vrot.lane.b32.xlu0 %v10690_v62, %s9894_s0  ;;  %1337 = vrot.lane.b32.xlu1 %v10692_v49, %s9894_s0 }
 0x177   :  { %v967_v52 = vpop.permute.xlu0 %966  ;;  %v969_v54 = vpop.permute.xlu1 %968 }
 0x178   :  { %1129 = vst.msk [vmem:[#allocation3 + $0xf0] sm:$0xff] %vm1098_vm3, %v967_v52  ;;  %1130 = vst.msk [vmem:[#allocation3 + $0xf8] sm:$0xff] %vm1098_vm3, %v969_v54  ;;  %v1554_v52 = vld [vmem:[#allocation2 + $0x61] sm:$0xff] }
 0x179   :  { %1339 = vrot.lane.b32.xlu0 %v10699_v48, %s9894_s0  ;;  %1341 = vrot.lane.b32.xlu1 %v10704_v46, %s9894_s0  ;;  %v1193_v46 = vld [vmem:[#allocation2 + $0x180] sm:$0xff] }
 0x17b   :  { %v971_v50 = vpop.permute.xlu0 %970  ;;  %v973_v0 = vpop.permute.xlu1 %972 }
 0x17c   :  { %1131 = vst.msk [vmem:[#allocation3 + $0x100] sm:$0xff] %vm1098_vm3, %v971_v50  ;;  %1132 = vst.msk [vmem:[#allocation3 + $0x108] sm:$0xff] %vm1098_vm3, %v973_v0  ;;  %v1555_v50 = vld [vmem:[#allocation2 + $0x69] sm:$0xff] }
 0x17d   :  { %1343 = vrot.lane.b32.xlu0 %v10708_v53, %s9894_s0  ;;  %1345 = vrot.lane.b32.xlu1 %v10710_v43, %s9894_s0 }
 0x17f   :  { %v975_v49 = vpop.permute.xlu0 %974  ;;  %v977_v62 = vpop.permute.xlu1 %976 }
 0x180   :  { %1133 = vst.msk [vmem:[#allocation3 + $0x110] sm:$0xff] %vm1098_vm3, %v975_v49  ;;  %1134 = vst.msk [vmem:[#allocation3 + $0x118] sm:$0xff] %vm1098_vm3, %v977_v62  ;;  %v1556_v49 = vld [vmem:[#allocation2 + $0x79] sm:$0xff] }
 0x181   :  { %1347 = vrot.lane.b32.xlu0 %v10716_v51, %s9894_s0  ;;  %1349 = vrot.lane.b32.xlu1 %v10718_v42, %s9894_s0 }
 0x183   :  { %v979_v48 = vpop.permute.xlu0 %978  ;;  %v981_v53 = vpop.permute.xlu1 %980 }
 0x184   :  { %1135 = vst.msk [vmem:[#allocation3 + $0x120] sm:$0xff] %vm1098_vm3, %v979_v48  ;;  %1136 = vst.msk [vmem:[#allocation3 + $0x128] sm:$0xff] %vm1098_vm3, %v981_v53 }
 0x185   :  { %1351 = vrot.lane.b32.xlu0 %v1193_v46, %s9894_s0  ;;  %1353 = vrot.lane.b32.xlu1 %v1194_v4, %s9894_s0  ;;  %v1557_v46 = vld [vmem:[#allocation2 + $0x81] sm:$0xff]  ;;  %v1558_v4 = vld [vmem:[#allocation2 + $0x91] sm:$0xff] }
 0x187   :  { %v983_v43 = vpop.permute.xlu0 %982  ;;  %v985_v5 = vpop.permute.xlu1 %984 }
 0x188   :  { %1137 = vst.msk [vmem:[#allocation3 + $0x130] sm:$0xff] %vm1098_vm3, %v983_v43  ;;  %1138 = vst.msk [vmem:[#allocation3 + $0x138] sm:$0xff] %vm1098_vm3, %v985_v5  ;;  %v1559_v43 = vld [vmem:[#allocation2 + $0x99] sm:$0xff] }
 0x189   :  { %1355 = vrot.lane.b32.xlu0 %v10728_v35, %s9894_s0  ;;  %1357 = vrot.lane.b32.xlu1 %v10730_v34, %s9894_s0 }
 0x18b   :  { %v987_v42 = vpop.permute.xlu0 %986  ;;  %v989_v51 = vpop.permute.xlu1 %988 }
 0x18c   :  { %1139 = vst.msk [vmem:[#allocation3 + $0x140] sm:$0xff] %vm1098_vm3, %v987_v42  ;;  %1140 = vst.msk [vmem:[#allocation3 + $0x148] sm:$0xff] %vm1098_vm3, %v989_v51  ;;  %v1560_v42 = vld [vmem:[#allocation2 + $0xa9] sm:$0xff] }
 0x18d   :  { %1359 = vrot.lane.b32.xlu0 %v10738_v41, %s9894_s0  ;;  %1361 = vrot.lane.b32.xlu1 %v10742_v37, %s9894_s0 }
 0x18f   :  { %v991_v1 = vpop.permute.xlu0 %990  ;;  %v993_v8 = vpop.permute.xlu1 %992 }
 0x190   :  { %1141 = vst.msk [vmem:[#allocation3 + $0x150] sm:$0xff] %vm1098_vm3, %v991_v1  ;;  %1142 = vst.msk [vmem:[#allocation3 + $0x158] sm:$0xff] %vm1098_vm3, %v993_v8  ;;  %v1561_v1 = vld [vmem:[#allocation2 + $0xb1] sm:$0xff] }
 0x191   :  { %1363 = vrot.lane.b32.xlu0 %v10748_v39, %s9894_s0  ;;  %1365 = vrot.lane.b32.xlu1 %v10752_v32, %s9894_s0 }
 0x193   :  { %v995_v34 = vpop.permute.xlu0 %994  ;;  %v997_v35 = vpop.permute.xlu1 %996 }
 0x194   :  { %1143 = vst.msk [vmem:[#allocation3 + $0x160] sm:$0xff] %vm1098_vm3, %v995_v34  ;;  %1144 = vst.msk [vmem:[#allocation3 + $0x168] sm:$0xff] %vm1098_vm3, %v997_v35  ;;  %v1562_v34 = vld [vmem:[#allocation2 + $0xc1] sm:$0xff] }
 0x195   :  { %1367 = vrot.lane.b32.xlu0 %v10758_v45, %s9894_s0  ;;  %1369 = vrot.lane.b32.xlu1 %v10762_v30, %s9894_s0 }
 0x197   :  { %v999_v41 = vpop.permute.xlu0 %998  ;;  %v1001_v37 = vpop.permute.xlu1 %1000 }
 0x198   :  { %1145 = vst.msk [vmem:[#allocation3 + $0x170] sm:$0xff] %vm1098_vm3, %v999_v41  ;;  %1146 = vst.msk [vmem:[#allocation3 + $0x178] sm:$0xff] %vm1098_vm3, %v1001_v37  ;;  %v1563_v41 = vld [vmem:[#allocation2 + $0xc9] sm:$0xff] }
 0x199   :  { %1371 = vrot.lane.b32.xlu0 %v10768_v33, %s9894_s0  ;;  %1373 = vrot.lane.b32.xlu1 %v10772_v21, %s9894_s0 }
 0x19b   :  { %v1003_v32 = vpop.permute.xlu0 %1002  ;;  %v1005_v39 = vpop.permute.xlu1 %1004 }
 0x19c   :  { %1147 = vst.msk [vmem:[#allocation3 + $0x180] sm:$0xff] %vm1098_vm3, %v1003_v32  ;;  %1148 = vst.msk [vmem:[#allocation3 + $0x188] sm:$0xff] %vm1098_vm3, %v1005_v39  ;;  %v1564_v32 = vld [vmem:[#allocation2 + $0xd9] sm:$0xff] }
 0x19d   :  { %1375 = vrot.lane.b32.xlu0 %v10778_v31, %s9894_s0  ;;  %1377 = vrot.lane.b32.xlu1 %v10782_v19, %s9894_s0 }
 0x19f   :  { %v1007_v30 = vpop.permute.xlu0 %1006  ;;  %v1009_v45 = vpop.permute.xlu1 %1008 }
 0x1a0   :  { %1149 = vst.msk [vmem:[#allocation3 + $0x190] sm:$0xff] %vm1098_vm3, %v1007_v30  ;;  %1150 = vst.msk [vmem:[#allocation3 + $0x198] sm:$0xff] %vm1098_vm3, %v1009_v45  ;;  %v1565_v30 = vld [vmem:[#allocation2 + $0xe1] sm:$0xff] }
 0x1a1   :  { %1379 = vrot.lane.b32.xlu0 %v10788_v23, %s9894_s0  ;;  %1381 = vrot.lane.b32.xlu1 %v10792_v17, %s9894_s0 }
 0x1a3   :  { %v1011_v21 = vpop.permute.xlu0 %1010  ;;  %v1013_v33 = vpop.permute.xlu1 %1012 }
 0x1a4   :  { %1151 = vst.msk [vmem:[#allocation3 + $0x1a0] sm:$0xff] %vm1098_vm3, %v1011_v21  ;;  %1152 = vst.msk [vmem:[#allocation3 + $0x1a8] sm:$0xff] %vm1098_vm3, %v1013_v33  ;;  %v1566_v21 = vld [vmem:[#allocation2 + $0xf1] sm:$0xff] }
 0x1a5   :  { %1383 = vrot.lane.b32.xlu0 %v10798_v20, %s9894_s0  ;;  %1385 = vrot.lane.b32.xlu1 %v10802_v15, %s9894_s0 }
 0x1a7   :  { %v1015_v19 = vpop.permute.xlu0 %1014  ;;  %v1017_v31 = vpop.permute.xlu1 %1016 }
 0x1a8   :  { %1153 = vst.msk [vmem:[#allocation3 + $0x1b0] sm:$0xff] %vm1098_vm3, %v1015_v19  ;;  %1154 = vst.msk [vmem:[#allocation3 + $0x1b8] sm:$0xff] %vm1098_vm3, %v1017_v31  ;;  %v1567_v19 = vld [vmem:[#allocation2 + $0xf9] sm:$0xff] }
 0x1a9   :  { %1387 = vrot.lane.b32.xlu0 %v10808_v18, %s9894_s0  ;;  %1389 = vrot.lane.b32.xlu1 %v10812_v13, %s9894_s0 }
 0x1ab   :  { %v1019_v17 = vpop.permute.xlu0 %1018  ;;  %v1021_v23 = vpop.permute.xlu1 %1020 }
 0x1ac   :  { %1155 = vst.msk [vmem:[#allocation3 + $0x1c0] sm:$0xff] %vm1098_vm3, %v1019_v17  ;;  %1156 = vst.msk [vmem:[#allocation3 + $0x1c8] sm:$0xff] %vm1098_vm3, %v1021_v23  ;;  %v1568_v17 = vld [vmem:[#allocation2 + $0x109] sm:$0xff] }
 0x1ad   :  { %1391 = vrot.lane.b32.xlu0 %v10818_v16, %s9894_s0  ;;  %1393 = vrot.lane.b32.xlu1 %v10822_v11, %s9894_s0 }
 0x1af   :  { %v1023_v15 = vpop.permute.xlu0 %1022  ;;  %v1025_v20 = vpop.permute.xlu1 %1024 }
 0x1b0   :  { %1157 = vst.msk [vmem:[#allocation3 + $0x1d0] sm:$0xff] %vm1098_vm3, %v1023_v15  ;;  %1158 = vst.msk [vmem:[#allocation3 + $0x1d8] sm:$0xff] %vm1098_vm3, %v1025_v20  ;;  %v1569_v15 = vld [vmem:[#allocation2 + $0x111] sm:$0xff] }
 0x1b1   :  { %1395 = vrot.lane.b32.xlu0 %v10828_v14, %s9894_s0  ;;  %1397 = vrot.lane.b32.xlu1 %v10832_v9, %s9894_s0  ;;  %v16889_v9 = vld [vmem:[#allocation64_spill] sm:$0xff]  ;;  %v16890_v14 = vld [vmem:[#allocation65_spill] sm:$0xff] }
 0x1b3   :  { %v1027_v13 = vpop.permute.xlu0 %1026  ;;  %v1029_v18 = vpop.permute.xlu1 %1028 }
 0x1b4   :  { %1159 = vst.msk [vmem:[#allocation3 + $0x1e0] sm:$0xff] %vm1098_vm3, %v1027_v13  ;;  %1160 = vst.msk [vmem:[#allocation3 + $0x1e8] sm:$0xff] %vm1098_vm3, %v1029_v18  ;;  %v1570_v13 = vld [vmem:[#allocation2 + $0x121] sm:$0xff] }
 0x1b5   :  { %1399 = vrot.lane.b32.xlu0 %v10838_v12, %s9894_s0  ;;  %1401 = vrot.lane.b32.xlu1 %v10842_v7, %s9894_s0  ;;  %v16891_v7 = vld [vmem:[#allocation66_spill] sm:$0xff] }
 0x1b7   :  { %v1031_v11 = vpop.permute.xlu0 %1030  ;;  %v1033_v16 = vpop.permute.xlu1 %1032 }
 0x1b8   :  { %1161 = vst.msk [vmem:[#allocation3 + $0x1f0] sm:$0xff] %vm1098_vm3, %v1031_v11  ;;  %1162 = vst.msk [vmem:[#allocation3 + $0x1f8] sm:$0xff] %vm1098_vm3, %v1033_v16  ;;  %v1571_v11 = vld [vmem:[#allocation2 + $0x129] sm:$0xff] }
 0x1b9   :  { %1403 = vrot.lane.b32.xlu0 %v16889_v9, %s9894_s0  ;;  %1405 = vrot.lane.b32.xlu1 %v16890_v14, %s9894_s0  ;;  %v1572_v9 = vld [vmem:[#allocation2 + $0x139] sm:$0xff] }
 0x1bb   :  { %v1292_v3 = vpop.permute.xlu0 %1291  ;;  %v1294_v12 = vpop.permute.xlu1 %1293 }
 0x1bc   :  { %1484 = vst.msk [vmem:[#allocation3] sm:$0xff] %vm1483_vm4, %v1292_v3  ;;  %1485 = vst.msk [vmem:[#allocation3 + $0x8] sm:$0xff] %vm1483_vm4, %v1294_v12  ;;  %v1573_v3 = vld [vmem:[#allocation2 + $0x141] sm:$0xff] }
 0x1bd   :  { %1407 = vrot.lane.b32.xlu0 %v16891_v7, %s9894_s0  ;;  %1409 = vrot.lane.b32.xlu1 %v16892_v2, %s9894_s0  ;;  %v1574_v7 = vld [vmem:[#allocation2 + $0x151] sm:$0xff] }
 0x1bf   :  { %v1296_v36 = vpop.permute.xlu0 %1295  ;;  %v1298_v10 = vpop.permute.xlu1 %1297 }
 0x1c0   :  { %1486 = vst.msk [vmem:[#allocation3 + $0x10] sm:$0xff] %vm1483_vm4, %v1296_v36  ;;  %1487 = vst.msk [vmem:[#allocation3 + $0x18] sm:$0xff] %vm1483_vm4, %v1298_v10  ;;  %v1575_v36 = vld [vmem:[#allocation2 + $0x159] sm:$0xff] }
 0x1c1   :  { %1411 = vrot.lane.b32.xlu0 %v16893_v40, %s9894_s0  ;;  %1413 = vrot.lane.b32.xlu1 %v16894_v60, %s9894_s0  ;;  %v1576_v40 = vld [vmem:[#allocation2 + $0x169] sm:$0xff] }
 0x1c3   :  { %v1300_v55 = vpop.permute.xlu0 %1299  ;;  %v1302_v61 = vpop.permute.xlu1 %1301 }
 0x1c4   :  { %1488 = vst.msk [vmem:[#allocation3 + $0x20] sm:$0xff] %vm1483_vm4, %v1300_v55  ;;  %1489 = vst.msk [vmem:[#allocation3 + $0x28] sm:$0xff] %vm1483_vm4, %v1302_v61 }
 0x1c5   :  { %1415 = vrot.lane.b32.xlu0 %v1225_v44, %s9894_s0  ;;  %1417 = vrot.lane.b32.xlu1 %v1226_v29, %s9894_s0  ;;  %v1577_v44 = vld [vmem:[#allocation2 + $0x171] sm:$0xff]  ;;  %v1578_v29 = vld [vmem:[#allocation2 + $0x181] sm:$0xff] }
 0x1c7   :  { %v1304_v59 = vpop.permute.xlu0 %1303  ;;  %v1306_v56 = vpop.permute.xlu1 %1305 }
 0x1c8   :  { %1490 = vst.msk [vmem:[#allocation3 + $0x30] sm:$0xff] %vm1483_vm4, %v1304_v59  ;;  %1491 = vst.msk [vmem:[#allocation3 + $0x38] sm:$0xff] %vm1483_vm4, %v1306_v56 }
 0x1c9   :  { %1676 = vrot.lane.b32.xlu0 %v1548_v25, %s9895_s19  ;;  %1678 = vrot.lane.b32.xlu1 %v1549_v28, %s9895_s19  ;;  %v1579_v25 = vld [vmem:[#allocation2 + $0x189] sm:$0xff] }
 0x1ca   :  { %v1580_v28 = vld [vmem:[#allocation2 + $0x1c9] sm:$0xff] }
 0x1cb   :  { %v1308_v27 = vpop.permute.xlu0 %1307  ;;  %v1310_v26 = vpop.permute.xlu1 %1309 }
 0x1cc   :  { %1492 = vst.msk [vmem:[#allocation3 + $0x40] sm:$0xff] %vm1483_vm4, %v1308_v27  ;;  %1493 = vst.msk [vmem:[#allocation3 + $0x48] sm:$0xff] %vm1483_vm4, %v1310_v26 }
 0x1cd   :  { %1680 = vrot.lane.b32.xlu0 %v1550_v22, %s9895_s19  ;;  %1682 = vrot.lane.b32.xlu1 %v1551_v63, %s9895_s19  ;;  %v1581_v22 = vld [vmem:[#allocation2 + $0x1d1] sm:$0xff]  ;;  %v1582_v63 = vld [vmem:[#allocation2 + $0x1e1] sm:$0xff] }
 0x1cf   :  { %v1312_v38 = vpop.permute.xlu0 %1311  ;;  %v1314_v24 = vpop.permute.xlu1 %1313 }
 0x1d0   :  { %1494 = vst.msk [vmem:[#allocation3 + $0x50] sm:$0xff] %vm1483_vm4, %v1312_v38  ;;  %1495 = vst.msk [vmem:[#allocation3 + $0x58] sm:$0xff] %vm1483_vm4, %v1314_v24 }
 0x1d1   :  { %1684 = vrot.lane.b32.xlu0 %v1552_v58, %s9895_s19  ;;  %1686 = vrot.lane.b32.xlu1 %v1553_v57, %s9895_s19  ;;  %v1583_v58 = vld [vmem:[#allocation2 + $0x1e9] sm:$0xff]  ;;  %v1584_v57 = vld [vmem:[#allocation2 + $0x1f9] sm:$0xff] }
 0x1d3   :  { %v1316_v54 = vpop.permute.xlu0 %1315  ;;  %v1318_v0 = vpop.permute.xlu1 %1317 }
 0x1d4   :  { %1496 = vst.msk [vmem:[#allocation3 + $0x60] sm:$0xff] %vm1483_vm4, %v1316_v54  ;;  %1497 = vst.msk [vmem:[#allocation3 + $0x68] sm:$0xff] %vm1483_vm4, %v1318_v0 }
 0x1d5   :  { %1688 = vrot.lane.b32.xlu0 %v1554_v52, %s9895_s19  ;;  %1690 = vrot.lane.b32.xlu1 %v1555_v50, %s9895_s19  ;;  %v1585_v52 = vld [vmem:[#allocation2 + $0x201] sm:$0xff]  ;;  %v1586_v50 = vld [vmem:[#allocation2 + $0x211] sm:$0xff] }
 0x1d7   :  { %v1320_v62 = vpop.permute.xlu0 %1319  ;;  %v1322_v48 = vpop.permute.xlu1 %1321 }
 0x1d8   :  { %1498 = vst.msk [vmem:[#allocation3 + $0x70] sm:$0xff] %vm1483_vm4, %v1320_v62  ;;  %1499 = vst.msk [vmem:[#allocation3 + $0x78] sm:$0xff] %vm1483_vm4, %v1322_v48 }
 0x1d9   :  { %1692 = vrot.lane.b32.xlu0 %v1556_v49, %s9895_s19  ;;  %1694 = vrot.lane.b32.xlu1 %v1557_v46, %s9895_s19  ;;  %v1587_v49 = vld [vmem:[#allocation2 + $0x219] sm:$0xff]  ;;  %v1588_v46 = vld [vmem:[#allocation2 + $0x229] sm:$0xff] }
 0x1db   :  { %v1324_v53 = vpop.permute.xlu0 %1323  ;;  %v1326_v5 = vpop.permute.xlu1 %1325 }
 0x1dc   :  { %1500 = vst.msk [vmem:[#allocation3 + $0x80] sm:$0xff] %vm1483_vm4, %v1324_v53  ;;  %1501 = vst.msk [vmem:[#allocation3 + $0x88] sm:$0xff] %vm1483_vm4, %v1326_v5 }
 0x1dd   :  { %1696 = vrot.lane.b32.xlu0 %v1558_v4, %s9895_s19  ;;  %1698 = vrot.lane.b32.xlu1 %v1559_v43, %s9895_s19  ;;  %v1589_v4 = vld [vmem:[#allocation2 + $0x231] sm:$0xff]  ;;  %v1590_v43 = vld [vmem:[#allocation2 + $0x241] sm:$0xff] }
 0x1df   :  { %v1328_v51 = vpop.permute.xlu0 %1327  ;;  %v1330_v8 = vpop.permute.xlu1 %1329 }
 0x1e0   :  { %1502 = vst.msk [vmem:[#allocation3 + $0x90] sm:$0xff] %vm1483_vm4, %v1328_v51  ;;  %1503 = vst.msk [vmem:[#allocation3 + $0x98] sm:$0xff] %vm1483_vm4, %v1330_v8 }
 0x1e1   :  { %1700 = vrot.lane.b32.xlu0 %v1560_v42, %s9895_s19  ;;  %1702 = vrot.lane.b32.xlu1 %v1561_v1, %s9895_s19  ;;  %v1591_v42 = vld [vmem:[#allocation2 + $0x249] sm:$0xff]  ;;  %v1592_v1 = vld [vmem:[#allocation2 + $0x259] sm:$0xff] }
 0x1e3   :  { %v1332_v35 = vpop.permute.xlu0 %1331  ;;  %v1334_v37 = vpop.permute.xlu1 %1333 }
 0x1e4   :  { %1504 = vst.msk [vmem:[#allocation3 + $0xa0] sm:$0xff] %vm1483_vm4, %v1332_v35  ;;  %1505 = vst.msk [vmem:[#allocation3 + $0xa8] sm:$0xff] %vm1483_vm4, %v1334_v37 }
 0x1e5   :  { %1704 = vrot.lane.b32.xlu0 %v1562_v34, %s9895_s19  ;;  %1706 = vrot.lane.b32.xlu1 %v1563_v41, %s9895_s19  ;;  %v1593_v34 = vld [vmem:[#allocation2 + $0x261] sm:$0xff]  ;;  %v1594_v41 = vld [vmem:[#allocation2 + $0x271] sm:$0xff] }
 0x1e7   :  { %v1336_v39 = vpop.permute.xlu0 %1335  ;;  %v1338_v45 = vpop.permute.xlu1 %1337 }
 0x1e8   :  { %1506 = vst.msk [vmem:[#allocation3 + $0xb0] sm:$0xff] %vm1483_vm4, %v1336_v39  ;;  %1507 = vst.msk [vmem:[#allocation3 + $0xb8] sm:$0xff] %vm1483_vm4, %v1338_v45 }
 0x1e9   :  { %1708 = vrot.lane.b32.xlu0 %v1564_v32, %s9895_s19  ;;  %1710 = vrot.lane.b32.xlu1 %v1565_v30, %s9895_s19  ;;  %v1595_v32 = vld [vmem:[#allocation2 + $0x279] sm:$0xff]  ;;  %v1596_v30 = vld [vmem:[#allocation2 + $0x289] sm:$0xff] }
 0x1eb   :  { %v1340_v33 = vpop.permute.xlu0 %1339  ;;  %v1342_v31 = vpop.permute.xlu1 %1341 }
 0x1ec   :  { %1508 = vst.msk [vmem:[#allocation3 + $0xc0] sm:$0xff] %vm1483_vm4, %v1340_v33  ;;  %1509 = vst.msk [vmem:[#allocation3 + $0xc8] sm:$0xff] %vm1483_vm4, %v1342_v31 }
 0x1ed   :  { %1712 = vrot.lane.b32.xlu0 %v1566_v21, %s9895_s19  ;;  %1714 = vrot.lane.b32.xlu1 %v1567_v19, %s9895_s19  ;;  %v1597_v21 = vld [vmem:[#allocation2 + $0x291] sm:$0xff]  ;;  %v1598_v19 = vld [vmem:[#allocation2 + $0x2a1] sm:$0xff] }
 0x1ef   :  { %v1344_v23 = vpop.permute.xlu0 %1343  ;;  %v1346_v20 = vpop.permute.xlu1 %1345 }
 0x1f0   :  { %1510 = vst.msk [vmem:[#allocation3 + $0xd0] sm:$0xff] %vm1483_vm4, %v1344_v23  ;;  %1511 = vst.msk [vmem:[#allocation3 + $0xd8] sm:$0xff] %vm1483_vm4, %v1346_v20 }
 0x1f1   :  { %1716 = vrot.lane.b32.xlu0 %v1568_v17, %s9895_s19  ;;  %1718 = vrot.lane.b32.xlu1 %v1569_v15, %s9895_s19  ;;  %v1599_v17 = vld [vmem:[#allocation2 + $0x2a9] sm:$0xff]  ;;  %v1600_v15 = vld [vmem:[#allocation2 + $0x2b9] sm:$0xff] }
 0x1f3   :  { %v1348_v18 = vpop.permute.xlu0 %1347  ;;  %v1350_v16 = vpop.permute.xlu1 %1349 }
 0x1f4   :  { %1512 = vst.msk [vmem:[#allocation3 + $0xe0] sm:$0xff] %vm1483_vm4, %v1348_v18  ;;  %1513 = vst.msk [vmem:[#allocation3 + $0xe8] sm:$0xff] %vm1483_vm4, %v1350_v16 }
 0x1f5   :  { %1720 = vrot.lane.b32.xlu0 %v1570_v13, %s9895_s19  ;;  %1722 = vrot.lane.b32.xlu1 %v1571_v11, %s9895_s19  ;;  %v1601_v13 = vld [vmem:[#allocation2 + $0x2c1] sm:$0xff]  ;;  %v1602_v11 = vld [vmem:[#allocation2 + $0x2d1] sm:$0xff] }
 0x1f7   :  { %v1352_v14 = vpop.permute.xlu0 %1351  ;;  %v1354_v12 = vpop.permute.xlu1 %1353 }
 0x1f8   :  { %1514 = vst.msk [vmem:[#allocation3 + $0xf0] sm:$0xff] %vm1483_vm4, %v1352_v14  ;;  %1515 = vst.msk [vmem:[#allocation3 + $0xf8] sm:$0xff] %vm1483_vm4, %v1354_v12 }
 0x1f9   :  { %1724 = vrot.lane.b32.xlu0 %v1572_v9, %s9895_s19  ;;  %1726 = vrot.lane.b32.xlu1 %v1573_v3, %s9895_s19  ;;  %v1603_v9 = vld [vmem:[#allocation2 + $0x2d9] sm:$0xff]  ;;  %v1604_v3 = vld [vmem:[#allocation2 + $0x2e9] sm:$0xff] }
 0x1fb   :  { %v1356_v2 = vpop.permute.xlu0 %1355  ;;  %v1358_v10 = vpop.permute.xlu1 %1357 }
 0x1fc   :  { %1516 = vst.msk [vmem:[#allocation3 + $0x100] sm:$0xff] %vm1483_vm4, %v1356_v2  ;;  %1517 = vst.msk [vmem:[#allocation3 + $0x108] sm:$0xff] %vm1483_vm4, %v1358_v10 }
 0x1fd   :  { %1728 = vrot.lane.b32.xlu0 %v1574_v7, %s9895_s19  ;;  %1730 = vrot.lane.b32.xlu1 %v1575_v36, %s9895_s19  ;;  %v1605_v7 = vld [vmem:[#allocation2 + $0x2f1] sm:$0xff]  ;;  %v1606_v36 = vld [vmem:[#allocation2 + $0x301] sm:$0xff] }
 0x1ff   :  { %v1360_v60 = vpop.permute.xlu0 %1359  ;;  %v1362_v55 = vpop.permute.xlu1 %1361 }
 0x200   :  { %1518 = vst.msk [vmem:[#allocation3 + $0x110] sm:$0xff] %vm1483_vm4, %v1360_v60  ;;  %1519 = vst.msk [vmem:[#allocation3 + $0x118] sm:$0xff] %vm1483_vm4, %v1362_v55 }
 0x201   :  { %1732 = vrot.lane.b32.xlu0 %v1576_v40, %s9895_s19  ;;  %1734 = vrot.lane.b32.xlu1 %v1577_v44, %s9895_s19  ;;  %v1607_v40 = vld [vmem:[#allocation2 + $0x309] sm:$0xff]  ;;  %v1608_v44 = vld [vmem:[#allocation2 + $0x319] sm:$0xff] }
 0x203   :  { %v1364_v61 = vpop.permute.xlu0 %1363  ;;  %v1366_v59 = vpop.permute.xlu1 %1365 }
 0x204   :  { %1520 = vst.msk [vmem:[#allocation3 + $0x120] sm:$0xff] %vm1483_vm4, %v1364_v61  ;;  %1521 = vst.msk [vmem:[#allocation3 + $0x128] sm:$0xff] %vm1483_vm4, %v1366_v59 }
 0x205   :  { %1736 = vrot.lane.b32.xlu0 %v1578_v29, %s9895_s19  ;;  %1738 = vrot.lane.b32.xlu1 %v1579_v25, %s9895_s19  ;;  %v1609_v29 = vld [vmem:[#allocation2 + $0x321] sm:$0xff]  ;;  %v1610_v25 = vld [vmem:[#allocation2 + $0x331] sm:$0xff] }
 0x207   :  { %v1368_v56 = vpop.permute.xlu0 %1367  ;;  %v1370_v27 = vpop.permute.xlu1 %1369 }
 0x208   :  { %1522 = vst.msk [vmem:[#allocation3 + $0x130] sm:$0xff] %vm1483_vm4, %v1368_v56  ;;  %1523 = vst.msk [vmem:[#allocation3 + $0x138] sm:$0xff] %vm1483_vm4, %v1370_v27 }
 0x209   :  { %1740 = vrot.lane.b32.xlu0 %v1580_v28, %s9895_s19  ;;  %1742 = vrot.lane.b32.xlu1 %v1581_v22, %s9895_s19  ;;  %v1611_v28 = vld [vmem:[#allocation2 + $0x339] sm:$0xff] }
 0x20a   :  { %v1933_v22 = vld [vmem:[#allocation2 + $0x1a] sm:$0xff] }
 0x20b   :  { %v1372_v26 = vpop.permute.xlu0 %1371  ;;  %v1374_v38 = vpop.permute.xlu1 %1373 }
 0x20c   :  { %1524 = vst.msk [vmem:[#allocation3 + $0x140] sm:$0xff] %vm1483_vm4, %v1372_v26  ;;  %1525 = vst.msk [vmem:[#allocation3 + $0x148] sm:$0xff] %vm1483_vm4, %v1374_v38 }
 0x20d   :  { %1744 = vrot.lane.b32.xlu0 %v1582_v63, %s9895_s19  ;;  %1746 = vrot.lane.b32.xlu1 %v1583_v58, %s9895_s19  ;;  %v1934_v63 = vld [vmem:[#allocation2 + $0x22] sm:$0xff]  ;;  %v1935_v58 = vld [vmem:[#allocation2 + $0x32] sm:$0xff] }
 0x20f   :  { %v1376_v24 = vpop.permute.xlu0 %1375  ;;  %v1378_v54 = vpop.permute.xlu1 %1377 }
 0x210   :  { %1526 = vst.msk [vmem:[#allocation3 + $0x150] sm:$0xff] %vm1483_vm4, %v1376_v24  ;;  %1527 = vst.msk [vmem:[#allocation3 + $0x158] sm:$0xff] %vm1483_vm4, %v1378_v54 }
 0x211   :  { %1748 = vrot.lane.b32.xlu0 %v1584_v57, %s9895_s19  ;;  %1750 = vrot.lane.b32.xlu1 %v1585_v52, %s9895_s19  ;;  %v1936_v57 = vld [vmem:[#allocation2 + $0x3a] sm:$0xff]  ;;  %v1937_v52 = vld [vmem:[#allocation2 + $0x4a] sm:$0xff] }
 0x213   :  { %v1380_v0 = vpop.permute.xlu0 %1379  ;;  %v1382_v62 = vpop.permute.xlu1 %1381 }
 0x214   :  { %1528 = vst.msk [vmem:[#allocation3 + $0x160] sm:$0xff] %vm1483_vm4, %v1380_v0  ;;  %1529 = vst.msk [vmem:[#allocation3 + $0x168] sm:$0xff] %vm1483_vm4, %v1382_v62 }
 0x215   :  { %1752 = vrot.lane.b32.xlu0 %v1586_v50, %s9895_s19  ;;  %1754 = vrot.lane.b32.xlu1 %v1587_v49, %s9895_s19  ;;  %v1938_v50 = vld [vmem:[#allocation2 + $0x52] sm:$0xff]  ;;  %v1939_v49 = vld [vmem:[#allocation2 + $0x62] sm:$0xff] }
 0x217   :  { %v1384_v48 = vpop.permute.xlu0 %1383  ;;  %v1386_v53 = vpop.permute.xlu1 %1385 }
 0x218   :  { %1530 = vst.msk [vmem:[#allocation3 + $0x170] sm:$0xff] %vm1483_vm4, %v1384_v48  ;;  %1531 = vst.msk [vmem:[#allocation3 + $0x178] sm:$0xff] %vm1483_vm4, %v1386_v53 }
 0x219   :  { %1756 = vrot.lane.b32.xlu0 %v1588_v46, %s9895_s19  ;;  %1758 = vrot.lane.b32.xlu1 %v1589_v4, %s9895_s19  ;;  %v1940_v46 = vld [vmem:[#allocation2 + $0x6a] sm:$0xff]  ;;  %v1941_v4 = vld [vmem:[#allocation2 + $0x7a] sm:$0xff] }
 0x21b   :  { %v1388_v5 = vpop.permute.xlu0 %1387  ;;  %v1390_v51 = vpop.permute.xlu1 %1389 }
 0x21c   :  { %1532 = vst.msk [vmem:[#allocation3 + $0x180] sm:$0xff] %vm1483_vm4, %v1388_v5  ;;  %1533 = vst.msk [vmem:[#allocation3 + $0x188] sm:$0xff] %vm1483_vm4, %v1390_v51 }
 0x21d   :  { %1760 = vrot.lane.b32.xlu0 %v1590_v43, %s9895_s19  ;;  %1762 = vrot.lane.b32.xlu1 %v1591_v42, %s9895_s19  ;;  %v1942_v43 = vld [vmem:[#allocation2 + $0x82] sm:$0xff]  ;;  %v1943_v42 = vld [vmem:[#allocation2 + $0x92] sm:$0xff] }
 0x21f   :  { %v1392_v8 = vpop.permute.xlu0 %1391  ;;  %v1394_v35 = vpop.permute.xlu1 %1393 }
 0x220   :  { %1534 = vst.msk [vmem:[#allocation3 + $0x190] sm:$0xff] %vm1483_vm4, %v1392_v8  ;;  %1535 = vst.msk [vmem:[#allocation3 + $0x198] sm:$0xff] %vm1483_vm4, %v1394_v35 }
 0x221   :  { %1764 = vrot.lane.b32.xlu0 %v1592_v1, %s9895_s19  ;;  %1766 = vrot.lane.b32.xlu1 %v1593_v34, %s9895_s19  ;;  %v1944_v1 = vld [vmem:[#allocation2 + $0x9a] sm:$0xff]  ;;  %v1945_v34 = vld [vmem:[#allocation2 + $0xaa] sm:$0xff] }
 0x223   :  { %v1396_v37 = vpop.permute.xlu0 %1395  ;;  %v1398_v39 = vpop.permute.xlu1 %1397 }
 0x224   :  { %1536 = vst.msk [vmem:[#allocation3 + $0x1a0] sm:$0xff] %vm1483_vm4, %v1396_v37  ;;  %1537 = vst.msk [vmem:[#allocation3 + $0x1a8] sm:$0xff] %vm1483_vm4, %v1398_v39 }
 0x225   :  { %1768 = vrot.lane.b32.xlu0 %v1594_v41, %s9895_s19  ;;  %1770 = vrot.lane.b32.xlu1 %v1595_v32, %s9895_s19  ;;  %v1946_v41 = vld [vmem:[#allocation2 + $0xb2] sm:$0xff]  ;;  %v1947_v32 = vld [vmem:[#allocation2 + $0xc2] sm:$0xff] }
 0x227   :  { %v1400_v45 = vpop.permute.xlu0 %1399  ;;  %v1402_v33 = vpop.permute.xlu1 %1401 }
 0x228   :  { %1538 = vst.msk [vmem:[#allocation3 + $0x1b0] sm:$0xff] %vm1483_vm4, %v1400_v45  ;;  %1539 = vst.msk [vmem:[#allocation3 + $0x1b8] sm:$0xff] %vm1483_vm4, %v1402_v33 }
 0x229   :  { %1772 = vrot.lane.b32.xlu0 %v1596_v30, %s9895_s19  ;;  %1774 = vrot.lane.b32.xlu1 %v1597_v21, %s9895_s19  ;;  %v1948_v30 = vld [vmem:[#allocation2 + $0xca] sm:$0xff]  ;;  %v1949_v21 = vld [vmem:[#allocation2 + $0xda] sm:$0xff] }
 0x22b   :  { %v1404_v31 = vpop.permute.xlu0 %1403  ;;  %v1406_v23 = vpop.permute.xlu1 %1405 }
 0x22c   :  { %1540 = vst.msk [vmem:[#allocation3 + $0x1c0] sm:$0xff] %vm1483_vm4, %v1404_v31  ;;  %1541 = vst.msk [vmem:[#allocation3 + $0x1c8] sm:$0xff] %vm1483_vm4, %v1406_v23 }
 0x22d   :  { %1776 = vrot.lane.b32.xlu0 %v1598_v19, %s9895_s19  ;;  %1778 = vrot.lane.b32.xlu1 %v1599_v17, %s9895_s19  ;;  %v1950_v19 = vld [vmem:[#allocation2 + $0xe2] sm:$0xff]  ;;  %v1951_v17 = vld [vmem:[#allocation2 + $0xf2] sm:$0xff] }
 0x22f   :  { %v1408_v20 = vpop.permute.xlu0 %1407  ;;  %v1410_v18 = vpop.permute.xlu1 %1409 }
 0x230   :  { %1542 = vst.msk [vmem:[#allocation3 + $0x1d0] sm:$0xff] %vm1483_vm4, %v1408_v20  ;;  %1543 = vst.msk [vmem:[#allocation3 + $0x1d8] sm:$0xff] %vm1483_vm4, %v1410_v18 }
 0x231   :  { %1780 = vrot.lane.b32.xlu0 %v1600_v15, %s9895_s19  ;;  %1782 = vrot.lane.b32.xlu1 %v1601_v13, %s9895_s19  ;;  %v1952_v15 = vld [vmem:[#allocation2 + $0xfa] sm:$0xff]  ;;  %v1953_v13 = vld [vmem:[#allocation2 + $0x10a] sm:$0xff] }
 0x233   :  { %v1412_v16 = vpop.permute.xlu0 %1411  ;;  %v1414_v14 = vpop.permute.xlu1 %1413 }
 0x234   :  { %1544 = vst.msk [vmem:[#allocation3 + $0x1e0] sm:$0xff] %vm1483_vm4, %v1412_v16  ;;  %1545 = vst.msk [vmem:[#allocation3 + $0x1e8] sm:$0xff] %vm1483_vm4, %v1414_v14 }
 0x235   :  { %1784 = vrot.lane.b32.xlu0 %v1602_v11, %s9895_s19  ;;  %1786 = vrot.lane.b32.xlu1 %v1603_v9, %s9895_s19  ;;  %v1954_v11 = vld [vmem:[#allocation2 + $0x112] sm:$0xff]  ;;  %v1955_v9 = vld [vmem:[#allocation2 + $0x122] sm:$0xff] }
 0x237   :  { %v1416_v12 = vpop.permute.xlu0 %1415  ;;  %v1418_v2 = vpop.permute.xlu1 %1417 }
 0x238   :  { %1546 = vst.msk [vmem:[#allocation3 + $0x1f0] sm:$0xff] %vm1483_vm4, %v1416_v12  ;;  %1547 = vst.msk [vmem:[#allocation3 + $0x1f8] sm:$0xff] %vm1483_vm4, %v1418_v2 }
 0x239   :  { %1788 = vrot.lane.b32.xlu0 %v1604_v3, %s9895_s19  ;;  %1790 = vrot.lane.b32.xlu1 %v1605_v7, %s9895_s19  ;;  %v1956_v3 = vld [vmem:[#allocation2 + $0x12a] sm:$0xff]  ;;  %v1957_v7 = vld [vmem:[#allocation2 + $0x13a] sm:$0xff] }
 0x23b   :  { %v1677_v10 = vpop.permute.xlu0 %1676  ;;  %v1679_v60 = vpop.permute.xlu1 %1678 }
 0x23c   :  { %1869 = vst.msk [vmem:[#allocation3] sm:$0xff] %vm1868_vm5, %v1677_v10  ;;  %1870 = vst.msk [vmem:[#allocation3 + $0x8] sm:$0xff] %vm1868_vm5, %v1679_v60 }
 0x23d   :  { %1792 = vrot.lane.b32.xlu0 %v1606_v36, %s9895_s19  ;;  %1794 = vrot.lane.b32.xlu1 %v1607_v40, %s9895_s19  ;;  %v1958_v36 = vld [vmem:[#allocation2 + $0x142] sm:$0xff]  ;;  %v1959_v40 = vld [vmem:[#allocation2 + $0x152] sm:$0xff] }
 0x23f   :  { %v1681_v55 = vpop.permute.xlu0 %1680  ;;  %v1683_v61 = vpop.permute.xlu1 %1682 }
 0x240   :  { %1871 = vst.msk [vmem:[#allocation3 + $0x10] sm:$0xff] %vm1868_vm5, %v1681_v55  ;;  %1872 = vst.msk [vmem:[#allocation3 + $0x18] sm:$0xff] %vm1868_vm5, %v1683_v61 }
 0x241   :  { %1796 = vrot.lane.b32.xlu0 %v1608_v44, %s9895_s19  ;;  %1798 = vrot.lane.b32.xlu1 %v1609_v29, %s9895_s19  ;;  %v1960_v44 = vld [vmem:[#allocation2 + $0x15a] sm:$0xff]  ;;  %v1961_v29 = vld [vmem:[#allocation2 + $0x16a] sm:$0xff] }
 0x243   :  { %v1685_v59 = vpop.permute.xlu0 %1684  ;;  %v1687_v56 = vpop.permute.xlu1 %1686 }
 0x244   :  { %1873 = vst.msk [vmem:[#allocation3 + $0x20] sm:$0xff] %vm1868_vm5, %v1685_v59  ;;  %1874 = vst.msk [vmem:[#allocation3 + $0x28] sm:$0xff] %vm1868_vm5, %v1687_v56 }
 0x245   :  { %1800 = vrot.lane.b32.xlu0 %v1610_v25, %s9895_s19  ;;  %1802 = vrot.lane.b32.xlu1 %v1611_v28, %s9895_s19  ;;  %v1962_v25 = vld [vmem:[#allocation2 + $0x172] sm:$0xff]  ;;  %v1963_v28 = vld [vmem:[#allocation2 + $0x182] sm:$0xff] }
 0x247   :  { %v1689_v27 = vpop.permute.xlu0 %1688  ;;  %v1691_v26 = vpop.permute.xlu1 %1690 }
 0x248   :  { %1875 = vst.msk [vmem:[#allocation3 + $0x30] sm:$0xff] %vm1868_vm5, %v1689_v27  ;;  %1876 = vst.msk [vmem:[#allocation3 + $0x38] sm:$0xff] %vm1868_vm5, %v1691_v26 }
 0x249   :  { %2061 = vrot.lane.b32.xlu0 %v1933_v22, %s9896_s20  ;;  %2063 = vrot.lane.b32.xlu1 %v1934_v63, %s9896_s20  ;;  %v1964_v22 = vld [vmem:[#allocation2 + $0x18a] sm:$0xff] }
 0x24a   :  { %v1965_v63 = vld [vmem:[#allocation2 + $0x1ca] sm:$0xff] }
 0x24b   :  { %v1693_v38 = vpop.permute.xlu0 %1692  ;;  %v1695_v24 = vpop.permute.xlu1 %1694 }
 0x24c   :  { %1877 = vst.msk [vmem:[#allocation3 + $0x40] sm:$0xff] %vm1868_vm5, %v1693_v38  ;;  %1878 = vst.msk [vmem:[#allocation3 + $0x48] sm:$0xff] %vm1868_vm5, %v1695_v24 }
 0x24d   :  { %2065 = vrot.lane.b32.xlu0 %v1935_v58, %s9896_s20  ;;  %2067 = vrot.lane.b32.xlu1 %v1936_v57, %s9896_s20  ;;  %v1966_v58 = vld [vmem:[#allocation2 + $0x1d2] sm:$0xff]  ;;  %v1967_v57 = vld [vmem:[#allocation2 + $0x1e2] sm:$0xff] }
 0x24f   :  { %v1697_v54 = vpop.permute.xlu0 %1696  ;;  %v1699_v0 = vpop.permute.xlu1 %1698 }
 0x250   :  { %1879 = vst.msk [vmem:[#allocation3 + $0x50] sm:$0xff] %vm1868_vm5, %v1697_v54  ;;  %1880 = vst.msk [vmem:[#allocation3 + $0x58] sm:$0xff] %vm1868_vm5, %v1699_v0 }
 0x251   :  { %2069 = vrot.lane.b32.xlu0 %v1937_v52, %s9896_s20  ;;  %2071 = vrot.lane.b32.xlu1 %v1938_v50, %s9896_s20  ;;  %v1968_v52 = vld [vmem:[#allocation2 + $0x1ea] sm:$0xff]  ;;  %v1969_v50 = vld [vmem:[#allocation2 + $0x1fa] sm:$0xff] }
 0x253   :  { %v1701_v62 = vpop.permute.xlu0 %1700  ;;  %v1703_v48 = vpop.permute.xlu1 %1702 }
 0x254   :  { %1881 = vst.msk [vmem:[#allocation3 + $0x60] sm:$0xff] %vm1868_vm5, %v1701_v62  ;;  %1882 = vst.msk [vmem:[#allocation3 + $0x68] sm:$0xff] %vm1868_vm5, %v1703_v48 }
 0x255   :  { %2073 = vrot.lane.b32.xlu0 %v1939_v49, %s9896_s20  ;;  %2075 = vrot.lane.b32.xlu1 %v1940_v46, %s9896_s20  ;;  %v1970_v49 = vld [vmem:[#allocation2 + $0x202] sm:$0xff]  ;;  %v1971_v46 = vld [vmem:[#allocation2 + $0x212] sm:$0xff] }
 0x257   :  { %v1705_v53 = vpop.permute.xlu0 %1704  ;;  %v1707_v5 = vpop.permute.xlu1 %1706 }
 0x258   :  { %1883 = vst.msk [vmem:[#allocation3 + $0x70] sm:$0xff] %vm1868_vm5, %v1705_v53  ;;  %1884 = vst.msk [vmem:[#allocation3 + $0x78] sm:$0xff] %vm1868_vm5, %v1707_v5 }
 0x259   :  { %2077 = vrot.lane.b32.xlu0 %v1941_v4, %s9896_s20  ;;  %2079 = vrot.lane.b32.xlu1 %v1942_v43, %s9896_s20  ;;  %v1972_v4 = vld [vmem:[#allocation2 + $0x21a] sm:$0xff]  ;;  %v1973_v43 = vld [vmem:[#allocation2 + $0x22a] sm:$0xff] }
 0x25b   :  { %v1709_v51 = vpop.permute.xlu0 %1708  ;;  %v1711_v8 = vpop.permute.xlu1 %1710 }
 0x25c   :  { %1885 = vst.msk [vmem:[#allocation3 + $0x80] sm:$0xff] %vm1868_vm5, %v1709_v51  ;;  %1886 = vst.msk [vmem:[#allocation3 + $0x88] sm:$0xff] %vm1868_vm5, %v1711_v8 }
 0x25d   :  { %2081 = vrot.lane.b32.xlu0 %v1943_v42, %s9896_s20  ;;  %2083 = vrot.lane.b32.xlu1 %v1944_v1, %s9896_s20  ;;  %v1974_v42 = vld [vmem:[#allocation2 + $0x232] sm:$0xff]  ;;  %v1975_v1 = vld [vmem:[#allocation2 + $0x242] sm:$0xff] }
 0x25f   :  { %v1713_v35 = vpop.permute.xlu0 %1712  ;;  %v1715_v37 = vpop.permute.xlu1 %1714 }
 0x260   :  { %1887 = vst.msk [vmem:[#allocation3 + $0x90] sm:$0xff] %vm1868_vm5, %v1713_v35  ;;  %1888 = vst.msk [vmem:[#allocation3 + $0x98] sm:$0xff] %vm1868_vm5, %v1715_v37 }
 0x261   :  { %2085 = vrot.lane.b32.xlu0 %v1945_v34, %s9896_s20  ;;  %2087 = vrot.lane.b32.xlu1 %v1946_v41, %s9896_s20  ;;  %v1976_v34 = vld [vmem:[#allocation2 + $0x24a] sm:$0xff]  ;;  %v1977_v41 = vld [vmem:[#allocation2 + $0x25a] sm:$0xff] }
 0x263   :  { %v1717_v39 = vpop.permute.xlu0 %1716  ;;  %v1719_v45 = vpop.permute.xlu1 %1718 }
 0x264   :  { %1889 = vst.msk [vmem:[#allocation3 + $0xa0] sm:$0xff] %vm1868_vm5, %v1717_v39  ;;  %1890 = vst.msk [vmem:[#allocation3 + $0xa8] sm:$0xff] %vm1868_vm5, %v1719_v45 }
 0x265   :  { %2089 = vrot.lane.b32.xlu0 %v1947_v32, %s9896_s20  ;;  %2091 = vrot.lane.b32.xlu1 %v1948_v30, %s9896_s20  ;;  %v1978_v32 = vld [vmem:[#allocation2 + $0x262] sm:$0xff]  ;;  %v1979_v30 = vld [vmem:[#allocation2 + $0x272] sm:$0xff] }
 0x267   :  { %v1721_v33 = vpop.permute.xlu0 %1720  ;;  %v1723_v31 = vpop.permute.xlu1 %1722 }
 0x268   :  { %1891 = vst.msk [vmem:[#allocation3 + $0xb0] sm:$0xff] %vm1868_vm5, %v1721_v33  ;;  %1892 = vst.msk [vmem:[#allocation3 + $0xb8] sm:$0xff] %vm1868_vm5, %v1723_v31 }
 0x269   :  { %2093 = vrot.lane.b32.xlu0 %v1949_v21, %s9896_s20  ;;  %2095 = vrot.lane.b32.xlu1 %v1950_v19, %s9896_s20  ;;  %v1980_v21 = vld [vmem:[#allocation2 + $0x27a] sm:$0xff]  ;;  %v1981_v19 = vld [vmem:[#allocation2 + $0x28a] sm:$0xff] }
 0x26b   :  { %v1725_v23 = vpop.permute.xlu0 %1724  ;;  %v1727_v20 = vpop.permute.xlu1 %1726 }
 0x26c   :  { %1893 = vst.msk [vmem:[#allocation3 + $0xc0] sm:$0xff] %vm1868_vm5, %v1725_v23  ;;  %1894 = vst.msk [vmem:[#allocation3 + $0xc8] sm:$0xff] %vm1868_vm5, %v1727_v20 }
 0x26d   :  { %2097 = vrot.lane.b32.xlu0 %v1951_v17, %s9896_s20  ;;  %2099 = vrot.lane.b32.xlu1 %v1952_v15, %s9896_s20  ;;  %v1982_v17 = vld [vmem:[#allocation2 + $0x292] sm:$0xff]  ;;  %v1983_v15 = vld [vmem:[#allocation2 + $0x2a2] sm:$0xff] }
 0x26f   :  { %v1729_v18 = vpop.permute.xlu0 %1728  ;;  %v1731_v16 = vpop.permute.xlu1 %1730 }
 0x270   :  { %1895 = vst.msk [vmem:[#allocation3 + $0xd0] sm:$0xff] %vm1868_vm5, %v1729_v18  ;;  %1896 = vst.msk [vmem:[#allocation3 + $0xd8] sm:$0xff] %vm1868_vm5, %v1731_v16 }
 0x271   :  { %2101 = vrot.lane.b32.xlu0 %v1953_v13, %s9896_s20  ;;  %2103 = vrot.lane.b32.xlu1 %v1954_v11, %s9896_s20  ;;  %v1984_v13 = vld [vmem:[#allocation2 + $0x2aa] sm:$0xff]  ;;  %v1985_v11 = vld [vmem:[#allocation2 + $0x2ba] sm:$0xff] }
 0x273   :  { %v1733_v14 = vpop.permute.xlu0 %1732  ;;  %v1735_v12 = vpop.permute.xlu1 %1734 }
 0x274   :  { %1897 = vst.msk [vmem:[#allocation3 + $0xe0] sm:$0xff] %vm1868_vm5, %v1733_v14  ;;  %1898 = vst.msk [vmem:[#allocation3 + $0xe8] sm:$0xff] %vm1868_vm5, %v1735_v12 }
 0x275   :  { %2105 = vrot.lane.b32.xlu0 %v1955_v9, %s9896_s20  ;;  %2107 = vrot.lane.b32.xlu1 %v1956_v3, %s9896_s20  ;;  %v1986_v9 = vld [vmem:[#allocation2 + $0x2c2] sm:$0xff]  ;;  %v1987_v3 = vld [vmem:[#allocation2 + $0x2d2] sm:$0xff] }
 0x277   :  { %v1737_v2 = vpop.permute.xlu0 %1736  ;;  %v1739_v10 = vpop.permute.xlu1 %1738 }
 0x278   :  { %1899 = vst.msk [vmem:[#allocation3 + $0xf0] sm:$0xff] %vm1868_vm5, %v1737_v2  ;;  %1900 = vst.msk [vmem:[#allocation3 + $0xf8] sm:$0xff] %vm1868_vm5, %v1739_v10 }
 0x279   :  { %2109 = vrot.lane.b32.xlu0 %v1957_v7, %s9896_s20  ;;  %2111 = vrot.lane.b32.xlu1 %v1958_v36, %s9896_s20  ;;  %v1988_v7 = vld [vmem:[#allocation2 + $0x2da] sm:$0xff]  ;;  %v1989_v36 = vld [vmem:[#allocation2 + $0x2ea] sm:$0xff] }
 0x27b   :  { %v1741_v60 = vpop.permute.xlu0 %1740  ;;  %v1743_v55 = vpop.permute.xlu1 %1742 }
 0x27c   :  { %1901 = vst.msk [vmem:[#allocation3 + $0x100] sm:$0xff] %vm1868_vm5, %v1741_v60  ;;  %1902 = vst.msk [vmem:[#allocation3 + $0x108] sm:$0xff] %vm1868_vm5, %v1743_v55 }
 0x27d   :  { %2113 = vrot.lane.b32.xlu0 %v1959_v40, %s9896_s20  ;;  %2115 = vrot.lane.b32.xlu1 %v1960_v44, %s9896_s20  ;;  %v1990_v40 = vld [vmem:[#allocation2 + $0x2f2] sm:$0xff]  ;;  %v1991_v44 = vld [vmem:[#allocation2 + $0x302] sm:$0xff] }
 0x27f   :  { %v1745_v61 = vpop.permute.xlu0 %1744  ;;  %v1747_v59 = vpop.permute.xlu1 %1746 }
 0x280   :  { %1903 = vst.msk [vmem:[#allocation3 + $0x110] sm:$0xff] %vm1868_vm5, %v1745_v61  ;;  %1904 = vst.msk [vmem:[#allocation3 + $0x118] sm:$0xff] %vm1868_vm5, %v1747_v59 }
 0x281   :  { %2117 = vrot.lane.b32.xlu0 %v1961_v29, %s9896_s20  ;;  %2119 = vrot.lane.b32.xlu1 %v1962_v25, %s9896_s20  ;;  %v1992_v29 = vld [vmem:[#allocation2 + $0x30a] sm:$0xff]  ;;  %v1993_v25 = vld [vmem:[#allocation2 + $0x31a] sm:$0xff] }
 0x283   :  { %v1749_v56 = vpop.permute.xlu0 %1748  ;;  %v1751_v27 = vpop.permute.xlu1 %1750 }
 0x284   :  { %1905 = vst.msk [vmem:[#allocation3 + $0x120] sm:$0xff] %vm1868_vm5, %v1749_v56  ;;  %1906 = vst.msk [vmem:[#allocation3 + $0x128] sm:$0xff] %vm1868_vm5, %v1751_v27 }
 0x285   :  { %2121 = vrot.lane.b32.xlu0 %v1963_v28, %s9896_s20  ;;  %2123 = vrot.lane.b32.xlu1 %v1964_v22, %s9896_s20  ;;  %v1994_v28 = vld [vmem:[#allocation2 + $0x322] sm:$0xff]  ;;  %v1995_v22 = vld [vmem:[#allocation2 + $0x332] sm:$0xff] }
 0x287   :  { %v1753_v26 = vpop.permute.xlu0 %1752  ;;  %v1755_v38 = vpop.permute.xlu1 %1754 }
 0x288   :  { %1907 = vst.msk [vmem:[#allocation3 + $0x130] sm:$0xff] %vm1868_vm5, %v1753_v26  ;;  %1908 = vst.msk [vmem:[#allocation3 + $0x138] sm:$0xff] %vm1868_vm5, %v1755_v38 }
 0x289   :  { %2125 = vrot.lane.b32.xlu0 %v1965_v63, %s9896_s20  ;;  %2127 = vrot.lane.b32.xlu1 %v1966_v58, %s9896_s20  ;;  %v1996_v63 = vld [vmem:[#allocation2 + $0x33a] sm:$0xff]  ;;  %v2319_v58 = vld [vmem:[#allocation2 + $0x30] sm:$0xff] }
 0x28b   :  { %v1757_v24 = vpop.permute.xlu0 %1756  ;;  %v1759_v54 = vpop.permute.xlu1 %1758 }
 0x28c   :  { %1909 = vst.msk [vmem:[#allocation3 + $0x140] sm:$0xff] %vm1868_vm5, %v1757_v24  ;;  %1910 = vst.msk [vmem:[#allocation3 + $0x148] sm:$0xff] %vm1868_vm5, %v1759_v54 }
 0x28d   :  { %2129 = vrot.lane.b32.xlu0 %v1967_v57, %s9896_s20  ;;  %2131 = vrot.lane.b32.xlu1 %v1968_v52, %s9896_s20  ;;  %v2320_v57 = vld [vmem:[#allocation2 + $0x38] sm:$0xff]  ;;  %v2321_v52 = vld [vmem:[#allocation2 + $0x48] sm:$0xff] }
 0x28f   :  { %v1761_v0 = vpop.permute.xlu0 %1760  ;;  %v1763_v62 = vpop.permute.xlu1 %1762 }
 0x290   :  { %1911 = vst.msk [vmem:[#allocation3 + $0x150] sm:$0xff] %vm1868_vm5, %v1761_v0  ;;  %1912 = vst.msk [vmem:[#allocation3 + $0x158] sm:$0xff] %vm1868_vm5, %v1763_v62 }
 0x291   :  { %2133 = vrot.lane.b32.xlu0 %v1969_v50, %s9896_s20  ;;  %2135 = vrot.lane.b32.xlu1 %v1970_v49, %s9896_s20  ;;  %v2322_v50 = vld [vmem:[#allocation2 + $0x50] sm:$0xff]  ;;  %v2323_v49 = vld [vmem:[#allocation2 + $0x60] sm:$0xff] }
 0x293   :  { %v1765_v48 = vpop.permute.xlu0 %1764  ;;  %v1767_v53 = vpop.permute.xlu1 %1766 }
 0x294   :  { %1913 = vst.msk [vmem:[#allocation3 + $0x160] sm:$0xff] %vm1868_vm5, %v1765_v48  ;;  %1914 = vst.msk [vmem:[#allocation3 + $0x168] sm:$0xff] %vm1868_vm5, %v1767_v53 }
 0x295   :  { %2137 = vrot.lane.b32.xlu0 %v1971_v46, %s9896_s20  ;;  %2139 = vrot.lane.b32.xlu1 %v1972_v4, %s9896_s20  ;;  %v2324_v46 = vld [vmem:[#allocation2 + $0x68] sm:$0xff]  ;;  %v2325_v4 = vld [vmem:[#allocation2 + $0x78] sm:$0xff] }
 0x297   :  { %v1769_v5 = vpop.permute.xlu0 %1768  ;;  %v1771_v51 = vpop.permute.xlu1 %1770 }
 0x298   :  { %1915 = vst.msk [vmem:[#allocation3 + $0x170] sm:$0xff] %vm1868_vm5, %v1769_v5  ;;  %1916 = vst.msk [vmem:[#allocation3 + $0x178] sm:$0xff] %vm1868_vm5, %v1771_v51 }
 0x299   :  { %2141 = vrot.lane.b32.xlu0 %v1973_v43, %s9896_s20  ;;  %2143 = vrot.lane.b32.xlu1 %v1974_v42, %s9896_s20  ;;  %v2326_v43 = vld [vmem:[#allocation2 + $0x80] sm:$0xff]  ;;  %v2327_v42 = vld [vmem:[#allocation2 + $0x90] sm:$0xff] }
 0x29b   :  { %v1773_v8 = vpop.permute.xlu0 %1772  ;;  %v1775_v35 = vpop.permute.xlu1 %1774 }
 0x29c   :  { %1917 = vst.msk [vmem:[#allocation3 + $0x180] sm:$0xff] %vm1868_vm5, %v1773_v8  ;;  %1918 = vst.msk [vmem:[#allocation3 + $0x188] sm:$0xff] %vm1868_vm5, %v1775_v35 }
 0x29d   :  { %2145 = vrot.lane.b32.xlu0 %v1975_v1, %s9896_s20  ;;  %2147 = vrot.lane.b32.xlu1 %v1976_v34, %s9896_s20  ;;  %v2328_v1 = vld [vmem:[#allocation2 + $0x98] sm:$0xff]  ;;  %v2329_v34 = vld [vmem:[#allocation2 + $0xa8] sm:$0xff] }
 0x29f   :  { %v1777_v37 = vpop.permute.xlu0 %1776  ;;  %v1779_v39 = vpop.permute.xlu1 %1778 }
 0x2a0   :  { %1919 = vst.msk [vmem:[#allocation3 + $0x190] sm:$0xff] %vm1868_vm5, %v1777_v37  ;;  %1920 = vst.msk [vmem:[#allocation3 + $0x198] sm:$0xff] %vm1868_vm5, %v1779_v39 }
 0x2a1   :  { %2149 = vrot.lane.b32.xlu0 %v1977_v41, %s9896_s20  ;;  %2151 = vrot.lane.b32.xlu1 %v1978_v32, %s9896_s20  ;;  %v2330_v41 = vld [vmem:[#allocation2 + $0xb0] sm:$0xff]  ;;  %v2331_v32 = vld [vmem:[#allocation2 + $0xc0] sm:$0xff] }
 0x2a3   :  { %v1781_v45 = vpop.permute.xlu0 %1780  ;;  %v1783_v33 = vpop.permute.xlu1 %1782 }
 0x2a4   :  { %1921 = vst.msk [vmem:[#allocation3 + $0x1a0] sm:$0xff] %vm1868_vm5, %v1781_v45  ;;  %1922 = vst.msk [vmem:[#allocation3 + $0x1a8] sm:$0xff] %vm1868_vm5, %v1783_v33 }
 0x2a5   :  { %2153 = vrot.lane.b32.xlu0 %v1979_v30, %s9896_s20  ;;  %2155 = vrot.lane.b32.xlu1 %v1980_v21, %s9896_s20  ;;  %v2332_v30 = vld [vmem:[#allocation2 + $0xc8] sm:$0xff]  ;;  %v2333_v21 = vld [vmem:[#allocation2 + $0xd8] sm:$0xff] }
 0x2a7   :  { %v1785_v31 = vpop.permute.xlu0 %1784  ;;  %v1787_v23 = vpop.permute.xlu1 %1786 }
 0x2a8   :  { %1923 = vst.msk [vmem:[#allocation3 + $0x1b0] sm:$0xff] %vm1868_vm5, %v1785_v31  ;;  %1924 = vst.msk [vmem:[#allocation3 + $0x1b8] sm:$0xff] %vm1868_vm5, %v1787_v23 }
 0x2a9   :  { %2157 = vrot.lane.b32.xlu0 %v1981_v19, %s9896_s20  ;;  %2159 = vrot.lane.b32.xlu1 %v1982_v17, %s9896_s20  ;;  %v2334_v19 = vld [vmem:[#allocation2 + $0xe0] sm:$0xff]  ;;  %v2335_v17 = vld [vmem:[#allocation2 + $0xf0] sm:$0xff] }
 0x2ab   :  { %v1789_v20 = vpop.permute.xlu0 %1788  ;;  %v1791_v18 = vpop.permute.xlu1 %1790 }
 0x2ac   :  { %1925 = vst.msk [vmem:[#allocation3 + $0x1c0] sm:$0xff] %vm1868_vm5, %v1789_v20  ;;  %1926 = vst.msk [vmem:[#allocation3 + $0x1c8] sm:$0xff] %vm1868_vm5, %v1791_v18 }
 0x2ad   :  { %2161 = vrot.lane.b32.xlu0 %v1983_v15, %s9896_s20  ;;  %2163 = vrot.lane.b32.xlu1 %v1984_v13, %s9896_s20  ;;  %v2336_v15 = vld [vmem:[#allocation2 + $0xf8] sm:$0xff]  ;;  %v2337_v13 = vld [vmem:[#allocation2 + $0x108] sm:$0xff] }
 0x2af   :  { %v1793_v16 = vpop.permute.xlu0 %1792  ;;  %v1795_v14 = vpop.permute.xlu1 %1794 }
 0x2b0   :  { %1927 = vst.msk [vmem:[#allocation3 + $0x1d0] sm:$0xff] %vm1868_vm5, %v1793_v16  ;;  %1928 = vst.msk [vmem:[#allocation3 + $0x1d8] sm:$0xff] %vm1868_vm5, %v1795_v14 }
 0x2b1   :  { %2165 = vrot.lane.b32.xlu0 %v1985_v11, %s9896_s20  ;;  %2167 = vrot.lane.b32.xlu1 %v1986_v9, %s9896_s20  ;;  %v2338_v11 = vld [vmem:[#allocation2 + $0x110] sm:$0xff]  ;;  %v2339_v9 = vld [vmem:[#allocation2 + $0x120] sm:$0xff] }
 0x2b3   :  { %v1797_v12 = vpop.permute.xlu0 %1796  ;;  %v1799_v2 = vpop.permute.xlu1 %1798 }
 0x2b4   :  { %1929 = vst.msk [vmem:[#allocation3 + $0x1e0] sm:$0xff] %vm1868_vm5, %v1797_v12  ;;  %1930 = vst.msk [vmem:[#allocation3 + $0x1e8] sm:$0xff] %vm1868_vm5, %v1799_v2 }
 0x2b5   :  { %2169 = vrot.lane.b32.xlu0 %v1987_v3, %s9896_s20  ;;  %2171 = vrot.lane.b32.xlu1 %v1988_v7, %s9896_s20  ;;  %v2340_v3 = vld [vmem:[#allocation2 + $0x128] sm:$0xff]  ;;  %v2341_v7 = vld [vmem:[#allocation2 + $0x138] sm:$0xff] }
 0x2b7   :  { %v1801_v10 = vpop.permute.xlu0 %1800  ;;  %v1803_v60 = vpop.permute.xlu1 %1802 }
 0x2b8   :  { %1931 = vst.msk [vmem:[#allocation3 + $0x1f0] sm:$0xff] %vm1868_vm5, %v1801_v10  ;;  %1932 = vst.msk [vmem:[#allocation3 + $0x1f8] sm:$0xff] %vm1868_vm5, %v1803_v60 }
 0x2b9   :  { %2173 = vrot.lane.b32.xlu0 %v1989_v36, %s9896_s20  ;;  %2175 = vrot.lane.b32.xlu1 %v1990_v40, %s9896_s20  ;;  %v2342_v36 = vld [vmem:[#allocation2 + $0x140] sm:$0xff]  ;;  %v2343_v40 = vld [vmem:[#allocation2 + $0x150] sm:$0xff] }
 0x2bb   :  { %v2062_v55 = vpop.permute.xlu0 %2061  ;;  %v2064_v61 = vpop.permute.xlu1 %2063 }
 0x2bc   :  { %2254 = vst.msk [vmem:[#allocation3] sm:$0xff] %vm2253_vm6, %v2062_v55  ;;  %2255 = vst.msk [vmem:[#allocation3 + $0x8] sm:$0xff] %vm2253_vm6, %v2064_v61 }
 0x2bd   :  { %2177 = vrot.lane.b32.xlu0 %v1991_v44, %s9896_s20  ;;  %2179 = vrot.lane.b32.xlu1 %v1992_v29, %s9896_s20  ;;  %v2344_v44 = vld [vmem:[#allocation2 + $0x158] sm:$0xff]  ;;  %v2345_v29 = vld [vmem:[#allocation2 + $0x168] sm:$0xff] }
 0x2bf   :  { %v2066_v59 = vpop.permute.xlu0 %2065  ;;  %v2068_v56 = vpop.permute.xlu1 %2067 }
 0x2c0   :  { %2256 = vst.msk [vmem:[#allocation3 + $0x10] sm:$0xff] %vm2253_vm6, %v2066_v59  ;;  %2257 = vst.msk [vmem:[#allocation3 + $0x18] sm:$0xff] %vm2253_vm6, %v2068_v56 }
 0x2c1   :  { %2181 = vrot.lane.b32.xlu0 %v1993_v25, %s9896_s20  ;;  %2183 = vrot.lane.b32.xlu1 %v1994_v28, %s9896_s20  ;;  %v2346_v25 = vld [vmem:[#allocation2 + $0x170] sm:$0xff]  ;;  %v2347_v28 = vld [vmem:[#allocation2 + $0x180] sm:$0xff] }
 0x2c3   :  { %v2070_v27 = vpop.permute.xlu0 %2069  ;;  %v2072_v26 = vpop.permute.xlu1 %2071 }
 0x2c4   :  { %2258 = vst.msk [vmem:[#allocation3 + $0x20] sm:$0xff] %vm2253_vm6, %v2070_v27  ;;  %2259 = vst.msk [vmem:[#allocation3 + $0x28] sm:$0xff] %vm2253_vm6, %v2072_v26 }
 0x2c5   :  { %2185 = vrot.lane.b32.xlu0 %v1995_v22, %s9896_s20  ;;  %2187 = vrot.lane.b32.xlu1 %v1996_v63, %s9896_s20  ;;  %v2348_v22 = vld [vmem:[#allocation2 + $0x188] sm:$0xff]  ;;  %v2349_v63 = vld [vmem:[#allocation2 + $0x198] sm:$0xff] }
 0x2c7   :  { %v2074_v38 = vpop.permute.xlu0 %2073  ;;  %v2076_v24 = vpop.permute.xlu1 %2075 }
 0x2c8   :  { %2260 = vst.msk [vmem:[#allocation3 + $0x30] sm:$0xff] %vm2253_vm6, %v2074_v38  ;;  %2261 = vst.msk [vmem:[#allocation3 + $0x38] sm:$0xff] %vm2253_vm6, %v2076_v24 }
 0x2c9   :  { %2447 = vrot.lane.b32.xlu0 %v2319_v58, %s9897_s21  ;;  %2449 = vrot.lane.b32.xlu1 %v2320_v57, %s9897_s21  ;;  %v2350_v58 = vld [vmem:[#allocation2 + $0x1a0] sm:$0xff] }
 0x2ca   :  { %v2351_v57 = vld [vmem:[#allocation2 + $0x1e0] sm:$0xff] }
 0x2cb   :  { %v2078_v54 = vpop.permute.xlu0 %2077  ;;  %v2080_v0 = vpop.permute.xlu1 %2079 }
 0x2cc   :  { %2262 = vst.msk [vmem:[#allocation3 + $0x40] sm:$0xff] %vm2253_vm6, %v2078_v54  ;;  %2263 = vst.msk [vmem:[#allocation3 + $0x48] sm:$0xff] %vm2253_vm6, %v2080_v0 }
 0x2cd   :  { %2451 = vrot.lane.b32.xlu0 %v2321_v52, %s9897_s21  ;;  %2453 = vrot.lane.b32.xlu1 %v2322_v50, %s9897_s21  ;;  %v2352_v52 = vld [vmem:[#allocation2 + $0x1e8] sm:$0xff]  ;;  %v2353_v50 = vld [vmem:[#allocation2 + $0x1f8] sm:$0xff] }
 0x2cf   :  { %v2082_v62 = vpop.permute.xlu0 %2081  ;;  %v2084_v48 = vpop.permute.xlu1 %2083 }
 0x2d0   :  { %2264 = vst.msk [vmem:[#allocation3 + $0x50] sm:$0xff] %vm2253_vm6, %v2082_v62  ;;  %2265 = vst.msk [vmem:[#allocation3 + $0x58] sm:$0xff] %vm2253_vm6, %v2084_v48 }
 0x2d1   :  { %2455 = vrot.lane.b32.xlu0 %v2323_v49, %s9897_s21  ;;  %2457 = vrot.lane.b32.xlu1 %v2324_v46, %s9897_s21  ;;  %v2354_v49 = vld [vmem:[#allocation2 + $0x200] sm:$0xff]  ;;  %v2355_v46 = vld [vmem:[#allocation2 + $0x210] sm:$0xff] }
 0x2d3   :  { %v2086_v53 = vpop.permute.xlu0 %2085  ;;  %v2088_v5 = vpop.permute.xlu1 %2087 }
 0x2d4   :  { %2266 = vst.msk [vmem:[#allocation3 + $0x60] sm:$0xff] %vm2253_vm6, %v2086_v53  ;;  %2267 = vst.msk [vmem:[#allocation3 + $0x68] sm:$0xff] %vm2253_vm6, %v2088_v5 }
 0x2d5   :  { %2459 = vrot.lane.b32.xlu0 %v2325_v4, %s9897_s21  ;;  %2461 = vrot.lane.b32.xlu1 %v2326_v43, %s9897_s21  ;;  %v2356_v4 = vld [vmem:[#allocation2 + $0x218] sm:$0xff]  ;;  %v2357_v43 = vld [vmem:[#allocation2 + $0x228] sm:$0xff] }
 0x2d7   :  { %v2090_v51 = vpop.permute.xlu0 %2089  ;;  %v2092_v8 = vpop.permute.xlu1 %2091 }
 0x2d8   :  { %2268 = vst.msk [vmem:[#allocation3 + $0x70] sm:$0xff] %vm2253_vm6, %v2090_v51  ;;  %2269 = vst.msk [vmem:[#allocation3 + $0x78] sm:$0xff] %vm2253_vm6, %v2092_v8 }
 0x2d9   :  { %2463 = vrot.lane.b32.xlu0 %v2327_v42, %s9897_s21  ;;  %2465 = vrot.lane.b32.xlu1 %v2328_v1, %s9897_s21  ;;  %v2358_v42 = vld [vmem:[#allocation2 + $0x230] sm:$0xff]  ;;  %v2359_v1 = vld [vmem:[#allocation2 + $0x240] sm:$0xff] }
 0x2db   :  { %v2094_v35 = vpop.permute.xlu0 %2093  ;;  %v2096_v37 = vpop.permute.xlu1 %2095 }
 0x2dc   :  { %2270 = vst.msk [vmem:[#allocation3 + $0x80] sm:$0xff] %vm2253_vm6, %v2094_v35  ;;  %2271 = vst.msk [vmem:[#allocation3 + $0x88] sm:$0xff] %vm2253_vm6, %v2096_v37 }
 0x2dd   :  { %2467 = vrot.lane.b32.xlu0 %v2329_v34, %s9897_s21  ;;  %2469 = vrot.lane.b32.xlu1 %v2330_v41, %s9897_s21  ;;  %v2360_v34 = vld [vmem:[#allocation2 + $0x248] sm:$0xff]  ;;  %v2361_v41 = vld [vmem:[#allocation2 + $0x258] sm:$0xff] }
 0x2df   :  { %v2098_v39 = vpop.permute.xlu0 %2097  ;;  %v2100_v45 = vpop.permute.xlu1 %2099 }
 0x2e0   :  { %2272 = vst.msk [vmem:[#allocation3 + $0x90] sm:$0xff] %vm2253_vm6, %v2098_v39  ;;  %2273 = vst.msk [vmem:[#allocation3 + $0x98] sm:$0xff] %vm2253_vm6, %v2100_v45 }
 0x2e1   :  { %2471 = vrot.lane.b32.xlu0 %v2331_v32, %s9897_s21  ;;  %2473 = vrot.lane.b32.xlu1 %v2332_v30, %s9897_s21  ;;  %v2362_v32 = vld [vmem:[#allocation2 + $0x260] sm:$0xff]  ;;  %v2363_v30 = vld [vmem:[#allocation2 + $0x270] sm:$0xff] }
 0x2e3   :  { %v2102_v33 = vpop.permute.xlu0 %2101  ;;  %v2104_v31 = vpop.permute.xlu1 %2103 }
 0x2e4   :  { %2274 = vst.msk [vmem:[#allocation3 + $0xa0] sm:$0xff] %vm2253_vm6, %v2102_v33  ;;  %2275 = vst.msk [vmem:[#allocation3 + $0xa8] sm:$0xff] %vm2253_vm6, %v2104_v31 }
 0x2e5   :  { %2475 = vrot.lane.b32.xlu0 %v2333_v21, %s9897_s21  ;;  %2477 = vrot.lane.b32.xlu1 %v2334_v19, %s9897_s21  ;;  %v2364_v21 = vld [vmem:[#allocation2 + $0x278] sm:$0xff]  ;;  %v2365_v19 = vld [vmem:[#allocation2 + $0x288] sm:$0xff] }
 0x2e7   :  { %v2106_v23 = vpop.permute.xlu0 %2105  ;;  %v2108_v20 = vpop.permute.xlu1 %2107 }
 0x2e8   :  { %2276 = vst.msk [vmem:[#allocation3 + $0xb0] sm:$0xff] %vm2253_vm6, %v2106_v23  ;;  %2277 = vst.msk [vmem:[#allocation3 + $0xb8] sm:$0xff] %vm2253_vm6, %v2108_v20 }
 0x2e9   :  { %2479 = vrot.lane.b32.xlu0 %v2335_v17, %s9897_s21  ;;  %2481 = vrot.lane.b32.xlu1 %v2336_v15, %s9897_s21  ;;  %v2366_v17 = vld [vmem:[#allocation2 + $0x290] sm:$0xff]  ;;  %v2367_v15 = vld [vmem:[#allocation2 + $0x2a0] sm:$0xff] }
 0x2eb   :  { %v2110_v18 = vpop.permute.xlu0 %2109  ;;  %v2112_v16 = vpop.permute.xlu1 %2111 }
 0x2ec   :  { %2278 = vst.msk [vmem:[#allocation3 + $0xc0] sm:$0xff] %vm2253_vm6, %v2110_v18  ;;  %2279 = vst.msk [vmem:[#allocation3 + $0xc8] sm:$0xff] %vm2253_vm6, %v2112_v16 }
 0x2ed   :  { %2483 = vrot.lane.b32.xlu0 %v2337_v13, %s9897_s21  ;;  %2485 = vrot.lane.b32.xlu1 %v2338_v11, %s9897_s21  ;;  %v2368_v13 = vld [vmem:[#allocation2 + $0x2a8] sm:$0xff]  ;;  %v2369_v11 = vld [vmem:[#allocation2 + $0x2b8] sm:$0xff] }
 0x2ef   :  { %v2114_v14 = vpop.permute.xlu0 %2113  ;;  %v2116_v12 = vpop.permute.xlu1 %2115 }
 0x2f0   :  { %2280 = vst.msk [vmem:[#allocation3 + $0xd0] sm:$0xff] %vm2253_vm6, %v2114_v14  ;;  %2281 = vst.msk [vmem:[#allocation3 + $0xd8] sm:$0xff] %vm2253_vm6, %v2116_v12 }
 0x2f1   :  { %2487 = vrot.lane.b32.xlu0 %v2339_v9, %s9897_s21  ;;  %2489 = vrot.lane.b32.xlu1 %v2340_v3, %s9897_s21  ;;  %v2370_v9 = vld [vmem:[#allocation2 + $0x2c0] sm:$0xff]  ;;  %v2371_v3 = vld [vmem:[#allocation2 + $0x2d0] sm:$0xff] }
 0x2f3   :  { %v2118_v2 = vpop.permute.xlu0 %2117  ;;  %v2120_v10 = vpop.permute.xlu1 %2119 }
 0x2f4   :  { %2282 = vst.msk [vmem:[#allocation3 + $0xe0] sm:$0xff] %vm2253_vm6, %v2118_v2  ;;  %2283 = vst.msk [vmem:[#allocation3 + $0xe8] sm:$0xff] %vm2253_vm6, %v2120_v10 }
 0x2f5   :  { %2491 = vrot.lane.b32.xlu0 %v2341_v7, %s9897_s21  ;;  %2493 = vrot.lane.b32.xlu1 %v2342_v36, %s9897_s21  ;;  %v2372_v7 = vld [vmem:[#allocation2 + $0x2d8] sm:$0xff]  ;;  %v2373_v36 = vld [vmem:[#allocation2 + $0x2e8] sm:$0xff] }
 0x2f7   :  { %v2122_v60 = vpop.permute.xlu0 %2121  ;;  %v2124_v55 = vpop.permute.xlu1 %2123 }
 0x2f8   :  { %2284 = vst.msk [vmem:[#allocation3 + $0xf0] sm:$0xff] %vm2253_vm6, %v2122_v60  ;;  %2285 = vst.msk [vmem:[#allocation3 + $0xf8] sm:$0xff] %vm2253_vm6, %v2124_v55 }
 0x2f9   :  { %2495 = vrot.lane.b32.xlu0 %v2343_v40, %s9897_s21  ;;  %2497 = vrot.lane.b32.xlu1 %v2344_v44, %s9897_s21  ;;  %v2374_v40 = vld [vmem:[#allocation2 + $0x2f0] sm:$0xff]  ;;  %v2375_v44 = vld [vmem:[#allocation2 + $0x300] sm:$0xff] }
 0x2fb   :  { %v2126_v61 = vpop.permute.xlu0 %2125  ;;  %v2128_v59 = vpop.permute.xlu1 %2127 }
 0x2fc   :  { %2286 = vst.msk [vmem:[#allocation3 + $0x100] sm:$0xff] %vm2253_vm6, %v2126_v61  ;;  %2287 = vst.msk [vmem:[#allocation3 + $0x108] sm:$0xff] %vm2253_vm6, %v2128_v59 }
 0x2fd   :  { %2499 = vrot.lane.b32.xlu0 %v2345_v29, %s9897_s21  ;;  %2501 = vrot.lane.b32.xlu1 %v2346_v25, %s9897_s21  ;;  %v2376_v29 = vld [vmem:[#allocation2 + $0x308] sm:$0xff]  ;;  %v2377_v25 = vld [vmem:[#allocation2 + $0x318] sm:$0xff] }
 0x2ff   :  { %v2130_v56 = vpop.permute.xlu0 %2129  ;;  %v2132_v27 = vpop.permute.xlu1 %2131 }
 0x300   :  { %2288 = vst.msk [vmem:[#allocation3 + $0x110] sm:$0xff] %vm2253_vm6, %v2130_v56  ;;  %2289 = vst.msk [vmem:[#allocation3 + $0x118] sm:$0xff] %vm2253_vm6, %v2132_v27 }
 0x301   :  { %2503 = vrot.lane.b32.xlu0 %v2347_v28, %s9897_s21  ;;  %2505 = vrot.lane.b32.xlu1 %v2348_v22, %s9897_s21  ;;  %v2378_v28 = vld [vmem:[#allocation2 + $0x320] sm:$0xff]  ;;  %v2379_v22 = vld [vmem:[#allocation2 + $0x330] sm:$0xff] }
 0x303   :  { %v2134_v26 = vpop.permute.xlu0 %2133  ;;  %v2136_v38 = vpop.permute.xlu1 %2135 }
 0x304   :  { %2290 = vst.msk [vmem:[#allocation3 + $0x120] sm:$0xff] %vm2253_vm6, %v2134_v26  ;;  %2291 = vst.msk [vmem:[#allocation3 + $0x128] sm:$0xff] %vm2253_vm6, %v2136_v38 }
 0x305   :  { %2507 = vrot.lane.b32.xlu0 %v2349_v63, %s9897_s21  ;;  %2509 = vrot.lane.b32.xlu1 %v2350_v58, %s9897_s21  ;;  %v2380_v63 = vld [vmem:[#allocation2 + $0x338] sm:$0xff]  ;;  %v2381_v58 = vld [vmem:[#allocation2 + $0x348] sm:$0xff] }
 0x307   :  { %v2138_v24 = vpop.permute.xlu0 %2137  ;;  %v2140_v54 = vpop.permute.xlu1 %2139 }
 0x308   :  { %2292 = vst.msk [vmem:[#allocation3 + $0x130] sm:$0xff] %vm2253_vm6, %v2138_v24  ;;  %2293 = vst.msk [vmem:[#allocation3 + $0x138] sm:$0xff] %vm2253_vm6, %v2140_v54 }
 0x309   :  { %2511 = vrot.lane.b32.xlu0 %v2351_v57, %s9897_s21  ;;  %2513 = vrot.lane.b32.xlu1 %v2352_v52, %s9897_s21  ;;  %v2382_v57 = vld [vmem:[#allocation2 + $0x350] sm:$0xff] }
 0x30a   :  { %v2704_v52 = vld [vmem:[#allocation2 + $0x31] sm:$0xff] }
 0x30b   :  { %v2142_v0 = vpop.permute.xlu0 %2141  ;;  %v2144_v62 = vpop.permute.xlu1 %2143 }
 0x30c   :  { %2294 = vst.msk [vmem:[#allocation3 + $0x140] sm:$0xff] %vm2253_vm6, %v2142_v0  ;;  %2295 = vst.msk [vmem:[#allocation3 + $0x148] sm:$0xff] %vm2253_vm6, %v2144_v62 }
 0x30d   :  { %2515 = vrot.lane.b32.xlu0 %v2353_v50, %s9897_s21  ;;  %2517 = vrot.lane.b32.xlu1 %v2354_v49, %s9897_s21  ;;  %v2705_v50 = vld [vmem:[#allocation2 + $0x39] sm:$0xff]  ;;  %v2706_v49 = vld [vmem:[#allocation2 + $0x49] sm:$0xff] }
 0x30f   :  { %v2146_v48 = vpop.permute.xlu0 %2145  ;;  %v2148_v53 = vpop.permute.xlu1 %2147 }
 0x310   :  { %2296 = vst.msk [vmem:[#allocation3 + $0x150] sm:$0xff] %vm2253_vm6, %v2146_v48  ;;  %2297 = vst.msk [vmem:[#allocation3 + $0x158] sm:$0xff] %vm2253_vm6, %v2148_v53 }
 0x311   :  { %2519 = vrot.lane.b32.xlu0 %v2355_v46, %s9897_s21  ;;  %2521 = vrot.lane.b32.xlu1 %v2356_v4, %s9897_s21  ;;  %v2707_v46 = vld [vmem:[#allocation2 + $0x51] sm:$0xff]  ;;  %v2708_v4 = vld [vmem:[#allocation2 + $0x61] sm:$0xff] }
 0x313   :  { %v2150_v5 = vpop.permute.xlu0 %2149  ;;  %v2152_v51 = vpop.permute.xlu1 %2151 }
 0x314   :  { %2298 = vst.msk [vmem:[#allocation3 + $0x160] sm:$0xff] %vm2253_vm6, %v2150_v5  ;;  %2299 = vst.msk [vmem:[#allocation3 + $0x168] sm:$0xff] %vm2253_vm6, %v2152_v51 }
 0x315   :  { %2523 = vrot.lane.b32.xlu0 %v2357_v43, %s9897_s21  ;;  %2525 = vrot.lane.b32.xlu1 %v2358_v42, %s9897_s21  ;;  %v2709_v43 = vld [vmem:[#allocation2 + $0x69] sm:$0xff]  ;;  %v2710_v42 = vld [vmem:[#allocation2 + $0x79] sm:$0xff] }
 0x317   :  { %v2154_v8 = vpop.permute.xlu0 %2153  ;;  %v2156_v35 = vpop.permute.xlu1 %2155 }
 0x318   :  { %2300 = vst.msk [vmem:[#allocation3 + $0x170] sm:$0xff] %vm2253_vm6, %v2154_v8  ;;  %2301 = vst.msk [vmem:[#allocation3 + $0x178] sm:$0xff] %vm2253_vm6, %v2156_v35 }
 0x319   :  { %2527 = vrot.lane.b32.xlu0 %v2359_v1, %s9897_s21  ;;  %2529 = vrot.lane.b32.xlu1 %v2360_v34, %s9897_s21  ;;  %v2711_v1 = vld [vmem:[#allocation2 + $0x81] sm:$0xff]  ;;  %v2712_v34 = vld [vmem:[#allocation2 + $0x91] sm:$0xff] }
 0x31b   :  { %v2158_v37 = vpop.permute.xlu0 %2157  ;;  %v2160_v39 = vpop.permute.xlu1 %2159 }
 0x31c   :  { %2302 = vst.msk [vmem:[#allocation3 + $0x180] sm:$0xff] %vm2253_vm6, %v2158_v37  ;;  %2303 = vst.msk [vmem:[#allocation3 + $0x188] sm:$0xff] %vm2253_vm6, %v2160_v39 }
 0x31d   :  { %2531 = vrot.lane.b32.xlu0 %v2361_v41, %s9897_s21  ;;  %2533 = vrot.lane.b32.xlu1 %v2362_v32, %s9897_s21  ;;  %v2713_v41 = vld [vmem:[#allocation2 + $0x99] sm:$0xff]  ;;  %v2714_v32 = vld [vmem:[#allocation2 + $0xa9] sm:$0xff] }
 0x31f   :  { %v2162_v45 = vpop.permute.xlu0 %2161  ;;  %v2164_v33 = vpop.permute.xlu1 %2163 }
 0x320   :  { %2304 = vst.msk [vmem:[#allocation3 + $0x190] sm:$0xff] %vm2253_vm6, %v2162_v45  ;;  %2305 = vst.msk [vmem:[#allocation3 + $0x198] sm:$0xff] %vm2253_vm6, %v2164_v33 }
 0x321   :  { %2535 = vrot.lane.b32.xlu0 %v2363_v30, %s9897_s21  ;;  %2537 = vrot.lane.b32.xlu1 %v2364_v21, %s9897_s21  ;;  %v2715_v30 = vld [vmem:[#allocation2 + $0xb1] sm:$0xff]  ;;  %v2716_v21 = vld [vmem:[#allocation2 + $0xc1] sm:$0xff] }
 0x323   :  { %v2166_v31 = vpop.permute.xlu0 %2165  ;;  %v2168_v23 = vpop.permute.xlu1 %2167 }
 0x324   :  { %2306 = vst.msk [vmem:[#allocation3 + $0x1a0] sm:$0xff] %vm2253_vm6, %v2166_v31  ;;  %2307 = vst.msk [vmem:[#allocation3 + $0x1a8] sm:$0xff] %vm2253_vm6, %v2168_v23 }
 0x325   :  { %2539 = vrot.lane.b32.xlu0 %v2365_v19, %s9897_s21  ;;  %2541 = vrot.lane.b32.xlu1 %v2366_v17, %s9897_s21  ;;  %v2717_v19 = vld [vmem:[#allocation2 + $0xc9] sm:$0xff]  ;;  %v2718_v17 = vld [vmem:[#allocation2 + $0xd9] sm:$0xff] }
 0x327   :  { %v2170_v20 = vpop.permute.xlu0 %2169  ;;  %v2172_v18 = vpop.permute.xlu1 %2171 }
 0x328   :  { %2308 = vst.msk [vmem:[#allocation3 + $0x1b0] sm:$0xff] %vm2253_vm6, %v2170_v20  ;;  %2309 = vst.msk [vmem:[#allocation3 + $0x1b8] sm:$0xff] %vm2253_vm6, %v2172_v18 }
 0x329   :  { %2543 = vrot.lane.b32.xlu0 %v2367_v15, %s9897_s21  ;;  %2545 = vrot.lane.b32.xlu1 %v2368_v13, %s9897_s21  ;;  %v2719_v15 = vld [vmem:[#allocation2 + $0xe1] sm:$0xff]  ;;  %v2720_v13 = vld [vmem:[#allocation2 + $0xf1] sm:$0xff] }
 0x32b   :  { %v2174_v16 = vpop.permute.xlu0 %2173  ;;  %v2176_v14 = vpop.permute.xlu1 %2175 }
 0x32c   :  { %2310 = vst.msk [vmem:[#allocation3 + $0x1c0] sm:$0xff] %vm2253_vm6, %v2174_v16  ;;  %2311 = vst.msk [vmem:[#allocation3 + $0x1c8] sm:$0xff] %vm2253_vm6, %v2176_v14 }
 0x32d   :  { %2547 = vrot.lane.b32.xlu0 %v2369_v11, %s9897_s21  ;;  %2549 = vrot.lane.b32.xlu1 %v2370_v9, %s9897_s21  ;;  %v2721_v11 = vld [vmem:[#allocation2 + $0xf9] sm:$0xff]  ;;  %v2722_v9 = vld [vmem:[#allocation2 + $0x109] sm:$0xff] }
 0x32f   :  { %v2178_v12 = vpop.permute.xlu0 %2177  ;;  %v2180_v2 = vpop.permute.xlu1 %2179 }
 0x330   :  { %2312 = vst.msk [vmem:[#allocation3 + $0x1d0] sm:$0xff] %vm2253_vm6, %v2178_v12  ;;  %2313 = vst.msk [vmem:[#allocation3 + $0x1d8] sm:$0xff] %vm2253_vm6, %v2180_v2 }
 0x331   :  { %2551 = vrot.lane.b32.xlu0 %v2371_v3, %s9897_s21  ;;  %2553 = vrot.lane.b32.xlu1 %v2372_v7, %s9897_s21  ;;  %v2723_v3 = vld [vmem:[#allocation2 + $0x111] sm:$0xff]  ;;  %v2724_v7 = vld [vmem:[#allocation2 + $0x121] sm:$0xff] }
 0x333   :  { %v2182_v10 = vpop.permute.xlu0 %2181  ;;  %v2184_v60 = vpop.permute.xlu1 %2183 }
 0x334   :  { %2314 = vst.msk [vmem:[#allocation3 + $0x1e0] sm:$0xff] %vm2253_vm6, %v2182_v10  ;;  %2315 = vst.msk [vmem:[#allocation3 + $0x1e8] sm:$0xff] %vm2253_vm6, %v2184_v60 }
 0x335   :  { %2555 = vrot.lane.b32.xlu0 %v2373_v36, %s9897_s21  ;;  %2557 = vrot.lane.b32.xlu1 %v2374_v40, %s9897_s21  ;;  %v2725_v36 = vld [vmem:[#allocation2 + $0x129] sm:$0xff]  ;;  %v2726_v40 = vld [vmem:[#allocation2 + $0x139] sm:$0xff] }
 0x337   :  { %v2186_v55 = vpop.permute.xlu0 %2185  ;;  %v2188_v61 = vpop.permute.xlu1 %2187 }
 0x338   :  { %2316 = vst.msk [vmem:[#allocation3 + $0x1f0] sm:$0xff] %vm2253_vm6, %v2186_v55  ;;  %2317 = vst.msk [vmem:[#allocation3 + $0x1f8] sm:$0xff] %vm2253_vm6, %v2188_v61 }
 0x339   :  { %2559 = vrot.lane.b32.xlu0 %v2375_v44, %s9897_s21  ;;  %2561 = vrot.lane.b32.xlu1 %v2376_v29, %s9897_s21  ;;  %v2727_v44 = vld [vmem:[#allocation2 + $0x141] sm:$0xff]  ;;  %v2728_v29 = vld [vmem:[#allocation2 + $0x151] sm:$0xff] }
 0x33b   :  { %v2448_v59 = vpop.permute.xlu0 %2447  ;;  %v2450_v56 = vpop.permute.xlu1 %2449 }
 0x33c   :  { %2640 = vst.msk [vmem:[#allocation3] sm:$0xff] %vm2639_vm7, %v2448_v59  ;;  %2641 = vst.msk [vmem:[#allocation3 + $0x8] sm:$0xff] %vm2639_vm7, %v2450_v56 }
 0x33d   :  { %2563 = vrot.lane.b32.xlu0 %v2377_v25, %s9897_s21  ;;  %2565 = vrot.lane.b32.xlu1 %v2378_v28, %s9897_s21  ;;  %v2729_v25 = vld [vmem:[#allocation2 + $0x159] sm:$0xff]  ;;  %v2730_v28 = vld [vmem:[#allocation2 + $0x169] sm:$0xff] }
 0x33f   :  { %v2452_v27 = vpop.permute.xlu0 %2451  ;;  %v2454_v26 = vpop.permute.xlu1 %2453 }
 0x340   :  { %2642 = vst.msk [vmem:[#allocation3 + $0x10] sm:$0xff] %vm2639_vm7, %v2452_v27  ;;  %2643 = vst.msk [vmem:[#allocation3 + $0x18] sm:$0xff] %vm2639_vm7, %v2454_v26 }
 0x341   :  { %2567 = vrot.lane.b32.xlu0 %v2379_v22, %s9897_s21  ;;  %2569 = vrot.lane.b32.xlu1 %v2380_v63, %s9897_s21  ;;  %v2731_v22 = vld [vmem:[#allocation2 + $0x171] sm:$0xff]  ;;  %v2732_v63 = vld [vmem:[#allocation2 + $0x181] sm:$0xff] }
 0x343   :  { %v2456_v38 = vpop.permute.xlu0 %2455  ;;  %v2458_v24 = vpop.permute.xlu1 %2457 }
 0x344   :  { %2644 = vst.msk [vmem:[#allocation3 + $0x20] sm:$0xff] %vm2639_vm7, %v2456_v38  ;;  %2645 = vst.msk [vmem:[#allocation3 + $0x28] sm:$0xff] %vm2639_vm7, %v2458_v24 }
 0x345   :  { %2571 = vrot.lane.b32.xlu0 %v2381_v58, %s9897_s21  ;;  %2573 = vrot.lane.b32.xlu1 %v2382_v57, %s9897_s21  ;;  %v2733_v58 = vld [vmem:[#allocation2 + $0x189] sm:$0xff]  ;;  %v2734_v57 = vld [vmem:[#allocation2 + $0x199] sm:$0xff] }
 0x347   :  { %v2460_v54 = vpop.permute.xlu0 %2459  ;;  %v2462_v0 = vpop.permute.xlu1 %2461 }
 0x348   :  { %2646 = vst.msk [vmem:[#allocation3 + $0x30] sm:$0xff] %vm2639_vm7, %v2460_v54  ;;  %2647 = vst.msk [vmem:[#allocation3 + $0x38] sm:$0xff] %vm2639_vm7, %v2462_v0 }
 0x349   :  { %2832 = vrot.lane.b32.xlu0 %v2704_v52, %s9898_s23  ;;  %2834 = vrot.lane.b32.xlu1 %v2705_v50, %s9898_s23  ;;  %v2735_v52 = vld [vmem:[#allocation2 + $0x1a1] sm:$0xff] }
 0x34a   :  { %v2736_v50 = vld [vmem:[#allocation2 + $0x1e1] sm:$0xff] }
 0x34b   :  { %v2464_v62 = vpop.permute.xlu0 %2463  ;;  %v2466_v48 = vpop.permute.xlu1 %2465 }
 0x34c   :  { %2648 = vst.msk [vmem:[#allocation3 + $0x40] sm:$0xff] %vm2639_vm7, %v2464_v62  ;;  %2649 = vst.msk [vmem:[#allocation3 + $0x48] sm:$0xff] %vm2639_vm7, %v2466_v48 }
 0x34d   :  { %2836 = vrot.lane.b32.xlu0 %v2706_v49, %s9898_s23  ;;  %2838 = vrot.lane.b32.xlu1 %v2707_v46, %s9898_s23  ;;  %v2737_v49 = vld [vmem:[#allocation2 + $0x1e9] sm:$0xff]  ;;  %v2738_v46 = vld [vmem:[#allocation2 + $0x1f9] sm:$0xff] }
 0x34f   :  { %v2468_v53 = vpop.permute.xlu0 %2467  ;;  %v2470_v5 = vpop.permute.xlu1 %2469 }
 0x350   :  { %2650 = vst.msk [vmem:[#allocation3 + $0x50] sm:$0xff] %vm2639_vm7, %v2468_v53  ;;  %2651 = vst.msk [vmem:[#allocation3 + $0x58] sm:$0xff] %vm2639_vm7, %v2470_v5  ;;  %v3539_v5 = vld [vmem:[%s16664_s1 + $0x8] sm:$0xff] }
 0x351   :  { %2840 = vrot.lane.b32.xlu0 %v2708_v4, %s9898_s23  ;;  %2842 = vrot.lane.b32.xlu1 %v2709_v43, %s9898_s23  ;;  %v2739_v4 = vld [vmem:[#allocation2 + $0x201] sm:$0xff] }
 0x352   :  { %v3538_v43 = vld [vmem:[%s16664_s1] sm:$0xff] }
 0x353   :  { %v2472_v51 = vpop.permute.xlu0 %2471  ;;  %v2474_v8 = vpop.permute.xlu1 %2473 }
 0x354   :  { %2652 = vst.msk [vmem:[#allocation3 + $0x60] sm:$0xff] %vm2639_vm7, %v2472_v51  ;;  %2653 = vst.msk [vmem:[#allocation3 + $0x68] sm:$0xff] %vm2639_vm7, %v2474_v8  ;;  %v2740_v51 = vld [vmem:[#allocation2 + $0x211] sm:$0xff]  ;;  %v2741_v8 = vld [vmem:[#allocation2 + $0x219] sm:$0xff] }
 0x355   :  { %2844 = vrot.lane.b32.xlu0 %v2710_v42, %s9898_s23  ;;  %2846 = vrot.lane.b32.xlu1 %v2711_v1, %s9898_s23  ;;  %v9862_v42 = vpack.c.bf16 %v3539_v5, %v3538_v43  ;;  %v3111_v5 = vld [vmem:[#allocation2 + $0x13a] sm:$0xff] }
 0x357   :  { %v2476_v35 = vpop.permute.xlu0 %2475  ;;  %v2478_v37 = vpop.permute.xlu1 %2477  ;;  %9863 = vmatprep.subr.bf16.mxu0 %v9862_v42 }
 0x358   :  { %2654 = vst.msk [vmem:[#allocation3 + $0x70] sm:$0xff] %vm2639_vm7, %v2476_v35  ;;  %2655 = vst.msk [vmem:[#allocation3 + $0x78] sm:$0xff] %vm2639_vm7, %v2478_v37  ;;  %9865 = vmatpush3.bf16.msra.mxu0 %v9862_v42  ;;  %v3540_v35 = vld [vmem:[%s16664_s1 + $0x10] sm:$0xff] }
 0x359   :  { %2848 = vrot.lane.b32.xlu0 %v2712_v34, %s9898_s23  ;;  %2850 = vrot.lane.b32.xlu1 %v2713_v41, %s9898_s23  ;;  %v3541_v41 = vld [vmem:[%s16664_s1 + $0x18] sm:$0xff] }
 0x35a   :  { %v9866_v37 = vpack.c.bf16 %v3541_v41, %v3540_v35  ;;  %v3114_v35 = vld [vmem:[#allocation2 + $0x15a] sm:$0xff] }
 0x35b   :  { %v2480_v39 = vpop.permute.xlu0 %2479  ;;  %v2482_v45 = vpop.permute.xlu1 %2481 }
 0x35c   :  { %2656 = vst.msk [vmem:[#allocation3 + $0x80] sm:$0xff] %vm2639_vm7, %v2480_v39  ;;  %2657 = vst.msk [vmem:[#allocation3 + $0x88] sm:$0xff] %vm2639_vm7, %v2482_v45  ;;  %9867 = vmatprep.subr.bf16.mxu0 %v9866_v37 }
 0x35d   :  { %2852 = vrot.lane.b32.xlu0 %v2714_v32, %s9898_s23  ;;  %2854 = vrot.lane.b32.xlu1 %v2715_v30, %s9898_s23  ;;  %v2742_v32 = vld [vmem:[#allocation2 + $0x229] sm:$0xff]  ;;  %v2743_v30 = vld [vmem:[#allocation2 + $0x231] sm:$0xff] }
 0x35e   :  { %9869 = vmatpush3.bf16.msra.mxu0 %v9866_v37  ;;  %v3115_v37 = vld [vmem:[#allocation2 + $0x16a] sm:$0xff] }
 0x35f   :  { %v2484_v33 = vpop.permute.xlu0 %2483  ;;  %v2486_v31 = vpop.permute.xlu1 %2485 }
 0x360   :  { %2658 = vst.msk [vmem:[#allocation3 + $0x90] sm:$0xff] %vm2639_vm7, %v2484_v33  ;;  %2659 = vst.msk [vmem:[#allocation3 + $0x98] sm:$0xff] %vm2639_vm7, %v2486_v31  ;;  %v3542_v33 = vld [vmem:[%s16664_s1 + $0x20] sm:$0xf]  ;;  %v2745_v31 = vld [vmem:[#allocation2 + $0x249] sm:$0xff]  ;;  %s9899_s1 = smov 32  }
 0x361   :  { %2856 = vrot.lane.b32.xlu0 %v2716_v21, %s9898_s23  ;;  %2858 = vrot.lane.b32.xlu1 %v2717_v19, %s9898_s23  ;;  %v2744_v21 = vld [vmem:[#allocation2 + $0x241] sm:$0xff] }
 0x362   :  { %9658 = vmatprep.subr.msk.mxu0 %vm3736_vm8, %v3542_v33 }
 0x363   :  { %v2488_v23 = vpop.permute.xlu0 %2487  ;;  %v2490_v20 = vpop.permute.xlu1 %2489  ;;  %9659 = vmatpush3.msk.msra.mxu0 %vm3736_vm8, %v3542_v33  ;;  %v3118_v33 = vld [vmem:[#allocation2 + $0x18a] sm:$0xff] }
 0x364   :  { %2660 = vst.msk [vmem:[#allocation3 + $0xa0] sm:$0xff] %vm2639_vm7, %v2488_v23  ;;  %2661 = vst.msk [vmem:[#allocation3 + $0xa8] sm:$0xff] %vm2639_vm7, %v2490_v20  ;;  %v3089_v23 = vld [vmem:[#allocation2 + $0x32] sm:$0xff]  ;;  %v3090_v20 = vld [vmem:[#allocation2 + $0x3a] sm:$0xff] }
 0x365   :  { %2860 = vrot.lane.b32.xlu0 %v2718_v17, %s9898_s23  ;;  %2862 = vrot.lane.b32.xlu1 %v2719_v15, %s9898_s23 }
 0x367   :  { %v2492_v18 = vpop.permute.xlu0 %2491  ;;  %v2494_v16 = vpop.permute.xlu1 %2493 }
 0x368   :  { %2662 = vst.msk [vmem:[#allocation3 + $0xb0] sm:$0xff] %vm2639_vm7, %v2492_v18  ;;  %2663 = vst.msk [vmem:[#allocation3 + $0xb8] sm:$0xff] %vm2639_vm7, %v2494_v16  ;;  %v3091_v18 = vld [vmem:[#allocation2 + $0x4a] sm:$0xff]  ;;  %v3092_v16 = vld [vmem:[#allocation2 + $0x52] sm:$0xff] }
 0x369   :  { %2864 = vrot.lane.b32.xlu0 %v2720_v13, %s9898_s23  ;;  %2866 = vrot.lane.b32.xlu1 %v2721_v11, %s9898_s23 }
 0x36b   :  { %v2496_v14 = vpop.permute.xlu0 %2495  ;;  %v2498_v12 = vpop.permute.xlu1 %2497 }
 0x36c   :  { %2664 = vst.msk [vmem:[#allocation3 + $0xc0] sm:$0xff] %vm2639_vm7, %v2496_v14  ;;  %2665 = vst.msk [vmem:[#allocation3 + $0xc8] sm:$0xff] %vm2639_vm7, %v2498_v12  ;;  %v3093_v14 = vld [vmem:[#allocation2 + $0x62] sm:$0xff]  ;;  %v3094_v12 = vld [vmem:[#allocation2 + $0x6a] sm:$0xff] }
 0x36d   :  { %2868 = vrot.lane.b32.xlu0 %v2722_v9, %s9898_s23  ;;  %2870 = vrot.lane.b32.xlu1 %v2723_v3, %s9898_s23 }
 0x36f   :  { %v2500_v2 = vpop.permute.xlu0 %2499  ;;  %v2502_v10 = vpop.permute.xlu1 %2501 }
 0x370   :  { %2666 = vst.msk [vmem:[#allocation3 + $0xd0] sm:$0xff] %vm2639_vm7, %v2500_v2  ;;  %2667 = vst.msk [vmem:[#allocation3 + $0xd8] sm:$0xff] %vm2639_vm7, %v2502_v10  ;;  %v3095_v2 = vld [vmem:[#allocation2 + $0x7a] sm:$0xff]  ;;  %v3096_v10 = vld [vmem:[#allocation2 + $0x82] sm:$0xff] }
 0x371   :  { %2872 = vrot.lane.b32.xlu0 %v2724_v7, %s9898_s23  ;;  %2874 = vrot.lane.b32.xlu1 %v2725_v36, %s9898_s23 }
 0x373   :  { %v2504_v60 = vpop.permute.xlu0 %2503  ;;  %v2506_v55 = vpop.permute.xlu1 %2505 }
 0x374   :  { %2668 = vst.msk [vmem:[#allocation3 + $0xe0] sm:$0xff] %vm2639_vm7, %v2504_v60  ;;  %2669 = vst.msk [vmem:[#allocation3 + $0xe8] sm:$0xff] %vm2639_vm7, %v2506_v55  ;;  %v3097_v60 = vld [vmem:[#allocation2 + $0x92] sm:$0xff]  ;;  %v3098_v55 = vld [vmem:[#allocation2 + $0x9a] sm:$0xff] }
 0x375   :  { %2876 = vrot.lane.b32.xlu0 %v2726_v40, %s9898_s23  ;;  %2878 = vrot.lane.b32.xlu1 %v2727_v44, %s9898_s23 }
 0x377   :  { %v2508_v61 = vpop.permute.xlu0 %2507  ;;  %v2510_v59 = vpop.permute.xlu1 %2509 }
 0x378   :  { %2670 = vst.msk [vmem:[#allocation3 + $0xf0] sm:$0xff] %vm2639_vm7, %v2508_v61  ;;  %2671 = vst.msk [vmem:[#allocation3 + $0xf8] sm:$0xff] %vm2639_vm7, %v2510_v59  ;;  %v3099_v61 = vld [vmem:[#allocation2 + $0xaa] sm:$0xff]  ;;  %v3100_v59 = vld [vmem:[#allocation2 + $0xb2] sm:$0xff] }
 0x379   :  { %2880 = vrot.lane.b32.xlu0 %v2728_v29, %s9898_s23  ;;  %2882 = vrot.lane.b32.xlu1 %v2729_v25, %s9898_s23 }
 0x37b   :  { %v2512_v56 = vpop.permute.xlu0 %2511  ;;  %v2514_v27 = vpop.permute.xlu1 %2513 }
 0x37c   :  { %2672 = vst.msk [vmem:[#allocation3 + $0x100] sm:$0xff] %vm2639_vm7, %v2512_v56  ;;  %2673 = vst.msk [vmem:[#allocation3 + $0x108] sm:$0xff] %vm2639_vm7, %v2514_v27  ;;  %v3101_v56 = vld [vmem:[#allocation2 + $0xc2] sm:$0xff]  ;;  %v3102_v27 = vld [vmem:[#allocation2 + $0xca] sm:$0xff] }
 0x37d   :  { %2884 = vrot.lane.b32.xlu0 %v2730_v28, %s9898_s23  ;;  %2886 = vrot.lane.b32.xlu1 %v2731_v22, %s9898_s23 }
 0x37f   :  { %v2516_v26 = vpop.permute.xlu0 %2515  ;;  %v2518_v38 = vpop.permute.xlu1 %2517 }
 0x380   :  { %2674 = vst.msk [vmem:[#allocation3 + $0x110] sm:$0xff] %vm2639_vm7, %v2516_v26  ;;  %2675 = vst.msk [vmem:[#allocation3 + $0x118] sm:$0xff] %vm2639_vm7, %v2518_v38  ;;  %v3103_v26 = vld [vmem:[#allocation2 + $0xda] sm:$0xff]  ;;  %v3104_v38 = vld [vmem:[#allocation2 + $0xe2] sm:$0xff] }
 0x381   :  { %2888 = vrot.lane.b32.xlu0 %v2732_v63, %s9898_s23  ;;  %2890 = vrot.lane.b32.xlu1 %v2733_v58, %s9898_s23 }
 0x383   :  { %v2520_v24 = vpop.permute.xlu0 %2519  ;;  %v2522_v54 = vpop.permute.xlu1 %2521 }
 0x384   :  { %2676 = vst.msk [vmem:[#allocation3 + $0x120] sm:$0xff] %vm2639_vm7, %v2520_v24  ;;  %2677 = vst.msk [vmem:[#allocation3 + $0x128] sm:$0xff] %vm2639_vm7, %v2522_v54  ;;  %v3105_v24 = vld [vmem:[#allocation2 + $0xf2] sm:$0xff]  ;;  %v3106_v54 = vld [vmem:[#allocation2 + $0xfa] sm:$0xff] }
 0x385   :  { %2892 = vrot.lane.b32.xlu0 %v2734_v57, %s9898_s23  ;;  %2894 = vrot.lane.b32.xlu1 %v2735_v52, %s9898_s23 }
 0x387   :  { %v2524_v0 = vpop.permute.xlu0 %2523  ;;  %v2526_v62 = vpop.permute.xlu1 %2525 }
 0x388   :  { %2678 = vst.msk [vmem:[#allocation3 + $0x130] sm:$0xff] %vm2639_vm7, %v2524_v0  ;;  %2679 = vst.msk [vmem:[#allocation3 + $0x138] sm:$0xff] %vm2639_vm7, %v2526_v62  ;;  %v3107_v0 = vld [vmem:[#allocation2 + $0x10a] sm:$0xff]  ;;  %v3108_v62 = vld [vmem:[#allocation2 + $0x112] sm:$0xff] }
 0x389   :  { %2896 = vrot.lane.b32.xlu0 %v2736_v50, %s9898_s23  ;;  %2898 = vrot.lane.b32.xlu1 %v2737_v49, %s9898_s23 }
 0x38b   :  { %v2528_v48 = vpop.permute.xlu0 %2527  ;;  %v2530_v53 = vpop.permute.xlu1 %2529 }
 0x38c   :  { %2680 = vst.msk [vmem:[#allocation3 + $0x140] sm:$0xff] %vm2639_vm7, %v2528_v48  ;;  %2681 = vst.msk [vmem:[#allocation3 + $0x148] sm:$0xff] %vm2639_vm7, %v2530_v53  ;;  %v3109_v48 = vld [vmem:[#allocation2 + $0x122] sm:$0xff]  ;;  %v3110_v53 = vld [vmem:[#allocation2 + $0x12a] sm:$0xff] }
 0x38d   :  { %2900 = vrot.lane.b32.xlu0 %v2738_v46, %s9898_s23  ;;  %2902 = vrot.lane.b32.xlu1 %v2739_v4, %s9898_s23 }
 0x38f   :  { %v2532_v1 = vpop.permute.xlu0 %2531  ;;  %v2534_v34 = vpop.permute.xlu1 %2533 }
 0x390   :  { %2682 = vst.msk [vmem:[#allocation3 + $0x150] sm:$0xff] %vm2639_vm7, %v2532_v1  ;;  %2683 = vst.msk [vmem:[#allocation3 + $0x158] sm:$0xff] %vm2639_vm7, %v2534_v34 }
 0x391   :  { %2904 = vrot.lane.b32.xlu0 %v2740_v51, %s9898_s23  ;;  %2906 = vrot.lane.b32.xlu1 %v2741_v8, %s9898_s23  ;;  %v3112_v51 = vld [vmem:[#allocation2 + $0x142] sm:$0xff]  ;;  %v3113_v8 = vld [vmem:[#allocation2 + $0x152] sm:$0xff] }
 0x393   :  { %v2536_v39 = vpop.permute.xlu0 %2535  ;;  %v2538_v45 = vpop.permute.xlu1 %2537 }
 0x394   :  { %2684 = vst.msk [vmem:[#allocation3 + $0x160] sm:$0xff] %vm2639_vm7, %v2536_v39  ;;  %2685 = vst.msk [vmem:[#allocation3 + $0x168] sm:$0xff] %vm2639_vm7, %v2538_v45  ;;  %v3116_v39 = vld [vmem:[#allocation2 + $0x172] sm:$0xff]  ;;  %v3117_v45 = vld [vmem:[#allocation2 + $0x182] sm:$0xff] }
 0x395   :  { %2908 = vrot.lane.b32.xlu0 %v2742_v32, %s9898_s23  ;;  %2910 = vrot.lane.b32.xlu1 %v2743_v30, %s9898_s23 }
 0x397   :  { %v2540_v19 = vpop.permute.xlu0 %2539  ;;  %v2542_v17 = vpop.permute.xlu1 %2541 }
 0x398   :  { %2686 = vst.msk [vmem:[#allocation3 + $0x170] sm:$0xff] %vm2639_vm7, %v2540_v19  ;;  %2687 = vst.msk [vmem:[#allocation3 + $0x178] sm:$0xff] %vm2639_vm7, %v2542_v17 }
 0x399   :  { %2912 = vrot.lane.b32.xlu0 %v2744_v21, %s9898_s23  ;;  %2914 = vrot.lane.b32.xlu1 %v2745_v31, %s9898_s23  ;;  %v3119_v31 = vld [vmem:[#allocation2 + $0x19a] sm:$0xff] }
 0x39b   :  { %v2544_v15 = vpop.permute.xlu0 %2543  ;;  %v2546_v13 = vpop.permute.xlu1 %2545 }
 0x39c   :  { %2688 = vst.msk [vmem:[#allocation3 + $0x180] sm:$0xff] %vm2639_vm7, %v2544_v15  ;;  %2689 = vst.msk [vmem:[#allocation3 + $0x188] sm:$0xff] %vm2639_vm7, %v2546_v13 }
 0x39d   :  { %3217 = vrot.lane.b32.xlu0 %v3089_v23, %s9899_s1  ;;  %3219 = vrot.lane.b32.xlu1 %v3090_v20, %s9899_s1  ;;  %v3120_v23 = vld [vmem:[#allocation2 + $0x1a2] sm:$0xff] }
 0x39e   :  { %v3121_v20 = vld [vmem:[#allocation2 + $0x1e2] sm:$0xff] }
 0x39f   :  { %v2548_v11 = vpop.permute.xlu0 %2547  ;;  %v2550_v9 = vpop.permute.xlu1 %2549 }
 0x3a0   :  { %2690 = vst.msk [vmem:[#allocation3 + $0x190] sm:$0xff] %vm2639_vm7, %v2548_v11  ;;  %2691 = vst.msk [vmem:[#allocation3 + $0x198] sm:$0xff] %vm2639_vm7, %v2550_v9 }
 0x3a1   :  { %3221 = vrot.lane.b32.xlu0 %v3091_v18, %s9899_s1  ;;  %3223 = vrot.lane.b32.xlu1 %v3092_v16, %s9899_s1  ;;  %v3122_v18 = vld [vmem:[#allocation2 + $0x1ea] sm:$0xff]  ;;  %v3123_v16 = vld [vmem:[#allocation2 + $0x1fa] sm:$0xff] }
 0x3a3   :  { %v2552_v3 = vpop.permute.xlu0 %2551  ;;  %v2554_v7 = vpop.permute.xlu1 %2553 }
 0x3a4   :  { %2692 = vst.msk [vmem:[#allocation3 + $0x1a0] sm:$0xff] %vm2639_vm7, %v2552_v3  ;;  %2693 = vst.msk [vmem:[#allocation3 + $0x1a8] sm:$0xff] %vm2639_vm7, %v2554_v7 }
 0x3a5   :  { %3225 = vrot.lane.b32.xlu0 %v3093_v14, %s9899_s1  ;;  %3227 = vrot.lane.b32.xlu1 %v3094_v12, %s9899_s1  ;;  %v3124_v14 = vld [vmem:[#allocation2 + $0x202] sm:$0xff]  ;;  %v3125_v12 = vld [vmem:[#allocation2 + $0x212] sm:$0xff] }
 0x3a7   :  { %v2556_v36 = vpop.permute.xlu0 %2555  ;;  %v2558_v40 = vpop.permute.xlu1 %2557 }
 0x3a8   :  { %2694 = vst.msk [vmem:[#allocation3 + $0x1b0] sm:$0xff] %vm2639_vm7, %v2556_v36  ;;  %2695 = vst.msk [vmem:[#allocation3 + $0x1b8] sm:$0xff] %vm2639_vm7, %v2558_v40 }
 0x3a9   :  { %3229 = vrot.lane.b32.xlu0 %v3095_v2, %s9899_s1  ;;  %3231 = vrot.lane.b32.xlu1 %v3096_v10, %s9899_s1  ;;  %v3126_v2 = vld [vmem:[#allocation2 + $0x21a] sm:$0xff]  ;;  %v3127_v10 = vld [vmem:[#allocation2 + $0x22a] sm:$0xff] }
 0x3ab   :  { %v2560_v44 = vpop.permute.xlu0 %2559  ;;  %v2562_v29 = vpop.permute.xlu1 %2561 }
 0x3ac   :  { %2696 = vst.msk [vmem:[#allocation3 + $0x1c0] sm:$0xff] %vm2639_vm7, %v2560_v44  ;;  %2697 = vst.msk [vmem:[#allocation3 + $0x1c8] sm:$0xff] %vm2639_vm7, %v2562_v29 }
 0x3ad   :  { %3233 = vrot.lane.b32.xlu0 %v3097_v60, %s9899_s1  ;;  %3235 = vrot.lane.b32.xlu1 %v3098_v55, %s9899_s1  ;;  %v3128_v60 = vld [vmem:[#allocation2 + $0x232] sm:$0xff]  ;;  %v3129_v55 = vld [vmem:[#allocation2 + $0x242] sm:$0xff] }
 0x3af   :  { %v2564_v25 = vpop.permute.xlu0 %2563  ;;  %v2566_v28 = vpop.permute.xlu1 %2565 }
 0x3b0   :  { %2698 = vst.msk [vmem:[#allocation3 + $0x1d0] sm:$0xff] %vm2639_vm7, %v2564_v25  ;;  %2699 = vst.msk [vmem:[#allocation3 + $0x1d8] sm:$0xff] %vm2639_vm7, %v2566_v28 }
 0x3b1   :  { %3237 = vrot.lane.b32.xlu0 %v3099_v61, %s9899_s1  ;;  %3239 = vrot.lane.b32.xlu1 %v3100_v59, %s9899_s1  ;;  %v3130_v61 = vld [vmem:[#allocation2 + $0x24a] sm:$0xff]  ;;  %v2746_v59 = vld [vmem:[#allocation2 + $0x259] sm:$0xff] }
 0x3b3   :  { %v2568_v22 = vpop.permute.xlu0 %2567  ;;  %v2570_v63 = vpop.permute.xlu1 %2569 }
 0x3b4   :  { %2700 = vst.msk [vmem:[#allocation3 + $0x1e0] sm:$0xff] %vm2639_vm7, %v2568_v22  ;;  %2701 = vst.msk [vmem:[#allocation3 + $0x1e8] sm:$0xff] %vm2639_vm7, %v2570_v63 }
 0x3b5   :  { %3241 = vrot.lane.b32.xlu0 %v3101_v56, %s9899_s1  ;;  %3243 = vrot.lane.b32.xlu1 %v3102_v27, %s9899_s1  ;;  %v2747_v56 = vld [vmem:[#allocation2 + $0x261] sm:$0xff] }
 0x3b6   :  { %v3131_v27 = vld [vmem:[#allocation2 + $0x25a] sm:$0xff] }
 0x3b7   :  { %v2572_v58 = vpop.permute.xlu0 %2571  ;;  %v2574_v57 = vpop.permute.xlu1 %2573 }
 0x3b8   :  { %2702 = vst.msk [vmem:[#allocation3 + $0x1f0] sm:$0xff] %vm2639_vm7, %v2572_v58  ;;  %2703 = vst.msk [vmem:[#allocation3 + $0x1f8] sm:$0xff] %vm2639_vm7, %v2574_v57 }
 0x3b9   :  { %3245 = vrot.lane.b32.xlu0 %v3103_v26, %s9899_s1  ;;  %3247 = vrot.lane.b32.xlu1 %v3104_v38, %s9899_s1  ;;  %v3132_v26 = vld [vmem:[#allocation2 + $0x262] sm:$0xff]  ;;  %v2748_v38 = vld [vmem:[#allocation2 + $0x271] sm:$0xff] }
 0x3bb   :  { %v2833_v52 = vpop.permute.xlu0 %2832  ;;  %v2835_v50 = vpop.permute.xlu1 %2834 }
 0x3bc   :  { %3025 = vst.msk [vmem:[#allocation3] sm:$0xff] %vm3024_vm9, %v2833_v52  ;;  %3026 = vst.msk [vmem:[#allocation3 + $0x8] sm:$0xff] %vm3024_vm9, %v2835_v50 }
 0x3bd   :  { %3249 = vrot.lane.b32.xlu0 %v3105_v24, %s9899_s1  ;;  %3251 = vrot.lane.b32.xlu1 %v3106_v54, %s9899_s1  ;;  %v2749_v24 = vld [vmem:[#allocation2 + $0x279] sm:$0xff] }
 0x3be   :  { %v3133_v54 = vld [vmem:[#allocation2 + $0x272] sm:$0xff] }
 0x3bf   :  { %v2837_v49 = vpop.permute.xlu0 %2836  ;;  %v2839_v46 = vpop.permute.xlu1 %2838 }
 0x3c0   :  { %3027 = vst.msk [vmem:[#allocation3 + $0x10] sm:$0xff] %vm3024_vm9, %v2837_v49  ;;  %3028 = vst.msk [vmem:[#allocation3 + $0x18] sm:$0xff] %vm3024_vm9, %v2839_v46 }
 0x3c1   :  { %3253 = vrot.lane.b32.xlu0 %v3107_v0, %s9899_s1  ;;  %3255 = vrot.lane.b32.xlu1 %v3108_v62, %s9899_s1  ;;  %v3134_v0 = vld [vmem:[#allocation2 + $0x27a] sm:$0xff]  ;;  %v2750_v62 = vld [vmem:[#allocation2 + $0x289] sm:$0xff] }
 0x3c3   :  { %v2841_v4 = vpop.permute.xlu0 %2840  ;;  %v2843_v43 = vpop.permute.xlu1 %2842 }
 0x3c4   :  { %3029 = vst.msk [vmem:[#allocation3 + $0x20] sm:$0xff] %vm3024_vm9, %v2841_v4  ;;  %3030 = vst.msk [vmem:[#allocation3 + $0x28] sm:$0xff] %vm3024_vm9, %v2843_v43 }
 0x3c5   :  { %3257 = vrot.lane.b32.xlu0 %v3109_v48, %s9899_s1  ;;  %3259 = vrot.lane.b32.xlu1 %v3110_v53, %s9899_s1  ;;  %v2751_v48 = vld [vmem:[#allocation2 + $0x291] sm:$0xff] }
 0x3c6   :  { %v3135_v53 = vld [vmem:[#allocation2 + $0x28a] sm:$0xff] }
 0x3c7   :  { %v2845_v42 = vpop.permute.xlu0 %2844  ;;  %v2847_v1 = vpop.permute.xlu1 %2846 }
 0x3c8   :  { %3031 = vst.msk [vmem:[#allocation3 + $0x30] sm:$0xff] %vm3024_vm9, %v2845_v42  ;;  %3032 = vst.msk [vmem:[#allocation3 + $0x38] sm:$0xff] %vm3024_vm9, %v2847_v1 }
 0x3c9   :  { %3261 = vrot.lane.b32.xlu0 %v3111_v5, %s9899_s1  ;;  %3263 = vrot.lane.b32.xlu1 %v3112_v51, %s9899_s1  ;;  %v3136_v5 = vld [vmem:[#allocation2 + $0x292] sm:$0xff]  ;;  %v2752_v51 = vld [vmem:[#allocation2 + $0x2a1] sm:$0xff] }
 0x3cb   :  { %v2849_v34 = vpop.permute.xlu0 %2848  ;;  %v2851_v41 = vpop.permute.xlu1 %2850 }
 0x3cc   :  { %3033 = vst.msk [vmem:[#allocation3 + $0x40] sm:$0xff] %vm3024_vm9, %v2849_v34  ;;  %3034 = vst.msk [vmem:[#allocation3 + $0x48] sm:$0xff] %vm3024_vm9, %v2851_v41 }
 0x3cd   :  { %3265 = vrot.lane.b32.xlu0 %v3113_v8, %s9899_s1  ;;  %3267 = vrot.lane.b32.xlu1 %v3114_v35, %s9899_s1  ;;  %v2753_v8 = vld [vmem:[#allocation2 + $0x2a9] sm:$0xff] }
 0x3ce   :  { %v3137_v35 = vld [vmem:[#allocation2 + $0x2a2] sm:$0xff] }
 0x3cf   :  { %v2853_v32 = vpop.permute.xlu0 %2852  ;;  %v2855_v30 = vpop.permute.xlu1 %2854 }
 0x3d0   :  { %3035 = vst.msk [vmem:[#allocation3 + $0x50] sm:$0xff] %vm3024_vm9, %v2853_v32  ;;  %3036 = vst.msk [vmem:[#allocation3 + $0x58] sm:$0xff] %vm3024_vm9, %v2855_v30 }
 0x3d1   :  { %3269 = vrot.lane.b32.xlu0 %v3115_v37, %s9899_s1  ;;  %3271 = vrot.lane.b32.xlu1 %v3116_v39, %s9899_s1  ;;  %v3138_v37 = vld [vmem:[#allocation2 + $0x2aa] sm:$0xff]  ;;  %v2754_v39 = vld [vmem:[#allocation2 + $0x2b9] sm:$0xff] }
 0x3d3   :  { %v2857_v21 = vpop.permute.xlu0 %2856  ;;  %v2859_v19 = vpop.permute.xlu1 %2858 }
 0x3d4   :  { %3037 = vst.msk [vmem:[#allocation3 + $0x60] sm:$0xff] %vm3024_vm9, %v2857_v21  ;;  %3038 = vst.msk [vmem:[#allocation3 + $0x68] sm:$0xff] %vm3024_vm9, %v2859_v19 }
 0x3d5   :  { %3273 = vrot.lane.b32.xlu0 %v3117_v45, %s9899_s1  ;;  %3275 = vrot.lane.b32.xlu1 %v3118_v33, %s9899_s1  ;;  %v2755_v45 = vld [vmem:[#allocation2 + $0x2c1] sm:$0xff] }
 0x3d6   :  { %v3139_v33 = vld [vmem:[#allocation2 + $0x2ba] sm:$0xff] }
 0x3d7   :  { %v2861_v17 = vpop.permute.xlu0 %2860  ;;  %v2863_v15 = vpop.permute.xlu1 %2862 }
 0x3d8   :  { %3039 = vst.msk [vmem:[#allocation3 + $0x70] sm:$0xff] %vm3024_vm9, %v2861_v17  ;;  %3040 = vst.msk [vmem:[#allocation3 + $0x78] sm:$0xff] %vm3024_vm9, %v2863_v15 }
 0x3d9   :  { %3277 = vrot.lane.b32.xlu0 %v3119_v31, %s9899_s1  ;;  %3279 = vrot.lane.b32.xlu1 %v3120_v23, %s9899_s1  ;;  %v3140_v31 = vld [vmem:[#allocation2 + $0x2c2] sm:$0xff]  ;;  %v2756_v23 = vld [vmem:[#allocation2 + $0x2d1] sm:$0xff] }
 0x3db   :  { %v2865_v13 = vpop.permute.xlu0 %2864  ;;  %v2867_v11 = vpop.permute.xlu1 %2866 }
 0x3dc   :  { %3041 = vst.msk [vmem:[#allocation3 + $0x80] sm:$0xff] %vm3024_vm9, %v2865_v13  ;;  %3042 = vst.msk [vmem:[#allocation3 + $0x88] sm:$0xff] %vm3024_vm9, %v2867_v11  ;;  %v2757_v13 = vld [vmem:[#allocation2 + $0x2d9] sm:$0xff] }
 0x3dd   :  { %3281 = vrot.lane.b32.xlu0 %v3121_v20, %s9899_s1  ;;  %3283 = vrot.lane.b32.xlu1 %v3122_v18, %s9899_s1 }
 0x3df   :  { %v2869_v9 = vpop.permute.xlu0 %2868  ;;  %v2871_v3 = vpop.permute.xlu1 %2870 }
 0x3e0   :  { %3043 = vst.msk [vmem:[#allocation3 + $0x90] sm:$0xff] %vm3024_vm9, %v2869_v9  ;;  %3044 = vst.msk [vmem:[#allocation3 + $0x98] sm:$0xff] %vm3024_vm9, %v2871_v3  ;;  %v3142_v3 = vld [vmem:[#allocation2 + $0x2da] sm:$0xff] }
 0x3e1   :  { %3285 = vrot.lane.b32.xlu0 %v3123_v16, %s9899_s1  ;;  %3287 = vrot.lane.b32.xlu1 %v3124_v14, %s9899_s1  ;;  %v3141_v16 = vld [vmem:[#allocation2 + $0x2d2] sm:$0xff] }
 0x3e3   :  { %v2873_v7 = vpop.permute.xlu0 %2872  ;;  %v2875_v36 = vpop.permute.xlu1 %2874 }
 0x3e4   :  { %3045 = vst.msk [vmem:[#allocation3 + $0xa0] sm:$0xff] %vm3024_vm9, %v2873_v7  ;;  %3046 = vst.msk [vmem:[#allocation3 + $0xa8] sm:$0xff] %vm3024_vm9, %v2875_v36 }
 0x3e5   :  { %3289 = vrot.lane.b32.xlu0 %v3125_v12, %s9899_s1  ;;  %3291 = vrot.lane.b32.xlu1 %v3126_v2, %s9899_s1  ;;  %v2758_v2 = vld [vmem:[#allocation2 + $0x2e9] sm:$0xff] }
 0x3e7   :  { %v2877_v40 = vpop.permute.xlu0 %2876  ;;  %v2879_v44 = vpop.permute.xlu1 %2878 }
 0x3e8   :  { %3047 = vst.msk [vmem:[#allocation3 + $0xb0] sm:$0xff] %vm3024_vm9, %v2877_v40  ;;  %3048 = vst.msk [vmem:[#allocation3 + $0xb8] sm:$0xff] %vm3024_vm9, %v2879_v44  ;;  %v2759_v40 = vld [vmem:[#allocation2 + $0x2f1] sm:$0xff] }
 0x3e9   :  { %3293 = vrot.lane.b32.xlu0 %v3127_v10, %s9899_s1  ;;  %3295 = vrot.lane.b32.xlu1 %v3128_v60, %s9899_s1 }
 0x3eb   :  { %v2881_v29 = vpop.permute.xlu0 %2880  ;;  %v2883_v25 = vpop.permute.xlu1 %2882 }
 0x3ec   :  { %3049 = vst.msk [vmem:[#allocation3 + $0xc0] sm:$0xff] %vm3024_vm9, %v2881_v29  ;;  %3050 = vst.msk [vmem:[#allocation3 + $0xc8] sm:$0xff] %vm3024_vm9, %v2883_v25  ;;  %v3144_v25 = vld [vmem:[#allocation2 + $0x2f2] sm:$0xff] }
 0x3ed   :  { %3297 = vrot.lane.b32.xlu0 %v3129_v55, %s9899_s1  ;;  %3299 = vrot.lane.b32.xlu1 %v3130_v61, %s9899_s1  ;;  %v3143_v55 = vld [vmem:[#allocation2 + $0x2ea] sm:$0xff] }
 0x3ef   :  { %v2885_v28 = vpop.permute.xlu0 %2884  ;;  %v2887_v22 = vpop.permute.xlu1 %2886 }
 0x3f0   :  { %3051 = vst.msk [vmem:[#allocation3 + $0xd0] sm:$0xff] %vm3024_vm9, %v2885_v28  ;;  %3052 = vst.msk [vmem:[#allocation3 + $0xd8] sm:$0xff] %vm3024_vm9, %v2887_v22 }
 0x3f1   :  { %2916 = vrot.lane.b32.xlu0 %v2746_v59, %s9898_s23  ;;  %2918 = vrot.lane.b32.xlu1 %v2747_v56, %s9898_s23  ;;  %v2760_v56 = vld [vmem:[#allocation2 + $0x301] sm:$0xff] }
 0x3f3   :  { %v2889_v63 = vpop.permute.xlu0 %2888  ;;  %v2891_v58 = vpop.permute.xlu1 %2890 }
 0x3f4   :  { %3053 = vst.msk [vmem:[#allocation3 + $0xe0] sm:$0xff] %vm3024_vm9, %v2889_v63  ;;  %3054 = vst.msk [vmem:[#allocation3 + $0xe8] sm:$0xff] %vm3024_vm9, %v2891_v58  ;;  %v2761_v63 = vld [vmem:[#allocation2 + $0x309] sm:$0xff] }
 0x3f5   :  { %3301 = vrot.lane.b32.xlu0 %v3131_v27, %s9899_s1  ;;  %3303 = vrot.lane.b32.xlu1 %v3132_v26, %s9899_s1 }
 0x3f7   :  { %v2893_v57 = vpop.permute.xlu0 %2892  ;;  %v2895_v52 = vpop.permute.xlu1 %2894 }
 0x3f8   :  { %3055 = vst.msk [vmem:[#allocation3 + $0xf0] sm:$0xff] %vm3024_vm9, %v2893_v57  ;;  %3056 = vst.msk [vmem:[#allocation3 + $0xf8] sm:$0xff] %vm3024_vm9, %v2895_v52  ;;  %v3146_v52 = vld [vmem:[#allocation2 + $0x30a] sm:$0xff] }
 0x3f9   :  { %2920 = vrot.lane.b32.xlu0 %v2748_v38, %s9898_s23  ;;  %2922 = vrot.lane.b32.xlu1 %v2749_v24, %s9898_s23  ;;  %v3145_v38 = vld [vmem:[#allocation2 + $0x302] sm:$0xff] }
 0x3fb   :  { %v2897_v50 = vpop.permute.xlu0 %2896  ;;  %v2899_v49 = vpop.permute.xlu1 %2898 }
 0x3fc   :  { %3057 = vst.msk [vmem:[#allocation3 + $0x100] sm:$0xff] %vm3024_vm9, %v2897_v50  ;;  %3058 = vst.msk [vmem:[#allocation3 + $0x108] sm:$0xff] %vm3024_vm9, %v2899_v49 }
 0x3fd   :  { %3305 = vrot.lane.b32.xlu0 %v3133_v54, %s9899_s1  ;;  %3307 = vrot.lane.b32.xlu1 %v3134_v0, %s9899_s1  ;;  %v2762_v0 = vld [vmem:[#allocation2 + $0x319] sm:$0xff] }
 0x3ff   :  { %v2901_v46 = vpop.permute.xlu0 %2900  ;;  %v2903_v4 = vpop.permute.xlu1 %2902 }
 0x400   :  { %3059 = vst.msk [vmem:[#allocation3 + $0x110] sm:$0xff] %vm3024_vm9, %v2901_v46  ;;  %3060 = vst.msk [vmem:[#allocation3 + $0x118] sm:$0xff] %vm3024_vm9, %v2903_v4  ;;  %v2763_v46 = vld [vmem:[#allocation2 + $0x321] sm:$0xff] }
 0x401   :  { %2924 = vrot.lane.b32.xlu0 %v2750_v62, %s9898_s23  ;;  %2926 = vrot.lane.b32.xlu1 %v2751_v48, %s9898_s23 }
 0x403   :  { %v2905_v43 = vpop.permute.xlu0 %2904  ;;  %v2907_v42 = vpop.permute.xlu1 %2906 }
 0x404   :  { %3061 = vst.msk [vmem:[#allocation3 + $0x120] sm:$0xff] %vm3024_vm9, %v2905_v43  ;;  %3062 = vst.msk [vmem:[#allocation3 + $0x128] sm:$0xff] %vm3024_vm9, %v2907_v42  ;;  %v3148_v42 = vld [vmem:[#allocation2 + $0x322] sm:$0xff] }
 0x405   :  { %3309 = vrot.lane.b32.xlu0 %v3135_v53, %s9899_s1  ;;  %3311 = vrot.lane.b32.xlu1 %v3136_v5, %s9899_s1  ;;  %v3147_v53 = vld [vmem:[#allocation2 + $0x31a] sm:$0xff] }
 0x407   :  { %v2909_v1 = vpop.permute.xlu0 %2908  ;;  %v2911_v34 = vpop.permute.xlu1 %2910 }
 0x408   :  { %3063 = vst.msk [vmem:[#allocation3 + $0x130] sm:$0xff] %vm3024_vm9, %v2909_v1  ;;  %3064 = vst.msk [vmem:[#allocation3 + $0x138] sm:$0xff] %vm3024_vm9, %v2911_v34 }
 0x409   :  { %2928 = vrot.lane.b32.xlu0 %v2752_v51, %s9898_s23  ;;  %2930 = vrot.lane.b32.xlu1 %v2753_v8, %s9898_s23  ;;  %v2764_v8 = vld [vmem:[#allocation2 + $0x331] sm:$0xff] }
 0x40b   :  { %v2913_v41 = vpop.permute.xlu0 %2912  ;;  %v2915_v32 = vpop.permute.xlu1 %2914 }
 0x40c   :  { %3065 = vst.msk [vmem:[#allocation3 + $0x140] sm:$0xff] %vm3024_vm9, %v2913_v41  ;;  %3066 = vst.msk [vmem:[#allocation3 + $0x148] sm:$0xff] %vm3024_vm9, %v2915_v32  ;;  %v2765_v41 = vld [vmem:[#allocation2 + $0x339] sm:$0xff] }
 0x40d   :  { %3313 = vrot.lane.b32.xlu0 %v3137_v35, %s9899_s1  ;;  %3315 = vrot.lane.b32.xlu1 %v3138_v37, %s9899_s1 }
 0x40f   :  { %v3218_v30 = vpop.permute.xlu0 %3217  ;;  %v3220_v21 = vpop.permute.xlu1 %3219 }
 0x410   :  { %3410 = vst.msk [vmem:[#allocation3] sm:$0xff] %vm3409_vm10, %v3218_v30  ;;  %3411 = vst.msk [vmem:[#allocation3 + $0x8] sm:$0xff] %vm3409_vm10, %v3220_v21  ;;  %v3150_v21 = vld [vmem:[#allocation2 + $0x33a] sm:$0xff] }
 0x411   :  { %2932 = vrot.lane.b32.xlu0 %v2754_v39, %s9898_s23  ;;  %2934 = vrot.lane.b32.xlu1 %v2755_v45, %s9898_s23  ;;  %v3149_v39 = vld [vmem:[#allocation2 + $0x332] sm:$0xff] }
 0x413   :  { %v3222_v19 = vpop.permute.xlu0 %3221  ;;  %v3224_v17 = vpop.permute.xlu1 %3223 }
 0x414   :  { %3412 = vst.msk [vmem:[#allocation3 + $0x10] sm:$0xff] %vm3409_vm10, %v3222_v19  ;;  %3413 = vst.msk [vmem:[#allocation3 + $0x18] sm:$0xff] %vm3409_vm10, %v3224_v17 }
 0x415   :  { %3317 = vrot.lane.b32.xlu0 %v3139_v33, %s9899_s1  ;;  %3319 = vrot.lane.b32.xlu1 %v3140_v31, %s9899_s1  ;;  %v2766_v31 = vld [vmem:[#allocation2 + $0x349] sm:$0xff] }
 0x417   :  { %v3226_v15 = vpop.permute.xlu0 %3225  ;;  %v3474_v20 = vld [vmem:[#allocation3] sm:$0xff]  ;;  %v3228_v18 = vpop.permute.xlu1 %3227  ;;  %v3475_v11 = vld [vmem:[#allocation3 + $0x8] sm:$0xff] }
 0x418   :  { %3414 = vst.msk [vmem:[#allocation3 + $0x20] sm:$0xff] %vm3409_vm10, %v3226_v15  ;;  %9660 = vmatprep.mubr.msk.f32.mxu0 %vm3543_vm11, %v3474_v20  ;;  %3415 = vst.msk [vmem:[#allocation3 + $0x28] sm:$0xff] %vm3409_vm10, %v3228_v18  ;;  %v2767_v15 = vld [vmem:[#allocation2 + $0x351] sm:$0xff] }
 0x419   :  { %2936 = vrot.lane.b32.xlu0 %v2756_v23, %s9898_s23  ;;  %9661 = vmatmul.mubr.msk.f32.vlgmr.msra.gmra.mrb[0].mxu0 %vm3543_vm11, %v3475_v11  ;;  %v3151_v18 = vld [vmem:[#allocation2 + $0x34a] sm:$0xff] }
 0x41a   :  { %2938 = vrot.lane.b32.xlu1 %v2757_v13, %s9898_s23 }
 0x41b   :  { %v3230_v9 = vpop.permute.xlu0 %3229  ;;  %v3476_v14 = vld [vmem:[#allocation3 + $0x10] sm:$0xff]  ;;  %v3232_v12 = vpop.permute.xlu1 %3231  ;;  %v3477_v7 = vld [vmem:[#allocation3 + $0x18] sm:$0xff] }
 0x41c   :  { %3416 = vst.msk [vmem:[#allocation3 + $0x30] sm:$0xff] %vm3409_vm10, %v3230_v9  ;;  %9663 = vmatprep.mubr.msk.f32.mxu0 %vm3543_vm11, %v3476_v14  ;;  %3417 = vst.msk [vmem:[#allocation3 + $0x38] sm:$0xff] %vm3409_vm10, %v3232_v12  ;;  %v3152_v9 = vld [vmem:[#allocation2 + $0x352] sm:$0xff] }
 0x41d   :  { %3321 = vrot.lane.b32.xlu0 %v3141_v16, %s9899_s1  ;;  %9664 = vmatmul.mubr.msk.f32.gmra.mrb[2].mxu0 %vm3543_vm11, %v3477_v7 }
 0x41e   :  { %3323 = vrot.lane.b32.xlu1 %v3142_v3, %s9899_s1 }
 0x41f   :  { %v3234_v36 = vpop.permute.xlu0 %3233  ;;  %v3478_v10 = vld [vmem:[#allocation3 + $0x20] sm:$0xff]  ;;  %v3236_v60 = vpop.permute.xlu1 %3235  ;;  %v3479_v44 = vld [vmem:[#allocation3 + $0x28] sm:$0xff] }
 0x420   :  { %3418 = vst.msk [vmem:[#allocation3 + $0x40] sm:$0xff] %vm3409_vm10, %v3234_v36  ;;  %9666 = vmatprep.mubr.msk.f32.mxu0 %vm3543_vm11, %v3478_v10  ;;  %3419 = vst.msk [vmem:[#allocation3 + $0x48] sm:$0xff] %vm3409_vm10, %v3236_v60 }
 0x421   :  { %2940 = vrot.lane.b32.xlu0 %v2758_v2, %s9898_s23  ;;  %9667 = vmatmul.mubr.msk.f32.gmra.mrb[4].mxu0 %vm3543_vm11, %v3479_v44 }
 0x422   :  { %2942 = vrot.lane.b32.xlu1 %v2759_v40, %s9898_s23 }
 0x423   :  { %v3238_v29 = vpop.permute.xlu0 %3237  ;;  %v3480_v61 = vld [vmem:[#allocation3 + $0x30] sm:$0xff]  ;;  %v3240_v59 = vpop.permute.xlu1 %3239  ;;  %v3481_v28 = vld [vmem:[#allocation3 + $0x38] sm:$0xff] }
 0x424   :  { %3420 = vst.msk [vmem:[#allocation3 + $0x50] sm:$0xff] %vm3409_vm10, %v3238_v29  ;;  %9669 = vmatprep.mubr.msk.f32.mxu0 %vm3543_vm11, %v3480_v61  ;;  %3421 = vst.msk [vmem:[#allocation3 + $0x58] sm:$0xff] %vm3409_vm10, %v3240_v59 }
 0x425   :  { %3325 = vrot.lane.b32.xlu0 %v3143_v55, %s9899_s1  ;;  %9670 = vmatmul.mubr.msk.f32.gmra.mrb[6].mxu0 %vm3543_vm11, %v3481_v28 }
 0x426   :  { %3327 = vrot.lane.b32.xlu1 %v3144_v25, %s9899_s1 }
 0x427   :  { %v3242_v22 = vpop.permute.xlu0 %3241  ;;  %v3482_v27 = vld [vmem:[#allocation3 + $0x40] sm:$0xff]  ;;  %v3244_v26 = vpop.permute.xlu1 %3243  ;;  %v3483_v58 = vld [vmem:[#allocation3 + $0x48] sm:$0xff] }
 0x428   :  { %3422 = vst.msk [vmem:[#allocation3 + $0x60] sm:$0xff] %vm3409_vm10, %v3242_v22  ;;  %9672 = vmatprep.mubr.msk.f32.mxu0 %vm3543_vm11, %v3482_v27  ;;  %3423 = vst.msk [vmem:[#allocation3 + $0x68] sm:$0xff] %vm3409_vm10, %v3244_v26 }
 0x429   :  { %2944 = vrot.lane.b32.xlu0 %v2760_v56, %s9898_s23  ;;  %9673 = vmatmul.mubr.msk.f32.gmra.mrb[8].mxu0 %vm3543_vm11, %v3483_v58 }
 0x42a   :  { %2946 = vrot.lane.b32.xlu1 %v2761_v63, %s9898_s23 }
 0x42b   :  { %v3246_v57 = vpop.permute.xlu0 %3245  ;;  %v3484_v24 = vld [vmem:[#allocation3 + $0x50] sm:$0xff]  ;;  %v3248_v54 = vpop.permute.xlu1 %3247  ;;  %v3485_v50 = vld [vmem:[#allocation3 + $0x58] sm:$0xff] }
 0x42c   :  { %3424 = vst.msk [vmem:[#allocation3 + $0x70] sm:$0xff] %vm3409_vm10, %v3246_v57  ;;  %9675 = vmatprep.mubr.msk.f32.mxu0 %vm3543_vm11, %v3484_v24  ;;  %3425 = vst.msk [vmem:[#allocation3 + $0x78] sm:$0xff] %vm3409_vm10, %v3248_v54 }
 0x42d   :  { %3329 = vrot.lane.b32.xlu0 %v3145_v38, %s9899_s1  ;;  %9676 = vmatmul.mubr.msk.f32.gmra.mrb[10].mxu0 %vm3543_vm11, %v3485_v50 }
 0x42e   :  { %3331 = vrot.lane.b32.xlu1 %v3146_v52, %s9899_s1 }
 0x42f   :  { %v3250_v49 = vpop.permute.xlu0 %3249  ;;  %v3486_v62 = vld [vmem:[#allocation3 + $0x60] sm:$0xff]  ;;  %v3252_v48 = vpop.permute.xlu1 %3251  ;;  %v3487_v4 = vld [vmem:[#allocation3 + $0x68] sm:$0xff] }
 0x430   :  { %3426 = vst.msk [vmem:[#allocation3 + $0x80] sm:$0xff] %vm3409_vm10, %v3250_v49  ;;  %9678 = vmatprep.mubr.msk.f32.mxu0 %vm3543_vm11, %v3486_v62  ;;  %3427 = vst.msk [vmem:[#allocation3 + $0x88] sm:$0xff] %vm3409_vm10, %v3252_v48 }
 0x431   :  { %2948 = vrot.lane.b32.xlu0 %v2762_v0, %s9898_s23  ;;  %9679 = vmatmul.mubr.msk.f32.gmra.mrb[12].mxu0 %vm3543_vm11, %v3487_v4 }
 0x432   :  { %2950 = vrot.lane.b32.xlu1 %v2763_v46, %s9898_s23 }
 0x433   :  { %v3254_v43 = vpop.permute.xlu0 %3253  ;;  %v3488_v5 = vld [vmem:[#allocation3 + $0x70] sm:$0xff]  ;;  %v3256_v51 = vpop.permute.xlu1 %3255  ;;  %v3489_v1 = vld [vmem:[#allocation3 + $0x78] sm:$0xff] }
 0x434   :  { %3428 = vst.msk [vmem:[#allocation3 + $0x90] sm:$0xff] %vm3409_vm10, %v3254_v43  ;;  %9681 = vmatprep.mubr.msk.f32.mxu0 %vm3543_vm11, %v3488_v5  ;;  %3429 = vst.msk [vmem:[#allocation3 + $0x98] sm:$0xff] %vm3409_vm10, %v3256_v51 }
 0x435   :  { %3333 = vrot.lane.b32.xlu0 %v3147_v53, %s9899_s1  ;;  %9682 = vmatmul.mubr.msk.f32.gmra.mrb[14].mxu0 %vm3543_vm11, %v3489_v1 }
 0x436   :  { %3335 = vrot.lane.b32.xlu1 %v3148_v42, %s9899_s1 }
 0x437   :  { %v3258_v34 = vpop.permute.xlu0 %3257  ;;  %v3490_v35 = vld [vmem:[#allocation3 + $0x80] sm:$0xff]  ;;  %v3260_v37 = vpop.permute.xlu1 %3259  ;;  %v3491_v32 = vld [vmem:[#allocation3 + $0x88] sm:$0xff] }
 0x438   :  { %3430 = vst.msk [vmem:[#allocation3 + $0xa0] sm:$0xff] %vm3409_vm10, %v3258_v34  ;;  %9684 = vmatprep.mubr.msk.f32.mxu0 %vm3543_vm11, %v3490_v35  ;;  %3431 = vst.msk [vmem:[#allocation3 + $0xa8] sm:$0xff] %vm3409_vm10, %v3260_v37 }
 0x439   :  { %2952 = vrot.lane.b32.xlu0 %v2764_v8, %s9898_s23  ;;  %9685 = vmatmul.mubr.msk.f32.gmra.mrb[16].mxu0 %vm3543_vm11, %v3491_v32 }
 0x43a   :  { %2954 = vrot.lane.b32.xlu1 %v2765_v41, %s9898_s23 }
 0x43b   :  { %v3262_v30 = vpop.permute.xlu0 %3261  ;;  %v3492_v45 = vld [vmem:[#allocation3 + $0x90] sm:$0xff]  ;;  %v3264_v33 = vpop.permute.xlu1 %3263  ;;  %v3493_v19 = vld [vmem:[#allocation3 + $0x98] sm:$0xff] }
 0x43c   :  { %3432 = vst.msk [vmem:[#allocation3 + $0xb0] sm:$0xff] %vm3409_vm10, %v3262_v30  ;;  %9687 = vmatprep.mubr.msk.f32.mxu0 %vm3543_vm11, %v3492_v45  ;;  %3433 = vst.msk [vmem:[#allocation3 + $0xb8] sm:$0xff] %vm3409_vm10, %v3264_v33 }
 0x43d   :  { %3337 = vrot.lane.b32.xlu0 %v3149_v39, %s9899_s1  ;;  %9688 = vmatmul.mubr.msk.f32.gmra.mrb[18].mxu0 %vm3543_vm11, %v3493_v19 }
 0x43e   :  { %3339 = vrot.lane.b32.xlu1 %v3150_v21, %s9899_s1 }
 0x43f   :  { %v3266_v17 = vpop.permute.xlu0 %3265  ;;  %v3494_v23 = vld [vmem:[#allocation3 + $0xa0] sm:$0xff]  ;;  %v3268_v20 = vpop.permute.xlu1 %3267  ;;  %v3495_v13 = vld [vmem:[#allocation3 + $0xa8] sm:$0xff] }
 0x440   :  { %3434 = vst.msk [vmem:[#allocation3 + $0xc0] sm:$0xff] %vm3409_vm10, %v3266_v17  ;;  %9690 = vmatprep.mubr.msk.f32.mxu0 %vm3543_vm11, %v3494_v23  ;;  %3435 = vst.msk [vmem:[#allocation3 + $0xc8] sm:$0xff] %vm3409_vm10, %v3268_v20 }
 0x441   :  { %2956 = vrot.lane.b32.xlu0 %v2766_v31, %s9898_s23  ;;  %9691 = vmatmul.mubr.msk.f32.gmra.mrb[20].mxu0 %vm3543_vm11, %v3495_v13 }
 0x442   :  { %2958 = vrot.lane.b32.xlu1 %v2767_v15, %s9898_s23 }
 0x443   :  { %v3270_v11 = vpop.permute.xlu0 %3269  ;;  %v3496_v16 = vld [vmem:[#allocation3 + $0xb0] sm:$0xff]  ;;  %v3272_v14 = vpop.permute.xlu1 %3271  ;;  %v3497_v3 = vld [vmem:[#allocation3 + $0xb8] sm:$0xff] }
 0x444   :  { %3436 = vst.msk [vmem:[#allocation3 + $0xd0] sm:$0xff] %vm3409_vm10, %v3270_v11  ;;  %9693 = vmatprep.mubr.msk.f32.mxu0 %vm3543_vm11, %v3496_v16  ;;  %3437 = vst.msk [vmem:[#allocation3 + $0xd8] sm:$0xff] %vm3409_vm10, %v3272_v14 }
 0x445   :  { %3341 = vrot.lane.b32.xlu0 %v3151_v18, %s9899_s1  ;;  %9694 = vmatmul.mubr.msk.f32.gmra.mrb[22].mxu0 %vm3543_vm11, %v3497_v3 }
 0x446   :  { %3343 = vrot.lane.b32.xlu1 %v3152_v9, %s9899_s1 }
 0x447   :  { %v3274_v12 = vpop.permute.xlu0 %3273  ;;  %v3498_v7 = vld [vmem:[#allocation3 + $0xc0] sm:$0xff]  ;;  %v3276_v2 = vpop.permute.xlu1 %3275  ;;  %v3499_v36 = vld [vmem:[#allocation3 + $0xc8] sm:$0xff] }
 0x448   :  { %3438 = vst.msk [vmem:[#allocation3 + $0xe0] sm:$0xff] %vm3409_vm10, %v3274_v12  ;;  %9696 = vmatprep.mubr.msk.f32.mxu0 %vm3543_vm11, %v3498_v7  ;;  %3439 = vst.msk [vmem:[#allocation3 + $0xe8] sm:$0xff] %vm3409_vm10, %v3276_v2 }
 0x449   :  { %9697 = vmatmul.mubr.msk.f32.gmra.mrb[24].mxu0 %vm3543_vm11, %v3499_v36 }
 0x44b   :  { %v3278_v10 = vpop.permute.xlu0 %3277  ;;  %v3500_v40 = vld [vmem:[#allocation3 + $0xd0] sm:$0xff]  ;;  %v3280_v60 = vpop.permute.xlu1 %3279  ;;  %v3501_v44 = vld [vmem:[#allocation3 + $0xd8] sm:$0xff] }
 0x44c   :  { %3440 = vst.msk [vmem:[#allocation3 + $0xf0] sm:$0xff] %vm3409_vm10, %v3278_v10  ;;  %9699 = vmatprep.mubr.msk.f32.mxu0 %vm3543_vm11, %v3500_v40  ;;  %3441 = vst.msk [vmem:[#allocation3 + $0xf8] sm:$0xff] %vm3409_vm10, %v3280_v60 }
 0x44d   :  { %9700 = vmatmul.mubr.msk.f32.gmra.mrb[26].mxu0 %vm3543_vm11, %v3501_v44 }
 0x44f   :  { %v3282_v55 = vpop.permute.xlu0 %3281  ;;  %v3502_v29 = vld [vmem:[#allocation3 + $0xe0] sm:$0xff]  ;;  %v3284_v61 = vpop.permute.xlu1 %3283  ;;  %v3503_v25 = vld [vmem:[#allocation3 + $0xe8] sm:$0xff] }
 0x450   :  { %3442 = vst.msk [vmem:[#allocation3 + $0x100] sm:$0xff] %vm3409_vm10, %v3282_v55  ;;  %9702 = vmatprep.mubr.msk.f32.mxu0 %vm3543_vm11, %v3502_v29  ;;  %3443 = vst.msk [vmem:[#allocation3 + $0x108] sm:$0xff] %vm3409_vm10, %v3284_v61 }
 0x451   :  { %9703 = vmatmul.mubr.msk.f32.gmra.mrb[28].mxu0 %vm3543_vm11, %v3503_v25 }
 0x453   :  { %v3286_v59 = vpop.permute.xlu0 %3285  ;;  %v3504_v28 = vld [vmem:[#allocation3 + $0xf0] sm:$0xff]  ;;  %v3288_v56 = vpop.permute.xlu1 %3287  ;;  %v3505_v22 = vld [vmem:[#allocation3 + $0xf8] sm:$0xff] }
 0x454   :  { %3444 = vst.msk [vmem:[#allocation3 + $0x110] sm:$0xff] %vm3409_vm10, %v3286_v59  ;;  %9705 = vmatprep.mubr.msk.f32.mxu0 %vm3543_vm11, %v3504_v28  ;;  %3445 = vst.msk [vmem:[#allocation3 + $0x118] sm:$0xff] %vm3409_vm10, %v3288_v56 }
 0x455   :  { %9706 = vmatmul.mubr.msk.f32.gmra.mrb[30].mxu0 %vm3543_vm11, %v3505_v22 }
 0x457   :  { %v3290_v27 = vpop.permute.xlu0 %3289  ;;  %v3506_v63 = vld [vmem:[#allocation3 + $0x100] sm:$0xff]  ;;  %v3292_v26 = vpop.permute.xlu1 %3291  ;;  %v3507_v58 = vld [vmem:[#allocation3 + $0x108] sm:$0xff] }
 0x458   :  { %3446 = vst.msk [vmem:[#allocation3 + $0x120] sm:$0xff] %vm3409_vm10, %v3290_v27  ;;  %9708 = vmatprep.mubr.msk.f32.mxu0 %vm3543_vm11, %v3506_v63  ;;  %3447 = vst.msk [vmem:[#allocation3 + $0x128] sm:$0xff] %vm3409_vm10, %v3292_v26 }
 0x459   :  { %9709 = vmatmul.mubr.msk.f32.gmra.mrb[32].mxu0 %vm3543_vm11, %v3507_v58 }
 0x45b   :  { %v3294_v38 = vpop.permute.xlu0 %3293  ;;  %v3508_v57 = vld [vmem:[#allocation3 + $0x110] sm:$0xff]  ;;  %v3296_v24 = vpop.permute.xlu1 %3295  ;;  %v3509_v52 = vld [vmem:[#allocation3 + $0x118] sm:$0xff] }
 0x45c   :  { %3448 = vst.msk [vmem:[#allocation3 + $0x130] sm:$0xff] %vm3409_vm10, %v3294_v38  ;;  %9711 = vmatprep.mubr.msk.f32.mxu0 %vm3543_vm11, %v3508_v57  ;;  %3449 = vst.msk [vmem:[#allocation3 + $0x138] sm:$0xff] %vm3409_vm10, %v3296_v24 }
 0x45d   :  { %9712 = vmatmul.mubr.msk.f32.gmra.mrb[34].mxu0 %vm3543_vm11, %v3509_v52 }
 0x45f   :  { %v3298_v54 = vpop.permute.xlu0 %3297  ;;  %v3510_v50 = vld [vmem:[#allocation3 + $0x120] sm:$0xff]  ;;  %v3300_v0 = vpop.permute.xlu1 %3299  ;;  %v3511_v49 = vld [vmem:[#allocation3 + $0x128] sm:$0xff] }
 0x460   :  { %3450 = vst.msk [vmem:[#allocation3 + $0x140] sm:$0xff] %vm3409_vm10, %v3298_v54  ;;  %9714 = vmatprep.mubr.msk.f32.mxu0 %vm3543_vm11, %v3510_v50  ;;  %3451 = vst.msk [vmem:[#allocation3 + $0x148] sm:$0xff] %vm3409_vm10, %v3300_v0 }
 0x461   :  { %9715 = vmatmul.mubr.msk.f32.gmra.mrb[36].mxu0 %vm3543_vm11, %v3511_v49 }
 0x463   :  { %v2917_v62 = vpop.permute.xlu0 %2916  ;;  %v3512_v46 = vld [vmem:[#allocation3 + $0x130] sm:$0xff]  ;;  %v2919_v48 = vpop.permute.xlu1 %2918  ;;  %v3513_v4 = vld [vmem:[#allocation3 + $0x138] sm:$0xff] }
 0x464   :  { %3067 = vst.msk [vmem:[#allocation3 + $0x150] sm:$0xff] %vm3024_vm9, %v2917_v62  ;;  %9717 = vmatprep.mubr.msk.f32.mxu0 %vm3543_vm11, %v3512_v46  ;;  %3068 = vst.msk [vmem:[#allocation3 + $0x158] sm:$0xff] %vm3024_vm9, %v2919_v48 }
 0x465   :  { %9718 = vmatmul.mubr.msk.f32.gmra.mrb[38].mxu0 %vm3543_vm11, %v3513_v4 }
 0x467   :  { %v3302_v53 = vpop.permute.xlu0 %3301  ;;  %v3514_v43 = vld [vmem:[#allocation3 + $0x140] sm:$0xff]  ;;  %v3304_v5 = vpop.permute.xlu1 %3303  ;;  %v3515_v42 = vld [vmem:[#allocation3 + $0x148] sm:$0xff] }
 0x468   :  { %3452 = vst.msk [vmem:[#allocation3 + $0x150] sm:$0xff] %vm3409_vm10, %v3302_v53  ;;  %9720 = vmatprep.mubr.msk.f32.mxu0 %vm3543_vm11, %v3514_v43  ;;  %3453 = vst.msk [vmem:[#allocation3 + $0x158] sm:$0xff] %vm3409_vm10, %v3304_v5 }
 0x469   :  { %9721 = vmatmul.mubr.msk.f32.gmra.mrb[40].mxu0 %vm3543_vm11, %v3515_v42 }
 0x46b   :  { %v2921_v51 = vpop.permute.xlu0 %2920  ;;  %v2923_v1 = vpop.permute.xlu1 %2922 }
 0x46c   :  { %3069 = vst.msk [vmem:[#allocation3 + $0x160] sm:$0xff] %vm3024_vm9, %v2921_v51  ;;  %3070 = vst.msk [vmem:[#allocation3 + $0x168] sm:$0xff] %vm3024_vm9, %v2923_v1 }
 0x46f   :  { %v3306_v8 = vpop.permute.xlu0 %3305  ;;  %v3516_v34 = vld [vmem:[#allocation3 + $0x150] sm:$0xff]  ;;  %v3308_v35 = vpop.permute.xlu1 %3307  ;;  %v3517_v41 = vld [vmem:[#allocation3 + $0x158] sm:$0xff] }
 0x470   :  { %3454 = vst.msk [vmem:[#allocation3 + $0x160] sm:$0xff] %vm3409_vm10, %v3306_v8  ;;  %9723 = vmatprep.mubr.msk.f32.mxu0 %vm3543_vm11, %v3516_v34  ;;  %3455 = vst.msk [vmem:[#allocation3 + $0x168] sm:$0xff] %vm3409_vm10, %v3308_v35 }
 0x471   :  { %9724 = vmatmul.mubr.msk.f32.gmra.mrb[42].mxu0 %vm3543_vm11, %v3517_v41 }
 0x473   :  { %v2925_v37 = vpop.permute.xlu0 %2924  ;;  %v2927_v32 = vpop.permute.xlu1 %2926 }
 0x474   :  { %3071 = vst.msk [vmem:[#allocation3 + $0x170] sm:$0xff] %vm3024_vm9, %v2925_v37  ;;  %3072 = vst.msk [vmem:[#allocation3 + $0x178] sm:$0xff] %vm3024_vm9, %v2927_v32 }
 0x477   :  { %v3310_v39 = vpop.permute.xlu0 %3309  ;;  %v3518_v30 = vld [vmem:[#allocation3 + $0x160] sm:$0xff]  ;;  %v3312_v45 = vpop.permute.xlu1 %3311  ;;  %v3519_v21 = vld [vmem:[#allocation3 + $0x168] sm:$0xff] }
 0x478   :  { %3456 = vst.msk [vmem:[#allocation3 + $0x170] sm:$0xff] %vm3409_vm10, %v3310_v39  ;;  %9726 = vmatprep.mubr.msk.f32.mxu0 %vm3543_vm11, %v3518_v30  ;;  %3457 = vst.msk [vmem:[#allocation3 + $0x178] sm:$0xff] %vm3409_vm10, %v3312_v45 }
 0x479   :  { %9727 = vmatmul.mubr.msk.f32.gmra.mrb[44].mxu0 %vm3543_vm11, %v3519_v21 }
 0x47b   :  { %v2929_v33 = vpop.permute.xlu0 %2928  ;;  %v2931_v19 = vpop.permute.xlu1 %2930 }
 0x47c   :  { %3073 = vst.msk [vmem:[#allocation3 + $0x180] sm:$0xff] %vm3024_vm9, %v2929_v33  ;;  %3074 = vst.msk [vmem:[#allocation3 + $0x188] sm:$0xff] %vm3024_vm9, %v2931_v19 }
 0x47f   :  { %v3314_v31 = vpop.permute.xlu0 %3313  ;;  %v3520_v17 = vld [vmem:[#allocation3 + $0x170] sm:$0xff]  ;;  %v3316_v23 = vpop.permute.xlu1 %3315  ;;  %v3521_v15 = vld [vmem:[#allocation3 + $0x178] sm:$0xff] }
 0x480   :  { %3458 = vst.msk [vmem:[#allocation3 + $0x180] sm:$0xff] %vm3409_vm10, %v3314_v31  ;;  %9729 = vmatprep.mubr.msk.f32.mxu0 %vm3543_vm11, %v3520_v17  ;;  %3459 = vst.msk [vmem:[#allocation3 + $0x188] sm:$0xff] %vm3409_vm10, %v3316_v23 }
 0x481   :  { %9730 = vmatmul.mubr.msk.f32.gmra.mrb[46].mxu0 %vm3543_vm11, %v3521_v15 }
 0x483   :  { %v2933_v20 = vpop.permute.xlu0 %2932  ;;  %v2935_v13 = vpop.permute.xlu1 %2934 }
 0x484   :  { %3075 = vst.msk [vmem:[#allocation3 + $0x190] sm:$0xff] %vm3024_vm9, %v2933_v20  ;;  %3076 = vst.msk [vmem:[#allocation3 + $0x198] sm:$0xff] %vm3024_vm9, %v2935_v13 }
 0x487   :  { %v3318_v18 = vpop.permute.xlu0 %3317  ;;  %v3522_v11 = vld [vmem:[#allocation3 + $0x180] sm:$0xff]  ;;  %v3320_v16 = vpop.permute.xlu1 %3319  ;;  %v3523_v9 = vld [vmem:[#allocation3 + $0x188] sm:$0xff] }
 0x488   :  { %3460 = vst.msk [vmem:[#allocation3 + $0x190] sm:$0xff] %vm3409_vm10, %v3318_v18  ;;  %9732 = vmatprep.mubr.msk.f32.mxu0 %vm3543_vm11, %v3522_v11  ;;  %3461 = vst.msk [vmem:[#allocation3 + $0x198] sm:$0xff] %vm3409_vm10, %v3320_v16 }
 0x489   :  { %9733 = vmatmul.mubr.msk.f32.gmra.mrb[48].mxu0 %vm3543_vm11, %v3523_v9 }
 0x48b   :  { %v2937_v14 = vpop.permute.xlu0 %2936 }
 0x48c   :  { %3077 = vst.msk [vmem:[#allocation3 + $0x1a0] sm:$0xff] %vm3024_vm9, %v2937_v14  ;;  %v2939_v3 = vpop.permute.xlu1 %2938 }
 0x48d   :  { %3078 = vst.msk [vmem:[#allocation3 + $0x1a8] sm:$0xff] %vm3024_vm9, %v2939_v3 }
 0x48f   :  { %v3322_v12 = vpop.permute.xlu0 %3321  ;;  %v3524_v7 = vld [vmem:[#allocation3 + $0x190] sm:$0xff]  ;;  %v3525_v36 = vld [vmem:[#allocation3 + $0x198] sm:$0xff] }
 0x490   :  { %3462 = vst.msk [vmem:[#allocation3 + $0x1a0] sm:$0xff] %vm3409_vm10, %v3322_v12  ;;  %v3324_v2 = vpop.permute.xlu1 %3323  ;;  %9735 = vmatprep.mubr.msk.f32.mxu0 %vm3543_vm11, %v3524_v7 }
 0x491   :  { %3463 = vst.msk [vmem:[#allocation3 + $0x1a8] sm:$0xff] %vm3409_vm10, %v3324_v2  ;;  %9736 = vmatmul.mubr.msk.f32.gmra.mrb[50].mxu0 %vm3543_vm11, %v3525_v36 }
 0x493   :  { %v2941_v10 = vpop.permute.xlu0 %2940 }
 0x494   :  { %3079 = vst.msk [vmem:[#allocation3 + $0x1b0] sm:$0xff] %vm3024_vm9, %v2941_v10  ;;  %v2943_v40 = vpop.permute.xlu1 %2942 }
 0x495   :  { %3080 = vst.msk [vmem:[#allocation3 + $0x1b8] sm:$0xff] %vm3024_vm9, %v2943_v40 }
 0x497   :  { %v3326_v60 = vpop.permute.xlu0 %3325  ;;  %v3526_v44 = vld [vmem:[#allocation3 + $0x1a0] sm:$0xff] }
 0x498   :  { %3464 = vst.msk [vmem:[#allocation3 + $0x1b0] sm:$0xff] %vm3409_vm10, %v3326_v60  ;;  %v3328_v55 = vpop.permute.xlu1 %3327  ;;  %9738 = vmatprep.mubr.msk.f32.mxu0 %vm3543_vm11, %v3526_v44  ;;  %v3527_v29 = vld [vmem:[#allocation3 + $0x1a8] sm:$0xff] }
 0x499   :  { %3465 = vst.msk [vmem:[#allocation3 + $0x1b8] sm:$0xff] %vm3409_vm10, %v3328_v55  ;;  %9739 = vmatmul.mubr.msk.f32.gmra.mrb[52].mxu0 %vm3543_vm11, %v3527_v29 }
 0x49b   :  { %v2945_v61 = vpop.permute.xlu0 %2944 }
 0x49c   :  { %3081 = vst.msk [vmem:[#allocation3 + $0x1c0] sm:$0xff] %vm3024_vm9, %v2945_v61  ;;  %v2947_v25 = vpop.permute.xlu1 %2946 }
 0x49d   :  { %3082 = vst.msk [vmem:[#allocation3 + $0x1c8] sm:$0xff] %vm3024_vm9, %v2947_v25 }
 0x49f   :  { %v3330_v59 = vpop.permute.xlu0 %3329  ;;  %v3528_v28 = vld [vmem:[#allocation3 + $0x1b0] sm:$0xff] }
 0x4a0   :  { %3466 = vst.msk [vmem:[#allocation3 + $0x1c0] sm:$0xff] %vm3409_vm10, %v3330_v59  ;;  %v3332_v56 = vpop.permute.xlu1 %3331  ;;  %9741 = vmatprep.mubr.msk.f32.mxu0 %vm3543_vm11, %v3528_v28  ;;  %v3529_v22 = vld [vmem:[#allocation3 + $0x1b8] sm:$0xff] }
 0x4a1   :  { %3467 = vst.msk [vmem:[#allocation3 + $0x1c8] sm:$0xff] %vm3409_vm10, %v3332_v56  ;;  %9742 = vmatmul.mubr.msk.f32.gmra.mrb[54].mxu0 %vm3543_vm11, %v3529_v22 }
 0x4a3   :  { %v2949_v27 = vpop.permute.xlu0 %2948 }
 0x4a4   :  { %3083 = vst.msk [vmem:[#allocation3 + $0x1d0] sm:$0xff] %vm3024_vm9, %v2949_v27  ;;  %v2951_v63 = vpop.permute.xlu1 %2950 }
 0x4a5   :  { %3084 = vst.msk [vmem:[#allocation3 + $0x1d8] sm:$0xff] %vm3024_vm9, %v2951_v63 }
 0x4a7   :  { %v3334_v26 = vpop.permute.xlu0 %3333  ;;  %v3530_v58 = vld [vmem:[#allocation3 + $0x1c0] sm:$0xff] }
 0x4a8   :  { %3468 = vst.msk [vmem:[#allocation3 + $0x1d0] sm:$0xff] %vm3409_vm10, %v3334_v26  ;;  %v3336_v38 = vpop.permute.xlu1 %3335  ;;  %9744 = vmatprep.mubr.msk.f32.mxu0 %vm3543_vm11, %v3530_v58  ;;  %v3531_v57 = vld [vmem:[#allocation3 + $0x1c8] sm:$0xff] }
 0x4a9   :  { %3469 = vst.msk [vmem:[#allocation3 + $0x1d8] sm:$0xff] %vm3409_vm10, %v3336_v38  ;;  %9745 = vmatmul.mubr.msk.f32.gmra.mrb[56].mxu0 %vm3543_vm11, %v3531_v57 }
 0x4ab   :  { %v2953_v24 = vpop.permute.xlu0 %2952 }
 0x4ac   :  { %3085 = vst.msk [vmem:[#allocation3 + $0x1e0] sm:$0xff] %vm3024_vm9, %v2953_v24  ;;  %v2955_v52 = vpop.permute.xlu1 %2954 }
 0x4ad   :  { %3086 = vst.msk [vmem:[#allocation3 + $0x1e8] sm:$0xff] %vm3024_vm9, %v2955_v52 }
 0x4af   :  { %v3338_v54 = vpop.permute.xlu0 %3337  ;;  %v3532_v50 = vld [vmem:[#allocation3 + $0x1d0] sm:$0xff] }
 0x4b0   :  { %3470 = vst.msk [vmem:[#allocation3 + $0x1e0] sm:$0xff] %vm3409_vm10, %v3338_v54  ;;  %v3340_v0 = vpop.permute.xlu1 %3339  ;;  %9747 = vmatprep.mubr.msk.f32.mxu0 %vm3543_vm11, %v3532_v50  ;;  %v3533_v49 = vld [vmem:[#allocation3 + $0x1d8] sm:$0xff] }
 0x4b1   :  { %3471 = vst.msk [vmem:[#allocation3 + $0x1e8] sm:$0xff] %vm3409_vm10, %v3340_v0  ;;  %9748 = vmatmul.mubr.msk.f32.gmra.mrb[58].mxu0 %vm3543_vm11, %v3533_v49 }
 0x4b3   :  { %v2957_v62 = vpop.permute.xlu0 %2956 }
 0x4b4   :  { %3087 = vst.msk [vmem:[#allocation3 + $0x1f0] sm:$0xff] %vm3024_vm9, %v2957_v62  ;;  %v2959_v46 = vpop.permute.xlu1 %2958 }
 0x4b5   :  { %3088 = vst.msk [vmem:[#allocation3 + $0x1f8] sm:$0xff] %vm3024_vm9, %v2959_v46 }
 0x4b7   :  { %v3342_v48 = vpop.permute.xlu0 %3341  ;;  %v3534_v4 = vld [vmem:[#allocation3 + $0x1e0] sm:$0xff] }
 0x4b8   :  { %3472 = vst.msk [vmem:[#allocation3 + $0x1f0] sm:$0xff] %vm3409_vm10, %v3342_v48  ;;  %v3344_v53 = vpop.permute.xlu1 %3343  ;;  %9750 = vmatprep.mubr.msk.f32.mxu0 %vm3543_vm11, %v3534_v4  ;;  %v3535_v43 = vld [vmem:[#allocation3 + $0x1e8] sm:$0xff] }
 0x4b9   :  { %3473 = vst.msk [vmem:[#allocation3 + $0x1f8] sm:$0xff] %vm3409_vm10, %v3344_v53  ;;  %9751 = vmatmul.mubr.msk.f32.gmra.mrb[60].mxu0 %vm3543_vm11, %v3535_v43 }
 0x4bf   :  { %v3536_v5 = vld [vmem:[#allocation3 + $0x1f0] sm:$0xff] }
 0x4c0   :  { %9753 = vmatprep.mubr.msk.f32.mxu0 %vm3543_vm11, %v3536_v5  ;;  %v3537_v42 = vld [vmem:[#allocation3 + $0x1f8] sm:$0xff] }
 0x4c1   :  { %9754 = vmatmul.mubr.msk.f32.gmra.mrb[62].mxu0 %vm3543_vm11, %v3537_v42 }
 0x4ec   :  { %v12013_v51 = vpop.f32.mrb[0].mxu0 }
 0x4ed   :  { %v4126_v1 = vsel %vm26_vm0, %v12013_v51, 0.0  ;;  %v12017_v8 = vpop.f32.mrb[1].mxu0 }
 0x4ee   :  { %v4125_v34 = vsel %vm26_vm0, %v12017_v8, 0.0 }
 0x4ef   :  { %v4127_v35 = vadd.f32 %v4126_v1, %v4125_v34 }
 0x4f0   :  { %v12021_v41 = vpop.f32.mrb[2].mxu0 }
 0x4f1   :  { %v12023_v37 = vpop.f32.mrb[3].mxu0  ;;  %v4130_v30 = vsel %vm26_vm0, %v12021_v41, 0.0 }
 0x4f2   :  { %v4128_v32 = vsel %vm26_vm0, %v12023_v37, 0.0 }
 0x4f3   :  { %v4129_v39 = vadd.f32 %v4128_v32, %v4127_v35 }
 0x4f4   :  { %v12029_v45 = vpop.f32.mrb[4].mxu0 }
 0x4f5   :  { %v4131_v21 = vadd.f32 %v4130_v30, %v4129_v39  ;;  %v12031_v33 = vpop.f32.mrb[5].mxu0  ;;  %v4134_v17 = vsel %vm26_vm0, %v12029_v45, 0.0 }
 0x4f6   :  { %v4132_v19 = vsel %vm26_vm0, %v12031_v33, 0.0 }
 0x4f7   :  { %v4133_v31 = vadd.f32 %v4132_v19, %v4131_v21 }
 0x4f8   :  { %v12037_v23 = vpop.f32.mrb[6].mxu0 }
 0x4f9   :  { %v12039_v15 = vpop.f32.mrb[7].mxu0  ;;  %v4135_v20 = vadd.f32 %v4134_v17, %v4133_v31  ;;  %v4138_v11 = vsel %vm26_vm0, %v12037_v23, 0.0 }
 0x4fa   :  { %v4136_v13 = vsel %vm26_vm0, %v12039_v15, 0.0 }
 0x4fb   :  { %v4137_v18 = vadd.f32 %v4136_v13, %v4135_v20 }
 0x4fc   :  { %v12045_v16 = vpop.f32.mrb[8].mxu0 }
 0x4fd   :  { %v12047_v9 = vpop.f32.mrb[9].mxu0  ;;  %v4139_v14 = vadd.f32 %v4138_v11, %v4137_v18  ;;  %v4142_v7 = vsel %vm26_vm0, %v12045_v16, 0.0 }
 0x4fe   :  { %v4140_v3 = vsel %vm26_vm0, %v12047_v9, 0.0 }
 0x4ff   :  { %v4141_v12 = vadd.f32 %v4140_v3, %v4139_v14 }
 0x500   :  { %v12053_v2 = vpop.f32.mrb[10].mxu0 }
 0x501   :  { %v12055_v36 = vpop.f32.mrb[11].mxu0  ;;  %v4143_v10 = vadd.f32 %v4142_v7, %v4141_v12  ;;  %v4146_v44 = vsel %vm26_vm0, %v12053_v2, 0.0 }
 0x502   :  { %v4144_v40 = vsel %vm26_vm0, %v12055_v36, 0.0 }
 0x503   :  { %v4145_v60 = vadd.f32 %v4144_v40, %v4143_v10 }
 0x504   :  { %v12061_v55 = vpop.f32.mrb[12].mxu0 }
 0x505   :  { %v12063_v29 = vpop.f32.mrb[13].mxu0  ;;  %v4147_v61 = vadd.f32 %v4146_v44, %v4145_v60  ;;  %v4150_v28 = vsel %vm26_vm0, %v12061_v55, 0.0 }
 0x506   :  { %v4148_v25 = vsel %vm26_vm0, %v12063_v29, 0.0 }
 0x507   :  { %v4149_v59 = vadd.f32 %v4148_v25, %v4147_v61 }
 0x508   :  { %v12069_v56 = vpop.f32.mrb[14].mxu0 }
 0x509   :  { %v12071_v22 = vpop.f32.mrb[15].mxu0  ;;  %v4151_v27 = vadd.f32 %v4150_v28, %v4149_v59  ;;  %v4154_v58 = vsel %vm26_vm0, %v12069_v56, 0.0 }
 0x50a   :  { %v4152_v63 = vsel %vm26_vm0, %v12071_v22, 0.0 }
 0x50b   :  { %v4153_v26 = vadd.f32 %v4152_v63, %v4151_v27 }
 0x50c   :  { %v12077_v38 = vpop.f32.mrb[16].mxu0 }
 0x50d   :  { %v12079_v57 = vpop.f32.mrb[17].mxu0  ;;  %v4155_v24 = vadd.f32 %v4154_v58, %v4153_v26  ;;  %v4158_v50 = vsel %vm26_vm0, %v12077_v38, 0.0 }
 0x50e   :  { %v4156_v52 = vsel %vm26_vm0, %v12079_v57, 0.0 }
 0x50f   :  { %v4157_v54 = vadd.f32 %v4156_v52, %v4155_v24 }
 0x510   :  { %v12085_v0 = vpop.f32.mrb[18].mxu0 }
 0x511   :  { %v12087_v49 = vpop.f32.mrb[19].mxu0  ;;  %v4159_v62 = vadd.f32 %v4158_v50, %v4157_v54  ;;  %v4162_v4 = vsel %vm26_vm0, %v12085_v0, 0.0 }
 0x512   :  { %v4160_v46 = vsel %vm26_vm0, %v12087_v49, 0.0 }
 0x513   :  { %v4161_v48 = vadd.f32 %v4160_v46, %v4159_v62 }
 0x514   :  { %v12093_v53 = vpop.f32.mrb[20].mxu0 }
 0x515   :  { %v12095_v43 = vpop.f32.mrb[21].mxu0  ;;  %v4163_v5 = vadd.f32 %v4162_v4, %v4161_v48  ;;  %v4166_v34 = vsel %vm26_vm0, %v12093_v53, 0.0 }
 0x516   :  { %v4164_v42 = vsel %vm26_vm0, %v12095_v43, 0.0 }
 0x517   :  { %v4165_v1 = vadd.f32 %v4164_v42, %v4163_v5 }
 0x518   :  { %v12101_v35 = vpop.f32.mrb[22].mxu0 }
 0x519   :  { %v12103_v32 = vpop.f32.mrb[23].mxu0  ;;  %v4167_v39 = vadd.f32 %v4166_v34, %v4165_v1  ;;  %v4170_v19 = vsel %vm26_vm0, %v12101_v35, 0.0 }
 0x51a   :  { %v4168_v30 = vsel %vm26_vm0, %v12103_v32, 0.0 }
 0x51b   :  { %v4169_v21 = vadd.f32 %v4168_v30, %v4167_v39 }
 0x51c   :  { %v12109_v31 = vpop.f32.mrb[24].mxu0 }
 0x51d   :  { %v12111_v17 = vpop.f32.mrb[25].mxu0  ;;  %v4171_v20 = vadd.f32 %v4170_v19, %v4169_v21  ;;  %v4174_v11 = vsel %vm26_vm0, %v12109_v31, 0.0 }
 0x51e   :  { %v4172_v13 = vsel %vm26_vm0, %v12111_v17, 0.0 }
 0x51f   :  { %v4173_v18 = vadd.f32 %v4172_v13, %v4171_v20 }
 0x520   :  { %v12117_v14 = vpop.f32.mrb[26].mxu0 }
 0x521   :  { %v12119_v3 = vpop.f32.mrb[27].mxu0  ;;  %v4175_v12 = vadd.f32 %v4174_v11, %v4173_v18  ;;  %v4178_v40 = vsel %vm26_vm0, %v12117_v14, 0.0 }
 0x522   :  { %v4176_v7 = vsel %vm26_vm0, %v12119_v3, 0.0 }
 0x523   :  { %v4177_v10 = vadd.f32 %v4176_v7, %v4175_v12 }
 0x524   :  { %v12125_v60 = vpop.f32.mrb[28].mxu0 }
 0x525   :  { %v12127_v44 = vpop.f32.mrb[29].mxu0  ;;  %v4179_v61 = vadd.f32 %v4178_v40, %v4177_v10  ;;  %v4182_v28 = vsel %vm26_vm0, %v12125_v60, 0.0 }
 0x526   :  { %v4180_v25 = vsel %vm26_vm0, %v12127_v44, 0.0 }
 0x527   :  { %v4181_v59 = vadd.f32 %v4180_v25, %v4179_v61 }
 0x528   :  { %v12133_v27 = vpop.f32.mrb[30].mxu0 }
 0x529   :  { %v12135_v63 = vpop.f32.mrb[31].mxu0  ;;  %v4183_v26 = vadd.f32 %v4182_v28, %v4181_v59  ;;  %v4186_v52 = vsel %vm26_vm0, %v12133_v27, 0.0 }
 0x52a   :  { %v4184_v58 = vsel %vm26_vm0, %v12135_v63, 0.0 }
 0x52b   :  { %v4185_v24 = vadd.f32 %v4184_v58, %v4183_v26 }
 0x52c   :  { %v12141_v54 = vpop.f32.mrb[32].mxu0 }
 0x52d   :  { %v12143_v50 = vpop.f32.mrb[33].mxu0  ;;  %v4187_v62 = vadd.f32 %v4186_v52, %v4185_v24  ;;  %v4190_v4 = vsel %vm26_vm0, %v12141_v54, 0.0 }
 0x52e   :  { %v4188_v46 = vsel %vm26_vm0, %v12143_v50, 0.0 }
 0x52f   :  { %v4189_v48 = vadd.f32 %v4188_v46, %v4187_v62 }
 0x530   :  { %v12149_v5 = vpop.f32.mrb[34].mxu0 }
 0x531   :  { %v12151_v42 = vpop.f32.mrb[35].mxu0  ;;  %v4191_v1 = vadd.f32 %v4190_v4, %v4189_v48  ;;  %v4194_v30 = vsel %vm26_vm0, %v12149_v5, 0.0 }
 0x532   :  { %v4192_v34 = vsel %vm26_vm0, %v12151_v42, 0.0 }
 0x533   :  { %v4193_v39 = vadd.f32 %v4192_v34, %v4191_v1 }
 0x534   :  { %v12157_v21 = vpop.f32.mrb[36].mxu0 }
 0x535   :  { %v12159_v19 = vpop.f32.mrb[37].mxu0  ;;  %v4195_v20 = vadd.f32 %v4194_v30, %v4193_v39  ;;  %v4198_v11 = vsel %vm26_vm0, %v12157_v21, 0.0 }
 0x536   :  { %v4196_v13 = vsel %vm26_vm0, %v12159_v19, 0.0 }
 0x537   :  { %v4197_v18 = vadd.f32 %v4196_v13, %v4195_v20 }
 0x538   :  { %v12165_v12 = vpop.f32.mrb[38].mxu0 }
 0x539   :  { %v12167_v7 = vpop.f32.mrb[39].mxu0  ;;  %v4199_v10 = vadd.f32 %v4198_v11, %v4197_v18  ;;  %v4202_v25 = vsel %vm26_vm0, %v12165_v12, 0.0 }
 0x53a   :  { %v4200_v40 = vsel %vm26_vm0, %v12167_v7, 0.0 }
 0x53b   :  { %v4201_v61 = vadd.f32 %v4200_v40, %v4199_v10 }
 0x53c   :  { %v12173_v59 = vpop.f32.mrb[40].mxu0 }
 0x53d   :  { %v12175_v28 = vpop.f32.mrb[41].mxu0  ;;  %v4203_v26 = vadd.f32 %v4202_v25, %v4201_v61  ;;  %v4206_v52 = vsel %vm26_vm0, %v12173_v59, 0.0 }
 0x53e   :  { %v4204_v58 = vsel %vm26_vm0, %v12175_v28, 0.0 }
 0x53f   :  { %v4205_v24 = vadd.f32 %v4204_v58, %v4203_v26 }
 0x541   :  { %v4207_v62 = vadd.f32 %v4206_v52, %v4205_v24 }
 0x544   :  { %v12181_v46 = vpop.f32.mrb[42].mxu0 }
 0x545   :  { %v12183_v48 = vpop.f32.mrb[43].mxu0  ;;  %v4210_v34 = vsel %vm26_vm0, %v12181_v46, 0.0 }
 0x546   :  { %v4208_v4 = vsel %vm26_vm0, %v12183_v48, 0.0 }
 0x547   :  { %v4209_v1 = vadd.f32 %v4208_v4, %v4207_v62 }
 0x549   :  { %v4211_v39 = vadd.f32 %v4210_v34, %v4209_v1 }
 0x54c   :  { %v12189_v30 = vpop.f32.mrb[44].mxu0 }
 0x54d   :  { %v12191_v20 = vpop.f32.mrb[45].mxu0  ;;  %v4214_v11 = vsel %vm26_vm0, %v12189_v30, 0.0 }
 0x54e   :  { %v4212_v13 = vsel %vm26_vm0, %v12191_v20, 0.0 }
 0x54f   :  { %v4213_v18 = vadd.f32 %v4212_v13, %v4211_v39 }
 0x551   :  { %v4215_v10 = vadd.f32 %v4214_v11, %v4213_v18 }
 0x554   :  { %v12197_v40 = vpop.f32.mrb[46].mxu0 }
 0x555   :  { %v12199_v61 = vpop.f32.mrb[47].mxu0  ;;  %v4218_v58 = vsel %vm26_vm0, %v12197_v40, 0.0 }
 0x556   :  { %v4216_v25 = vsel %vm26_vm0, %v12199_v61, 0.0 }
 0x557   :  { %v4217_v26 = vadd.f32 %v4216_v25, %v4215_v10 }
 0x559   :  { %v4219_v24 = vadd.f32 %v4218_v58, %v4217_v26 }
 0x55c   :  { %v12205_v52 = vpop.f32.mrb[48].mxu0 }
 0x55d   :  { %16895 = vst [vmem:[#allocation64_spill] sm:$0xff] %v12205_v52  ;;  %v12207_v62 = vpop.f32.mrb[49].mxu0  ;;  %v4222_v34 = vsel %vm26_vm0, %v12205_v52, 0.0 }
 0x55e   :  { %16896 = vst [vmem:[#allocation65_spill] sm:$0xff] %v12207_v62  ;;  %v4220_v4 = vsel %vm26_vm0, %v12207_v62, 0.0 }
 0x55f   :  { %v4221_v1 = vadd.f32 %v4220_v4, %v4219_v24 }
 0x561   :  { %v4223_v39 = vadd.f32 %v4222_v34, %v4221_v1 }
 0x564   :  { %v12213_v13 = vpop.f32.mrb[50].mxu0 }
 0x565   :  { %16897 = vst [vmem:[#allocation66_spill] sm:$0xff] %v12213_v13  ;;  %v12215_v18 = vpop.f32.mrb[51].mxu0  ;;  %v4226_v25 = vsel %vm26_vm0, %v12213_v13, 0.0 }
 0x566   :  { %16898 = vst [vmem:[#allocation67_spill] sm:$0xff] %v12215_v18  ;;  %v4224_v11 = vsel %vm26_vm0, %v12215_v18, 0.0 }
 0x567   :  { %v4225_v10 = vadd.f32 %v4224_v11, %v4223_v39 }
 0x569   :  { %v4227_v26 = vadd.f32 %v4226_v25, %v4225_v10 }
 0x56c   :  { %v12221_v58 = vpop.f32.mrb[52].mxu0 }
 0x56d   :  { %16899 = vst [vmem:[#allocation68_spill] sm:$0xff] %v12221_v58  ;;  %v12223_v47 = vpop.f32.mrb[53].mxu0  ;;  %v4230_v1 = vsel %vm26_vm0, %v12221_v58, 0.0 }
 0x56e   :  { %16900 = vst [vmem:[#allocation69_spill] sm:$0xff] %v12223_v47  ;;  %v4228_v24 = vsel %vm26_vm0, %v12223_v47, 0.0 }
 0x56f   :  { %v4229_v4 = vadd.f32 %v4228_v24, %v4227_v26 }
 0x571   :  { %v4231_v34 = vadd.f32 %v4230_v1, %v4229_v4 }
 0x574   :  { %v12229_v6 = vpop.f32.mrb[54].mxu0 }
 0x575   :  { %16901 = vst [vmem:[#allocation74_spill] sm:$0xff] %v12229_v6  ;;  %v12231_v18 = vpop.f32.mrb[55].mxu0  ;;  %v4234_v10 = vsel %vm26_vm0, %v12229_v6, 0.0 }
 0x576   :  { %16902 = vst [vmem:[#allocation75_spill] sm:$0xff] %v12231_v18  ;;  %v4232_v39 = vsel %vm26_vm0, %v12231_v18, 0.0 }
 0x577   :  { %v4233_v11 = vadd.f32 %v4232_v39, %v4231_v34 }
 0x579   :  { %v4235_v25 = vadd.f32 %v4234_v10, %v4233_v11 }
 0x57c   :  { %v12237_v13 = vpop.f32.mrb[56].mxu0 }
 0x57d   :  { %16903 = vst [vmem:[#allocation76_spill] sm:$0xff] %v12237_v13  ;;  %v12239_v47 = vpop.f32.mrb[57].mxu0  ;;  %v4238_v4 = vsel %vm26_vm0, %v12237_v13, 0.0 }
 0x57e   :  { %16904 = vst [vmem:[#allocation77_spill] sm:$0xff] %v12239_v47  ;;  %v4236_v26 = vsel %vm26_vm0, %v12239_v47, 0.0 }
 0x57f   :  { %v4237_v24 = vadd.f32 %v4236_v26, %v4235_v25 }
 0x581   :  { %v4239_v1 = vadd.f32 %v4238_v4, %v4237_v24 }
 0x584   :  { %v12245_v58 = vpop.f32.mrb[58].mxu0 }
 0x585   :  { %16905 = vst [vmem:[#allocation78_spill] sm:$0xff] %v12245_v58  ;;  %v12247_v18 = vpop.f32.mrb[59].mxu0  ;;  %v4242_v11 = vsel %vm26_vm0, %v12245_v58, 0.0 }
 0x586   :  { %16906 = vst [vmem:[#allocation79_spill] sm:$0xff] %v12247_v18  ;;  %v4240_v34 = vsel %vm26_vm0, %v12247_v18, 0.0 }
 0x587   :  { %v4241_v39 = vadd.f32 %v4240_v34, %v4239_v1 }
 0x589   :  { %v4243_v10 = vadd.f32 %v4242_v11, %v4241_v39 }
 0x58c   :  { %v12253_v6 = vpop.f32.mrb[60].mxu0 }
 0x58d   :  { %16907 = vst [vmem:[#allocation80_spill] sm:$0xff] %v12253_v6  ;;  %v12255_v47 = vpop.f32.mrb[61].mxu0  ;;  %v4246_v24 = vsel %vm26_vm0, %v12253_v6, 0.0 }
 0x58e   :  { %16908 = vst [vmem:[#allocation81_spill] sm:$0xff] %v12255_v47  ;;  %v4244_v25 = vsel %vm26_vm0, %v12255_v47, 0.0 }
 0x58f   :  { %v4245_v26 = vadd.f32 %v4244_v25, %v4243_v10 }
 0x591   :  { %v4247_v4 = vadd.f32 %v4246_v24, %v4245_v26 }
 0x594   :  { %v12261_v13 = vpop.f32.mrb[62].mxu0 }
 0x595   :  { %v12263_v18 = vpop.f32.mrb[63].mxu0  ;;  %v4250_v39 = vsel %vm26_vm0, %v12261_v13, 0.0 }
 0x596   :  { %v4248_v1 = vsel %vm26_vm0, %v12263_v18, 0.0 }
 0x597   :  { %v4249_v34 = vadd.f32 %v4248_v1, %v4247_v4  ;;  %v16918_v1 = vld [vmem:[#allocation67_spill] sm:$0xff] }
 0x599   :  { %v4251_v11 = vadd.f32 %v4250_v39, %v4249_v34  ;;  %v16920_v34 = vld [vmem:[#allocation66_spill] sm:$0xff]  ;;  %v16922_v39 = vld [vmem:[#allocation69_spill] sm:$0xff] }
 0x59b   :  { %v4252_v58 = vrot.slane %v4251_v11, 4 }
 0x59d   :  { %v4253_v52 = vadd.f32 %v4252_v58, %v4251_v11  ;;  %v16924_v11 = vld [vmem:[#allocation68_spill] sm:$0xff] }
 0x59f   :  { %v4254_v47 = vrot.slane %v4253_v52, 2 }
 0x5a1   :  { %v4255_v10 = vadd.f32 %v4254_v47, %v4253_v52  ;;  %v16914_v52 = vld [vmem:[#allocation65_spill] sm:$0xff] }
 0x5a3   :  { %v4256_v25 = vrot.slane %v4255_v10, 1 }
 0x5a5   :  { %v4257_v62 = vadd.f32 %v4256_v25, %v4255_v10  ;;  %v16926_v25 = vld [vmem:[#allocation75_spill] sm:$0xff] }
 0x5a7   :  { %v12269_v6 = vmul.f32 0.001953125, %v4257_v62  ;;  %v16916_v62 = vld [vmem:[#allocation64_spill] sm:$0xff] }
 0x5a9   :  { %v12273_v26 = vsub.f32 %v12017_v8, %v12269_v6  ;;  %v12277_v24 = vsub.f32 %v12013_v51, %v12269_v6  ;;  %v12281_v4 = vsub.f32 %v12023_v37, %v12269_v6  ;;  %v12285_v58 = vsub.f32 %v12021_v41, %v12269_v6 }
 0x5aa   :  { %v12289_v47 = vsub.f32 %v12031_v33, %v12269_v6  ;;  %v12293_v8 = vsub.f32 %v12029_v45, %v12269_v6  ;;  %v12297_v51 = vsub.f32 %v12039_v15, %v12269_v6  ;;  %v12301_v37 = vsub.f32 %v12037_v23, %v12269_v6 }
 0x5ab   :  { %16909 = vst [vmem:[#allocation82_spill] sm:$0xff] %v12273_v26  ;;  %16910 = vst [vmem:[#allocation83_spill] sm:$0xff] %v12277_v24  ;;  %v12305_v41 = vsub.f32 %v12047_v9, %v12269_v6  ;;  %v12309_v33 = vsub.f32 %v12045_v16, %v12269_v6  ;;  %v12313_v45 = vsub.f32 %v12055_v36, %v12269_v6 }
 0x5ac   :  { %16911 = vst [vmem:[#allocation84_spill] sm:$0xff] %v12281_v4  ;;  %16912 = vst [vmem:[#allocation85_spill] sm:$0xff] %v12285_v58  ;;  %v12317_v15 = vsub.f32 %v12053_v2, %v12269_v6  ;;  %v12321_v23 = vsub.f32 %v12063_v29, %v12269_v6  ;;  %v12325_v9 = vsub.f32 %v12061_v55, %v12269_v6 }
 0x5ad   :  { %v12329_v16 = vsub.f32 %v12071_v22, %v12269_v6  ;;  %v12333_v36 = vsub.f32 %v12069_v56, %v12269_v6  ;;  %v12337_v2 = vsub.f32 %v12079_v57, %v12269_v6  ;;  %v12341_v29 = vsub.f32 %v12077_v38, %v12269_v6 }
 0x5ae   :  { %v12345_v55 = vsub.f32 %v12087_v49, %v12269_v6  ;;  %v12349_v22 = vsub.f32 %v12085_v0, %v12269_v6  ;;  %v12353_v56 = vsub.f32 %v12095_v43, %v12269_v6  ;;  %v12357_v57 = vsub.f32 %v12093_v53, %v12269_v6 }
 0x5af   :  { %v12361_v38 = vsub.f32 %v12103_v32, %v12269_v6  ;;  %v12365_v49 = vsub.f32 %v12101_v35, %v12269_v6  ;;  %v12369_v0 = vsub.f32 %v12111_v17, %v12269_v6  ;;  %v12373_v43 = vsub.f32 %v12109_v31, %v12269_v6 }
 0x5b0   :  { %v12377_v53 = vsub.f32 %v12119_v3, %v12269_v6  ;;  %v12381_v32 = vsub.f32 %v12117_v14, %v12269_v6  ;;  %v12385_v35 = vsub.f32 %v12127_v44, %v12269_v6  ;;  %v12389_v17 = vsub.f32 %v12125_v60, %v12269_v6 }
 0x5b1   :  { %v12393_v31 = vsub.f32 %v12135_v63, %v12269_v6  ;;  %v12397_v3 = vsub.f32 %v12133_v27, %v12269_v6  ;;  %v12401_v14 = vsub.f32 %v12143_v50, %v12269_v6  ;;  %v12405_v44 = vsub.f32 %v12141_v54, %v12269_v6 }
 0x5b2   :  { %v12409_v60 = vsub.f32 %v12151_v42, %v12269_v6  ;;  %v12413_v63 = vsub.f32 %v12149_v5, %v12269_v6  ;;  %v12417_v27 = vsub.f32 %v12159_v19, %v12269_v6  ;;  %v12421_v50 = vsub.f32 %v12157_v21, %v12269_v6 }
 0x5b3   :  { %v12425_v54 = vsub.f32 %v12167_v7, %v12269_v6  ;;  %v12429_v42 = vsub.f32 %v12165_v12, %v12269_v6  ;;  %v12433_v5 = vsub.f32 %v12175_v28, %v12269_v6  ;;  %v12437_v19 = vsub.f32 %v12173_v59, %v12269_v6 }
 0x5b4   :  { %v12441_v21 = vsub.f32 %v12183_v48, %v12269_v6  ;;  %v12445_v7 = vsub.f32 %v12181_v46, %v12269_v6  ;;  %v12449_v12 = vsub.f32 %v12191_v20, %v12269_v6  ;;  %v12453_v28 = vsub.f32 %v12189_v30, %v12269_v6 }
 0x5b5   :  { %v12457_v59 = vsub.f32 %v12199_v61, %v12269_v6  ;;  %v12461_v48 = vsub.f32 %v12197_v40, %v12269_v6  ;;  %v12465_v46 = vsub.f32 %v16914_v52, %v12269_v6  ;;  %v12469_v20 = vsub.f32 %v16916_v62, %v12269_v6  ;;  %v16928_v62 = vld [vmem:[#allocation74_spill] sm:$0xff] }
 0x5b6   :  { %v12473_v30 = vsub.f32 %v16918_v1, %v12269_v6  ;;  %v12477_v61 = vsub.f32 %v16920_v34, %v12269_v6  ;;  %v12481_v40 = vsub.f32 %v16922_v39, %v12269_v6  ;;  %v12485_v10 = vsub.f32 %v16924_v11, %v12269_v6 }
 0x5b7   :  { %16913 = vst [vmem:[#allocation86_spill] sm:$0xff] %v12461_v48  ;;  %16915 = vst [vmem:[#allocation65_spill] sm:$0xff] %v12465_v46  ;;  %v12489_v52 = vsub.f32 %v16926_v25, %v12269_v6  ;;  %v12493_v1 = vsub.f32 %v16928_v62, %v12269_v6 }
 0x5b8   :  { %16917 = vst [vmem:[#allocation64_spill] sm:$0xff] %v12469_v20  ;;  %16919 = vst [vmem:[#allocation67_spill] sm:$0xff] %v12473_v30  ;;  %v16930_v30 = vld [vmem:[#allocation77_spill] sm:$0xff] }
 0x5b9   :  { %16921 = vst [vmem:[#allocation66_spill] sm:$0xff] %v12477_v61  ;;  %16923 = vst [vmem:[#allocation69_spill] sm:$0xff] %v12481_v40  ;;  %v12497_v34 = vsub.f32 %v16930_v30, %v12269_v6  ;;  %v16932_v61 = vld [vmem:[#allocation76_spill] sm:$0xff]  ;;  %v16934_v40 = vld [vmem:[#allocation79_spill] sm:$0xff] }
 0x5ba   :  { %16925 = vst [vmem:[#allocation68_spill] sm:$0xff] %v12485_v10  ;;  %16927 = vst [vmem:[#allocation75_spill] sm:$0xff] %v12489_v52  ;;  %v12501_v39 = vsub.f32 %v16932_v61, %v12269_v6  ;;  %v12505_v11 = vsub.f32 %v16934_v40, %v12269_v6  ;;  %v16936_v10 = vld [vmem:[#allocation78_spill] sm:$0xff]  ;;  %v16938_v52 = vld [vmem:[#allocation81_spill] sm:$0xff]  ;;  %v12521_v61 = vsub.f32 %v12263_v18, %v12269_v6 }
 0x5bb   :  { %16929 = vst [vmem:[#allocation74_spill] sm:$0xff] %v12493_v1  ;;  %16931 = vst [vmem:[#allocation77_spill] sm:$0xff] %v12497_v34  ;;  %v12509_v25 = vsub.f32 %v16936_v10, %v12269_v6  ;;  %v12513_v62 = vsub.f32 %v16938_v52, %v12269_v6  ;;  %v16940_v1 = vld [vmem:[#allocation80_spill] sm:$0xff]  ;;  %v12525_v40 = vsub.f32 %v12261_v13, %v12269_v6 }
 0x5bc   :  { %16933 = vst [vmem:[#allocation76_spill] sm:$0xff] %v12501_v39  ;;  %16935 = vst [vmem:[#allocation79_spill] sm:$0xff] %v12505_v11  ;;  %v12517_v30 = vsub.f32 %v16940_v1, %v12269_v6  ;;  %v4323_v10 = vmul.f32 %v12273_v26, %v12273_v26  ;;  %v4325_v52 = vmul.f32 %v12281_v4, %v12281_v4 }
 0x5bd   :  { %16937 = vst [vmem:[#allocation78_spill] sm:$0xff] %v12509_v25  ;;  %16939 = vst [vmem:[#allocation81_spill] sm:$0xff] %v12513_v62  ;;  %v4324_v25 = vmul.f32 %v12277_v24, %v12277_v24  ;;  %v4326_v1 = vmul.f32 %v12285_v58, %v12285_v58  ;;  %v4327_v6 = vmul.f32 %v12289_v47, %v12289_v47 }
 0x5be   :  { %16941 = vst [vmem:[#allocation80_spill] sm:$0xff] %v12517_v30  ;;  %16942 = vst [vmem:[#allocation87_spill] sm:$0xff] %v12521_v61  ;;  %v4387_v30 = vsel %vm26_vm0, %v4323_v10, 0.0  ;;  %v4390_v13 = vsel %vm26_vm0, %v4325_v52, 0.0  ;;  %v4328_v24 = vmul.f32 %v12293_v8, %v12293_v8  ;;  %v4329_v58 = vmul.f32 %v12297_v51, %v12297_v51 }
 0x5bf   :  { %16943 = vst [vmem:[#allocation88_spill] sm:$0xff] %v12525_v40  ;;  %v4388_v18 = vsel %vm26_vm0, %v4324_v25, 0.0  ;;  %v4392_v40 = vsel %vm26_vm0, %v4326_v1, 0.0  ;;  %v4394_v10 = vsel %vm26_vm0, %v4327_v6, 0.0  ;;  %v4330_v25 = vmul.f32 %v12301_v37, %v12301_v37 }
 0x5c0   :  { %v4389_v61 = vadd.f32 %v4388_v18, %v4387_v30  ;;  %v4396_v30 = vsel %vm26_vm0, %v4328_v24, 0.0  ;;  %v4398_v52 = vsel %vm26_vm0, %v4329_v58, 0.0  ;;  %v4334_v24 = vmul.f32 %v12317_v15, %v12317_v15 }
 0x5c1   :  { %v4335_v58 = vmul.f32 %v12321_v23, %v12321_v23 }
 0x5c2   :  { %v4391_v26 = vadd.f32 %v4390_v13, %v4389_v61  ;;  %v4331_v61 = vmul.f32 %v12305_v41, %v12305_v41 }
 0x5c4   :  { %v4393_v4 = vadd.f32 %v4392_v40, %v4391_v26  ;;  %v4332_v26 = vmul.f32 %v12309_v33, %v12309_v33  ;;  %v4400_v40 = vsel %vm26_vm0, %v4330_v25, 0.0  ;;  %v4402_v6 = vsel %vm26_vm0, %v4331_v61, 0.0 }
 0x5c5   :  { %v4336_v25 = vmul.f32 %v12325_v9, %v12325_v9  ;;  %v4337_v61 = vmul.f32 %v12329_v16, %v12329_v16 }
 0x5c6   :  { %v4395_v62 = vadd.f32 %v4394_v10, %v4393_v4  ;;  %v4333_v4 = vmul.f32 %v12313_v45, %v12313_v45 }
 0x5c8   :  { %v4397_v18 = vadd.f32 %v4396_v30, %v4395_v62  ;;  %v4404_v62 = vsel %vm26_vm0, %v4332_v26, 0.0  ;;  %v4338_v26 = vmul.f32 %v12333_v36, %v12333_v36 }
 0x5ca   :  { %v4399_v13 = vadd.f32 %v4398_v52, %v4397_v18  ;;  %v4406_v18 = vsel %vm26_vm0, %v4333_v4, 0.0  ;;  %v4339_v4 = vmul.f32 %v12337_v2, %v12337_v2 }
 0x5cc   :  { %v4401_v1 = vadd.f32 %v4400_v40, %v4399_v13  ;;  %v4408_v13 = vsel %vm26_vm0, %v4334_v24, 0.0  ;;  %v4340_v24 = vmul.f32 %v12341_v29, %v12341_v29 }
 0x5ce   :  { %v4403_v10 = vadd.f32 %v4402_v6, %v4401_v1  ;;  %v4410_v1 = vsel %vm26_vm0, %v4335_v58, 0.0  ;;  %v4341_v58 = vmul.f32 %v12345_v55, %v12345_v55 }
 0x5d0   :  { %v4405_v30 = vadd.f32 %v4404_v62, %v4403_v10  ;;  %v4412_v10 = vsel %vm26_vm0, %v4336_v25, 0.0  ;;  %v4342_v25 = vmul.f32 %v12349_v22, %v12349_v22 }
 0x5d2   :  { %v4407_v52 = vadd.f32 %v4406_v18, %v4405_v30  ;;  %v4414_v30 = vsel %vm26_vm0, %v4337_v61, 0.0  ;;  %v4343_v61 = vmul.f32 %v12353_v56, %v12353_v56 }
 0x5d4   :  { %v4409_v40 = vadd.f32 %v4408_v13, %v4407_v52  ;;  %v4416_v52 = vsel %vm26_vm0, %v4338_v26, 0.0  ;;  %v4344_v26 = vmul.f32 %v12357_v57, %v12357_v57 }
 0x5d6   :  { %v4411_v6 = vadd.f32 %v4410_v1, %v4409_v40  ;;  %v4418_v40 = vsel %vm26_vm0, %v4339_v4, 0.0  ;;  %v4345_v4 = vmul.f32 %v12361_v38, %v12361_v38 }
 0x5d8   :  { %v4413_v62 = vadd.f32 %v4412_v10, %v4411_v6  ;;  %v4420_v6 = vsel %vm26_vm0, %v4340_v24, 0.0  ;;  %v4346_v24 = vmul.f32 %v12365_v49, %v12365_v49 }
 0x5da   :  { %v4415_v18 = vadd.f32 %v4414_v30, %v4413_v62  ;;  %v4422_v62 = vsel %vm26_vm0, %v4341_v58, 0.0  ;;  %v4347_v58 = vmul.f32 %v12369_v0, %v12369_v0 }
 0x5dc   :  { %v4417_v13 = vadd.f32 %v4416_v52, %v4415_v18  ;;  %v4424_v18 = vsel %vm26_vm0, %v4342_v25, 0.0  ;;  %v4348_v25 = vmul.f32 %v12373_v43, %v12373_v43 }
 0x5de   :  { %v4419_v1 = vadd.f32 %v4418_v40, %v4417_v13  ;;  %v4426_v13 = vsel %vm26_vm0, %v4343_v61, 0.0  ;;  %v4349_v61 = vmul.f32 %v12377_v53, %v12377_v53 }
 0x5e0   :  { %v4421_v10 = vadd.f32 %v4420_v6, %v4419_v1  ;;  %v4428_v1 = vsel %vm26_vm0, %v4344_v26, 0.0 }
 0x5e2   :  { %v4423_v30 = vadd.f32 %v4422_v62, %v4421_v10  ;;  %v4430_v10 = vsel %vm26_vm0, %v4345_v4, 0.0  ;;  %v4436_v4 = vsel %vm26_vm0, %v4348_v25, 0.0  ;;  %v4354_v25 = vmul.f32 %v12397_v3, %v12397_v3 }
 0x5e4   :  { %v4425_v52 = vadd.f32 %v4424_v18, %v4423_v30  ;;  %v4432_v30 = vsel %vm26_vm0, %v4346_v24, 0.0  ;;  %v4438_v24 = vsel %vm26_vm0, %v4349_v61, 0.0  ;;  %v4355_v61 = vmul.f32 %v12401_v14, %v12401_v14 }
 0x5e6   :  { %v4427_v40 = vadd.f32 %v4426_v13, %v4425_v52  ;;  %v4434_v52 = vsel %vm26_vm0, %v4347_v58, 0.0  ;;  %v4922_v13 = vld [vmem:[#allocation2 + $0x1] sm:$0xff] }
 0x5e7   :  { %5050 = vrot.lane.b32.xlu0 %v4922_v13, %s9892_s22 }
 0x5e8   :  { %v4429_v6 = vadd.f32 %v4428_v1, %v4427_v40  ;;  %v4350_v40 = vmul.f32 %v12381_v32, %v12381_v32 }
 0x5ea   :  { %v4431_v62 = vadd.f32 %v4430_v10, %v4429_v6  ;;  %v4351_v6 = vmul.f32 %v12385_v35, %v12385_v35  ;;  %v4440_v58 = vsel %vm26_vm0, %v4350_v40, 0.0  ;;  %v4356_v40 = vmul.f32 %v12405_v44, %v12405_v44 }
 0x5ec   :  { %v4433_v18 = vadd.f32 %v4432_v30, %v4431_v62  ;;  %v4352_v62 = vmul.f32 %v12389_v17, %v12389_v17 }
 0x5ee   :  { %v4435_v26 = vadd.f32 %v4434_v52, %v4433_v18  ;;  %v4353_v18 = vmul.f32 %v12393_v31, %v12393_v31  ;;  %v4442_v52 = vsel %vm26_vm0, %v4351_v6, 0.0  ;;  %v4357_v6 = vmul.f32 %v12409_v60, %v12409_v60 }
 0x5f0   :  { %v4437_v1 = vadd.f32 %v4436_v4, %v4435_v26  ;;  %v4444_v26 = vsel %vm26_vm0, %v4352_v62, 0.0 }
 0x5f2   :  { %v4439_v10 = vadd.f32 %v4438_v24, %v4437_v1  ;;  %v4446_v1 = vsel %vm26_vm0, %v4353_v18, 0.0  ;;  %v4452_v18 = vsel %vm26_vm0, %v4356_v40, 0.0  ;;  %v4362_v40 = vmul.f32 %v12429_v42, %v12429_v42 }
 0x5f4   :  { %v4441_v30 = vadd.f32 %v4440_v58, %v4439_v10  ;;  %v4448_v10 = vsel %vm26_vm0, %v4354_v25, 0.0  ;;  %v4454_v25 = vsel %vm26_vm0, %v4357_v6, 0.0  ;;  %v4363_v6 = vmul.f32 %v12433_v5, %v12433_v5 }
 0x5f6   :  { %v4443_v13 = vadd.f32 %v4442_v52, %v4441_v30  ;;  %v4450_v30 = vsel %vm26_vm0, %v4355_v61, 0.0  ;;  %v4923_v52 = vld [vmem:[#allocation2 + $0x9] sm:$0xff] }
 0x5f7   :  { %5052 = vrot.lane.b32.xlu1 %v4923_v52, %s9892_s22 }
 0x5f8   :  { %v4445_v4 = vadd.f32 %v4444_v26, %v4443_v13  ;;  %v4358_v13 = vmul.f32 %v12413_v63, %v12413_v63 }
 0x5fa   :  { %v4447_v24 = vadd.f32 %v4446_v1, %v4445_v4  ;;  %v4359_v4 = vmul.f32 %v12417_v27, %v12417_v27  ;;  %v4456_v61 = vsel %vm26_vm0, %v4358_v13, 0.0  ;;  %v4364_v13 = vmul.f32 %v12437_v19, %v12437_v19 }
 0x5fc   :  { %v4449_v58 = vadd.f32 %v4448_v10, %v4447_v24  ;;  %v4360_v24 = vmul.f32 %v12421_v50, %v12421_v50 }
 0x5fe   :  { %v4451_v62 = vadd.f32 %v4450_v30, %v4449_v58  ;;  %v4361_v58 = vmul.f32 %v12425_v54, %v12425_v54  ;;  %v4458_v30 = vsel %vm26_vm0, %v4359_v4, 0.0  ;;  %v4365_v4 = vmul.f32 %v12441_v21, %v12441_v21 }
 0x600   :  { %v4453_v26 = vadd.f32 %v4452_v18, %v4451_v62  ;;  %v4460_v62 = vsel %vm26_vm0, %v4360_v24, 0.0  ;;  %v4366_v24 = vmul.f32 %v12445_v7, %v12445_v7 }
 0x602   :  { %v4455_v1 = vadd.f32 %v4454_v25, %v4453_v26  ;;  %v4462_v26 = vsel %vm26_vm0, %v4361_v58, 0.0  ;;  %v4367_v58 = vmul.f32 %v12449_v12, %v12449_v12 }
 0x604   :  { %v4457_v10 = vadd.f32 %v4456_v61, %v4455_v1  ;;  %v4464_v1 = vsel %vm26_vm0, %v4362_v40, 0.0  ;;  %v4368_v40 = vmul.f32 %v12453_v28, %v12453_v28 }
 0x606   :  { %v4459_v52 = vadd.f32 %v4458_v30, %v4457_v10  ;;  %v4466_v10 = vsel %vm26_vm0, %v4363_v6, 0.0  ;;  %v4369_v6 = vmul.f32 %v12457_v59, %v12457_v59 }
 0x608   :  { %v4461_v18 = vadd.f32 %v4460_v62, %v4459_v52  ;;  %v4468_v52 = vsel %vm26_vm0, %v4364_v13, 0.0  ;;  %v4370_v13 = vmul.f32 %v12461_v48, %v12461_v48 }
 0x60a   :  { %v4463_v25 = vadd.f32 %v4462_v26, %v4461_v18  ;;  %v4470_v18 = vsel %vm26_vm0, %v4365_v4, 0.0  ;;  %v4371_v4 = vmul.f32 %v12465_v46, %v12465_v46 }
 0x60c   :  { %v4465_v61 = vadd.f32 %v4464_v1, %v4463_v25  ;;  %v4472_v25 = vsel %vm26_vm0, %v4366_v24, 0.0  ;;  %v4372_v24 = vmul.f32 %v12469_v20, %v12469_v20 }
 0x60e   :  { %v4467_v30 = vadd.f32 %v4466_v10, %v4465_v61  ;;  %v4474_v61 = vsel %vm26_vm0, %v4367_v58, 0.0  ;;  %v16944_v58 = vld [vmem:[#allocation67_spill] sm:$0xff] }
 0x610   :  { %v4469_v62 = vadd.f32 %v4468_v52, %v4467_v30  ;;  %v4476_v30 = vsel %vm26_vm0, %v4368_v40, 0.0  ;;  %v16945_v40 = vld [vmem:[#allocation66_spill] sm:$0xff] }
 0x612   :  { %v4471_v26 = vadd.f32 %v4470_v18, %v4469_v62  ;;  %v4478_v62 = vsel %vm26_vm0, %v4369_v6, 0.0  ;;  %v16946_v6 = vld [vmem:[#allocation69_spill] sm:$0xff] }
 0x614   :  { %v4473_v1 = vadd.f32 %v4472_v25, %v4471_v26  ;;  %v4480_v26 = vsel %vm26_vm0, %v4370_v13, 0.0  ;;  %v16947_v13 = vld [vmem:[#allocation68_spill] sm:$0xff] }
 0x616   :  { %v4475_v10 = vadd.f32 %v4474_v61, %v4473_v1  ;;  %v4373_v1 = vmul.f32 %v16944_v58, %v16944_v58  ;;  %v4482_v61 = vsel %vm26_vm0, %v4371_v4, 0.0  ;;  %v16948_v4 = vld [vmem:[#allocation75_spill] sm:$0xff] }
 0x618   :  { %v4477_v52 = vadd.f32 %v4476_v30, %v4475_v10  ;;  %v4374_v10 = vmul.f32 %v16945_v40, %v16945_v40  ;;  %v4484_v30 = vsel %vm26_vm0, %v4372_v24, 0.0  ;;  %v16949_v24 = vld [vmem:[#allocation74_spill] sm:$0xff] }
 0x61a   :  { %v4479_v18 = vadd.f32 %v4478_v62, %v4477_v52  ;;  %v4375_v52 = vmul.f32 %v16946_v6, %v16946_v6  ;;  %v4486_v62 = vsel %vm26_vm0, %v4373_v1, 0.0 }
 0x61c   :  { %v4481_v25 = vadd.f32 %v4480_v26, %v4479_v18  ;;  %v4376_v18 = vmul.f32 %v16947_v13, %v16947_v13  ;;  %v4488_v26 = vsel %vm26_vm0, %v4374_v10, 0.0 }
 0x61e   :  { %v4483_v48 = vadd.f32 %v4482_v61, %v4481_v25  ;;  %v4377_v25 = vmul.f32 %v16948_v4, %v16948_v4  ;;  %v4490_v61 = vsel %vm26_vm0, %v4375_v52, 0.0 }
 0x620   :  { %v4485_v46 = vadd.f32 %v4484_v30, %v4483_v48  ;;  %v4378_v48 = vmul.f32 %v16949_v24, %v16949_v24  ;;  %v4492_v30 = vsel %vm26_vm0, %v4376_v18, 0.0  ;;  %v4494_v1 = vsel %vm26_vm0, %v4377_v25, 0.0  ;;  %v16950_v18 = vld [vmem:[#allocation78_spill] sm:$0xff]  ;;  %v16951_v25 = vld [vmem:[#allocation81_spill] sm:$0xff] }
 0x622   :  { %v4487_v20 = vadd.f32 %v4486_v62, %v4485_v46  ;;  %v4379_v46 = vmul.f32 %v12497_v34, %v12497_v34  ;;  %v4496_v10 = vsel %vm26_vm0, %v4378_v48, 0.0  ;;  %v16952_v48 = vld [vmem:[#allocation80_spill] sm:$0xff] }
 0x624   :  { %v4489_v58 = vadd.f32 %v4488_v26, %v4487_v20  ;;  %v4380_v20 = vmul.f32 %v12501_v39, %v12501_v39  ;;  %v4498_v52 = vsel %vm26_vm0, %v4379_v46, 0.0  ;;  %v16953_v46 = vld [vmem:[#allocation87_spill] sm:$0xff] }
 0x626   :  { %v4491_v40 = vadd.f32 %v4490_v61, %v4489_v58  ;;  %v4381_v58 = vmul.f32 %v12505_v11, %v12505_v11 }
 0x628   :  { %v4493_v6 = vadd.f32 %v4492_v30, %v4491_v40  ;;  %v4382_v40 = vmul.f32 %v16950_v18, %v16950_v18  ;;  %v4500_v30 = vsel %vm26_vm0, %v4380_v20, 0.0  ;;  %v16954_v20 = vld [vmem:[#allocation88_spill] sm:$0xff] }
 0x62a   :  { %v4495_v62 = vadd.f32 %v4494_v1, %v4493_v6  ;;  %v4383_v6 = vmul.f32 %v16951_v25, %v16951_v25  ;;  %v4502_v1 = vsel %vm26_vm0, %v4381_v58, 0.0 }
 0x62c   :  { %v4497_v26 = vadd.f32 %v4496_v10, %v4495_v62  ;;  %v4384_v62 = vmul.f32 %v16952_v48, %v16952_v48  ;;  %v4504_v10 = vsel %vm26_vm0, %v4382_v40, 0.0 }
 0x62e   :  { %v4499_v61 = vadd.f32 %v4498_v52, %v4497_v26  ;;  %v4385_v26 = vmul.f32 %v16953_v46, %v16953_v46  ;;  %v4506_v52 = vsel %vm26_vm0, %v4383_v6, 0.0 }
 0x630   :  { %v4501_v34 = vadd.f32 %v4500_v30, %v4499_v61  ;;  %v4386_v61 = vmul.f32 %v16954_v20, %v16954_v20  ;;  %v4508_v30 = vsel %vm26_vm0, %v4384_v62, 0.0 }
 0x632   :  { %v4503_v39 = vadd.f32 %v4502_v1, %v4501_v34  ;;  %v4510_v34 = vsel %vm26_vm0, %v4385_v26, 0.0  ;;  %v4512_v1 = vsel %vm26_vm0, %v4386_v61, 0.0 }
 0x634   :  { %v4505_v11 = vadd.f32 %v4504_v10, %v4503_v39 }
 0x636   :  { %v4507_v18 = vadd.f32 %v4506_v52, %v4505_v11  ;;  %v4526_v52 = vlaneseq }
 0x638   :  { %v4509_v25 = vadd.f32 %v4508_v30, %v4507_v18  ;;  %v12721_v20 = vshrl.u32 %v4526_v52, 7  ;;  %v4521_v18 = vld [vmem:[%s16665_s2] sm:$0x1]  ;;  %v16957_v30 = vld [vmem:[#allocation83_spill] sm:$0xff] }
 0x63a   :  { %v4511_v58 = vadd.f32 %v4510_v34, %v4509_v25  ;;  %16955 = vst [vmem:[#allocation87_spill] sm:$0xff] %v12721_v20  ;;  %v16776_v25 = vsub.s32 0, %v12721_v20  ;;  %v16974_v20 = vld [vmem:[#allocation77_spill] sm:$0xff] }
 0x63c   :  { %v4513_v48 = vadd.f32 %v4512_v1, %v4511_v58  ;;  %v16958_v58 = vld [vmem:[#allocation84_spill] sm:$0xff] }
 0x63e   :  { %v4514_v40 = vrot.slane %v4513_v48, 4 }
 0x640   :  { %v4515_v39 = vadd.f32 %v4514_v40, %v4513_v48  ;;  %v16959_v40 = vld [vmem:[#allocation85_spill] sm:$0xff] }
 0x642   :  { %v4516_v10 = vrot.slane %v4515_v39, 2 }
 0x644   :  { %v4517_v24 = vadd.f32 %v4516_v10, %v4515_v39 }
 0x646   :  { %v4518_v4 = vrot.slane %v4517_v24, 1 }
 0x648   :  { %v4519_v13 = vadd.f32 %v4518_v4, %v4517_v24  ;;  %v16956_v24 = vld [vmem:[#allocation82_spill] sm:$0xff] }
 0x64a   :  { %v4520_v6 = vmul.f32 0.001953125, %v4519_v13  ;;  %v12734_v13 = vld [vmem:[%s16666_s3] ss:$0 sm:$0xff] }
 0x64c   :  { %v4522_v11 = vadd.f32 1e-05, %v4520_v6 }
 0x64e   :  { %9887 = vrsqrt.f32 %v4522_v11 }
 0x658   :  { %v9888_v62 = vpop.eup %9887 }
 0x659   :  { %v4524_v26 = vmul.f32 %v9888_v62, %v4521_v18 }
 0x65b   :  { %v12729_v48 = vrot.slane %v4524_v26, %v16776_v25  ;;  %v16960_v26 = vld [vmem:[#allocation86_spill] sm:$0xff] }
 0x65c   :  { %v16972_v25 = vld [vmem:[#allocation74_spill] sm:$0xff] }
 0x65d   :  { %v4593_v4 = vmul.f32 %v12729_v48, %v16953_v46  ;;  %v12740_v61 = vmul.f32 %v12729_v48, %v16956_v24  ;;  %v12744_v34 = vmul.f32 %v12729_v48, %v16957_v30  ;;  %v12748_v1 = vmul.f32 %v12729_v48, %v16958_v58  ;;  %v16962_v24 = vld [vmem:[#allocation64_spill] sm:$0xff]  ;;  %v16963_v30 = vld [vmem:[#allocation67_spill] sm:$0xff]  ;;  %v16964_v58 = vld [vmem:[#allocation66_spill] sm:$0xff] }
 0x65e   :  { %v12752_v39 = vmul.f32 %v12729_v48, %v16959_v40  ;;  %v12756_v10 = vmul.f32 %v12729_v48, %v12289_v47  ;;  %v12760_v46 = vmul.f32 %v12729_v48, %v12293_v8  ;;  %v12764_v6 = vmul.f32 %v12729_v48, %v12297_v51  ;;  %v16966_v40 = vld [vmem:[#allocation69_spill] sm:$0xff] }
 0x65f   :  { %v4664_v11 = vadd.f32 %v12734_v13, %v4593_v4  ;;  %v12769_v52 = vmul.f32 %v12729_v48, %v12301_v37  ;;  %v12773_v18 = vmul.f32 %v12729_v48, %v12305_v41  ;;  %v12777_v47 = vmul.f32 %v12729_v48, %v12309_v33  ;;  %v16961_v4 = vld [vmem:[#allocation65_spill] sm:$0xff] }
 0x660   :  { %v12781_v8 = vmul.f32 %v12729_v48, %v12313_v45  ;;  %v12785_v51 = vmul.f32 %v12729_v48, %v12317_v15  ;;  %v12789_v37 = vmul.f32 %v12729_v48, %v12321_v23  ;;  %v12793_v41 = vmul.f32 %v12729_v48, %v12325_v9 }
 0x661   :  { %v4728_v62 = vmax.f32 %v4664_v11, 0.0  ;;  %v12797_v33 = vmul.f32 %v12729_v48, %v12329_v16  ;;  %v12801_v45 = vmul.f32 %v12729_v48, %v12333_v36  ;;  %v12805_v15 = vmul.f32 %v12729_v48, %v12337_v2 }
 0x662   :  { %v12809_v23 = vmul.f32 %v12729_v48, %v12341_v29  ;;  %v12813_v9 = vmul.f32 %v12729_v48, %v12345_v55  ;;  %v12817_v16 = vmul.f32 %v12729_v48, %v12349_v22  ;;  %v12821_v36 = vmul.f32 %v12729_v48, %v12353_v56 }
 0x663   :  { %v12825_v2 = vmul.f32 %v12729_v48, %v12357_v57  ;;  %v12829_v29 = vmul.f32 %v12729_v48, %v12361_v38  ;;  %v12833_v55 = vmul.f32 %v12729_v48, %v12365_v49  ;;  %v12837_v22 = vmul.f32 %v12729_v48, %v12369_v0  ;;  %4792 = vst.msk [vmem:[#allocation2 + $0x331] sm:$0xff] %vm26_vm0, %v4728_v62  ;;  %v16968_v62 = vld [vmem:[#allocation68_spill] sm:$0xff] }
 0x664   :  { %v12842_v56 = vmul.f32 %v12729_v48, %v12373_v43  ;;  %v12846_v57 = vmul.f32 %v12729_v48, %v12377_v53  ;;  %v12850_v38 = vmul.f32 %v12729_v48, %v12381_v32  ;;  %v12854_v49 = vmul.f32 %v12729_v48, %v12385_v35 }
 0x665   :  { %v12858_v0 = vmul.f32 %v12729_v48, %v12389_v17  ;;  %v12862_v43 = vmul.f32 %v12729_v48, %v12393_v31  ;;  %v12866_v53 = vmul.f32 %v12729_v48, %v12397_v3  ;;  %v12870_v32 = vmul.f32 %v12729_v48, %v12401_v14 }
 0x666   :  { %v12874_v35 = vmul.f32 %v12729_v48, %v12405_v44  ;;  %v12878_v17 = vmul.f32 %v12729_v48, %v12409_v60  ;;  %v12882_v31 = vmul.f32 %v12729_v48, %v12413_v63  ;;  %v12886_v3 = vmul.f32 %v12729_v48, %v12417_v27 }
 0x667   :  { %v12890_v14 = vmul.f32 %v12729_v48, %v12421_v50  ;;  %v12894_v44 = vmul.f32 %v12729_v48, %v12425_v54  ;;  %v12898_v60 = vmul.f32 %v12729_v48, %v12429_v42  ;;  %v12902_v63 = vmul.f32 %v12729_v48, %v12433_v5 }
 0x668   :  { %v12906_v27 = vmul.f32 %v12729_v48, %v12437_v19  ;;  %v12910_v50 = vmul.f32 %v12729_v48, %v12441_v21  ;;  %v12914_v54 = vmul.f32 %v12729_v48, %v12445_v7  ;;  %v12918_v42 = vmul.f32 %v12729_v48, %v12449_v12 }
 0x669   :  { %v12922_v5 = vmul.f32 %v12729_v48, %v12453_v28  ;;  %v12926_v19 = vmul.f32 %v12729_v48, %v12457_v59  ;;  %v12930_v21 = vmul.f32 %v12729_v48, %v16960_v26  ;;  %v12934_v7 = vmul.f32 %v12729_v48, %v16961_v4  ;;  %v16970_v4 = vld [vmem:[#allocation75_spill] sm:$0xff] }
 0x66a   :  { %v12938_v12 = vmul.f32 %v12729_v48, %v16962_v24  ;;  %v12942_v28 = vmul.f32 %v12729_v48, %v16963_v30  ;;  %v12946_v59 = vmul.f32 %v12729_v48, %v16964_v58  ;;  %v12950_v11 = vmul.f32 %v12729_v48, %v16966_v40 }
 0x66b   :  { %v12954_v26 = vmul.f32 %v12729_v48, %v16968_v62  ;;  %v12958_v24 = vmul.f32 %v12729_v48, %v16970_v4  ;;  %v12962_v30 = vmul.f32 %v12729_v48, %v16972_v25  ;;  %v12966_v58 = vmul.f32 %v12729_v48, %v16974_v20 }
 0x66c   :  { %16965 = vst [vmem:[#allocation82_spill] sm:$0xff] %v12946_v59  ;;  %16967 = vst [vmem:[#allocation83_spill] sm:$0xff] %v12950_v11  ;;  %v16976_v59 = vld [vmem:[#allocation76_spill] sm:$0xff]  ;;  %v16977_v11 = vld [vmem:[#allocation79_spill] sm:$0xff] }
 0x66d   :  { %16969 = vst [vmem:[#allocation84_spill] sm:$0xff] %v12954_v26  ;;  %16971 = vst [vmem:[#allocation85_spill] sm:$0xff] %v12958_v24  ;;  %v12970_v40 = vmul.f32 %v12729_v48, %v16976_v59  ;;  %v12974_v62 = vmul.f32 %v12729_v48, %v16977_v11  ;;  %v16978_v26 = vld [vmem:[#allocation78_spill] sm:$0xff]  ;;  %v16979_v24 = vld [vmem:[#allocation81_spill] sm:$0xff]  ;;  %v12994_v11 = vadd.f32 %v12734_v13, %v12740_v61 }
 0x66e   :  { %16973 = vst [vmem:[#allocation86_spill] sm:$0xff] %v12962_v30  ;;  %16975 = vst [vmem:[#allocation65_spill] sm:$0xff] %v12966_v58  ;;  %v12978_v4 = vmul.f32 %v12729_v48, %v16978_v26  ;;  %v12982_v25 = vmul.f32 %v12729_v48, %v16979_v24  ;;  %v16980_v30 = vld [vmem:[#allocation80_spill] sm:$0xff]  ;;  %v12998_v26 = vadd.f32 %v12734_v13, %v12744_v34 }
 0x66f   :  { %v12986_v20 = vmul.f32 %v12729_v48, %v16980_v30  ;;  %v16981_v58 = vld [vmem:[#allocation88_spill] sm:$0xff]  ;;  %v13002_v24 = vadd.f32 %v12734_v13, %v12748_v1  ;;  %v13006_v30 = vadd.f32 %v12734_v13, %v12752_v39  ;;  %v13014_v61 = vadd.f32 %v12734_v13, %v12760_v46 }
 0x670   :  { %v12990_v59 = vmul.f32 %v12729_v48, %v16981_v58  ;;  %v13010_v48 = vadd.f32 %v12734_v13, %v12756_v10  ;;  %v13018_v34 = vadd.f32 %v12734_v13, %v12764_v6  ;;  %v13022_v1 = vadd.f32 %v12734_v13, %v12769_v52  ;;  %v4794_v58 = vld [vmem:[#allocation2] sm:$0xff] }
 0x671   :  { %v13026_v39 = vadd.f32 %v12734_v13, %v12773_v18  ;;  %v13030_v10 = vadd.f32 %v12734_v13, %v12777_v47  ;;  %v13034_v46 = vadd.f32 %v12734_v13, %v12781_v8  ;;  %v13038_v6 = vadd.f32 %v12734_v13, %v12785_v51  ;;  %4858 = vst.msk [vmem:[#allocation3] sm:$0xff] %vm26_vm0, %v4794_v58 }
 0x672   :  { %v13042_v52 = vadd.f32 %v12734_v13, %v12789_v37  ;;  %v13046_v18 = vadd.f32 %v12734_v13, %v12793_v41  ;;  %v13050_v47 = vadd.f32 %v12734_v13, %v12797_v33  ;;  %v13054_v8 = vadd.f32 %v12734_v13, %v12801_v45 }
 0x673   :  { %v13058_v51 = vadd.f32 %v12734_v13, %v12805_v15  ;;  %v13062_v37 = vadd.f32 %v12734_v13, %v12809_v23  ;;  %v13066_v41 = vadd.f32 %v12734_v13, %v12813_v9  ;;  %v13070_v33 = vadd.f32 %v12734_v13, %v12817_v16  ;;  %v16988_v58 = vld [vmem:[#allocation83_spill] sm:$0xff] }
 0x674   :  { %v13074_v45 = vadd.f32 %v12734_v13, %v12821_v36  ;;  %v13078_v15 = vadd.f32 %v12734_v13, %v12825_v2  ;;  %v13082_v23 = vadd.f32 %v12734_v13, %v12829_v29  ;;  %v13086_v9 = vadd.f32 %v12734_v13, %v12833_v55  ;;  %v4795_v2 = vld [vmem:[#allocation2 + $0x8] sm:$0xff] }
 0x675   :  { %v13090_v16 = vadd.f32 %v12734_v13, %v12837_v22  ;;  %v13094_v36 = vadd.f32 %v12734_v13, %v12842_v56  ;;  %v13098_v29 = vadd.f32 %v12734_v13, %v12846_v57  ;;  %v13102_v55 = vadd.f32 %v12734_v13, %v12850_v38  ;;  %4859 = vst.msk [vmem:[#allocation3 + $0x8] sm:$0xff] %vm26_vm0, %v4795_v2  ;;  %v16989_v2 = vld [vmem:[#allocation84_spill] sm:$0xff] }
 0x676   :  { %16982 = vst [vmem:[#allocation64_spill] sm:$0xff] %v13074_v45  ;;  %16983 = vst [vmem:[#allocation67_spill] sm:$0xff] %v13078_v15  ;;  %v5051_v45 = vpop.permute.xlu0 %5050  ;;  %v5053_v15 = vpop.permute.xlu1 %5052  ;;  %v13106_v22 = vadd.f32 %v12734_v13, %v12854_v49  ;;  %v13110_v56 = vadd.f32 %v12734_v13, %v12858_v0  ;;  %v13116_v57 = vadd.f32 %v12734_v13, %v12862_v43 }
 0x677   :  { %v13120_v38 = vadd.f32 %v12734_v13, %v12866_v53  ;;  %v13124_v49 = vadd.f32 %v12734_v13, %v12870_v32  ;;  %v13128_v0 = vadd.f32 %v12734_v13, %v12874_v35  ;;  %5242 = vst.msk [vmem:[#allocation3] sm:$0xff] %vm713_vm2, %v5051_v45  ;;  %5243 = vst.msk [vmem:[#allocation3 + $0x8] sm:$0xff] %vm713_vm2, %v5053_v15  ;;  %v16987_v15 = vld [vmem:[#allocation82_spill] sm:$0xff] }
 0x678   :  { %v13134_v43 = vadd.f32 %v12734_v13, %v12878_v17  ;;  %v13138_v53 = vadd.f32 %v12734_v13, %v12882_v31  ;;  %v13142_v32 = vadd.f32 %v12734_v13, %v12886_v3  ;;  %v13146_v35 = vadd.f32 %v12734_v13, %v12890_v14 }
 0x679   :  { %v13150_v45 = vadd.f32 %v12734_v13, %v12894_v44  ;;  %v13154_v17 = vadd.f32 %v12734_v13, %v12898_v60  ;;  %v13158_v31 = vadd.f32 %v12734_v13, %v12902_v63  ;;  %v13162_v3 = vadd.f32 %v12734_v13, %v12906_v27 }
 0x67a   :  { %v13166_v14 = vadd.f32 %v12734_v13, %v12910_v50  ;;  %v13170_v44 = vadd.f32 %v12734_v13, %v12914_v54  ;;  %v13174_v60 = vadd.f32 %v12734_v13, %v12918_v42  ;;  %v13178_v63 = vadd.f32 %v12734_v13, %v12922_v5 }
 0x67b   :  { %v13182_v27 = vadd.f32 %v12734_v13, %v12926_v19  ;;  %v13186_v50 = vadd.f32 %v12734_v13, %v12930_v21  ;;  %v13190_v54 = vadd.f32 %v12734_v13, %v12934_v7  ;;  %v13194_v42 = vadd.f32 %v12734_v13, %v12938_v12 }
 0x67c   :  { %v13198_v5 = vadd.f32 %v12734_v13, %v12942_v28  ;;  %v13202_v19 = vadd.f32 %v12734_v13, %v16987_v15  ;;  %v13206_v21 = vadd.f32 %v12734_v13, %v16988_v58  ;;  %v13210_v7 = vadd.f32 %v12734_v13, %v16989_v2 }
 0x67d   :  { %16984 = vst [vmem:[#allocation66_spill] sm:$0xff] %v13190_v54  ;;  %16985 = vst [vmem:[#allocation69_spill] sm:$0xff] %v13194_v42  ;;  %v16990_v54 = vld [vmem:[#allocation85_spill] sm:$0xff]  ;;  %v16991_v42 = vld [vmem:[#allocation86_spill] sm:$0xff]  ;;  %v13226_v58 = vadd.f32 %v12734_v13, %v12970_v40  ;;  %v13230_v2 = vadd.f32 %v12734_v13, %v12974_v62  ;;  %v13246_v40 = vadd.f32 %v12734_v13, %v12990_v59  ;;  %v4667_v62 = vmax.f32 %v12998_v26, 0.0 }
 0x67e   :  { %16986 = vst [vmem:[#allocation68_spill] sm:$0xff] %v13198_v5  ;;  %v13214_v12 = vadd.f32 %v12734_v13, %v16990_v54  ;;  %v13218_v28 = vadd.f32 %v12734_v13, %v16991_v42  ;;  %v16992_v5 = vld [vmem:[#allocation65_spill] sm:$0xff]  ;;  %v13234_v54 = vadd.f32 %v12734_v13, %v12978_v4  ;;  %v13238_v42 = vadd.f32 %v12734_v13, %v12982_v25 }
 0x67f   :  { %v13222_v15 = vadd.f32 %v12734_v13, %v16992_v5  ;;  %16993 = vst [vmem:[#allocation75_spill] sm:$0xff] %v13226_v58  ;;  %16994 = vst [vmem:[#allocation74_spill] sm:$0xff] %v13230_v2  ;;  %v13242_v5 = vadd.f32 %v12734_v13, %v12986_v20  ;;  %v4666_v58 = vmax.f32 %v12994_v11, 0.0  ;;  %v4668_v2 = vmax.f32 %v13002_v24, 0.0 }
 0x680   :  { %16995 = vst [vmem:[#allocation77_spill] sm:$0xff] %v13234_v54  ;;  %16996 = vst [vmem:[#allocation76_spill] sm:$0xff] %v13238_v42  ;;  %v4669_v4 = vmax.f32 %v13006_v30, 0.0  ;;  %v4670_v54 = vmax.f32 %v13010_v48, 0.0  ;;  %v4671_v25 = vmax.f32 %v13014_v61, 0.0  ;;  %v4672_v42 = vmax.f32 %v13018_v34, 0.0 }
 0x681   :  { %16997 = vst [vmem:[#allocation79_spill] sm:$0xff] %v13242_v5  ;;  %v4673_v20 = vmax.f32 %v13022_v1, 0.0  ;;  %v4674_v5 = vmax.f32 %v13026_v39, 0.0  ;;  %v4675_v13 = vmax.f32 %v13030_v10, 0.0  ;;  %v4676_v59 = vmax.f32 %v13034_v46, 0.0  ;;  %4731 = vst.msk [vmem:[#allocation2 + $0x21] sm:$0xff] %vm26_vm0, %v4667_v62 }
 0x682   :  { %4730 = vst.msk [vmem:[#allocation2 + $0x19] sm:$0xff] %vm26_vm0, %v4666_v58  ;;  %4732 = vst.msk [vmem:[#allocation2 + $0x31] sm:$0xff] %vm26_vm0, %v4668_v2  ;;  %v4677_v11 = vmax.f32 %v13038_v6, 0.0  ;;  %v4678_v26 = vmax.f32 %v13042_v52, 0.0  ;;  %v4679_v24 = vmax.f32 %v13046_v18, 0.0  ;;  %v4680_v30 = vmax.f32 %v13050_v47, 0.0 }
 0x683   :  { %4733 = vst.msk [vmem:[#allocation2 + $0x39] sm:$0xff] %vm26_vm0, %v4669_v4  ;;  %4734 = vst.msk [vmem:[#allocation2 + $0x49] sm:$0xff] %vm26_vm0, %v4670_v54  ;;  %v4681_v48 = vmax.f32 %v13054_v8, 0.0  ;;  %v4682_v61 = vmax.f32 %v13058_v51, 0.0  ;;  %v4683_v34 = vmax.f32 %v13062_v37, 0.0  ;;  %v4684_v1 = vmax.f32 %v13066_v41, 0.0 }
 0x684   :  { %4735 = vst.msk [vmem:[#allocation2 + $0x51] sm:$0xff] %vm26_vm0, %v4671_v25  ;;  %4736 = vst.msk [vmem:[#allocation2 + $0x61] sm:$0xff] %vm26_vm0, %v4672_v42  ;;  %v4685_v39 = vmax.f32 %v13070_v33, 0.0  ;;  %v16998_v10 = vld [vmem:[#allocation64_spill] sm:$0xff]  ;;  %v16999_v6 = vld [vmem:[#allocation67_spill] sm:$0xff]  ;;  %v4688_v18 = vmax.f32 %v13082_v23, 0.0 }
 0x685   :  { %4737 = vst.msk [vmem:[#allocation2 + $0x69] sm:$0xff] %vm26_vm0, %v4673_v20  ;;  %4738 = vst.msk [vmem:[#allocation2 + $0x79] sm:$0xff] %vm26_vm0, %v4674_v5  ;;  %v4686_v46 = vmax.f32 %v16998_v10, 0.0  ;;  %v4687_v52 = vmax.f32 %v16999_v6, 0.0  ;;  %v4689_v47 = vmax.f32 %v13086_v9, 0.0  ;;  %v4690_v8 = vmax.f32 %v13090_v16, 0.0 }
 0x686   :  { %4739 = vst.msk [vmem:[#allocation2 + $0x81] sm:$0xff] %vm26_vm0, %v4675_v13  ;;  %4740 = vst.msk [vmem:[#allocation2 + $0x91] sm:$0xff] %vm26_vm0, %v4676_v59  ;;  %v4691_v51 = vmax.f32 %v13094_v36, 0.0  ;;  %v4692_v37 = vmax.f32 %v13098_v29, 0.0  ;;  %v4693_v41 = vmax.f32 %v13102_v55, 0.0  ;;  %v4694_v33 = vmax.f32 %v13106_v22, 0.0 }
 0x687   :  { %4741 = vst.msk [vmem:[#allocation2 + $0x99] sm:$0xff] %vm26_vm0, %v4677_v11  ;;  %4742 = vst.msk [vmem:[#allocation2 + $0xa9] sm:$0xff] %vm26_vm0, %v4678_v26  ;;  %v4695_v23 = vmax.f32 %v13110_v56, 0.0  ;;  %v4696_v9 = vmax.f32 %v13116_v57, 0.0  ;;  %v4697_v16 = vmax.f32 %v13120_v38, 0.0  ;;  %v4698_v36 = vmax.f32 %v13124_v49, 0.0 }
 0x688   :  { %4743 = vst.msk [vmem:[#allocation2 + $0xb1] sm:$0xff] %vm26_vm0, %v4679_v24  ;;  %4744 = vst.msk [vmem:[#allocation2 + $0xc1] sm:$0xff] %vm26_vm0, %v4680_v30  ;;  %v4699_v29 = vmax.f32 %v13128_v0, 0.0  ;;  %v4700_v55 = vmax.f32 %v13134_v43, 0.0  ;;  %v4701_v22 = vmax.f32 %v13138_v53, 0.0  ;;  %v4702_v56 = vmax.f32 %v13142_v32, 0.0 }
 0x689   :  { %4745 = vst.msk [vmem:[#allocation2 + $0xc9] sm:$0xff] %vm26_vm0, %v4681_v48  ;;  %4746 = vst.msk [vmem:[#allocation2 + $0xd9] sm:$0xff] %vm26_vm0, %v4682_v61  ;;  %v4703_v57 = vmax.f32 %v13146_v35, 0.0  ;;  %v4704_v38 = vmax.f32 %v13150_v45, 0.0  ;;  %v4925_v49 = vld [vmem:[#allocation2 + $0x21] sm:$0xff]  ;;  %v4924_v0 = vld [vmem:[#allocation2 + $0x19] sm:$0xff] }
 0x68a   :  { %4747 = vst.msk [vmem:[#allocation2 + $0xe1] sm:$0xff] %vm26_vm0, %v4683_v34  ;;  %4748 = vst.msk [vmem:[#allocation2 + $0xf1] sm:$0xff] %vm26_vm0, %v4684_v1  ;;  %v4705_v43 = vmax.f32 %v13154_v17, 0.0  ;;  %v4706_v53 = vmax.f32 %v13158_v31, 0.0  ;;  %v4707_v32 = vmax.f32 %v13162_v3, 0.0  ;;  %v4708_v35 = vmax.f32 %v13166_v14, 0.0  ;;  %5056 = vrot.lane.b32.xlu1 %v4925_v49, %s9892_s22  ;;  %5054 = vrot.lane.b32.xlu0 %v4924_v0, %s9892_s22 }
 0x68b   :  { %4749 = vst.msk [vmem:[#allocation2 + $0xf9] sm:$0xff] %vm26_vm0, %v4685_v39  ;;  %4750 = vst.msk [vmem:[#allocation2 + $0x109] sm:$0xff] %vm26_vm0, %v4686_v46  ;;  %v4709_v45 = vmax.f32 %v13170_v44, 0.0  ;;  %v4710_v17 = vmax.f32 %v13174_v60, 0.0  ;;  %v4711_v31 = vmax.f32 %v13178_v63, 0.0  ;;  %v4712_v3 = vmax.f32 %v13182_v27, 0.0 }
 0x68c   :  { %4751 = vst.msk [vmem:[#allocation2 + $0x111] sm:$0xff] %vm26_vm0, %v4687_v52  ;;  %4752 = vst.msk [vmem:[#allocation2 + $0x121] sm:$0xff] %vm26_vm0, %v4688_v18  ;;  %v4713_v14 = vmax.f32 %v13186_v50, 0.0  ;;  %v17000_v58 = vld [vmem:[#allocation66_spill] sm:$0xff]  ;;  %v17001_v54 = vld [vmem:[#allocation69_spill] sm:$0xff]  ;;  %v4717_v63 = vmax.f32 %v13202_v19, 0.0 }
 0x68d   :  { %4753 = vst.msk [vmem:[#allocation2 + $0x129] sm:$0xff] %vm26_vm0, %v4689_v47  ;;  %4754 = vst.msk [vmem:[#allocation2 + $0x139] sm:$0xff] %vm26_vm0, %v4690_v8  ;;  %v4714_v2 = vmax.f32 %v17000_v58, 0.0  ;;  %v4715_v44 = vmax.f32 %v17001_v54, 0.0  ;;  %v17002_v42 = vld [vmem:[#allocation68_spill] sm:$0xff]  ;;  %v4718_v27 = vmax.f32 %v13206_v21, 0.0 }
 0x68e   :  { %4755 = vst.msk [vmem:[#allocation2 + $0x141] sm:$0xff] %vm26_vm0, %v4691_v51  ;;  %4756 = vst.msk [vmem:[#allocation2 + $0x151] sm:$0xff] %vm26_vm0, %v4692_v37  ;;  %v4716_v60 = vmax.f32 %v17002_v42, 0.0  ;;  %v4719_v50 = vmax.f32 %v13210_v7, 0.0  ;;  %v4720_v5 = vmax.f32 %v13214_v12, 0.0  ;;  %v4927_v62 = vld [vmem:[#allocation2 + $0x39] sm:$0xff] }
 0x68f   :  { %4757 = vst.msk [vmem:[#allocation2 + $0x159] sm:$0xff] %vm26_vm0, %v4693_v41  ;;  %4758 = vst.msk [vmem:[#allocation2 + $0x169] sm:$0xff] %vm26_vm0, %v4694_v33  ;;  %v4926_v4 = vld [vmem:[#allocation2 + $0x31] sm:$0xff]  ;;  %v4721_v25 = vmax.f32 %v13218_v28, 0.0  ;;  %v4722_v19 = vmax.f32 %v13222_v15, 0.0  ;;  %5060 = vrot.lane.b32.xlu1 %v4927_v62, %s9892_s22  ;;  %v17005_v12 = vld [vmem:[#allocation77_spill] sm:$0xff] }
 0x690   :  { %4759 = vst.msk [vmem:[#allocation2 + $0x171] sm:$0xff] %vm26_vm0, %v4695_v23  ;;  %4760 = vst.msk [vmem:[#allocation2 + $0x181] sm:$0xff] %vm26_vm0, %v4696_v9  ;;  %v17003_v20 = vld [vmem:[#allocation75_spill] sm:$0xff]  ;;  %v17004_v13 = vld [vmem:[#allocation74_spill] sm:$0xff]  ;;  %5058 = vrot.lane.b32.xlu0 %v4926_v4, %s9892_s22  ;;  %v4725_v28 = vmax.f32 %v17005_v12, 0.0  ;;  %v4729_v24 = vmax.f32 %v13246_v40, 0.0 }
 0x691   :  { %4761 = vst.msk [vmem:[#allocation2 + $0x189] sm:$0xff] %vm26_vm0, %v4697_v16  ;;  %4762 = vst.msk [vmem:[#allocation2 + $0x1c9] sm:$0xff] %vm26_vm0, %v4698_v36  ;;  %v4723_v21 = vmax.f32 %v17003_v20, 0.0  ;;  %v4724_v7 = vmax.f32 %v17004_v13, 0.0  ;;  %v17006_v59 = vld [vmem:[#allocation76_spill] sm:$0xff]  ;;  %v17007_v11 = vld [vmem:[#allocation79_spill] sm:$0xff] }
 0x692   :  { %4763 = vst.msk [vmem:[#allocation2 + $0x1d1] sm:$0xff] %vm26_vm0, %v4699_v29  ;;  %4764 = vst.msk [vmem:[#allocation2 + $0x1e1] sm:$0xff] %vm26_vm0, %v4700_v55  ;;  %v4726_v15 = vmax.f32 %v17006_v59, 0.0  ;;  %v4727_v26 = vmax.f32 %v17007_v11, 0.0  ;;  %v4929_v40 = vld [vmem:[#allocation2 + $0x51] sm:$0xff]  ;;  %v4928_v30 = vld [vmem:[#allocation2 + $0x49] sm:$0xff] }
 0x693   :  { %4765 = vst.msk [vmem:[#allocation2 + $0x1e9] sm:$0xff] %vm26_vm0, %v4701_v22  ;;  %4766 = vst.msk [vmem:[#allocation2 + $0x1f9] sm:$0xff] %vm26_vm0, %v4702_v56  ;;  %5064 = vrot.lane.b32.xlu1 %v4929_v40, %s9892_s22  ;;  %v4931_v48 = vld [vmem:[#allocation2 + $0x69] sm:$0xff]  ;;  %v4930_v61 = vld [vmem:[#allocation2 + $0x61] sm:$0xff] }
 0x694   :  { %4767 = vst.msk [vmem:[#allocation2 + $0x201] sm:$0xff] %vm26_vm0, %v4703_v57  ;;  %4768 = vst.msk [vmem:[#allocation2 + $0x211] sm:$0xff] %vm26_vm0, %v4704_v38  ;;  %5062 = vrot.lane.b32.xlu0 %v4928_v30, %s9892_s22  ;;  %v4933_v34 = vld [vmem:[#allocation2 + $0x81] sm:$0xff]  ;;  %v4932_v1 = vld [vmem:[#allocation2 + $0x79] sm:$0xff] }
 0x695   :  { %4769 = vst.msk [vmem:[#allocation2 + $0x219] sm:$0xff] %vm26_vm0, %v4705_v43  ;;  %4770 = vst.msk [vmem:[#allocation2 + $0x229] sm:$0xff] %vm26_vm0, %v4706_v53  ;;  %v4935_v39 = vld [vmem:[#allocation2 + $0x99] sm:$0xff]  ;;  %v4934_v10 = vld [vmem:[#allocation2 + $0x91] sm:$0xff] }
 0x696   :  { %4771 = vst.msk [vmem:[#allocation2 + $0x231] sm:$0xff] %vm26_vm0, %v4707_v32  ;;  %4772 = vst.msk [vmem:[#allocation2 + $0x241] sm:$0xff] %vm26_vm0, %v4708_v35  ;;  %v13386_v46 = vld [vmem:[#allocation2 + $0x20] sm:$0xff]  ;;  %v13388_v6 = vld [vmem:[#allocation2 + $0x18] sm:$0xff] }
 0x697   :  { %4773 = vst.msk [vmem:[#allocation2 + $0x249] sm:$0xff] %vm26_vm0, %v4709_v45  ;;  %4774 = vst.msk [vmem:[#allocation2 + $0x259] sm:$0xff] %vm26_vm0, %v4710_v17  ;;  %5068 = vrot.lane.b32.xlu1 %v4931_v48, %s9892_s22  ;;  %v13394_v52 = vld [vmem:[#allocation2 + $0x38] sm:$0xff]  ;;  %v13396_v18 = vld [vmem:[#allocation2 + $0x30] sm:$0xff] }
 0x698   :  { %4775 = vst.msk [vmem:[#allocation2 + $0x261] sm:$0xff] %vm26_vm0, %v4711_v31  ;;  %4776 = vst.msk [vmem:[#allocation2 + $0x271] sm:$0xff] %vm26_vm0, %v4712_v3  ;;  %5066 = vrot.lane.b32.xlu0 %v4930_v61, %s9892_s22  ;;  %v4937_v47 = vld [vmem:[#allocation2 + $0xb1] sm:$0xff]  ;;  %v4936_v8 = vld [vmem:[#allocation2 + $0xa9] sm:$0xff] }
 0x699   :  { %4777 = vst.msk [vmem:[#allocation2 + $0x279] sm:$0xff] %vm26_vm0, %v4713_v14  ;;  %4778 = vst.msk [vmem:[#allocation2 + $0x289] sm:$0xff] %vm26_vm0, %v4714_v2  ;;  %v13402_v51 = vld [vmem:[#allocation2 + $0x50] sm:$0xff]  ;;  %v13406_v37 = vld [vmem:[#allocation2 + $0x48] sm:$0xff] }
 0x69a   :  { %4779 = vst.msk [vmem:[#allocation2 + $0x291] sm:$0xff] %vm26_vm0, %v4715_v44  ;;  %4780 = vst.msk [vmem:[#allocation2 + $0x2a1] sm:$0xff] %vm26_vm0, %v4716_v60  ;;  %v13408_v41 = vld [vmem:[#allocation2 + $0x68] sm:$0xff]  ;;  %v13410_v33 = vld [vmem:[#allocation2 + $0x60] sm:$0xff] }
 0x69b   :  { %4781 = vst.msk [vmem:[#allocation2 + $0x2a9] sm:$0xff] %vm26_vm0, %v4717_v63  ;;  %4782 = vst.msk [vmem:[#allocation2 + $0x2b9] sm:$0xff] %vm26_vm0, %v4718_v27  ;;  %5072 = vrot.lane.b32.xlu1 %v4933_v34, %s9892_s22  ;;  %v13420_v23 = vld [vmem:[#allocation2 + $0x80] sm:$0xff]  ;;  %v13424_v9 = vld [vmem:[#allocation2 + $0x78] sm:$0xff] }
 0x69c   :  { %4783 = vst.msk [vmem:[#allocation2 + $0x2c1] sm:$0xff] %vm26_vm0, %v4719_v50  ;;  %4784 = vst.msk [vmem:[#allocation2 + $0x2d1] sm:$0xff] %vm26_vm0, %v4720_v5  ;;  %5070 = vrot.lane.b32.xlu0 %v4932_v1, %s9892_s22  ;;  %v4939_v16 = vld [vmem:[#allocation2 + $0xc9] sm:$0xff]  ;;  %v13428_v36 = vld [vmem:[#allocation2 + $0x98] sm:$0xff] }
 0x69d   :  { %4785 = vst.msk [vmem:[#allocation2 + $0x2d9] sm:$0xff] %vm26_vm0, %v4721_v25  ;;  %4786 = vst.msk [vmem:[#allocation2 + $0x2e9] sm:$0xff] %vm26_vm0, %v4722_v19  ;;  %v13430_v29 = vld [vmem:[#allocation2 + $0x90] sm:$0xff]  ;;  %v4938_v55 = vld [vmem:[#allocation2 + $0xc1] sm:$0xff] }
 0x69e   :  { %4787 = vst.msk [vmem:[#allocation2 + $0x2f1] sm:$0xff] %vm26_vm0, %v4723_v21  ;;  %4788 = vst.msk [vmem:[#allocation2 + $0x301] sm:$0xff] %vm26_vm0, %v4724_v7  ;;  %v13436_v22 = vld [vmem:[#allocation2 + $0xb0] sm:$0xff]  ;;  %v13438_v56 = vld [vmem:[#allocation2 + $0xa8] sm:$0xff] }
 0x69f   :  { %4789 = vst.msk [vmem:[#allocation2 + $0x309] sm:$0xff] %vm26_vm0, %v4725_v28  ;;  %4790 = vst.msk [vmem:[#allocation2 + $0x319] sm:$0xff] %vm26_vm0, %v4726_v15  ;;  %5076 = vrot.lane.b32.xlu1 %v4935_v39, %s9892_s22  ;;  %v13446_v57 = vld [vmem:[#allocation2 + $0xc8] sm:$0xff]  ;;  %v13450_v38 = vld [vmem:[#allocation2 + $0xc0] sm:$0xff] }
 0x6a0   :  { %4791 = vst.msk [vmem:[#allocation2 + $0x321] sm:$0xff] %vm26_vm0, %v4727_v26  ;;  %4793 = vst.msk [vmem:[#allocation2 + $0x339] sm:$0xff] %vm26_vm0, %v4729_v24  ;;  %5074 = vrot.lane.b32.xlu0 %v4934_v10, %s9892_s22  ;;  %v4941_v49 = vld [vmem:[#allocation2 + $0xe1] sm:$0xff]  ;;  %v13456_v43 = vld [vmem:[#allocation2 + $0xd8] sm:$0xff] }
 0x6a1   :  { %4861 = vst.msk [vmem:[#allocation3 + $0x18] sm:$0xff] %vm26_vm0, %v13386_v46  ;;  %4860 = vst.msk [vmem:[#allocation3 + $0x10] sm:$0xff] %vm26_vm0, %v13388_v6  ;;  %v13454_v0 = vld [vmem:[#allocation2 + $0xe0] sm:$0xff]  ;;  %v13462_v32 = vld [vmem:[#allocation2 + $0xf8] sm:$0xff] }
 0x6a2   :  { %4863 = vst.msk [vmem:[#allocation3 + $0x28] sm:$0xff] %vm26_vm0, %v13394_v52  ;;  %4862 = vst.msk [vmem:[#allocation3 + $0x20] sm:$0xff] %vm26_vm0, %v13396_v18  ;;  %v4940_v53 = vld [vmem:[#allocation2 + $0xd9] sm:$0xff]  ;;  %v13464_v35 = vld [vmem:[#allocation2 + $0xf0] sm:$0xff] }
 0x6a3   :  { %4865 = vst.msk [vmem:[#allocation3 + $0x38] sm:$0xff] %vm26_vm0, %v13402_v51  ;;  %5080 = vrot.lane.b32.xlu1 %v4937_v47, %s9892_s22  ;;  %4864 = vst.msk [vmem:[#allocation3 + $0x30] sm:$0xff] %vm26_vm0, %v13406_v37  ;;  %v13472_v45 = vld [vmem:[#allocation2 + $0x110] sm:$0xff]  ;;  %v13476_v17 = vld [vmem:[#allocation2 + $0x108] sm:$0xff] }
 0x6a4   :  { %5078 = vrot.lane.b32.xlu0 %v4936_v8, %s9892_s22  ;;  %4867 = vst.msk [vmem:[#allocation3 + $0x48] sm:$0xff] %vm26_vm0, %v13408_v41  ;;  %4866 = vst.msk [vmem:[#allocation3 + $0x40] sm:$0xff] %vm26_vm0, %v13410_v33  ;;  %v4943_v31 = vld [vmem:[#allocation2 + $0xf9] sm:$0xff]  ;;  %v13480_v3 = vld [vmem:[#allocation2 + $0x128] sm:$0xff] }
 0x6a5   :  { %4869 = vst.msk [vmem:[#allocation3 + $0x58] sm:$0xff] %vm26_vm0, %v13420_v23  ;;  %4868 = vst.msk [vmem:[#allocation3 + $0x50] sm:$0xff] %vm26_vm0, %v13424_v9  ;;  %v13482_v14 = vld [vmem:[#allocation2 + $0x120] sm:$0xff]  ;;  %v4942_v58 = vld [vmem:[#allocation2 + $0xf1] sm:$0xff] }
 0x6a6   :  { %4871 = vst.msk [vmem:[#allocation3 + $0x68] sm:$0xff] %vm26_vm0, %v13428_v36  ;;  %4870 = vst.msk [vmem:[#allocation3 + $0x60] sm:$0xff] %vm26_vm0, %v13430_v29  ;;  %v13488_v2 = vld [vmem:[#allocation2 + $0x140] sm:$0xff]  ;;  %v13490_v54 = vld [vmem:[#allocation2 + $0x138] sm:$0xff] }
 0x6a7   :  { %5084 = vrot.lane.b32.xlu1 %v4939_v16, %s9892_s22  ;;  %4873 = vst.msk [vmem:[#allocation3 + $0x78] sm:$0xff] %vm26_vm0, %v13436_v22  ;;  %4872 = vst.msk [vmem:[#allocation3 + $0x70] sm:$0xff] %vm26_vm0, %v13438_v56  ;;  %v13498_v44 = vld [vmem:[#allocation2 + $0x158] sm:$0xff]  ;;  %v13502_v42 = vld [vmem:[#allocation2 + $0x150] sm:$0xff] }
 0x6a8   :  { %5082 = vrot.lane.b32.xlu0 %v4938_v55, %s9892_s22  ;;  %4875 = vst.msk [vmem:[#allocation3 + $0x88] sm:$0xff] %vm26_vm0, %v13446_v57  ;;  %4874 = vst.msk [vmem:[#allocation3 + $0x80] sm:$0xff] %vm26_vm0, %v13450_v38  ;;  %v13506_v60 = vld [vmem:[#allocation2 + $0x170] sm:$0xff]  ;;  %v13508_v63 = vld [vmem:[#allocation2 + $0x168] sm:$0xff] }
 0x6a9   :  { %4877 = vst.msk [vmem:[#allocation3 + $0x98] sm:$0xff] %vm26_vm0, %v13454_v0  ;;  %4876 = vst.msk [vmem:[#allocation3 + $0x90] sm:$0xff] %vm26_vm0, %v13456_v43  ;;  %v4945_v27 = vld [vmem:[#allocation2 + $0x111] sm:$0xff]  ;;  %v4944_v50 = vld [vmem:[#allocation2 + $0x109] sm:$0xff] }
 0x6aa   :  { %4879 = vst.msk [vmem:[#allocation3 + $0xa8] sm:$0xff] %vm26_vm0, %v13462_v32  ;;  %4878 = vst.msk [vmem:[#allocation3 + $0xa0] sm:$0xff] %vm26_vm0, %v13464_v35  ;;  %v13516_v5 = vld [vmem:[#allocation2 + $0x1d0] sm:$0xff]  ;;  %v13518_v62 = vld [vmem:[#allocation2 + $0x1c8] sm:$0xff] }
 0x6ab   :  { %5088 = vrot.lane.b32.xlu1 %v4941_v49, %s9892_s22  ;;  %4881 = vst.msk [vmem:[#allocation3 + $0xb8] sm:$0xff] %vm26_vm0, %v13472_v45  ;;  %4880 = vst.msk [vmem:[#allocation3 + $0xb0] sm:$0xff] %vm26_vm0, %v13476_v17  ;;  %v13524_v4 = vld [vmem:[#allocation2 + $0x1e8] sm:$0xff]  ;;  %v13526_v25 = vld [vmem:[#allocation2 + $0x1e0] sm:$0xff] }
 0x6ac   :  { %5086 = vrot.lane.b32.xlu0 %v4940_v53, %s9892_s22  ;;  %4883 = vst.msk [vmem:[#allocation3 + $0xc8] sm:$0xff] %vm26_vm0, %v13480_v3  ;;  %4882 = vst.msk [vmem:[#allocation3 + $0xc0] sm:$0xff] %vm26_vm0, %v13482_v14  ;;  %v4947_v19 = vld [vmem:[#allocation2 + $0x129] sm:$0xff]  ;;  %v4946_v20 = vld [vmem:[#allocation2 + $0x121] sm:$0xff] }
 0x6ad   :  { %4885 = vst.msk [vmem:[#allocation3 + $0xd8] sm:$0xff] %vm26_vm0, %v13488_v2  ;;  %4884 = vst.msk [vmem:[#allocation3 + $0xd0] sm:$0xff] %vm26_vm0, %v13490_v54  ;;  %v13532_v21 = vld [vmem:[#allocation2 + $0x200] sm:$0xff]  ;;  %v13536_v13 = vld [vmem:[#allocation2 + $0x1f8] sm:$0xff] }
 0x6ae   :  { %4887 = vst.msk [vmem:[#allocation3 + $0xe8] sm:$0xff] %vm26_vm0, %v13498_v44  ;;  %4886 = vst.msk [vmem:[#allocation3 + $0xe0] sm:$0xff] %vm26_vm0, %v13502_v42  ;;  %v13538_v7 = vld [vmem:[#allocation2 + $0x218] sm:$0xff]  ;;  %v13540_v12 = vld [vmem:[#allocation2 + $0x210] sm:$0xff] }
 0x6af   :  { %5092 = vrot.lane.b32.xlu1 %v4943_v31, %s9892_s22  ;;  %4889 = vst.msk [vmem:[#allocation3 + $0xf8] sm:$0xff] %vm26_vm0, %v13506_v60  ;;  %4888 = vst.msk [vmem:[#allocation3 + $0xf0] sm:$0xff] %vm26_vm0, %v13508_v63  ;;  %v4827_v28 = vld [vmem:[#allocation2 + $0x1b8] sm:$0xff]  ;;  %v13551_v59 = vld [vmem:[#allocation2 + $0x230] sm:$0xff] }
 0x6b0   :  { %5090 = vrot.lane.b32.xlu0 %v4942_v58, %s9892_s22  ;;  %4893 = vst.msk [vmem:[#allocation3 + $0x118] sm:$0xff] %vm26_vm0, %v13516_v5  ;;  %4892 = vst.msk [vmem:[#allocation3 + $0x110] sm:$0xff] %vm26_vm0, %v13518_v62  ;;  %v13553_v15 = vld [vmem:[#allocation2 + $0x228] sm:$0xff]  ;;  %v13561_v26 = vld [vmem:[#allocation2 + $0x240] sm:$0xff] }
 0x6b1   :  { %4895 = vst.msk [vmem:[#allocation3 + $0x128] sm:$0xff] %vm26_vm0, %v13524_v4  ;;  %4894 = vst.msk [vmem:[#allocation3 + $0x120] sm:$0xff] %vm26_vm0, %v13526_v25  ;;  %v13559_v11 = vld [vmem:[#allocation2 + $0x248] sm:$0xff]  ;;  %v4948_v40 = vld [vmem:[#allocation2 + $0x139] sm:$0xff] }
 0x6b2   :  { %4897 = vst.msk [vmem:[#allocation3 + $0x138] sm:$0xff] %vm26_vm0, %v13532_v21  ;;  %4896 = vst.msk [vmem:[#allocation3 + $0x130] sm:$0xff] %vm26_vm0, %v13536_v13  ;;  %v4949_v24 = vld [vmem:[#allocation2 + $0x141] sm:$0xff]  ;;  %v4826_v30 = vld [vmem:[#allocation2 + $0x1b0] sm:$0xff] }
 0x6b3   :  { %5096 = vrot.lane.b32.xlu1 %v4945_v27, %s9892_s22  ;;  %4899 = vst.msk [vmem:[#allocation3 + $0x148] sm:$0xff] %vm26_vm0, %v13538_v7  ;;  %4898 = vst.msk [vmem:[#allocation3 + $0x140] sm:$0xff] %vm26_vm0, %v13540_v12  ;;  %v13570_v48 = vld [vmem:[#allocation2 + $0x260] sm:$0xff]  ;;  %v13572_v61 = vld [vmem:[#allocation2 + $0x258] sm:$0xff] }
 0x6b4   :  { %5094 = vrot.lane.b32.xlu0 %v4944_v50, %s9892_s22  ;;  %4891 = vst.msk [vmem:[#allocation3 + $0x108] sm:$0xff] %vm26_vm0, %v4827_v28  ;;  %4901 = vst.msk [vmem:[#allocation3 + $0x158] sm:$0xff] %vm26_vm0, %v13551_v59  ;;  %v13578_v34 = vld [vmem:[#allocation2 + $0x278] sm:$0xff]  ;;  %v13580_v1 = vld [vmem:[#allocation2 + $0x270] sm:$0xff] }
 0x6b5   :  { %4900 = vst.msk [vmem:[#allocation3 + $0x150] sm:$0xff] %vm26_vm0, %v13553_v15  ;;  %4903 = vst.msk [vmem:[#allocation3 + $0x168] sm:$0xff] %vm26_vm0, %v13559_v11  ;;  %v13586_v39 = vld [vmem:[#allocation2 + $0x290] sm:$0xff]  ;;  %v4951_v10 = vld [vmem:[#allocation2 + $0x159] sm:$0xff] }
 0x6b6   :  { %4902 = vst.msk [vmem:[#allocation3 + $0x160] sm:$0xff] %vm26_vm0, %v13561_v26  ;;  %4890 = vst.msk [vmem:[#allocation3 + $0x100] sm:$0xff] %vm26_vm0, %v4826_v30  ;;  %v4950_v47 = vld [vmem:[#allocation2 + $0x151] sm:$0xff]  ;;  %v13590_v8 = vld [vmem:[#allocation2 + $0x288] sm:$0xff] }
 0x6b7   :  { %5100 = vrot.lane.b32.xlu1 %v4947_v19, %s9892_s22  ;;  %4905 = vst.msk [vmem:[#allocation3 + $0x178] sm:$0xff] %vm26_vm0, %v13570_v48  ;;  %4904 = vst.msk [vmem:[#allocation3 + $0x170] sm:$0xff] %vm26_vm0, %v13572_v61  ;;  %v13596_v16 = vld [vmem:[#allocation2 + $0x2a8] sm:$0xff]  ;;  %v13598_v55 = vld [vmem:[#allocation2 + $0x2a0] sm:$0xff] }
 0x6b8   :  { %5098 = vrot.lane.b32.xlu0 %v4946_v20, %s9892_s22  ;;  %4907 = vst.msk [vmem:[#allocation3 + $0x188] sm:$0xff] %vm26_vm0, %v13578_v34  ;;  %4906 = vst.msk [vmem:[#allocation3 + $0x180] sm:$0xff] %vm26_vm0, %v13580_v1  ;;  %v13604_v49 = vld [vmem:[#allocation2 + $0x2c0] sm:$0xff]  ;;  %v13606_v53 = vld [vmem:[#allocation2 + $0x2b8] sm:$0xff] }
 0x6b9   :  { %4909 = vst.msk [vmem:[#allocation3 + $0x198] sm:$0xff] %vm26_vm0, %v13586_v39  ;;  %4908 = vst.msk [vmem:[#allocation3 + $0x190] sm:$0xff] %vm26_vm0, %v13590_v8  ;;  %v13612_v31 = vld [vmem:[#allocation2 + $0x2d8] sm:$0xff]  ;;  %v4952_v27 = vld [vmem:[#allocation2 + $0x169] sm:$0xff] }
 0x6ba   :  { %4911 = vst.msk [vmem:[#allocation3 + $0x1a8] sm:$0xff] %vm26_vm0, %v13596_v16  ;;  %4910 = vst.msk [vmem:[#allocation3 + $0x1a0] sm:$0xff] %vm26_vm0, %v13598_v55  ;;  %v4953_v58 = vld [vmem:[#allocation2 + $0x171] sm:$0xff]  ;;  %v4955_v19 = vld [vmem:[#allocation2 + $0x1b9] sm:$0xff] }
 0x6bb   :  { %5104 = vrot.lane.b32.xlu1 %v4949_v24, %s9892_s22  ;;  %4913 = vst.msk [vmem:[#allocation3 + $0x1b8] sm:$0xff] %vm26_vm0, %v13604_v49  ;;  %4912 = vst.msk [vmem:[#allocation3 + $0x1b0] sm:$0xff] %vm26_vm0, %v13606_v53  ;;  %v13616_v50 = vld [vmem:[#allocation2 + $0x2d0] sm:$0xff]  ;;  %v13624_v28 = vld [vmem:[#allocation2 + $0x2e8] sm:$0xff] }
 0x6bc   :  { %5102 = vrot.lane.b32.xlu0 %v4948_v40, %s9892_s22  ;;  %4915 = vst.msk [vmem:[#allocation3 + $0x1c8] sm:$0xff] %vm26_vm0, %v13612_v31  ;;  %4914 = vst.msk [vmem:[#allocation3 + $0x1c0] sm:$0xff] %vm26_vm0, %v13616_v50  ;;  %v13622_v20 = vld [vmem:[#allocation2 + $0x2f0] sm:$0xff]  ;;  %v13630_v40 = vld [vmem:[#allocation2 + $0x308] sm:$0xff] }
 0x6bd   :  { %17008 = vst [vmem:[#allocation78_spill] sm:$0xff] %v13622_v20  ;;  %17009 = vst [vmem:[#allocation81_spill] sm:$0xff] %v13624_v28  ;;  %v4954_v24 = vld [vmem:[#allocation2 + $0x1b1] sm:$0xff]  ;;  %v13632_v30 = vld [vmem:[#allocation2 + $0x300] sm:$0xff] }
 0x6be   :  { %4917 = vst.msk [vmem:[#allocation3 + $0x1d8] sm:$0xff] %vm26_vm0, %v13622_v20  ;;  %4916 = vst.msk [vmem:[#allocation3 + $0x1d0] sm:$0xff] %vm26_vm0, %v13624_v28  ;;  %v4960_v28 = vld [vmem:[#allocation2 + $0x1f9] sm:$0xff] }
 0x6bf   :  { %5108 = vrot.lane.b32.xlu1 %v4951_v10, %s9892_s22  ;;  %17010 = vst [vmem:[#allocation80_spill] sm:$0xff] %v13630_v40  ;;  %17011 = vst [vmem:[#allocation88_spill] sm:$0xff] %v13632_v30  ;;  %v13638_v10 = vld [vmem:[#allocation2 + $0x320] sm:$0xff] }
 0x6c0   :  { %5106 = vrot.lane.b32.xlu0 %v4950_v47, %s9892_s22  ;;  %4919 = vst.msk [vmem:[#allocation3 + $0x1e8] sm:$0xff] %vm26_vm0, %v13630_v40  ;;  %4918 = vst.msk [vmem:[#allocation3 + $0x1e0] sm:$0xff] %vm26_vm0, %v13632_v30  ;;  %v13642_v47 = vld [vmem:[#allocation2 + $0x318] sm:$0xff]  ;;  %v4959_v30 = vld [vmem:[#allocation2 + $0x1e9] sm:$0xff] }
 0x6c1   :  { %17012 = vst [vmem:[#allocation82_spill] sm:$0xff] %v13638_v10  ;;  %4921 = vst.msk [vmem:[#allocation3 + $0x1f8] sm:$0xff] %vm26_vm0, %v13638_v10  ;;  %v4958_v40 = vld [vmem:[#allocation2 + $0x1e1] sm:$0xff] }
 0x6c2   :  { %17013 = vst [vmem:[#allocation83_spill] sm:$0xff] %v13642_v47  ;;  %4920 = vst.msk [vmem:[#allocation3 + $0x1f0] sm:$0xff] %vm26_vm0, %v13642_v47  ;;  %v4961_v10 = vld [vmem:[#allocation2 + $0x201] sm:$0xff] }
 0x6c3   :  { %5112 = vrot.lane.b32.xlu1 %v4953_v58, %s9892_s22  ;;  %v4957_v58 = vld [vmem:[#allocation2 + $0x1d1] sm:$0xff] }
 0x6c4   :  { %5110 = vrot.lane.b32.xlu0 %v4952_v27, %s9892_s22  ;;  %v4956_v27 = vld [vmem:[#allocation2 + $0x1c9] sm:$0xff] }
 0x6c7   :  { %5116 = vrot.lane.b32.xlu1 %v4955_v19, %s9892_s22  ;;  %v4963_v19 = vld [vmem:[#allocation2 + $0x219] sm:$0xff] }
 0x6c8   :  { %5114 = vrot.lane.b32.xlu0 %v4954_v24, %s9892_s22  ;;  %v4962_v24 = vld [vmem:[#allocation2 + $0x211] sm:$0xff] }
 0x6cb   :  { %5120 = vrot.lane.b32.xlu1 %v4957_v58, %s9892_s22  ;;  %v4965_v58 = vld [vmem:[#allocation2 + $0x231] sm:$0xff] }
 0x6cc   :  { %5118 = vrot.lane.b32.xlu0 %v4956_v27, %s9892_s22  ;;  %v4964_v27 = vld [vmem:[#allocation2 + $0x229] sm:$0xff] }
 0x6cf   :  { %5124 = vrot.lane.b32.xlu1 %v4959_v30, %s9892_s22  ;;  %v4967_v30 = vld [vmem:[#allocation2 + $0x249] sm:$0xff] }
 0x6d0   :  { %5122 = vrot.lane.b32.xlu0 %v4958_v40, %s9892_s22  ;;  %v4966_v40 = vld [vmem:[#allocation2 + $0x241] sm:$0xff] }
 0x6d3   :  { %5128 = vrot.lane.b32.xlu1 %v4961_v10, %s9892_s22  ;;  %v4969_v10 = vld [vmem:[#allocation2 + $0x261] sm:$0xff] }
 0x6d4   :  { %5126 = vrot.lane.b32.xlu0 %v4960_v28, %s9892_s22  ;;  %v4968_v28 = vld [vmem:[#allocation2 + $0x259] sm:$0xff] }
 0x6d7   :  { %5132 = vrot.lane.b32.xlu1 %v4963_v19, %s9892_s22  ;;  %v4971_v19 = vld [vmem:[#allocation2 + $0x279] sm:$0xff] }
 0x6d8   :  { %5130 = vrot.lane.b32.xlu0 %v4962_v24, %s9892_s22  ;;  %v4970_v24 = vld [vmem:[#allocation2 + $0x271] sm:$0xff] }
 0x6db   :  { %5136 = vrot.lane.b32.xlu1 %v4965_v58, %s9892_s22  ;;  %v4973_v58 = vld [vmem:[#allocation2 + $0x291] sm:$0xff] }
 0x6dc   :  { %5134 = vrot.lane.b32.xlu0 %v4964_v27, %s9892_s22  ;;  %v4972_v27 = vld [vmem:[#allocation2 + $0x289] sm:$0xff] }
 0x6df   :  { %5140 = vrot.lane.b32.xlu1 %v4967_v30, %s9892_s22  ;;  %v4975_v30 = vld [vmem:[#allocation2 + $0x2a9] sm:$0xff] }
 0x6e0   :  { %5138 = vrot.lane.b32.xlu0 %v4966_v40, %s9892_s22  ;;  %v4974_v40 = vld [vmem:[#allocation2 + $0x2a1] sm:$0xff] }
 0x6e3   :  { %5144 = vrot.lane.b32.xlu1 %v4969_v10, %s9892_s22  ;;  %v4977_v10 = vld [vmem:[#allocation2 + $0x2c1] sm:$0xff] }
 0x6e4   :  { %5142 = vrot.lane.b32.xlu0 %v4968_v28, %s9892_s22  ;;  %v4976_v28 = vld [vmem:[#allocation2 + $0x2b9] sm:$0xff] }
 0x6e7   :  { %5148 = vrot.lane.b32.xlu1 %v4971_v19, %s9892_s22  ;;  %v4979_v19 = vld [vmem:[#allocation2 + $0x2d9] sm:$0xff] }
 0x6e8   :  { %5146 = vrot.lane.b32.xlu0 %v4970_v24, %s9892_s22  ;;  %v4978_v24 = vld [vmem:[#allocation2 + $0x2d1] sm:$0xff] }
 0x6eb   :  { %5152 = vrot.lane.b32.xlu1 %v4973_v58, %s9892_s22  ;;  %v4981_v58 = vld [vmem:[#allocation2 + $0x2f1] sm:$0xff] }
 0x6ec   :  { %5150 = vrot.lane.b32.xlu0 %v4972_v27, %s9892_s22  ;;  %v4980_v27 = vld [vmem:[#allocation2 + $0x2e9] sm:$0xff] }
 0x6ef   :  { %5156 = vrot.lane.b32.xlu1 %v4975_v30, %s9892_s22 }
 0x6f0   :  { %5154 = vrot.lane.b32.xlu0 %v4974_v40, %s9892_s22 }
 0x6f3   :  { %5160 = vrot.lane.b32.xlu1 %v4977_v10, %s9892_s22  ;;  %v4983_v10 = vld [vmem:[#allocation2 + $0x309] sm:$0xff] }
 0x6f4   :  { %5158 = vrot.lane.b32.xlu0 %v4976_v28, %s9892_s22  ;;  %v4982_v28 = vld [vmem:[#allocation2 + $0x301] sm:$0xff] }
 0x6f7   :  { %5164 = vrot.lane.b32.xlu1 %v4979_v19, %s9892_s22 }
 0x6f8   :  { %5162 = vrot.lane.b32.xlu0 %v4978_v24, %s9892_s22 }
 0x6fb   :  { %5168 = vrot.lane.b32.xlu1 %v4981_v58, %s9892_s22  ;;  %v4985_v58 = vld [vmem:[#allocation2 + $0x321] sm:$0xff] }
 0x6fc   :  { %5166 = vrot.lane.b32.xlu0 %v4980_v27, %s9892_s22  ;;  %v5057_v30 = vpop.permute.xlu1 %5056  ;;  %v5055_v40 = vpop.permute.xlu0 %5054  ;;  %v4984_v27 = vld [vmem:[#allocation2 + $0x319] sm:$0xff] }
 0x6fd   :  { %5245 = vst.msk [vmem:[#allocation3 + $0x18] sm:$0xff] %vm713_vm2, %v5057_v30  ;;  %5244 = vst.msk [vmem:[#allocation3 + $0x10] sm:$0xff] %vm713_vm2, %v5055_v40  ;;  %v5307_v30 = vld [vmem:[#allocation2 + $0xa] sm:$0xff]  ;;  %v5306_v40 = vld [vmem:[#allocation2 + $0x2] sm:$0xff] }
 0x6ff   :  { %5172 = vrot.lane.b32.xlu1 %v4983_v10, %s9892_s22 }
 0x700   :  { %5170 = vrot.lane.b32.xlu0 %v4982_v28, %s9892_s22 }
 0x701   :  { %v5061_v19 = vpop.permute.xlu1 %5060 }
 0x702   :  { %v5059_v24 = vpop.permute.xlu0 %5058  ;;  %5247 = vst.msk [vmem:[#allocation3 + $0x28] sm:$0xff] %vm713_vm2, %v5061_v19  ;;  %v5309_v19 = vld [vmem:[#allocation2 + $0x22] sm:$0xff] }
 0x703   :  { %5246 = vst.msk [vmem:[#allocation3 + $0x20] sm:$0xff] %vm713_vm2, %v5059_v24  ;;  %5176 = vrot.lane.b32.xlu1 %v4985_v58, %s9892_s22  ;;  %v5308_v24 = vld [vmem:[#allocation2 + $0x1a] sm:$0xff] }
 0x704   :  { %5174 = vrot.lane.b32.xlu0 %v4984_v27, %s9892_s22  ;;  %v5310_v27 = vld [vmem:[#allocation2 + $0x32] sm:$0xff] }
 0x705   :  { %v5065_v47 = vpop.permute.xlu1 %5064 }
 0x706   :  { %v5063_v20 = vpop.permute.xlu0 %5062  ;;  %5249 = vst.msk [vmem:[#allocation3 + $0x38] sm:$0xff] %vm713_vm2, %v5065_v47 }
 0x707   :  { %5248 = vst.msk [vmem:[#allocation3 + $0x30] sm:$0xff] %vm713_vm2, %v5063_v20  ;;  %5436 = vrot.lane.b32.xlu1 %v5307_v30, %s9893_s10  ;;  %v5311_v20 = vld [vmem:[#allocation2 + $0x3a] sm:$0xff] }
 0x708   :  { %5434 = vrot.lane.b32.xlu0 %v5306_v40, %s9893_s10 }
 0x709   :  { %v5069_v10 = vpop.permute.xlu1 %5068 }
 0x70a   :  { %v5067_v28 = vpop.permute.xlu0 %5066  ;;  %5251 = vst.msk [vmem:[#allocation3 + $0x48] sm:$0xff] %vm713_vm2, %v5069_v10  ;;  %v5313_v10 = vld [vmem:[#allocation2 + $0x52] sm:$0xff] }
 0x70b   :  { %5250 = vst.msk [vmem:[#allocation3 + $0x40] sm:$0xff] %vm713_vm2, %v5067_v28  ;;  %5440 = vrot.lane.b32.xlu1 %v5309_v19, %s9893_s10  ;;  %v5312_v28 = vld [vmem:[#allocation2 + $0x4a] sm:$0xff] }
 0x70c   :  { %5438 = vrot.lane.b32.xlu0 %v5308_v24, %s9893_s10 }
 0x70d   :  { %v5073_v58 = vpop.permute.xlu1 %5072 }
 0x70e   :  { %v5071_v47 = vpop.permute.xlu0 %5070  ;;  %5253 = vst.msk [vmem:[#allocation3 + $0x58] sm:$0xff] %vm713_vm2, %v5073_v58  ;;  %v5315_v58 = vld [vmem:[#allocation2 + $0x6a] sm:$0xff] }
 0x70f   :  { %5252 = vst.msk [vmem:[#allocation3 + $0x50] sm:$0xff] %vm713_vm2, %v5071_v47  ;;  %5444 = vrot.lane.b32.xlu1 %v5311_v20, %s9893_s10  ;;  %v5314_v47 = vld [vmem:[#allocation2 + $0x62] sm:$0xff] }
 0x710   :  { %5442 = vrot.lane.b32.xlu0 %v5310_v27, %s9893_s10 }
 0x711   :  { %v5077_v30 = vpop.permute.xlu1 %5076 }
 0x712   :  { %v5075_v40 = vpop.permute.xlu0 %5074  ;;  %5255 = vst.msk [vmem:[#allocation3 + $0x68] sm:$0xff] %vm713_vm2, %v5077_v30  ;;  %v5317_v30 = vld [vmem:[#allocation2 + $0x82] sm:$0xff] }
 0x713   :  { %5254 = vst.msk [vmem:[#allocation3 + $0x60] sm:$0xff] %vm713_vm2, %v5075_v40  ;;  %5448 = vrot.lane.b32.xlu1 %v5313_v10, %s9893_s10  ;;  %v5316_v40 = vld [vmem:[#allocation2 + $0x7a] sm:$0xff] }
 0x714   :  { %5446 = vrot.lane.b32.xlu0 %v5312_v28, %s9893_s10 }
 0x715   :  { %v5081_v19 = vpop.permute.xlu1 %5080 }
 0x716   :  { %v5079_v24 = vpop.permute.xlu0 %5078  ;;  %5257 = vst.msk [vmem:[#allocation3 + $0x78] sm:$0xff] %vm713_vm2, %v5081_v19  ;;  %v5319_v19 = vld [vmem:[#allocation2 + $0x9a] sm:$0xff] }
 0x717   :  { %5256 = vst.msk [vmem:[#allocation3 + $0x70] sm:$0xff] %vm713_vm2, %v5079_v24  ;;  %5452 = vrot.lane.b32.xlu1 %v5315_v58, %s9893_s10  ;;  %v5318_v24 = vld [vmem:[#allocation2 + $0x92] sm:$0xff] }
 0x718   :  { %5450 = vrot.lane.b32.xlu0 %v5314_v47, %s9893_s10 }
 0x719   :  { %v5085_v20 = vpop.permute.xlu1 %5084 }
 0x71a   :  { %v5083_v27 = vpop.permute.xlu0 %5082  ;;  %5259 = vst.msk [vmem:[#allocation3 + $0x88] sm:$0xff] %vm713_vm2, %v5085_v20  ;;  %v5321_v20 = vld [vmem:[#allocation2 + $0xb2] sm:$0xff] }
 0x71b   :  { %5258 = vst.msk [vmem:[#allocation3 + $0x80] sm:$0xff] %vm713_vm2, %v5083_v27  ;;  %5456 = vrot.lane.b32.xlu1 %v5317_v30, %s9893_s10  ;;  %v5320_v27 = vld [vmem:[#allocation2 + $0xaa] sm:$0xff] }
 0x71c   :  { %5454 = vrot.lane.b32.xlu0 %v5316_v40, %s9893_s10 }
 0x71d   :  { %v5089_v10 = vpop.permute.xlu1 %5088 }
 0x71e   :  { %v5087_v28 = vpop.permute.xlu0 %5086  ;;  %5261 = vst.msk [vmem:[#allocation3 + $0x98] sm:$0xff] %vm713_vm2, %v5089_v10  ;;  %v5323_v10 = vld [vmem:[#allocation2 + $0xca] sm:$0xff] }
 0x71f   :  { %5260 = vst.msk [vmem:[#allocation3 + $0x90] sm:$0xff] %vm713_vm2, %v5087_v28  ;;  %5460 = vrot.lane.b32.xlu1 %v5319_v19, %s9893_s10  ;;  %v5322_v28 = vld [vmem:[#allocation2 + $0xc2] sm:$0xff] }
 0x720   :  { %5458 = vrot.lane.b32.xlu0 %v5318_v24, %s9893_s10 }
 0x721   :  { %v5093_v58 = vpop.permute.xlu1 %5092 }
 0x722   :  { %v5091_v47 = vpop.permute.xlu0 %5090  ;;  %5263 = vst.msk [vmem:[#allocation3 + $0xa8] sm:$0xff] %vm713_vm2, %v5093_v58  ;;  %v5325_v58 = vld [vmem:[#allocation2 + $0xe2] sm:$0xff] }
 0x723   :  { %5262 = vst.msk [vmem:[#allocation3 + $0xa0] sm:$0xff] %vm713_vm2, %v5091_v47  ;;  %5464 = vrot.lane.b32.xlu1 %v5321_v20, %s9893_s10  ;;  %v5324_v47 = vld [vmem:[#allocation2 + $0xda] sm:$0xff] }
 0x724   :  { %5462 = vrot.lane.b32.xlu0 %v5320_v27, %s9893_s10 }
 0x725   :  { %v5097_v30 = vpop.permute.xlu1 %5096 }
 0x726   :  { %v5095_v40 = vpop.permute.xlu0 %5094  ;;  %5265 = vst.msk [vmem:[#allocation3 + $0xb8] sm:$0xff] %vm713_vm2, %v5097_v30  ;;  %v5327_v30 = vld [vmem:[#allocation2 + $0xfa] sm:$0xff] }
 0x727   :  { %5264 = vst.msk [vmem:[#allocation3 + $0xb0] sm:$0xff] %vm713_vm2, %v5095_v40  ;;  %5468 = vrot.lane.b32.xlu1 %v5323_v10, %s9893_s10  ;;  %v5326_v40 = vld [vmem:[#allocation2 + $0xf2] sm:$0xff] }
 0x728   :  { %5466 = vrot.lane.b32.xlu0 %v5322_v28, %s9893_s10 }
 0x729   :  { %v5101_v19 = vpop.permute.xlu1 %5100 }
 0x72a   :  { %v5099_v24 = vpop.permute.xlu0 %5098  ;;  %5267 = vst.msk [vmem:[#allocation3 + $0xc8] sm:$0xff] %vm713_vm2, %v5101_v19  ;;  %v5329_v19 = vld [vmem:[#allocation2 + $0x112] sm:$0xff] }
 0x72b   :  { %5266 = vst.msk [vmem:[#allocation3 + $0xc0] sm:$0xff] %vm713_vm2, %v5099_v24  ;;  %5472 = vrot.lane.b32.xlu1 %v5325_v58, %s9893_s10  ;;  %v5328_v24 = vld [vmem:[#allocation2 + $0x10a] sm:$0xff] }
 0x72c   :  { %5470 = vrot.lane.b32.xlu0 %v5324_v47, %s9893_s10 }
 0x72d   :  { %v5105_v20 = vpop.permute.xlu1 %5104 }
 0x72e   :  { %v5103_v27 = vpop.permute.xlu0 %5102  ;;  %5269 = vst.msk [vmem:[#allocation3 + $0xd8] sm:$0xff] %vm713_vm2, %v5105_v20  ;;  %v5331_v20 = vld [vmem:[#allocation2 + $0x12a] sm:$0xff] }
 0x72f   :  { %5268 = vst.msk [vmem:[#allocation3 + $0xd0] sm:$0xff] %vm713_vm2, %v5103_v27  ;;  %5476 = vrot.lane.b32.xlu1 %v5327_v30, %s9893_s10  ;;  %v5330_v27 = vld [vmem:[#allocation2 + $0x122] sm:$0xff] }
 0x730   :  { %5474 = vrot.lane.b32.xlu0 %v5326_v40, %s9893_s10 }
 0x731   :  { %v5109_v10 = vpop.permute.xlu1 %5108 }
 0x732   :  { %v5107_v28 = vpop.permute.xlu0 %5106  ;;  %5271 = vst.msk [vmem:[#allocation3 + $0xe8] sm:$0xff] %vm713_vm2, %v5109_v10  ;;  %v5333_v10 = vld [vmem:[#allocation2 + $0x142] sm:$0xff] }
 0x733   :  { %5270 = vst.msk [vmem:[#allocation3 + $0xe0] sm:$0xff] %vm713_vm2, %v5107_v28  ;;  %5480 = vrot.lane.b32.xlu1 %v5329_v19, %s9893_s10  ;;  %v5332_v28 = vld [vmem:[#allocation2 + $0x13a] sm:$0xff] }
 0x734   :  { %5478 = vrot.lane.b32.xlu0 %v5328_v24, %s9893_s10 }
 0x735   :  { %v5113_v58 = vpop.permute.xlu1 %5112 }
 0x736   :  { %v5111_v47 = vpop.permute.xlu0 %5110  ;;  %5273 = vst.msk [vmem:[#allocation3 + $0xf8] sm:$0xff] %vm713_vm2, %v5113_v58  ;;  %v5335_v58 = vld [vmem:[#allocation2 + $0x15a] sm:$0xff] }
 0x737   :  { %5272 = vst.msk [vmem:[#allocation3 + $0xf0] sm:$0xff] %vm713_vm2, %v5111_v47  ;;  %5484 = vrot.lane.b32.xlu1 %v5331_v20, %s9893_s10  ;;  %v5334_v47 = vld [vmem:[#allocation2 + $0x152] sm:$0xff] }
 0x738   :  { %5482 = vrot.lane.b32.xlu0 %v5330_v27, %s9893_s10 }
 0x739   :  { %v5117_v30 = vpop.permute.xlu1 %5116 }
 0x73a   :  { %v5115_v40 = vpop.permute.xlu0 %5114  ;;  %5275 = vst.msk [vmem:[#allocation3 + $0x108] sm:$0xff] %vm713_vm2, %v5117_v30  ;;  %v5337_v30 = vld [vmem:[#allocation2 + $0x172] sm:$0xff] }
 0x73b   :  { %5274 = vst.msk [vmem:[#allocation3 + $0x100] sm:$0xff] %vm713_vm2, %v5115_v40  ;;  %5488 = vrot.lane.b32.xlu1 %v5333_v10, %s9893_s10  ;;  %v5336_v40 = vld [vmem:[#allocation2 + $0x16a] sm:$0xff]  ;;  %v5339_v10 = vld [vmem:[#allocation2 + $0x1ba] sm:$0xff] }
 0x73c   :  { %5486 = vrot.lane.b32.xlu0 %v5332_v28, %s9893_s10  ;;  %v5338_v28 = vld [vmem:[#allocation2 + $0x1b2] sm:$0xff] }
 0x73d   :  { %v5121_v19 = vpop.permute.xlu1 %5120 }
 0x73e   :  { %v5119_v24 = vpop.permute.xlu0 %5118  ;;  %5277 = vst.msk [vmem:[#allocation3 + $0x118] sm:$0xff] %vm713_vm2, %v5121_v19 }
 0x73f   :  { %5276 = vst.msk [vmem:[#allocation3 + $0x110] sm:$0xff] %vm713_vm2, %v5119_v24  ;;  %5492 = vrot.lane.b32.xlu1 %v5335_v58, %s9893_s10 }
 0x740   :  { %5490 = vrot.lane.b32.xlu0 %v5334_v47, %s9893_s10 }
 0x741   :  { %v5125_v20 = vpop.permute.xlu1 %5124 }
 0x742   :  { %v5123_v27 = vpop.permute.xlu0 %5122  ;;  %5279 = vst.msk [vmem:[#allocation3 + $0x128] sm:$0xff] %vm713_vm2, %v5125_v20  ;;  %v5341_v20 = vld [vmem:[#allocation2 + $0x1d2] sm:$0xff] }
 0x743   :  { %5278 = vst.msk [vmem:[#allocation3 + $0x120] sm:$0xff] %vm713_vm2, %v5123_v27  ;;  %5496 = vrot.lane.b32.xlu1 %v5337_v30, %s9893_s10  ;;  %v5340_v27 = vld [vmem:[#allocation2 + $0x1ca] sm:$0xff] }
 0x744   :  { %5494 = vrot.lane.b32.xlu0 %v5336_v40, %s9893_s10 }
 0x745   :  { %v5129_v19 = vpop.permute.xlu1 %5128 }
 0x746   :  { %v5127_v24 = vpop.permute.xlu0 %5126  ;;  %5281 = vst.msk [vmem:[#allocation3 + $0x138] sm:$0xff] %vm713_vm2, %v5129_v19 }
 0x747   :  { %5280 = vst.msk [vmem:[#allocation3 + $0x130] sm:$0xff] %vm713_vm2, %v5127_v24  ;;  %5500 = vrot.lane.b32.xlu1 %v5339_v10, %s9893_s10  ;;  %v5343_v10 = vld [vmem:[#allocation2 + $0x1ea] sm:$0xff] }
 0x748   :  { %5498 = vrot.lane.b32.xlu0 %v5338_v28, %s9893_s10  ;;  %v5342_v28 = vld [vmem:[#allocation2 + $0x1e2] sm:$0xff] }
 0x749   :  { %v5133_v58 = vpop.permute.xlu1 %5132 }
 0x74a   :  { %v5131_v47 = vpop.permute.xlu0 %5130  ;;  %5283 = vst.msk [vmem:[#allocation3 + $0x148] sm:$0xff] %vm713_vm2, %v5133_v58  ;;  %v5345_v58 = vld [vmem:[#allocation2 + $0x202] sm:$0xff] }
 0x74b   :  { %5282 = vst.msk [vmem:[#allocation3 + $0x140] sm:$0xff] %vm713_vm2, %v5131_v47  ;;  %5504 = vrot.lane.b32.xlu1 %v5341_v20, %s9893_s10  ;;  %v5344_v47 = vld [vmem:[#allocation2 + $0x1fa] sm:$0xff] }
 0x74c   :  { %5502 = vrot.lane.b32.xlu0 %v5340_v27, %s9893_s10 }
 0x74d   :  { %v5137_v30 = vpop.permute.xlu1 %5136 }
 0x74e   :  { %v5135_v40 = vpop.permute.xlu0 %5134  ;;  %5285 = vst.msk [vmem:[#allocation3 + $0x158] sm:$0xff] %vm713_vm2, %v5137_v30  ;;  %v5347_v30 = vld [vmem:[#allocation2 + $0x21a] sm:$0xff] }
 0x74f   :  { %5284 = vst.msk [vmem:[#allocation3 + $0x150] sm:$0xff] %vm713_vm2, %v5135_v40  ;;  %5508 = vrot.lane.b32.xlu1 %v5343_v10, %s9893_s10  ;;  %v5346_v40 = vld [vmem:[#allocation2 + $0x212] sm:$0xff] }
 0x750   :  { %5506 = vrot.lane.b32.xlu0 %v5342_v28, %s9893_s10 }
 0x751   :  { %v5141_v19 = vpop.permute.xlu1 %5140 }
 0x752   :  { %v5139_v24 = vpop.permute.xlu0 %5138  ;;  %5287 = vst.msk [vmem:[#allocation3 + $0x168] sm:$0xff] %vm713_vm2, %v5141_v19  ;;  %v5349_v19 = vld [vmem:[#allocation2 + $0x232] sm:$0xff] }
 0x753   :  { %5286 = vst.msk [vmem:[#allocation3 + $0x160] sm:$0xff] %vm713_vm2, %v5139_v24  ;;  %5512 = vrot.lane.b32.xlu1 %v5345_v58, %s9893_s10  ;;  %v5348_v24 = vld [vmem:[#allocation2 + $0x22a] sm:$0xff] }
 0x754   :  { %5510 = vrot.lane.b32.xlu0 %v5344_v47, %s9893_s10 }
 0x755   :  { %v5145_v20 = vpop.permute.xlu1 %5144 }
 0x756   :  { %v5143_v27 = vpop.permute.xlu0 %5142  ;;  %5289 = vst.msk [vmem:[#allocation3 + $0x178] sm:$0xff] %vm713_vm2, %v5145_v20  ;;  %v5351_v20 = vld [vmem:[#allocation2 + $0x24a] sm:$0xff] }
 0x757   :  { %5288 = vst.msk [vmem:[#allocation3 + $0x170] sm:$0xff] %vm713_vm2, %v5143_v27  ;;  %5516 = vrot.lane.b32.xlu1 %v5347_v30, %s9893_s10  ;;  %v5350_v27 = vld [vmem:[#allocation2 + $0x242] sm:$0xff] }
 0x758   :  { %5514 = vrot.lane.b32.xlu0 %v5346_v40, %s9893_s10 }
 0x759   :  { %v5149_v10 = vpop.permute.xlu1 %5148 }
 0x75a   :  { %v5147_v28 = vpop.permute.xlu0 %5146  ;;  %5291 = vst.msk [vmem:[#allocation3 + $0x188] sm:$0xff] %vm713_vm2, %v5149_v10  ;;  %v5353_v10 = vld [vmem:[#allocation2 + $0x262] sm:$0xff] }
 0x75b   :  { %5290 = vst.msk [vmem:[#allocation3 + $0x180] sm:$0xff] %vm713_vm2, %v5147_v28  ;;  %5520 = vrot.lane.b32.xlu1 %v5349_v19, %s9893_s10  ;;  %v5352_v28 = vld [vmem:[#allocation2 + $0x25a] sm:$0xff] }
 0x75c   :  { %5518 = vrot.lane.b32.xlu0 %v5348_v24, %s9893_s10 }
 0x75d   :  { %v5153_v58 = vpop.permute.xlu1 %5152 }
 0x75e   :  { %v5151_v47 = vpop.permute.xlu0 %5150  ;;  %5293 = vst.msk [vmem:[#allocation3 + $0x198] sm:$0xff] %vm713_vm2, %v5153_v58  ;;  %v5355_v58 = vld [vmem:[#allocation2 + $0x27a] sm:$0xff] }
 0x75f   :  { %5292 = vst.msk [vmem:[#allocation3 + $0x190] sm:$0xff] %vm713_vm2, %v5151_v47  ;;  %5524 = vrot.lane.b32.xlu1 %v5351_v20, %s9893_s10  ;;  %v5354_v47 = vld [vmem:[#allocation2 + $0x272] sm:$0xff] }
 0x760   :  { %5522 = vrot.lane.b32.xlu0 %v5350_v27, %s9893_s10 }
 0x761   :  { %v5157_v30 = vpop.permute.xlu1 %5156 }
 0x762   :  { %v5155_v40 = vpop.permute.xlu0 %5154  ;;  %5295 = vst.msk [vmem:[#allocation3 + $0x1a8] sm:$0xff] %vm713_vm2, %v5157_v30  ;;  %v5357_v30 = vld [vmem:[#allocation2 + $0x292] sm:$0xff] }
 0x763   :  { %5294 = vst.msk [vmem:[#allocation3 + $0x1a0] sm:$0xff] %vm713_vm2, %v5155_v40  ;;  %5528 = vrot.lane.b32.xlu1 %v5353_v10, %s9893_s10  ;;  %v5356_v40 = vld [vmem:[#allocation2 + $0x28a] sm:$0xff] }
 0x764   :  { %5526 = vrot.lane.b32.xlu0 %v5352_v28, %s9893_s10 }
 0x765   :  { %v5161_v19 = vpop.permute.xlu1 %5160 }
 0x766   :  { %v5159_v24 = vpop.permute.xlu0 %5158  ;;  %5297 = vst.msk [vmem:[#allocation3 + $0x1b8] sm:$0xff] %vm713_vm2, %v5161_v19  ;;  %v5359_v19 = vld [vmem:[#allocation2 + $0x2aa] sm:$0xff] }
 0x767   :  { %5296 = vst.msk [vmem:[#allocation3 + $0x1b0] sm:$0xff] %vm713_vm2, %v5159_v24  ;;  %5532 = vrot.lane.b32.xlu1 %v5355_v58, %s9893_s10  ;;  %v5358_v24 = vld [vmem:[#allocation2 + $0x2a2] sm:$0xff] }
 0x768   :  { %5530 = vrot.lane.b32.xlu0 %v5354_v47, %s9893_s10 }
 0x769   :  { %v5165_v20 = vpop.permute.xlu1 %5164 }
 0x76a   :  { %v5163_v27 = vpop.permute.xlu0 %5162  ;;  %5299 = vst.msk [vmem:[#allocation3 + $0x1c8] sm:$0xff] %vm713_vm2, %v5165_v20  ;;  %v5361_v20 = vld [vmem:[#allocation2 + $0x2c2] sm:$0xff] }
 0x76b   :  { %5298 = vst.msk [vmem:[#allocation3 + $0x1c0] sm:$0xff] %vm713_vm2, %v5163_v27  ;;  %5536 = vrot.lane.b32.xlu1 %v5357_v30, %s9893_s10  ;;  %v5360_v27 = vld [vmem:[#allocation2 + $0x2ba] sm:$0xff] }
 0x76c   :  { %5534 = vrot.lane.b32.xlu0 %v5356_v40, %s9893_s10 }
 0x76d   :  { %v5169_v10 = vpop.permute.xlu1 %5168 }
 0x76e   :  { %v5167_v28 = vpop.permute.xlu0 %5166  ;;  %5301 = vst.msk [vmem:[#allocation3 + $0x1d8] sm:$0xff] %vm713_vm2, %v5169_v10  ;;  %v5363_v10 = vld [vmem:[#allocation2 + $0x2da] sm:$0xff] }
 0x76f   :  { %5300 = vst.msk [vmem:[#allocation3 + $0x1d0] sm:$0xff] %vm713_vm2, %v5167_v28  ;;  %5540 = vrot.lane.b32.xlu1 %v5359_v19, %s9893_s10  ;;  %v5362_v28 = vld [vmem:[#allocation2 + $0x2d2] sm:$0xff] }
 0x770   :  { %5538 = vrot.lane.b32.xlu0 %v5358_v24, %s9893_s10 }
 0x771   :  { %v5173_v58 = vpop.permute.xlu1 %5172 }
 0x772   :  { %v5171_v47 = vpop.permute.xlu0 %5170  ;;  %5303 = vst.msk [vmem:[#allocation3 + $0x1e8] sm:$0xff] %vm713_vm2, %v5173_v58  ;;  %v5365_v58 = vld [vmem:[#allocation2 + $0x2f2] sm:$0xff] }
 0x773   :  { %5302 = vst.msk [vmem:[#allocation3 + $0x1e0] sm:$0xff] %vm713_vm2, %v5171_v47  ;;  %5544 = vrot.lane.b32.xlu1 %v5361_v20, %s9893_s10  ;;  %v5364_v47 = vld [vmem:[#allocation2 + $0x2ea] sm:$0xff] }
 0x774   :  { %5542 = vrot.lane.b32.xlu0 %v5360_v27, %s9893_s10 }
 0x775   :  { %v5177_v30 = vpop.permute.xlu1 %5176 }
 0x776   :  { %v5175_v40 = vpop.permute.xlu0 %5174  ;;  %5305 = vst.msk [vmem:[#allocation3 + $0x1f8] sm:$0xff] %vm713_vm2, %v5177_v30  ;;  %v5367_v30 = vld [vmem:[#allocation2 + $0x30a] sm:$0xff] }
 0x777   :  { %5304 = vst.msk [vmem:[#allocation3 + $0x1f0] sm:$0xff] %vm713_vm2, %v5175_v40  ;;  %5548 = vrot.lane.b32.xlu1 %v5363_v10, %s9893_s10  ;;  %v5366_v40 = vld [vmem:[#allocation2 + $0x302] sm:$0xff] }
 0x778   :  { %5546 = vrot.lane.b32.xlu0 %v5362_v28, %s9893_s10 }
 0x779   :  { %v5437_v19 = vpop.permute.xlu1 %5436 }
 0x77a   :  { %v5435_v24 = vpop.permute.xlu0 %5434  ;;  %5627 = vst.msk [vmem:[#allocation3 + $0x8] sm:$0xff] %vm1098_vm3, %v5437_v19  ;;  %v5369_v19 = vld [vmem:[#allocation2 + $0x322] sm:$0xff] }
 0x77b   :  { %5626 = vst.msk [vmem:[#allocation3] sm:$0xff] %vm1098_vm3, %v5435_v24  ;;  %5552 = vrot.lane.b32.xlu1 %v5365_v58, %s9893_s10  ;;  %v5368_v24 = vld [vmem:[#allocation2 + $0x31a] sm:$0xff] }
 0x77c   :  { %5550 = vrot.lane.b32.xlu0 %v5364_v47, %s9893_s10 }
 0x77d   :  { %v5441_v20 = vpop.permute.xlu1 %5440 }
 0x77e   :  { %v5439_v27 = vpop.permute.xlu0 %5438  ;;  %5629 = vst.msk [vmem:[#allocation3 + $0x18] sm:$0xff] %vm1098_vm3, %v5441_v20 }
 0x77f   :  { %5628 = vst.msk [vmem:[#allocation3 + $0x10] sm:$0xff] %vm1098_vm3, %v5439_v27  ;;  %5556 = vrot.lane.b32.xlu1 %v5367_v30, %s9893_s10 }
 0x780   :  { %5554 = vrot.lane.b32.xlu0 %v5366_v40, %s9893_s10 }
 0x781   :  { %v5445_v10 = vpop.permute.xlu1 %5444 }
 0x782   :  { %v5443_v28 = vpop.permute.xlu0 %5442  ;;  %5631 = vst.msk [vmem:[#allocation3 + $0x28] sm:$0xff] %vm1098_vm3, %v5445_v10 }
 0x783   :  { %5630 = vst.msk [vmem:[#allocation3 + $0x20] sm:$0xff] %vm1098_vm3, %v5443_v28  ;;  %5560 = vrot.lane.b32.xlu1 %v5369_v19, %s9893_s10 }
 0x784   :  { %5558 = vrot.lane.b32.xlu0 %v5368_v24, %s9893_s10 }
 0x785   :  { %v5449_v58 = vpop.permute.xlu1 %5448 }
 0x786   :  { %v5447_v47 = vpop.permute.xlu0 %5446  ;;  %5633 = vst.msk [vmem:[#allocation3 + $0x38] sm:$0xff] %vm1098_vm3, %v5449_v58 }
 0x787   :  { %5632 = vst.msk [vmem:[#allocation3 + $0x30] sm:$0xff] %vm1098_vm3, %v5447_v47  ;;  %5820 = vrot.lane.b32.xlu1 %v13386_v46, %s9894_s0 }
 0x788   :  { %5818 = vrot.lane.b32.xlu0 %v13388_v6, %s9894_s0 }
 0x789   :  { %v5453_v20 = vpop.permute.xlu1 %5452 }
 0x78a   :  { %v5451_v27 = vpop.permute.xlu0 %5450  ;;  %5635 = vst.msk [vmem:[#allocation3 + $0x48] sm:$0xff] %vm1098_vm3, %v5453_v20 }
 0x78b   :  { %5634 = vst.msk [vmem:[#allocation3 + $0x40] sm:$0xff] %vm1098_vm3, %v5451_v27  ;;  %5824 = vrot.lane.b32.xlu1 %v13394_v52, %s9894_s0 }
 0x78c   :  { %5822 = vrot.lane.b32.xlu0 %v13396_v18, %s9894_s0 }
 0x78d   :  { %v5457_v30 = vpop.permute.xlu1 %5456 }
 0x78e   :  { %v5455_v40 = vpop.permute.xlu0 %5454  ;;  %5637 = vst.msk [vmem:[#allocation3 + $0x58] sm:$0xff] %vm1098_vm3, %v5457_v30  ;;  %v17018_v30 = vld [vmem:[#allocation82_spill] sm:$0xff] }
 0x78f   :  { %5636 = vst.msk [vmem:[#allocation3 + $0x50] sm:$0xff] %vm1098_vm3, %v5455_v40  ;;  %5828 = vrot.lane.b32.xlu1 %v13402_v51, %s9894_s0  ;;  %v17019_v40 = vld [vmem:[#allocation83_spill] sm:$0xff] }
 0x790   :  { %5826 = vrot.lane.b32.xlu0 %v13406_v37, %s9894_s0 }
 0x791   :  { %v5461_v46 = vpop.permute.xlu1 %5460 }
 0x792   :  { %v5459_v6 = vpop.permute.xlu0 %5458  ;;  %5639 = vst.msk [vmem:[#allocation3 + $0x68] sm:$0xff] %vm1098_vm3, %v5461_v46 }
 0x793   :  { %5638 = vst.msk [vmem:[#allocation3 + $0x60] sm:$0xff] %vm1098_vm3, %v5459_v6  ;;  %5832 = vrot.lane.b32.xlu1 %v13408_v41, %s9894_s0 }
 0x794   :  { %5830 = vrot.lane.b32.xlu0 %v13410_v33, %s9894_s0 }
 0x795   :  { %v5465_v52 = vpop.permute.xlu1 %5464 }
 0x796   :  { %v5463_v18 = vpop.permute.xlu0 %5462  ;;  %5641 = vst.msk [vmem:[#allocation3 + $0x78] sm:$0xff] %vm1098_vm3, %v5465_v52  ;;  %v5753_v52 = vld [vmem:[#allocation2 + $0x338] sm:$0xff] }
 0x797   :  { %5640 = vst.msk [vmem:[#allocation3 + $0x70] sm:$0xff] %vm1098_vm3, %v5463_v18  ;;  %5836 = vrot.lane.b32.xlu1 %v13420_v23, %s9894_s0  ;;  %v5752_v18 = vld [vmem:[#allocation2 + $0x330] sm:$0xff] }
 0x798   :  { %5834 = vrot.lane.b32.xlu0 %v13424_v9, %s9894_s0 }
 0x799   :  { %v5469_v51 = vpop.permute.xlu1 %5468 }
 0x79a   :  { %v5467_v37 = vpop.permute.xlu0 %5466  ;;  %5643 = vst.msk [vmem:[#allocation3 + $0x88] sm:$0xff] %vm1098_vm3, %v5469_v51 }
 0x79b   :  { %5642 = vst.msk [vmem:[#allocation3 + $0x80] sm:$0xff] %vm1098_vm3, %v5467_v37  ;;  %5840 = vrot.lane.b32.xlu1 %v13428_v36, %s9894_s0 }
 0x79c   :  { %5838 = vrot.lane.b32.xlu0 %v13430_v29, %s9894_s0 }
 0x79d   :  { %v5473_v41 = vpop.permute.xlu1 %5472 }
 0x79e   :  { %v5471_v33 = vpop.permute.xlu0 %5470  ;;  %5645 = vst.msk [vmem:[#allocation3 + $0x98] sm:$0xff] %vm1098_vm3, %v5473_v41  ;;  %v6075_v41 = vld [vmem:[#allocation2 + $0x21] sm:$0xff] }
 0x79f   :  { %5644 = vst.msk [vmem:[#allocation3 + $0x90] sm:$0xff] %vm1098_vm3, %v5471_v33  ;;  %5844 = vrot.lane.b32.xlu1 %v13436_v22, %s9894_s0  ;;  %v6074_v33 = vld [vmem:[#allocation2 + $0x19] sm:$0xff] }
 0x7a0   :  { %5842 = vrot.lane.b32.xlu0 %v13438_v56, %s9894_s0 }
 0x7a1   :  { %v5477_v23 = vpop.permute.xlu1 %5476 }
 0x7a2   :  { %v5475_v9 = vpop.permute.xlu0 %5474  ;;  %5647 = vst.msk [vmem:[#allocation3 + $0xa8] sm:$0xff] %vm1098_vm3, %v5477_v23 }
 0x7a3   :  { %5646 = vst.msk [vmem:[#allocation3 + $0xa0] sm:$0xff] %vm1098_vm3, %v5475_v9  ;;  %5848 = vrot.lane.b32.xlu1 %v13446_v57, %s9894_s0 }
 0x7a4   :  { %5846 = vrot.lane.b32.xlu0 %v13450_v38, %s9894_s0 }
 0x7a5   :  { %v5481_v36 = vpop.permute.xlu1 %5480 }
 0x7a6   :  { %v5479_v29 = vpop.permute.xlu0 %5478  ;;  %5649 = vst.msk [vmem:[#allocation3 + $0xb8] sm:$0xff] %vm1098_vm3, %v5481_v36  ;;  %v14004_v36 = vld [vmem:[#allocation2 + $0x39] sm:$0xff] }
 0x7a7   :  { %5648 = vst.msk [vmem:[#allocation3 + $0xb0] sm:$0xff] %vm1098_vm3, %v5479_v29  ;;  %5852 = vrot.lane.b32.xlu1 %v13454_v0, %s9894_s0  ;;  %v14006_v29 = vld [vmem:[#allocation2 + $0x31] sm:$0xff] }
 0x7a8   :  { %5850 = vrot.lane.b32.xlu0 %v13456_v43, %s9894_s0 }
 0x7a9   :  { %v5485_v22 = vpop.permute.xlu1 %5484 }
 0x7aa   :  { %v5483_v56 = vpop.permute.xlu0 %5482  ;;  %5651 = vst.msk [vmem:[#allocation3 + $0xc8] sm:$0xff] %vm1098_vm3, %v5485_v22 }
 0x7ab   :  { %5650 = vst.msk [vmem:[#allocation3 + $0xc0] sm:$0xff] %vm1098_vm3, %v5483_v56  ;;  %5856 = vrot.lane.b32.xlu1 %v13462_v32, %s9894_s0 }
 0x7ac   :  { %5854 = vrot.lane.b32.xlu0 %v13464_v35, %s9894_s0 }
 0x7ad   :  { %v5489_v57 = vpop.permute.xlu1 %5488 }
 0x7ae   :  { %v5487_v38 = vpop.permute.xlu0 %5486  ;;  %5653 = vst.msk [vmem:[#allocation3 + $0xd8] sm:$0xff] %vm1098_vm3, %v5489_v57  ;;  %v14014_v57 = vld [vmem:[#allocation2 + $0x51] sm:$0xff] }
 0x7af   :  { %5652 = vst.msk [vmem:[#allocation3 + $0xd0] sm:$0xff] %vm1098_vm3, %v5487_v38  ;;  %5860 = vrot.lane.b32.xlu1 %v13472_v45, %s9894_s0  ;;  %v14016_v38 = vld [vmem:[#allocation2 + $0x49] sm:$0xff] }
 0x7b0   :  { %5858 = vrot.lane.b32.xlu0 %v13476_v17, %s9894_s0 }
 0x7b1   :  { %v5493_v0 = vpop.permute.xlu1 %5492 }
 0x7b2   :  { %v5491_v43 = vpop.permute.xlu0 %5490  ;;  %5655 = vst.msk [vmem:[#allocation3 + $0xe8] sm:$0xff] %vm1098_vm3, %v5493_v0 }
 0x7b3   :  { %5654 = vst.msk [vmem:[#allocation3 + $0xe0] sm:$0xff] %vm1098_vm3, %v5491_v43  ;;  %5864 = vrot.lane.b32.xlu1 %v13480_v3, %s9894_s0 }
 0x7b4   :  { %5862 = vrot.lane.b32.xlu0 %v13482_v14, %s9894_s0 }
 0x7b5   :  { %v5497_v32 = vpop.permute.xlu1 %5496 }
 0x7b6   :  { %v5495_v35 = vpop.permute.xlu0 %5494  ;;  %5657 = vst.msk [vmem:[#allocation3 + $0xf8] sm:$0xff] %vm1098_vm3, %v5497_v32  ;;  %v14024_v32 = vld [vmem:[#allocation2 + $0x69] sm:$0xff] }
 0x7b7   :  { %5656 = vst.msk [vmem:[#allocation3 + $0xf0] sm:$0xff] %vm1098_vm3, %v5495_v35  ;;  %5868 = vrot.lane.b32.xlu1 %v13488_v2, %s9894_s0  ;;  %v14026_v35 = vld [vmem:[#allocation2 + $0x61] sm:$0xff] }
 0x7b8   :  { %5866 = vrot.lane.b32.xlu0 %v13490_v54, %s9894_s0 }
 0x7b9   :  { %v5501_v45 = vpop.permute.xlu1 %5500 }
 0x7ba   :  { %v5499_v17 = vpop.permute.xlu0 %5498  ;;  %5659 = vst.msk [vmem:[#allocation3 + $0x108] sm:$0xff] %vm1098_vm3, %v5501_v45 }
 0x7bb   :  { %5658 = vst.msk [vmem:[#allocation3 + $0x100] sm:$0xff] %vm1098_vm3, %v5499_v17  ;;  %5872 = vrot.lane.b32.xlu1 %v13498_v44, %s9894_s0  ;;  %v5721_v44 = vld [vmem:[#allocation2 + $0x188] sm:$0xff] }
 0x7bc   :  { %5870 = vrot.lane.b32.xlu0 %v13502_v42, %s9894_s0  ;;  %v5720_v42 = vld [vmem:[#allocation2 + $0x180] sm:$0xff] }
 0x7bd   :  { %v5505_v3 = vpop.permute.xlu1 %5504 }
 0x7be   :  { %v5503_v14 = vpop.permute.xlu0 %5502  ;;  %5661 = vst.msk [vmem:[#allocation3 + $0x118] sm:$0xff] %vm1098_vm3, %v5505_v3  ;;  %v14034_v3 = vld [vmem:[#allocation2 + $0x81] sm:$0xff] }
 0x7bf   :  { %5660 = vst.msk [vmem:[#allocation3 + $0x110] sm:$0xff] %vm1098_vm3, %v5503_v14  ;;  %5876 = vrot.lane.b32.xlu1 %v13506_v60, %s9894_s0  ;;  %v14036_v14 = vld [vmem:[#allocation2 + $0x79] sm:$0xff] }
 0x7c0   :  { %5874 = vrot.lane.b32.xlu0 %v13508_v63, %s9894_s0 }
 0x7c1   :  { %v5509_v2 = vpop.permute.xlu1 %5508 }
 0x7c2   :  { %v5507_v54 = vpop.permute.xlu0 %5506  ;;  %5663 = vst.msk [vmem:[#allocation3 + $0x128] sm:$0xff] %vm1098_vm3, %v5509_v2 }
 0x7c3   :  { %5662 = vst.msk [vmem:[#allocation3 + $0x120] sm:$0xff] %vm1098_vm3, %v5507_v54  ;;  %5880 = vrot.lane.b32.xlu1 %v5721_v44, %s9894_s0  ;;  %v14044_v44 = vld [vmem:[#allocation2 + $0x99] sm:$0xff] }
 0x7c4   :  { %5878 = vrot.lane.b32.xlu0 %v5720_v42, %s9894_s0  ;;  %v14046_v42 = vld [vmem:[#allocation2 + $0x91] sm:$0xff] }
 0x7c5   :  { %v5513_v10 = vpop.permute.xlu1 %5512 }
 0x7c6   :  { %v5511_v28 = vpop.permute.xlu0 %5510  ;;  %5665 = vst.msk [vmem:[#allocation3 + $0x138] sm:$0xff] %vm1098_vm3, %v5513_v10 }
 0x7c7   :  { %5664 = vst.msk [vmem:[#allocation3 + $0x130] sm:$0xff] %vm1098_vm3, %v5511_v28  ;;  %5884 = vrot.lane.b32.xlu1 %v13516_v5, %s9894_s0 }
 0x7c8   :  { %5882 = vrot.lane.b32.xlu0 %v13518_v62, %s9894_s0 }
 0x7c9   :  { %v5517_v60 = vpop.permute.xlu1 %5516 }
 0x7ca   :  { %v5515_v63 = vpop.permute.xlu0 %5514  ;;  %5667 = vst.msk [vmem:[#allocation3 + $0x148] sm:$0xff] %vm1098_vm3, %v5517_v60  ;;  %v14054_v60 = vld [vmem:[#allocation2 + $0xb1] sm:$0xff] }
 0x7cb   :  { %5666 = vst.msk [vmem:[#allocation3 + $0x140] sm:$0xff] %vm1098_vm3, %v5515_v63  ;;  %5888 = vrot.lane.b32.xlu1 %v13524_v4, %s9894_s0  ;;  %v14056_v63 = vld [vmem:[#allocation2 + $0xa9] sm:$0xff] }
 0x7cc   :  { %5886 = vrot.lane.b32.xlu0 %v13526_v25, %s9894_s0 }
 0x7cd   :  { %v5521_v19 = vpop.permute.xlu1 %5520 }
 0x7ce   :  { %v5519_v24 = vpop.permute.xlu0 %5518  ;;  %5669 = vst.msk [vmem:[#allocation3 + $0x158] sm:$0xff] %vm1098_vm3, %v5521_v19 }
 0x7cf   :  { %5668 = vst.msk [vmem:[#allocation3 + $0x150] sm:$0xff] %vm1098_vm3, %v5519_v24  ;;  %5892 = vrot.lane.b32.xlu1 %v13532_v21, %s9894_s0 }
 0x7d0   :  { %5890 = vrot.lane.b32.xlu0 %v13536_v13, %s9894_s0 }
 0x7d1   :  { %v5525_v5 = vpop.permute.xlu1 %5524 }
 0x7d2   :  { %v5523_v62 = vpop.permute.xlu0 %5522  ;;  %5671 = vst.msk [vmem:[#allocation3 + $0x168] sm:$0xff] %vm1098_vm3, %v5525_v5  ;;  %v14064_v5 = vld [vmem:[#allocation2 + $0xc9] sm:$0xff] }
 0x7d3   :  { %5670 = vst.msk [vmem:[#allocation3 + $0x160] sm:$0xff] %vm1098_vm3, %v5523_v62  ;;  %5896 = vrot.lane.b32.xlu1 %v13538_v7, %s9894_s0  ;;  %v14066_v62 = vld [vmem:[#allocation2 + $0xc1] sm:$0xff] }
 0x7d4   :  { %5894 = vrot.lane.b32.xlu0 %v13540_v12, %s9894_s0 }
 0x7d5   :  { %v5529_v4 = vpop.permute.xlu1 %5528 }
 0x7d6   :  { %v5527_v25 = vpop.permute.xlu0 %5526  ;;  %5673 = vst.msk [vmem:[#allocation3 + $0x178] sm:$0xff] %vm1098_vm3, %v5529_v4 }
 0x7d7   :  { %5672 = vst.msk [vmem:[#allocation3 + $0x170] sm:$0xff] %vm1098_vm3, %v5527_v25  ;;  %5900 = vrot.lane.b32.xlu1 %v13551_v59, %s9894_s0 }
 0x7d8   :  { %5898 = vrot.lane.b32.xlu0 %v13553_v15, %s9894_s0 }
 0x7d9   :  { %v5533_v21 = vpop.permute.xlu1 %5532 }
 0x7da   :  { %v5531_v13 = vpop.permute.xlu0 %5530  ;;  %5675 = vst.msk [vmem:[#allocation3 + $0x188] sm:$0xff] %vm1098_vm3, %v5533_v21  ;;  %v14074_v21 = vld [vmem:[#allocation2 + $0xe1] sm:$0xff] }
 0x7db   :  { %5674 = vst.msk [vmem:[#allocation3 + $0x180] sm:$0xff] %vm1098_vm3, %v5531_v13  ;;  %5904 = vrot.lane.b32.xlu1 %v13559_v11, %s9894_s0  ;;  %v14076_v13 = vld [vmem:[#allocation2 + $0xd9] sm:$0xff] }
 0x7dc   :  { %5902 = vrot.lane.b32.xlu0 %v13561_v26, %s9894_s0 }
 0x7dd   :  { %v5537_v7 = vpop.permute.xlu1 %5536 }
 0x7de   :  { %v5535_v12 = vpop.permute.xlu0 %5534  ;;  %5677 = vst.msk [vmem:[#allocation3 + $0x198] sm:$0xff] %vm1098_vm3, %v5537_v7 }
 0x7df   :  { %5676 = vst.msk [vmem:[#allocation3 + $0x190] sm:$0xff] %vm1098_vm3, %v5535_v12  ;;  %5908 = vrot.lane.b32.xlu1 %v13570_v48, %s9894_s0 }
 0x7e0   :  { %5906 = vrot.lane.b32.xlu0 %v13572_v61, %s9894_s0 }
 0x7e1   :  { %v5541_v59 = vpop.permute.xlu1 %5540 }
 0x7e2   :  { %v5539_v15 = vpop.permute.xlu0 %5538  ;;  %5679 = vst.msk [vmem:[#allocation3 + $0x1a8] sm:$0xff] %vm1098_vm3, %v5541_v59  ;;  %v14084_v59 = vld [vmem:[#allocation2 + $0xf9] sm:$0xff] }
 0x7e3   :  { %5678 = vst.msk [vmem:[#allocation3 + $0x1a0] sm:$0xff] %vm1098_vm3, %v5539_v15  ;;  %5912 = vrot.lane.b32.xlu1 %v13578_v34, %s9894_s0  ;;  %v14086_v15 = vld [vmem:[#allocation2 + $0xf1] sm:$0xff] }
 0x7e4   :  { %5910 = vrot.lane.b32.xlu0 %v13580_v1, %s9894_s0 }
 0x7e5   :  { %v5545_v11 = vpop.permute.xlu1 %5544 }
 0x7e6   :  { %v5543_v26 = vpop.permute.xlu0 %5542  ;;  %5681 = vst.msk [vmem:[#allocation3 + $0x1b8] sm:$0xff] %vm1098_vm3, %v5545_v11 }
 0x7e7   :  { %5680 = vst.msk [vmem:[#allocation3 + $0x1b0] sm:$0xff] %vm1098_vm3, %v5543_v26  ;;  %5916 = vrot.lane.b32.xlu1 %v13586_v39, %s9894_s0 }
 0x7e8   :  { %5914 = vrot.lane.b32.xlu0 %v13590_v8, %s9894_s0 }
 0x7e9   :  { %v5549_v48 = vpop.permute.xlu1 %5548 }
 0x7ea   :  { %v5547_v61 = vpop.permute.xlu0 %5546  ;;  %5683 = vst.msk [vmem:[#allocation3 + $0x1c8] sm:$0xff] %vm1098_vm3, %v5549_v48  ;;  %v14094_v48 = vld [vmem:[#allocation2 + $0x111] sm:$0xff] }
 0x7eb   :  { %5682 = vst.msk [vmem:[#allocation3 + $0x1c0] sm:$0xff] %vm1098_vm3, %v5547_v61  ;;  %5920 = vrot.lane.b32.xlu1 %v13596_v16, %s9894_s0  ;;  %v14096_v61 = vld [vmem:[#allocation2 + $0x109] sm:$0xff] }
 0x7ec   :  { %5918 = vrot.lane.b32.xlu0 %v13598_v55, %s9894_s0 }
 0x7ed   :  { %v5553_v34 = vpop.permute.xlu1 %5552 }
 0x7ee   :  { %v5551_v1 = vpop.permute.xlu0 %5550  ;;  %5685 = vst.msk [vmem:[#allocation3 + $0x1d8] sm:$0xff] %vm1098_vm3, %v5553_v34 }
 0x7ef   :  { %5684 = vst.msk [vmem:[#allocation3 + $0x1d0] sm:$0xff] %vm1098_vm3, %v5551_v1  ;;  %5924 = vrot.lane.b32.xlu1 %v13604_v49, %s9894_s0  ;;  %v17014_v49 = vld [vmem:[#allocation78_spill] sm:$0xff] }
 0x7f0   :  { %5922 = vrot.lane.b32.xlu0 %v13606_v53, %s9894_s0  ;;  %v17015_v53 = vld [vmem:[#allocation81_spill] sm:$0xff] }
 0x7f1   :  { %v5557_v39 = vpop.permute.xlu1 %5556 }
 0x7f2   :  { %v5555_v8 = vpop.permute.xlu0 %5554  ;;  %5687 = vst.msk [vmem:[#allocation3 + $0x1e8] sm:$0xff] %vm1098_vm3, %v5557_v39  ;;  %v6459_v39 = vld [vmem:[#allocation2 + $0x22] sm:$0xff] }
 0x7f3   :  { %5686 = vst.msk [vmem:[#allocation3 + $0x1e0] sm:$0xff] %vm1098_vm3, %v5555_v8  ;;  %5928 = vrot.lane.b32.xlu1 %v13612_v31, %s9894_s0  ;;  %v17016_v31 = vld [vmem:[#allocation80_spill] sm:$0xff] }
 0x7f4   :  { %5926 = vrot.lane.b32.xlu0 %v13616_v50, %s9894_s0  ;;  %v17017_v50 = vld [vmem:[#allocation88_spill] sm:$0xff] }
 0x7f5   :  { %v5561_v16 = vpop.permute.xlu1 %5560  ;;  %v6458_v8 = vld [vmem:[#allocation2 + $0x1a] sm:$0xff] }
 0x7f6   :  { %v5559_v55 = vpop.permute.xlu0 %5558  ;;  %5689 = vst.msk [vmem:[#allocation3 + $0x1f8] sm:$0xff] %vm1098_vm3, %v5561_v16  ;;  %v8058_v16 = vld [vmem:[%s16667_s4] sm:$0xff] }
 0x7f7   :  { %5688 = vst.msk [vmem:[#allocation3 + $0x1f0] sm:$0xff] %vm1098_vm3, %v5559_v55  ;;  %5932 = vrot.lane.b32.xlu1 %v17014_v49, %s9894_s0  ;;  %v8059_v55 = vld [vmem:[%s16667_s4 + $0x8] sm:$0xff] }
 0x7f8   :  { %5930 = vrot.lane.b32.xlu0 %v17015_v53, %s9894_s0 }
 0x7f9   :  { %v5821_v58 = vpop.permute.xlu1 %5820 }
 0x7fa   :  { %v5819_v47 = vpop.permute.xlu0 %5818  ;;  %6011 = vst.msk [vmem:[#allocation3 + $0x8] sm:$0xff] %vm1483_vm4, %v5821_v58  ;;  %v9870_v58 = vpack.c.bf16 %v8059_v55, %v8058_v16  ;;  %v6466_v55 = vld [vmem:[#allocation2 + $0x7a] sm:$0xff] }
 0x7fb   :  { %6010 = vst.msk [vmem:[#allocation3] sm:$0xff] %vm1483_vm4, %v5819_v47  ;;  %5936 = vrot.lane.b32.xlu1 %v17016_v31, %s9894_s0  ;;  %v6843_v47 = vld [vmem:[#allocation2 + $0x38] sm:$0xff]  ;;  %v6842_v31 = vld [vmem:[#allocation2 + $0x30] sm:$0xff] }
 0x7fc   :  { %5934 = vrot.lane.b32.xlu0 %v17017_v50, %s9894_s0  ;;  %v8060_v50 = vld [vmem:[%s16667_s4 + $0x10] sm:$0xff]  ;;  %9871 = vmatprep.subr.bf16.mxu1 %v9870_v58 }
 0x7fd   :  { %v5825_v20 = vpop.permute.xlu1 %5824  ;;  %9873 = vmatpush3.bf16.msra.mxu1 %v9870_v58 }
 0x7fe   :  { %v5823_v27 = vpop.permute.xlu0 %5822  ;;  %6013 = vst.msk [vmem:[#allocation3 + $0x18] sm:$0xff] %vm1483_vm4, %v5825_v20  ;;  %v8061_v20 = vld [vmem:[%s16667_s4 + $0x18] sm:$0xff] }
 0x7ff   :  { %6012 = vst.msk [vmem:[#allocation3 + $0x10] sm:$0xff] %vm1483_vm4, %v5823_v27  ;;  %5940 = vrot.lane.b32.xlu1 %v17018_v30, %s9894_s0  ;;  %v9874_v27 = vpack.c.bf16 %v8061_v20, %v8060_v50 }
 0x800   :  { %5938 = vrot.lane.b32.xlu0 %v17019_v40, %s9894_s0 }
 0x801   :  { %v5829_v46 = vpop.permute.xlu1 %5828  ;;  %9875 = vmatprep.subr.bf16.mxu1 %v9874_v27 }
 0x802   :  { %v5827_v6 = vpop.permute.xlu0 %5826  ;;  %6015 = vst.msk [vmem:[#allocation3 + $0x28] sm:$0xff] %vm1483_vm4, %v5829_v46  ;;  %v8062_v46 = vld [vmem:[%s16667_s4 + $0x20] sm:$0xf]  ;;  %9877 = vmatpush3.bf16.msra.mxu1 %v9874_v27 }
 0x803   :  { %6014 = vst.msk [vmem:[#allocation3 + $0x20] sm:$0xff] %vm1483_vm4, %v5827_v6  ;;  %5944 = vrot.lane.b32.xlu1 %v5753_v52, %s9894_s0  ;;  %9764 = vmatprep.subr.msk.mxu1 %vm3736_vm8, %v8062_v46 }
 0x804   :  { %5942 = vrot.lane.b32.xlu0 %v5752_v18, %s9894_s0  ;;  %v6460_v18 = vld [vmem:[#allocation2 + $0x32] sm:$0xff] }
 0x805   :  { %v5833_v51 = vpop.permute.xlu1 %5832 }
 0x806   :  { %v5831_v37 = vpop.permute.xlu0 %5830  ;;  %6017 = vst.msk [vmem:[#allocation3 + $0x38] sm:$0xff] %vm1483_vm4, %v5833_v51  ;;  %9765 = vmatpush3.msk.msra.mxu1 %vm3736_vm8, %v8062_v46 }
 0x807   :  { %6016 = vst.msk [vmem:[#allocation3 + $0x30] sm:$0xff] %vm1483_vm4, %v5831_v37  ;;  %6204 = vrot.lane.b32.xlu1 %v6075_v41, %s9895_s19  ;;  %v6461_v41 = vld [vmem:[#allocation2 + $0x3a] sm:$0xff] }
 0x808   :  { %6202 = vrot.lane.b32.xlu0 %v6074_v33, %s9895_s19 }
 0x809   :  { %v5837_v23 = vpop.permute.xlu1 %5836 }
 0x80a   :  { %v5835_v9 = vpop.permute.xlu0 %5834  ;;  %6019 = vst.msk [vmem:[#allocation3 + $0x48] sm:$0xff] %vm1483_vm4, %v5837_v23 }
 0x80b   :  { %6018 = vst.msk [vmem:[#allocation3 + $0x40] sm:$0xff] %vm1483_vm4, %v5835_v9  ;;  %6208 = vrot.lane.b32.xlu1 %v14004_v36, %s9895_s19  ;;  %v6845_v9 = vld [vmem:[#allocation2 + $0x50] sm:$0xff] }
 0x80c   :  { %6206 = vrot.lane.b32.xlu0 %v14006_v29, %s9895_s19 }
 0x80d   :  { %v5841_v22 = vpop.permute.xlu1 %5840 }
 0x80e   :  { %v5839_v56 = vpop.permute.xlu0 %5838  ;;  %6021 = vst.msk [vmem:[#allocation3 + $0x58] sm:$0xff] %vm1483_vm4, %v5841_v22 }
 0x80f   :  { %6020 = vst.msk [vmem:[#allocation3 + $0x50] sm:$0xff] %vm1483_vm4, %v5839_v56  ;;  %6212 = vrot.lane.b32.xlu1 %v14014_v57, %s9895_s19 }
 0x810   :  { %6210 = vrot.lane.b32.xlu0 %v14016_v38, %s9895_s19 }
 0x811   :  { %v5845_v0 = vpop.permute.xlu1 %5844 }
 0x812   :  { %v5843_v43 = vpop.permute.xlu0 %5842  ;;  %6023 = vst.msk [vmem:[#allocation3 + $0x68] sm:$0xff] %vm1483_vm4, %v5845_v0 }
 0x813   :  { %6022 = vst.msk [vmem:[#allocation3 + $0x60] sm:$0xff] %vm1483_vm4, %v5843_v43  ;;  %6216 = vrot.lane.b32.xlu1 %v14024_v32, %s9895_s19  ;;  %v6462_v43 = vld [vmem:[#allocation2 + $0x4a] sm:$0xff] }
 0x814   :  { %6214 = vrot.lane.b32.xlu0 %v14026_v35, %s9895_s19 }
 0x815   :  { %v5849_v45 = vpop.permute.xlu1 %5848 }
 0x816   :  { %v5847_v17 = vpop.permute.xlu0 %5846  ;;  %6025 = vst.msk [vmem:[#allocation3 + $0x78] sm:$0xff] %vm1483_vm4, %v5849_v45 }
 0x817   :  { %6024 = vst.msk [vmem:[#allocation3 + $0x70] sm:$0xff] %vm1483_vm4, %v5847_v17  ;;  %6220 = vrot.lane.b32.xlu1 %v14034_v3, %s9895_s19 }
 0x818   :  { %6218 = vrot.lane.b32.xlu0 %v14036_v14, %s9895_s19 }
 0x819   :  { %v5853_v2 = vpop.permute.xlu1 %5852 }
 0x81a   :  { %v5851_v54 = vpop.permute.xlu0 %5850  ;;  %6027 = vst.msk [vmem:[#allocation3 + $0x88] sm:$0xff] %vm1483_vm4, %v5853_v2 }
 0x81b   :  { %6026 = vst.msk [vmem:[#allocation3 + $0x80] sm:$0xff] %vm1483_vm4, %v5851_v54  ;;  %6224 = vrot.lane.b32.xlu1 %v14044_v44, %s9895_s19  ;;  %v6847_v54 = vld [vmem:[#allocation2 + $0x68] sm:$0xff] }
 0x81c   :  { %6222 = vrot.lane.b32.xlu0 %v14046_v42, %s9895_s19 }
 0x81d   :  { %v5857_v10 = vpop.permute.xlu1 %5856 }
 0x81e   :  { %v5855_v28 = vpop.permute.xlu0 %5854  ;;  %6029 = vst.msk [vmem:[#allocation3 + $0x98] sm:$0xff] %vm1483_vm4, %v5857_v10  ;;  %v6846_v10 = vld [vmem:[#allocation2 + $0x60] sm:$0xff] }
 0x81f   :  { %6028 = vst.msk [vmem:[#allocation3 + $0x90] sm:$0xff] %vm1483_vm4, %v5855_v28  ;;  %6228 = vrot.lane.b32.xlu1 %v14054_v60, %s9895_s19 }
 0x820   :  { %6226 = vrot.lane.b32.xlu0 %v14056_v63, %s9895_s19 }
 0x821   :  { %v5861_v19 = vpop.permute.xlu1 %5860 }
 0x822   :  { %v5859_v24 = vpop.permute.xlu0 %5858  ;;  %6031 = vst.msk [vmem:[#allocation3 + $0xa8] sm:$0xff] %vm1483_vm4, %v5861_v19 }
 0x823   :  { %6030 = vst.msk [vmem:[#allocation3 + $0xa0] sm:$0xff] %vm1483_vm4, %v5859_v24  ;;  %6232 = vrot.lane.b32.xlu1 %v14064_v5, %s9895_s19 }
 0x824   :  { %6230 = vrot.lane.b32.xlu0 %v14066_v62, %s9895_s19 }
 0x825   :  { %v5865_v4 = vpop.permute.xlu1 %5864 }
 0x826   :  { %v5863_v25 = vpop.permute.xlu0 %5862  ;;  %6033 = vst.msk [vmem:[#allocation3 + $0xb8] sm:$0xff] %vm1483_vm4, %v5865_v4 }
 0x827   :  { %6032 = vst.msk [vmem:[#allocation3 + $0xb0] sm:$0xff] %vm1483_vm4, %v5863_v25  ;;  %6236 = vrot.lane.b32.xlu1 %v14074_v21, %s9895_s19  ;;  %v6464_v25 = vld [vmem:[#allocation2 + $0x62] sm:$0xff] }
 0x828   :  { %6234 = vrot.lane.b32.xlu0 %v14076_v13, %s9895_s19 }
 0x829   :  { %v5869_v7 = vpop.permute.xlu1 %5868 }
 0x82a   :  { %v5867_v12 = vpop.permute.xlu0 %5866  ;;  %6035 = vst.msk [vmem:[#allocation3 + $0xc8] sm:$0xff] %vm1483_vm4, %v5869_v7 }
 0x82b   :  { %6034 = vst.msk [vmem:[#allocation3 + $0xc0] sm:$0xff] %vm1483_vm4, %v5867_v12  ;;  %6240 = vrot.lane.b32.xlu1 %v14084_v59, %s9895_s19 }
 0x82c   :  { %6238 = vrot.lane.b32.xlu0 %v14086_v15, %s9895_s19 }
 0x82d   :  { %v5873_v11 = vpop.permute.xlu1 %5872 }
 0x82e   :  { %v5871_v26 = vpop.permute.xlu0 %5870  ;;  %6037 = vst.msk [vmem:[#allocation3 + $0xd8] sm:$0xff] %vm1483_vm4, %v5873_v11 }
 0x82f   :  { %6036 = vst.msk [vmem:[#allocation3 + $0xd0] sm:$0xff] %vm1483_vm4, %v5871_v26  ;;  %6244 = vrot.lane.b32.xlu1 %v14094_v48, %s9895_s19  ;;  %v6849_v26 = vld [vmem:[#allocation2 + $0x80] sm:$0xff] }
 0x830   :  { %6242 = vrot.lane.b32.xlu0 %v14096_v61, %s9895_s19 }
 0x831   :  { %v5877_v34 = vpop.permute.xlu1 %5876 }
 0x832   :  { %v5875_v1 = vpop.permute.xlu0 %5874  ;;  %6039 = vst.msk [vmem:[#allocation3 + $0xe8] sm:$0xff] %vm1483_vm4, %v5877_v34  ;;  %v6848_v34 = vld [vmem:[#allocation2 + $0x78] sm:$0xff] }
 0x833   :  { %6038 = vst.msk [vmem:[#allocation3 + $0xe0] sm:$0xff] %vm1483_vm4, %v5875_v1  ;;  %6588 = vrot.lane.b32.xlu1 %v6459_v39, %s9896_s20 }
 0x834   :  { %6586 = vrot.lane.b32.xlu0 %v6458_v8, %s9896_s20 }
 0x835   :  { %v5881_v49 = vpop.permute.xlu1 %5880 }
 0x836   :  { %v5879_v53 = vpop.permute.xlu0 %5878  ;;  %6041 = vst.msk [vmem:[#allocation3 + $0xf8] sm:$0xff] %vm1483_vm4, %v5881_v49 }
 0x837   :  { %6040 = vst.msk [vmem:[#allocation3 + $0xf0] sm:$0xff] %vm1483_vm4, %v5879_v53  ;;  %6972 = vrot.lane.b32.xlu1 %v6843_v47, %s9897_s21  ;;  %v6851_v47 = vld [vmem:[#allocation2 + $0x98] sm:$0xff] }
 0x838   :  { %6970 = vrot.lane.b32.xlu0 %v6842_v31, %s9897_s21  ;;  %v6850_v31 = vld [vmem:[#allocation2 + $0x90] sm:$0xff] }
 0x839   :  { %v5885_v30 = vpop.permute.xlu1 %5884 }
 0x83a   :  { %v5883_v40 = vpop.permute.xlu0 %5882  ;;  %6043 = vst.msk [vmem:[#allocation3 + $0x108] sm:$0xff] %vm1483_vm4, %v5885_v30 }
 0x83b   :  { %6042 = vst.msk [vmem:[#allocation3 + $0x100] sm:$0xff] %vm1483_vm4, %v5883_v40  ;;  %7356 = vrot.lane.b32.xlu1 %v14004_v36, %s9898_s23  ;;  %v6844_v36 = vld [vmem:[#allocation2 + $0x48] sm:$0xff]  ;;  %v6468_v40 = vld [vmem:[#allocation2 + $0x92] sm:$0xff] }
 0x83c   :  { %7354 = vrot.lane.b32.xlu0 %v14006_v29, %s9898_s23 }
 0x83d   :  { %v5889_v6 = vpop.permute.xlu1 %5888 }
 0x83e   :  { %v5887_v52 = vpop.permute.xlu0 %5886  ;;  %6045 = vst.msk [vmem:[#allocation3 + $0x118] sm:$0xff] %vm1483_vm4, %v5889_v6 }
 0x83f   :  { %6044 = vst.msk [vmem:[#allocation3 + $0x110] sm:$0xff] %vm1483_vm4, %v5887_v52  ;;  %6590 = vrot.lane.b32.xlu1 %v6460_v18, %s9896_s20 }
 0x840   :  { %7738 = vrot.lane.b32.xlu0 %v6460_v18, %s9899_s1  ;;  %v6853_v18 = vld [vmem:[#allocation2 + $0xb0] sm:$0xff] }
 0x841   :  { %v5893_v51 = vpop.permute.xlu1 %5892 }
 0x842   :  { %v5891_v37 = vpop.permute.xlu0 %5890  ;;  %6047 = vst.msk [vmem:[#allocation3 + $0x128] sm:$0xff] %vm1483_vm4, %v5893_v51  ;;  %v6852_v51 = vld [vmem:[#allocation2 + $0xa8] sm:$0xff] }
 0x843   :  { %6046 = vst.msk [vmem:[#allocation3 + $0x120] sm:$0xff] %vm1483_vm4, %v5891_v37  ;;  %6592 = vrot.lane.b32.xlu1 %v6461_v41, %s9896_s20 }
 0x844   :  { %7740 = vrot.lane.b32.xlu0 %v6461_v41, %s9899_s1 }
 0x845   :  { %v5897_v33 = vpop.permute.xlu1 %5896 }
 0x846   :  { %v5895_v23 = vpop.permute.xlu0 %5894  ;;  %6049 = vst.msk [vmem:[#allocation3 + $0x138] sm:$0xff] %vm1483_vm4, %v5897_v33 }
 0x847   :  { %6048 = vst.msk [vmem:[#allocation3 + $0x130] sm:$0xff] %vm1483_vm4, %v5895_v23  ;;  %6976 = vrot.lane.b32.xlu1 %v6845_v9, %s9897_s21  ;;  %v6470_v9 = vld [vmem:[#allocation2 + $0xaa] sm:$0xff] }
 0x848   :  { %6974 = vrot.lane.b32.xlu0 %v6844_v36, %s9897_s21 }
 0x849   :  { %v5901_v29 = vpop.permute.xlu1 %5900 }
 0x84a   :  { %v5899_v22 = vpop.permute.xlu0 %5898  ;;  %6051 = vst.msk [vmem:[#allocation3 + $0x148] sm:$0xff] %vm1483_vm4, %v5901_v29 }
 0x84b   :  { %6050 = vst.msk [vmem:[#allocation3 + $0x140] sm:$0xff] %vm1483_vm4, %v5899_v22  ;;  %7360 = vrot.lane.b32.xlu1 %v14014_v57, %s9898_s23  ;;  %v6463_v57 = vld [vmem:[#allocation2 + $0x52] sm:$0xff] }
 0x84c   :  { %7358 = vrot.lane.b32.xlu0 %v14016_v38, %s9898_s23 }
 0x84d   :  { %v5905_v56 = vpop.permute.xlu1 %5904 }
 0x84e   :  { %v5903_v0 = vpop.permute.xlu0 %5902  ;;  %6053 = vst.msk [vmem:[#allocation3 + $0x158] sm:$0xff] %vm1483_vm4, %v5905_v56  ;;  %v6855_v56 = vld [vmem:[#allocation2 + $0xc8] sm:$0xff] }
 0x84f   :  { %6052 = vst.msk [vmem:[#allocation3 + $0x150] sm:$0xff] %vm1483_vm4, %v5903_v0  ;;  %6594 = vrot.lane.b32.xlu1 %v6462_v43, %s9896_s20  ;;  %v6854_v0 = vld [vmem:[#allocation2 + $0xc0] sm:$0xff] }
 0x850   :  { %7742 = vrot.lane.b32.xlu0 %v6462_v43, %s9899_s1 }
 0x851   :  { %v5909_v45 = vpop.permute.xlu1 %5908 }
 0x852   :  { %v5907_v17 = vpop.permute.xlu0 %5906  ;;  %6055 = vst.msk [vmem:[#allocation3 + $0x168] sm:$0xff] %vm1483_vm4, %v5909_v45 }
 0x853   :  { %6054 = vst.msk [vmem:[#allocation3 + $0x160] sm:$0xff] %vm1483_vm4, %v5907_v17  ;;  %6596 = vrot.lane.b32.xlu1 %v6463_v57, %s9896_s20 }
 0x854   :  { %7744 = vrot.lane.b32.xlu0 %v6463_v57, %s9899_s1 }
 0x855   :  { %v5913_v38 = vpop.permute.xlu1 %5912 }
 0x856   :  { %v5911_v2 = vpop.permute.xlu0 %5910  ;;  %6057 = vst.msk [vmem:[#allocation3 + $0x178] sm:$0xff] %vm1483_vm4, %v5913_v38  ;;  %v6472_v38 = vld [vmem:[#allocation2 + $0xc2] sm:$0xff] }
 0x857   :  { %6056 = vst.msk [vmem:[#allocation3 + $0x170] sm:$0xff] %vm1483_vm4, %v5911_v2  ;;  %6980 = vrot.lane.b32.xlu1 %v6847_v54, %s9897_s21 }
 0x858   :  { %6978 = vrot.lane.b32.xlu0 %v6846_v10, %s9897_s21 }
 0x859   :  { %v5917_v28 = vpop.permute.xlu1 %5916 }
 0x85a   :  { %v5915_v19 = vpop.permute.xlu0 %5914  ;;  %6059 = vst.msk [vmem:[#allocation3 + $0x188] sm:$0xff] %vm1483_vm4, %v5917_v28  ;;  %v6857_v28 = vld [vmem:[#allocation2 + $0xe0] sm:$0xff] }
 0x85b   :  { %6058 = vst.msk [vmem:[#allocation3 + $0x180] sm:$0xff] %vm1483_vm4, %v5915_v19  ;;  %7364 = vrot.lane.b32.xlu1 %v14024_v32, %s9898_s23  ;;  %v6465_v32 = vld [vmem:[#allocation2 + $0x6a] sm:$0xff]  ;;  %v6856_v19 = vld [vmem:[#allocation2 + $0xd8] sm:$0xff] }
 0x85c   :  { %7362 = vrot.lane.b32.xlu0 %v14026_v35, %s9898_s23 }
 0x85d   :  { %v5921_v24 = vpop.permute.xlu1 %5920 }
 0x85e   :  { %v5919_v4 = vpop.permute.xlu0 %5918  ;;  %6061 = vst.msk [vmem:[#allocation3 + $0x198] sm:$0xff] %vm1483_vm4, %v5921_v24 }
 0x85f   :  { %6060 = vst.msk [vmem:[#allocation3 + $0x190] sm:$0xff] %vm1483_vm4, %v5919_v4  ;;  %6598 = vrot.lane.b32.xlu1 %v6464_v25, %s9896_s20 }
 0x860   :  { %7746 = vrot.lane.b32.xlu0 %v6464_v25, %s9899_s1 }
 0x861   :  { %v5925_v7 = vpop.permute.xlu1 %5924 }
 0x862   :  { %v5923_v12 = vpop.permute.xlu0 %5922  ;;  %6063 = vst.msk [vmem:[#allocation3 + $0x1a8] sm:$0xff] %vm1483_vm4, %v5925_v7 }
 0x863   :  { %6062 = vst.msk [vmem:[#allocation3 + $0x1a0] sm:$0xff] %vm1483_vm4, %v5923_v12  ;;  %6600 = vrot.lane.b32.xlu1 %v6465_v32, %s9896_s20  ;;  %v6474_v12 = vld [vmem:[#allocation2 + $0xda] sm:$0xff] }
 0x864   :  { %7748 = vrot.lane.b32.xlu0 %v6465_v32, %s9899_s1 }
 0x865   :  { %v5929_v35 = vpop.permute.xlu1 %5928 }
 0x866   :  { %v5927_v11 = vpop.permute.xlu0 %5926  ;;  %6065 = vst.msk [vmem:[#allocation3 + $0x1b8] sm:$0xff] %vm1483_vm4, %v5929_v35 }
 0x867   :  { %6064 = vst.msk [vmem:[#allocation3 + $0x1b0] sm:$0xff] %vm1483_vm4, %v5927_v11  ;;  %6984 = vrot.lane.b32.xlu1 %v6849_v26, %s9897_s21  ;;  %v6859_v26 = vld [vmem:[#allocation2 + $0xf8] sm:$0xff] }
 0x868   :  { %6982 = vrot.lane.b32.xlu0 %v6848_v34, %s9897_s21  ;;  %v6858_v34 = vld [vmem:[#allocation2 + $0xf0] sm:$0xff] }
 0x869   :  { %v5933_v1 = vpop.permute.xlu1 %5932 }
 0x86a   :  { %v5931_v39 = vpop.permute.xlu0 %5930  ;;  %6067 = vst.msk [vmem:[#allocation3 + $0x1c8] sm:$0xff] %vm1483_vm4, %v5933_v1 }
 0x86b   :  { %6066 = vst.msk [vmem:[#allocation3 + $0x1c0] sm:$0xff] %vm1483_vm4, %v5931_v39  ;;  %7368 = vrot.lane.b32.xlu1 %v14034_v3, %s9898_s23  ;;  %v6467_v3 = vld [vmem:[#allocation2 + $0x82] sm:$0xff] }
 0x86c   :  { %7366 = vrot.lane.b32.xlu0 %v14036_v14, %s9898_s23 }
 0x86d   :  { %v5937_v8 = vpop.permute.xlu1 %5936 }
 0x86e   :  { %v5935_v16 = vpop.permute.xlu0 %5934  ;;  %6069 = vst.msk [vmem:[#allocation3 + $0x1d8] sm:$0xff] %vm1483_vm4, %v5937_v8 }
 0x86f   :  { %6068 = vst.msk [vmem:[#allocation3 + $0x1d0] sm:$0xff] %vm1483_vm4, %v5935_v16  ;;  %6602 = vrot.lane.b32.xlu1 %v6466_v55, %s9896_s20 }
 0x870   :  { %7750 = vrot.lane.b32.xlu0 %v6466_v55, %s9899_s1 }
 0x871   :  { %v5941_v49 = vpop.permute.xlu1 %5940 }
 0x872   :  { %v5939_v53 = vpop.permute.xlu0 %5938  ;;  %6071 = vst.msk [vmem:[#allocation3 + $0x1e8] sm:$0xff] %vm1483_vm4, %v5941_v49 }
 0x873   :  { %6070 = vst.msk [vmem:[#allocation3 + $0x1e0] sm:$0xff] %vm1483_vm4, %v5939_v53  ;;  %6604 = vrot.lane.b32.xlu1 %v6467_v3, %s9896_s20  ;;  %v6476_v53 = vld [vmem:[#allocation2 + $0xf2] sm:$0xff] }
 0x874   :  { %7752 = vrot.lane.b32.xlu0 %v6467_v3, %s9899_s1 }
 0x875   :  { %v5945_v14 = vpop.permute.xlu1 %5944 }
 0x876   :  { %v5943_v58 = vpop.permute.xlu0 %5942  ;;  %6073 = vst.msk [vmem:[#allocation3 + $0x1f8] sm:$0xff] %vm1483_vm4, %v5945_v14 }
 0x877   :  { %6072 = vst.msk [vmem:[#allocation3 + $0x1f0] sm:$0xff] %vm1483_vm4, %v5943_v58  ;;  %6988 = vrot.lane.b32.xlu1 %v6851_v47, %s9897_s21  ;;  %v6861_v47 = vld [vmem:[#allocation2 + $0x110] sm:$0xff] }
 0x878   :  { %6986 = vrot.lane.b32.xlu0 %v6850_v31, %s9897_s21  ;;  %v6860_v31 = vld [vmem:[#allocation2 + $0x108] sm:$0xff] }
 0x879   :  { %v6205_v50 = vpop.permute.xlu1 %6204 }
 0x87a   :  { %v6203_v20 = vpop.permute.xlu0 %6202  ;;  %6395 = vst.msk [vmem:[#allocation3 + $0x8] sm:$0xff] %vm1868_vm5, %v6205_v50 }
 0x87b   :  { %6394 = vst.msk [vmem:[#allocation3] sm:$0xff] %vm1868_vm5, %v6203_v20  ;;  %7372 = vrot.lane.b32.xlu1 %v14044_v44, %s9898_s23  ;;  %v6469_v44 = vld [vmem:[#allocation2 + $0x9a] sm:$0xff] }
 0x87c   :  { %7370 = vrot.lane.b32.xlu0 %v14046_v42, %s9898_s23 }
 0x87d   :  { %v6209_v27 = vpop.permute.xlu1 %6208 }
 0x87e   :  { %v6207_v30 = vpop.permute.xlu0 %6206  ;;  %6397 = vst.msk [vmem:[#allocation3 + $0x18] sm:$0xff] %vm1868_vm5, %v6209_v27 }
 0x87f   :  { %6396 = vst.msk [vmem:[#allocation3 + $0x10] sm:$0xff] %vm1868_vm5, %v6207_v30  ;;  %6606 = vrot.lane.b32.xlu1 %v6468_v40, %s9896_s20 }
 0x880   :  { %7754 = vrot.lane.b32.xlu0 %v6468_v40, %s9899_s1 }
 0x881   :  { %v6213_v46 = vpop.permute.xlu1 %6212 }
 0x882   :  { %v6211_v6 = vpop.permute.xlu0 %6210  ;;  %6399 = vst.msk [vmem:[#allocation3 + $0x28] sm:$0xff] %vm1868_vm5, %v6213_v46 }
 0x883   :  { %6398 = vst.msk [vmem:[#allocation3 + $0x20] sm:$0xff] %vm1868_vm5, %v6211_v6  ;;  %6608 = vrot.lane.b32.xlu1 %v6469_v44, %s9896_s20  ;;  %v6478_v6 = vld [vmem:[#allocation2 + $0x10a] sm:$0xff] }
 0x884   :  { %7756 = vrot.lane.b32.xlu0 %v6469_v44, %s9899_s1 }
 0x885   :  { %v6217_v42 = vpop.permute.xlu1 %6216 }
 0x886   :  { %v6215_v52 = vpop.permute.xlu0 %6214  ;;  %6401 = vst.msk [vmem:[#allocation3 + $0x38] sm:$0xff] %vm1868_vm5, %v6217_v42 }
 0x887   :  { %6400 = vst.msk [vmem:[#allocation3 + $0x30] sm:$0xff] %vm1868_vm5, %v6215_v52  ;;  %6992 = vrot.lane.b32.xlu1 %v6853_v18, %s9897_s21  ;;  %v6863_v18 = vld [vmem:[#allocation2 + $0x128] sm:$0xff] }
 0x888   :  { %6990 = vrot.lane.b32.xlu0 %v6852_v51, %s9897_s21  ;;  %v6862_v51 = vld [vmem:[#allocation2 + $0x120] sm:$0xff] }
 0x889   :  { %v6221_v37 = vpop.permute.xlu1 %6220 }
 0x88a   :  { %v6219_v41 = vpop.permute.xlu0 %6218  ;;  %6403 = vst.msk [vmem:[#allocation3 + $0x48] sm:$0xff] %vm1868_vm5, %v6221_v37 }
 0x88b   :  { %6402 = vst.msk [vmem:[#allocation3 + $0x40] sm:$0xff] %vm1868_vm5, %v6219_v41  ;;  %7376 = vrot.lane.b32.xlu1 %v14054_v60, %s9898_s23  ;;  %v6471_v60 = vld [vmem:[#allocation2 + $0xb2] sm:$0xff] }
 0x88c   :  { %7374 = vrot.lane.b32.xlu0 %v14056_v63, %s9898_s23 }
 0x88d   :  { %v6225_v33 = vpop.permute.xlu1 %6224 }
 0x88e   :  { %v6223_v23 = vpop.permute.xlu0 %6222  ;;  %6405 = vst.msk [vmem:[#allocation3 + $0x58] sm:$0xff] %vm1868_vm5, %v6225_v33 }
 0x88f   :  { %6404 = vst.msk [vmem:[#allocation3 + $0x50] sm:$0xff] %vm1868_vm5, %v6223_v23  ;;  %6610 = vrot.lane.b32.xlu1 %v6470_v9, %s9896_s20  ;;  %v6096_v23 = vld [vmem:[#allocation2 + $0x121] sm:$0xff] }
 0x890   :  { %7758 = vrot.lane.b32.xlu0 %v6470_v9, %s9899_s1 }
 0x891   :  { %v6229_v36 = vpop.permute.xlu1 %6228 }
 0x892   :  { %v6227_v29 = vpop.permute.xlu0 %6226  ;;  %6407 = vst.msk [vmem:[#allocation3 + $0x68] sm:$0xff] %vm1868_vm5, %v6229_v36 }
 0x893   :  { %6406 = vst.msk [vmem:[#allocation3 + $0x60] sm:$0xff] %vm1868_vm5, %v6227_v29  ;;  %6612 = vrot.lane.b32.xlu1 %v6471_v60, %s9896_s20 }
 0x894   :  { %7760 = vrot.lane.b32.xlu0 %v6471_v60, %s9899_s1  ;;  %v7630_v60 = vld [vmem:[#allocation2 + $0x122] sm:$0xff] }
 0x895   :  { %v6233_v63 = vpop.permute.xlu1 %6232 }
 0x896   :  { %v6231_v22 = vpop.permute.xlu0 %6230  ;;  %6409 = vst.msk [vmem:[#allocation3 + $0x78] sm:$0xff] %vm1868_vm5, %v6233_v63  ;;  %v7247_v63 = vld [vmem:[#allocation2 + $0x129] sm:$0xff] }
 0x897   :  { %6408 = vst.msk [vmem:[#allocation3 + $0x70] sm:$0xff] %vm1868_vm5, %v6231_v22  ;;  %6996 = vrot.lane.b32.xlu1 %v6855_v56, %s9897_s21 }
 0x898   :  { %6994 = vrot.lane.b32.xlu0 %v6854_v0, %s9897_s21 }
 0x899   :  { %v6237_v43 = vpop.permute.xlu1 %6236 }
 0x89a   :  { %v6235_v45 = vpop.permute.xlu0 %6234  ;;  %6411 = vst.msk [vmem:[#allocation3 + $0x88] sm:$0xff] %vm1868_vm5, %v6237_v43 }
 0x89b   :  { %6410 = vst.msk [vmem:[#allocation3 + $0x80] sm:$0xff] %vm1868_vm5, %v6235_v45  ;;  %7380 = vrot.lane.b32.xlu1 %v14064_v5, %s9898_s23  ;;  %v6473_v5 = vld [vmem:[#allocation2 + $0xca] sm:$0xff] }
 0x89c   :  { %7378 = vrot.lane.b32.xlu0 %v14066_v62, %s9898_s23  ;;  %v6481_v45 = vld [vmem:[#allocation2 + $0x12a] sm:$0xff] }
 0x89d   :  { %v6241_v17 = vpop.permute.xlu1 %6240 }
 0x89e   :  { %v6239_v57 = vpop.permute.xlu0 %6238  ;;  %6413 = vst.msk [vmem:[#allocation3 + $0x98] sm:$0xff] %vm1868_vm5, %v6241_v17 }
 0x89f   :  { %6412 = vst.msk [vmem:[#allocation3 + $0x90] sm:$0xff] %vm1868_vm5, %v6239_v57  ;;  %6614 = vrot.lane.b32.xlu1 %v6472_v38, %s9896_s20 }
 0x8a0   :  { %7762 = vrot.lane.b32.xlu0 %v6472_v38, %s9899_s1 }
 0x8a1   :  { %v6245_v2 = vpop.permute.xlu1 %6244 }
 0x8a2   :  { %v6243_v54 = vpop.permute.xlu0 %6242  ;;  %6415 = vst.msk [vmem:[#allocation3 + $0xa8] sm:$0xff] %vm1868_vm5, %v6245_v2  ;;  %v6865_v2 = vld [vmem:[#allocation2 + $0x140] sm:$0xff] }
 0x8a3   :  { %6414 = vst.msk [vmem:[#allocation3 + $0xa0] sm:$0xff] %vm1868_vm5, %v6243_v54  ;;  %6616 = vrot.lane.b32.xlu1 %v6473_v5, %s9896_s20  ;;  %v6864_v54 = vld [vmem:[#allocation2 + $0x138] sm:$0xff] }
 0x8a4   :  { %7764 = vrot.lane.b32.xlu0 %v6473_v5, %s9899_s1 }
 0x8a5   :  { %v6589_v62 = vpop.permute.xlu1 %6588 }
 0x8a6   :  { %v6587_v10 = vpop.permute.xlu0 %6586  ;;  %6779 = vst.msk [vmem:[#allocation3 + $0x8] sm:$0xff] %vm2253_vm6, %v6589_v62 }
 0x8a7   :  { %6778 = vst.msk [vmem:[#allocation3] sm:$0xff] %vm2253_vm6, %v6587_v10  ;;  %7000 = vrot.lane.b32.xlu1 %v6857_v28, %s9897_s21  ;;  %v6098_v28 = vld [vmem:[#allocation2 + $0x139] sm:$0xff] }
 0x8a8   :  { %6998 = vrot.lane.b32.xlu0 %v6856_v19, %s9897_s21 }
 0x8a9   :  { %v6973_v24 = vpop.permute.xlu1 %6972 }
 0x8aa   :  { %v6971_v4 = vpop.permute.xlu0 %6970  ;;  %7163 = vst.msk [vmem:[#allocation3 + $0x8] sm:$0xff] %vm2639_vm7, %v6973_v24 }
 0x8ab   :  { %7162 = vst.msk [vmem:[#allocation3] sm:$0xff] %vm2639_vm7, %v6971_v4  ;;  %7384 = vrot.lane.b32.xlu1 %v14074_v21, %s9898_s23  ;;  %v6475_v21 = vld [vmem:[#allocation2 + $0xe2] sm:$0xff]  ;;  %v7632_v4 = vld [vmem:[#allocation2 + $0x13a] sm:$0xff] }
 0x8ac   :  { %7382 = vrot.lane.b32.xlu0 %v14076_v13, %s9898_s23 }
 0x8ad   :  { %v7357_v25 = vpop.permute.xlu1 %7356 }
 0x8ae   :  { %v7355_v7 = vpop.permute.xlu0 %7354  ;;  %7547 = vst.msk [vmem:[#allocation3 + $0x8] sm:$0xff] %vm3024_vm9, %v7357_v25  ;;  %v7249_v25 = vld [vmem:[#allocation2 + $0x141] sm:$0xff] }
 0x8af   :  { %7546 = vst.msk [vmem:[#allocation3] sm:$0xff] %vm3024_vm9, %v7355_v7  ;;  %6618 = vrot.lane.b32.xlu1 %v6474_v12, %s9896_s20 }
 0x8b0   :  { %7766 = vrot.lane.b32.xlu0 %v6474_v12, %s9899_s1 }
 0x8b1   :  { %v6591_v32 = vpop.permute.xlu1 %6590 }
 0x8b2   :  { %v7739_v35 = vpop.permute.xlu0 %7738  ;;  %6780 = vst.msk [vmem:[#allocation3 + $0x10] sm:$0xff] %vm2253_vm6, %v6591_v32 }
 0x8b3   :  { %7930 = vst.msk [vmem:[#allocation3] sm:$0xff] %vm3409_vm10, %v7739_v35  ;;  %6620 = vrot.lane.b32.xlu1 %v6475_v21, %s9896_s20 }
 0x8b4   :  { %7768 = vrot.lane.b32.xlu0 %v6475_v21, %s9899_s1 }
 0x8b5   :  { %v6593_v13 = vpop.permute.xlu1 %6592 }
 0x8b6   :  { %v7741_v11 = vpop.permute.xlu0 %7740  ;;  %6781 = vst.msk [vmem:[#allocation3 + $0x18] sm:$0xff] %vm2253_vm6, %v6593_v13  ;;  %v6483_v13 = vld [vmem:[#allocation2 + $0x142] sm:$0xff] }
 0x8b7   :  { %7931 = vst.msk [vmem:[#allocation3 + $0x8] sm:$0xff] %vm3409_vm10, %v7741_v11  ;;  %7004 = vrot.lane.b32.xlu1 %v6859_v26, %s9897_s21 }
 0x8b8   :  { %7002 = vrot.lane.b32.xlu0 %v6858_v34, %s9897_s21 }
 0x8b9   :  { %v6977_v1 = vpop.permute.xlu1 %6976 }
 0x8ba   :  { %v6975_v39 = vpop.permute.xlu0 %6974  ;;  %v7994_v8 = vld [vmem:[#allocation3] sm:$0xff]  ;;  %7165 = vst.msk [vmem:[#allocation3 + $0x18] sm:$0xff] %vm2639_vm7, %v6977_v1  ;;  %v6867_v1 = vld [vmem:[#allocation2 + $0x158] sm:$0xff] }
 0x8bb   :  { %7164 = vst.msk [vmem:[#allocation3 + $0x10] sm:$0xff] %vm2639_vm7, %v6975_v39  ;;  %9766 = vmatprep.mubr.msk.f32.mxu1 %vm3543_vm11, %v7994_v8  ;;  %7388 = vrot.lane.b32.xlu1 %v14084_v59, %s9898_s23  ;;  %v6477_v59 = vld [vmem:[#allocation2 + $0xfa] sm:$0xff]  ;;  %v6866_v39 = vld [vmem:[#allocation2 + $0x150] sm:$0xff] }
 0x8bc   :  { %7386 = vrot.lane.b32.xlu0 %v14086_v15, %s9898_s23 }
 0x8bd   :  { %v7361_v16 = vpop.permute.xlu1 %7360 }
 0x8be   :  { %v7359_v55 = vpop.permute.xlu0 %7358  ;;  %v7995_v49 = vld [vmem:[#allocation3 + $0x8] sm:$0xff]  ;;  %7549 = vst.msk [vmem:[#allocation3 + $0x18] sm:$0xff] %vm3024_vm9, %v7361_v16 }
 0x8bf   :  { %7548 = vst.msk [vmem:[#allocation3 + $0x10] sm:$0xff] %vm3024_vm9, %v7359_v55  ;;  %9767 = vmatmul.mubr.msk.f32.vlgmr.msra.gmra.mrb[0].mxu1 %vm3543_vm11, %v7995_v49  ;;  %6622 = vrot.lane.b32.xlu1 %v6476_v53, %s9896_s20  ;;  %v6100_v55 = vld [vmem:[#allocation2 + $0x151] sm:$0xff] }
 0x8c0   :  { %7770 = vrot.lane.b32.xlu0 %v6476_v53, %s9899_s1 }
 0x8c1   :  { %v6595_v3 = vpop.permute.xlu1 %6594 }
 0x8c2   :  { %v7743_v14 = vpop.permute.xlu0 %7742  ;;  %6782 = vst.msk [vmem:[#allocation3 + $0x20] sm:$0xff] %vm2253_vm6, %v6595_v3  ;;  %v7634_v3 = vld [vmem:[#allocation2 + $0x152] sm:$0xff] }
 0x8c3   :  { %7932 = vst.msk [vmem:[#allocation3 + $0x10] sm:$0xff] %vm3409_vm10, %v7743_v14  ;;  %6624 = vrot.lane.b32.xlu1 %v6477_v59, %s9896_s20  ;;  %v7251_v14 = vld [vmem:[#allocation2 + $0x159] sm:$0xff] }
 0x8c4   :  { %7772 = vrot.lane.b32.xlu0 %v6477_v59, %s9899_s1 }
 0x8c5   :  { %v6597_v15 = vpop.permute.xlu1 %6596 }
 0x8c6   :  { %v7745_v58 = vpop.permute.xlu0 %7744  ;;  %6783 = vst.msk [vmem:[#allocation3 + $0x28] sm:$0xff] %vm2253_vm6, %v6597_v15 }
 0x8c7   :  { %7933 = vst.msk [vmem:[#allocation3 + $0x18] sm:$0xff] %vm3409_vm10, %v7745_v58  ;;  %7008 = vrot.lane.b32.xlu1 %v6861_v47, %s9897_s21 }
 0x8c8   :  { %7006 = vrot.lane.b32.xlu0 %v6860_v31, %s9897_s21 }
 0x8c9   :  { %v6981_v50 = vpop.permute.xlu1 %6980 }
 0x8ca   :  { %v6979_v20 = vpop.permute.xlu0 %6978  ;;  %v7996_v27 = vld [vmem:[#allocation3 + $0x10] sm:$0xff]  ;;  %7167 = vst.msk [vmem:[#allocation3 + $0x28] sm:$0xff] %vm2639_vm7, %v6981_v50 }
 0x8cb   :  { %7166 = vst.msk [vmem:[#allocation3 + $0x20] sm:$0xff] %vm2639_vm7, %v6979_v20  ;;  %9769 = vmatprep.mubr.msk.f32.mxu1 %vm3543_vm11, %v7996_v27  ;;  %7392 = vrot.lane.b32.xlu1 %v14094_v48, %s9898_s23  ;;  %v6479_v48 = vld [vmem:[#allocation2 + $0x112] sm:$0xff]  ;;  %v6485_v20 = vld [vmem:[#allocation2 + $0x15a] sm:$0xff] }
 0x8cc   :  { %7390 = vrot.lane.b32.xlu0 %v14096_v61, %s9898_s23 }
 0x8cd   :  { %v7365_v30 = vpop.permute.xlu1 %7364 }
 0x8ce   :  { %v7363_v40 = vpop.permute.xlu0 %7362  ;;  %v7997_v46 = vld [vmem:[#allocation3 + $0x18] sm:$0xff]  ;;  %7551 = vst.msk [vmem:[#allocation3 + $0x28] sm:$0xff] %vm3024_vm9, %v7365_v30 }
 0x8cf   :  { %7550 = vst.msk [vmem:[#allocation3 + $0x20] sm:$0xff] %vm3024_vm9, %v7363_v40  ;;  %9770 = vmatmul.mubr.msk.f32.gmra.mrb[2].mxu1 %vm3543_vm11, %v7997_v46  ;;  %6626 = vrot.lane.b32.xlu1 %v6478_v6, %s9896_s20  ;;  %v6869_v40 = vld [vmem:[#allocation2 + $0x170] sm:$0xff]  ;;  %v6868_v46 = vld [vmem:[#allocation2 + $0x168] sm:$0xff] }
 0x8d0   :  { %7774 = vrot.lane.b32.xlu0 %v6478_v6, %s9899_s1 }
 0x8d1   :  { %v6599_v44 = vpop.permute.xlu1 %6598 }
 0x8d2   :  { %v7747_v42 = vpop.permute.xlu0 %7746  ;;  %6784 = vst.msk [vmem:[#allocation3 + $0x30] sm:$0xff] %vm2253_vm6, %v6599_v44 }
 0x8d3   :  { %7934 = vst.msk [vmem:[#allocation3 + $0x20] sm:$0xff] %vm3409_vm10, %v7747_v42  ;;  %6628 = vrot.lane.b32.xlu1 %v6479_v48, %s9896_s20  ;;  %v6102_v42 = vld [vmem:[#allocation2 + $0x169] sm:$0xff] }
 0x8d4   :  { %7776 = vrot.lane.b32.xlu0 %v6479_v48, %s9899_s1 }
 0x8d5   :  { %v6601_v61 = vpop.permute.xlu1 %6600 }
 0x8d6   :  { %v7749_v52 = vpop.permute.xlu0 %7748  ;;  %6785 = vst.msk [vmem:[#allocation3 + $0x38] sm:$0xff] %vm2253_vm6, %v6601_v61 }
 0x8d7   :  { %7935 = vst.msk [vmem:[#allocation3 + $0x28] sm:$0xff] %vm3409_vm10, %v7749_v52  ;;  %7012 = vrot.lane.b32.xlu1 %v6863_v18, %s9897_s21  ;;  %v7636_v18 = vld [vmem:[#allocation2 + $0x16a] sm:$0xff] }
 0x8d8   :  { %7010 = vrot.lane.b32.xlu0 %v6862_v51, %s9897_s21  ;;  %v7253_v51 = vld [vmem:[#allocation2 + $0x171] sm:$0xff] }
 0x8d9   :  { %v6985_v37 = vpop.permute.xlu1 %6984 }
 0x8da   :  { %v6983_v41 = vpop.permute.xlu0 %6982  ;;  %v7998_v33 = vld [vmem:[#allocation3 + $0x20] sm:$0xff]  ;;  %7169 = vst.msk [vmem:[#allocation3 + $0x38] sm:$0xff] %vm2639_vm7, %v6985_v37 }
 0x8db   :  { %7168 = vst.msk [vmem:[#allocation3 + $0x30] sm:$0xff] %vm2639_vm7, %v6983_v41  ;;  %9772 = vmatprep.mubr.msk.f32.mxu1 %vm3543_vm11, %v7998_v33  ;;  %6246 = vrot.lane.b32.xlu1 %v6096_v23, %s9895_s19 }
 0x8dc   :  { %7394 = vrot.lane.b32.xlu0 %v6096_v23, %s9898_s23 }
 0x8dd   :  { %v7369_v9 = vpop.permute.xlu1 %7368 }
 0x8de   :  { %v7367_v36 = vpop.permute.xlu0 %7366  ;;  %v7999_v29 = vld [vmem:[#allocation3 + $0x28] sm:$0xff]  ;;  %7553 = vst.msk [vmem:[#allocation3 + $0x38] sm:$0xff] %vm3024_vm9, %v7369_v9 }
 0x8df   :  { %7552 = vst.msk [vmem:[#allocation3 + $0x30] sm:$0xff] %vm3024_vm9, %v7367_v36  ;;  %9773 = vmatmul.mubr.msk.f32.gmra.mrb[4].mxu1 %vm3543_vm11, %v7999_v29  ;;  %7778 = vrot.lane.b32.xlu1 %v7630_v60, %s9899_s1  ;;  %v6487_v36 = vld [vmem:[#allocation2 + $0x172] sm:$0xff] }
 0x8e0   :  { %7396 = vrot.lane.b32.xlu0 %v7247_v63, %s9898_s23 }
 0x8e1   :  { %v6603_v22 = vpop.permute.xlu1 %6602 }
 0x8e2   :  { %v7751_v56 = vpop.permute.xlu0 %7750  ;;  %6786 = vst.msk [vmem:[#allocation3 + $0x40] sm:$0xff] %vm2253_vm6, %v6603_v22  ;;  %v6870_v22 = vld [vmem:[#allocation2 + $0x180] sm:$0xff] }
 0x8e3   :  { %7936 = vst.msk [vmem:[#allocation3 + $0x30] sm:$0xff] %vm3409_vm10, %v7751_v56  ;;  %6630 = vrot.lane.b32.xlu1 %v7630_v60, %s9896_s20 }
 0x8e4   :  { %6248 = vrot.lane.b32.xlu0 %v7247_v63, %s9895_s19  ;;  %v6871_v63 = vld [vmem:[#allocation2 + $0x188] sm:$0xff] }
 0x8e5   :  { %v6605_v0 = vpop.permute.xlu1 %6604 }
 0x8e6   :  { %v7753_v43 = vpop.permute.xlu0 %7752  ;;  %6787 = vst.msk [vmem:[#allocation3 + $0x48] sm:$0xff] %vm2253_vm6, %v6605_v0 }
 0x8e7   :  { %7937 = vst.msk [vmem:[#allocation3 + $0x38] sm:$0xff] %vm3409_vm10, %v7753_v43  ;;  %6632 = vrot.lane.b32.xlu1 %v6481_v45, %s9896_s20 }
 0x8e8   :  { %7780 = vrot.lane.b32.xlu0 %v6481_v45, %s9899_s1  ;;  %v6104_v45 = vld [vmem:[#allocation2 + $0x181] sm:$0xff] }
 0x8e9   :  { %v6989_v17 = vpop.permute.xlu1 %6988 }
 0x8ea   :  { %v6987_v57 = vpop.permute.xlu0 %6986  ;;  %v8000_v38 = vld [vmem:[#allocation3 + $0x30] sm:$0xff]  ;;  %7171 = vst.msk [vmem:[#allocation3 + $0x48] sm:$0xff] %vm2639_vm7, %v6989_v17 }
 0x8eb   :  { %7170 = vst.msk [vmem:[#allocation3 + $0x40] sm:$0xff] %vm2639_vm7, %v6987_v57  ;;  %9775 = vmatprep.mubr.msk.f32.mxu1 %vm3543_vm11, %v8000_v38  ;;  %7016 = vrot.lane.b32.xlu1 %v6865_v2, %s9897_s21  ;;  %v7638_v2 = vld [vmem:[#allocation2 + $0x182] sm:$0xff] }
 0x8ec   :  { %7014 = vrot.lane.b32.xlu0 %v6864_v54, %s9897_s21  ;;  %v7255_v54 = vld [vmem:[#allocation2 + $0x189] sm:$0xff] }
 0x8ed   :  { %v7373_v5 = vpop.permute.xlu1 %7372 }
 0x8ee   :  { %v7371_v62 = vpop.permute.xlu0 %7370  ;;  %v8001_v10 = vld [vmem:[#allocation3 + $0x38] sm:$0xff]  ;;  %7555 = vst.msk [vmem:[#allocation3 + $0x48] sm:$0xff] %vm3024_vm9, %v7373_v5 }
 0x8ef   :  { %7554 = vst.msk [vmem:[#allocation3 + $0x40] sm:$0xff] %vm3024_vm9, %v7371_v62  ;;  %9776 = vmatmul.mubr.msk.f32.gmra.mrb[6].mxu1 %vm3543_vm11, %v8001_v10  ;;  %6250 = vrot.lane.b32.xlu1 %v6098_v28, %s9895_s19 }
 0x8f0   :  { %7398 = vrot.lane.b32.xlu0 %v6098_v28, %s9898_s23 }
 0x8f1   :  { %v6607_v19 = vpop.permute.xlu1 %6606 }
 0x8f2   :  { %v7755_v24 = vpop.permute.xlu0 %7754  ;;  %6788 = vst.msk [vmem:[#allocation3 + $0x50] sm:$0xff] %vm2253_vm6, %v6607_v19  ;;  %v6489_v19 = vld [vmem:[#allocation2 + $0x18a] sm:$0xff] }
 0x8f3   :  { %7938 = vst.msk [vmem:[#allocation3 + $0x40] sm:$0xff] %vm3409_vm10, %v7755_v24  ;;  %7782 = vrot.lane.b32.xlu1 %v7632_v4, %s9899_s1  ;;  %v6873_v24 = vld [vmem:[#allocation2 + $0x1a0] sm:$0xff] }
 0x8f4   :  { %7400 = vrot.lane.b32.xlu0 %v7249_v25, %s9898_s23 }
 0x8f5   :  { %v6609_v7 = vpop.permute.xlu1 %6608 }
 0x8f6   :  { %v7757_v12 = vpop.permute.xlu0 %7756  ;;  %6789 = vst.msk [vmem:[#allocation3 + $0x58] sm:$0xff] %vm2253_vm6, %v6609_v7 }
 0x8f7   :  { %7939 = vst.msk [vmem:[#allocation3 + $0x48] sm:$0xff] %vm3409_vm10, %v7757_v12  ;;  %6634 = vrot.lane.b32.xlu1 %v7632_v4, %s9896_s20  ;;  %v6872_v4 = vld [vmem:[#allocation2 + $0x198] sm:$0xff] }
 0x8f8   :  { %6252 = vrot.lane.b32.xlu0 %v7249_v25, %s9895_s19 }
 0x8f9   :  { %v6993_v32 = vpop.permute.xlu1 %6992 }
 0x8fa   :  { %v6991_v35 = vpop.permute.xlu0 %6990  ;;  %v8002_v21 = vld [vmem:[#allocation3 + $0x40] sm:$0xff]  ;;  %7173 = vst.msk [vmem:[#allocation3 + $0x58] sm:$0xff] %vm2639_vm7, %v6993_v32 }
 0x8fb   :  { %7172 = vst.msk [vmem:[#allocation3 + $0x50] sm:$0xff] %vm2639_vm7, %v6991_v35  ;;  %9778 = vmatprep.mubr.msk.f32.mxu1 %vm3543_vm11, %v8002_v21  ;;  %6636 = vrot.lane.b32.xlu1 %v6483_v13, %s9896_s20  ;;  %v7256_v32 = vld [vmem:[#allocation2 + $0x199] sm:$0xff] }
 0x8fc   :  { %7784 = vrot.lane.b32.xlu0 %v6483_v13, %s9899_s1 }
 0x8fd   :  { %v7377_v11 = vpop.permute.xlu1 %7376 }
 0x8fe   :  { %v7375_v26 = vpop.permute.xlu0 %7374  ;;  %v8003_v34 = vld [vmem:[#allocation3 + $0x48] sm:$0xff]  ;;  %7557 = vst.msk [vmem:[#allocation3 + $0x58] sm:$0xff] %vm3024_vm9, %v7377_v11 }
 0x8ff   :  { %7556 = vst.msk [vmem:[#allocation3 + $0x50] sm:$0xff] %vm3024_vm9, %v7375_v26  ;;  %9779 = vmatmul.mubr.msk.f32.gmra.mrb[8].mxu1 %vm3543_vm11, %v8003_v34  ;;  %7020 = vrot.lane.b32.xlu1 %v6867_v1, %s9897_s21  ;;  %v6106_v11 = vld [vmem:[#allocation2 + $0x1c9] sm:$0xff]  ;;  %v7640_v26 = vld [vmem:[#allocation2 + $0x19a] sm:$0xff] }
 0x900   :  { %7018 = vrot.lane.b32.xlu0 %v6866_v39, %s9897_s21  ;;  %v7257_v34 = vld [vmem:[#allocation2 + $0x1a1] sm:$0xff] }
 0x901   :  { %v6611_v8 = vpop.permute.xlu1 %6610 }
 0x902   :  { %v7759_v16 = vpop.permute.xlu0 %7758  ;;  %6790 = vst.msk [vmem:[#allocation3 + $0x60] sm:$0xff] %vm2253_vm6, %v6611_v8 }
 0x903   :  { %7940 = vst.msk [vmem:[#allocation3 + $0x50] sm:$0xff] %vm3409_vm10, %v7759_v16  ;;  %6254 = vrot.lane.b32.xlu1 %v6100_v55, %s9895_s19 }
 0x904   :  { %7402 = vrot.lane.b32.xlu0 %v6100_v55, %s9898_s23  ;;  %v6490_v55 = vld [vmem:[#allocation2 + $0x1ca] sm:$0xff] }
 0x905   :  { %v6613_v49 = vpop.permute.xlu1 %6612 }
 0x906   :  { %v7761_v53 = vpop.permute.xlu0 %7760  ;;  %6791 = vst.msk [vmem:[#allocation3 + $0x68] sm:$0xff] %vm2253_vm6, %v6613_v49  ;;  %v6107_v49 = vld [vmem:[#allocation2 + $0x1d1] sm:$0xff] }
 0x907   :  { %7941 = vst.msk [vmem:[#allocation3 + $0x58] sm:$0xff] %vm3409_vm10, %v7761_v53  ;;  %7786 = vrot.lane.b32.xlu1 %v7634_v3, %s9899_s1  ;;  %v7641_v53 = vld [vmem:[#allocation2 + $0x1a2] sm:$0xff] }
 0x908   :  { %7404 = vrot.lane.b32.xlu0 %v7251_v14, %s9898_s23 }
 0x909   :  { %v6997_v59 = vpop.permute.xlu1 %6996 }
 0x90a   :  { %v6995_v15 = vpop.permute.xlu0 %6994  ;;  %v8004_v58 = vld [vmem:[#allocation3 + $0x50] sm:$0xff]  ;;  %7175 = vst.msk [vmem:[#allocation3 + $0x68] sm:$0xff] %vm2639_vm7, %v6997_v59 }
 0x90b   :  { %7174 = vst.msk [vmem:[#allocation3 + $0x60] sm:$0xff] %vm2639_vm7, %v6995_v15  ;;  %9781 = vmatprep.mubr.msk.f32.mxu1 %vm3543_vm11, %v8004_v58  ;;  %6638 = vrot.lane.b32.xlu1 %v7634_v3, %s9896_s20  ;;  %v6491_v15 = vld [vmem:[#allocation2 + $0x1d2] sm:$0xff] }
 0x90c   :  { %6256 = vrot.lane.b32.xlu0 %v7251_v14, %s9895_s19 }
 0x90d   :  { %v7381_v47 = vpop.permute.xlu1 %7380 }
 0x90e   :  { %v7379_v31 = vpop.permute.xlu0 %7378  ;;  %v8005_v50 = vld [vmem:[#allocation3 + $0x58] sm:$0xff]  ;;  %7559 = vst.msk [vmem:[#allocation3 + $0x68] sm:$0xff] %vm3024_vm9, %v7381_v47 }
 0x90f   :  { %7558 = vst.msk [vmem:[#allocation3 + $0x60] sm:$0xff] %vm3024_vm9, %v7379_v31  ;;  %9782 = vmatmul.mubr.msk.f32.gmra.mrb[10].mxu1 %vm3543_vm11, %v8005_v50  ;;  %6640 = vrot.lane.b32.xlu1 %v6485_v20, %s9896_s20  ;;  %v6875_v50 = vld [vmem:[#allocation2 + $0x1e8] sm:$0xff] }
 0x910   :  { %7788 = vrot.lane.b32.xlu0 %v6485_v20, %s9899_s1  ;;  %v6874_v20 = vld [vmem:[#allocation2 + $0x1e0] sm:$0xff] }
 0x911   :  { %v6615_v27 = vpop.permute.xlu1 %6614 }
 0x912   :  { %v7763_v30 = vpop.permute.xlu0 %7762  ;;  %6792 = vst.msk [vmem:[#allocation3 + $0x70] sm:$0xff] %vm2253_vm6, %v6615_v27 }
 0x913   :  { %7942 = vst.msk [vmem:[#allocation3 + $0x60] sm:$0xff] %vm3409_vm10, %v7763_v30  ;;  %7024 = vrot.lane.b32.xlu1 %v6869_v40, %s9897_s21  ;;  %v6108_v40 = vld [vmem:[#allocation2 + $0x1e1] sm:$0xff] }
 0x914   :  { %7022 = vrot.lane.b32.xlu0 %v6868_v46, %s9897_s21 }
 0x915   :  { %v6617_v6 = vpop.permute.xlu1 %6616 }
 0x916   :  { %v7765_v44 = vpop.permute.xlu0 %7764  ;;  %6793 = vst.msk [vmem:[#allocation3 + $0x78] sm:$0xff] %vm2253_vm6, %v6617_v6 }
 0x917   :  { %7943 = vst.msk [vmem:[#allocation3 + $0x68] sm:$0xff] %vm3409_vm10, %v7765_v44  ;;  %6258 = vrot.lane.b32.xlu1 %v6102_v42, %s9895_s19  ;;  %v7642_v44 = vld [vmem:[#allocation2 + $0x1e2] sm:$0xff] }
 0x918   :  { %7406 = vrot.lane.b32.xlu0 %v6102_v42, %s9898_s23  ;;  %v7259_v42 = vld [vmem:[#allocation2 + $0x1e9] sm:$0xff] }
 0x919   :  { %v7001_v48 = vpop.permute.xlu1 %7000 }
 0x91a   :  { %v6999_v61 = vpop.permute.xlu0 %6998  ;;  %v8006_v52 = vld [vmem:[#allocation3 + $0x60] sm:$0xff]  ;;  %7177 = vst.msk [vmem:[#allocation3 + $0x78] sm:$0xff] %vm2639_vm7, %v7001_v48 }
 0x91b   :  { %7176 = vst.msk [vmem:[#allocation3 + $0x70] sm:$0xff] %vm2639_vm7, %v6999_v61  ;;  %9784 = vmatprep.mubr.msk.f32.mxu1 %vm3543_vm11, %v8006_v52  ;;  %7790 = vrot.lane.b32.xlu1 %v7636_v18, %s9899_s1 }
 0x91c   :  { %7408 = vrot.lane.b32.xlu0 %v7253_v51, %s9898_s23 }
 0x91d   :  { %v7385_v37 = vpop.permute.xlu1 %7384 }
 0x91e   :  { %v7383_v41 = vpop.permute.xlu0 %7382  ;;  %v8007_v33 = vld [vmem:[#allocation3 + $0x68] sm:$0xff]  ;;  %7561 = vst.msk [vmem:[#allocation3 + $0x78] sm:$0xff] %vm3024_vm9, %v7385_v37 }
 0x91f   :  { %7560 = vst.msk [vmem:[#allocation3 + $0x70] sm:$0xff] %vm3024_vm9, %v7383_v41  ;;  %9785 = vmatmul.mubr.msk.f32.gmra.mrb[12].mxu1 %vm3543_vm11, %v8007_v33  ;;  %6642 = vrot.lane.b32.xlu1 %v7636_v18, %s9896_s20  ;;  %v6493_v37 = vld [vmem:[#allocation2 + $0x1ea] sm:$0xff] }
 0x920   :  { %6260 = vrot.lane.b32.xlu0 %v7253_v51, %s9895_s19 }
 0x921   :  { %v6619_v23 = vpop.permute.xlu1 %6618 }
 0x922   :  { %v7767_v9 = vpop.permute.xlu0 %7766  ;;  %6794 = vst.msk [vmem:[#allocation3 + $0x80] sm:$0xff] %vm2253_vm6, %v6619_v23 }
 0x923   :  { %7944 = vst.msk [vmem:[#allocation3 + $0x70] sm:$0xff] %vm3409_vm10, %v7767_v9  ;;  %6644 = vrot.lane.b32.xlu1 %v6487_v36, %s9896_s20  ;;  %v6877_v9 = vld [vmem:[#allocation2 + $0x200] sm:$0xff] }
 0x924   :  { %7792 = vrot.lane.b32.xlu0 %v6487_v36, %s9899_s1  ;;  %v6876_v36 = vld [vmem:[#allocation2 + $0x1f8] sm:$0xff] }
 0x925   :  { %v6621_v29 = vpop.permute.xlu1 %6620 }
 0x926   :  { %v7769_v60 = vpop.permute.xlu0 %7768  ;;  %6795 = vst.msk [vmem:[#allocation3 + $0x88] sm:$0xff] %vm2253_vm6, %v6621_v29 }
 0x927   :  { %7945 = vst.msk [vmem:[#allocation3 + $0x78] sm:$0xff] %vm3409_vm10, %v7769_v60  ;;  %7028 = vrot.lane.b32.xlu1 %v6871_v63, %s9897_s21  ;;  %v6110_v63 = vld [vmem:[#allocation2 + $0x1f9] sm:$0xff] }
 0x928   :  { %7026 = vrot.lane.b32.xlu0 %v6870_v22, %s9897_s21 }
 0x929   :  { %v7005_v56 = vpop.permute.xlu1 %7004 }
 0x92a   :  { %v7003_v0 = vpop.permute.xlu0 %7002  ;;  %v8008_v43 = vld [vmem:[#allocation3 + $0x70] sm:$0xff]  ;;  %7179 = vst.msk [vmem:[#allocation3 + $0x88] sm:$0xff] %vm2639_vm7, %v7005_v56 }
 0x92b   :  { %7178 = vst.msk [vmem:[#allocation3 + $0x80] sm:$0xff] %vm2639_vm7, %v7003_v0  ;;  %9787 = vmatprep.mubr.msk.f32.mxu1 %vm3543_vm11, %v8008_v43  ;;  %6262 = vrot.lane.b32.xlu1 %v6104_v45, %s9895_s19  ;;  %v7644_v0 = vld [vmem:[#allocation2 + $0x1fa] sm:$0xff] }
 0x92c   :  { %7410 = vrot.lane.b32.xlu0 %v6104_v45, %s9898_s23  ;;  %v7261_v43 = vld [vmem:[#allocation2 + $0x201] sm:$0xff] }
 0x92d   :  { %v7389_v17 = vpop.permute.xlu1 %7388 }
 0x92e   :  { %v7387_v57 = vpop.permute.xlu0 %7386  ;;  %v8009_v38 = vld [vmem:[#allocation3 + $0x78] sm:$0xff]  ;;  %7563 = vst.msk [vmem:[#allocation3 + $0x88] sm:$0xff] %vm3024_vm9, %v7389_v17 }
 0x92f   :  { %7562 = vst.msk [vmem:[#allocation3 + $0x80] sm:$0xff] %vm3024_vm9, %v7387_v57  ;;  %9788 = vmatmul.mubr.msk.f32.gmra.mrb[14].mxu1 %vm3543_vm11, %v8009_v38  ;;  %7794 = vrot.lane.b32.xlu1 %v7638_v2, %s9899_s1 }
 0x930   :  { %7412 = vrot.lane.b32.xlu0 %v7255_v54, %s9898_s23 }
 0x931   :  { %v6623_v5 = vpop.permute.xlu1 %6622 }
 0x932   :  { %v7771_v62 = vpop.permute.xlu0 %7770  ;;  %6796 = vst.msk [vmem:[#allocation3 + $0x90] sm:$0xff] %vm2253_vm6, %v6623_v5 }
 0x933   :  { %7946 = vst.msk [vmem:[#allocation3 + $0x80] sm:$0xff] %vm3409_vm10, %v7771_v62  ;;  %6646 = vrot.lane.b32.xlu1 %v7638_v2, %s9896_s20 }
 0x934   :  { %6264 = vrot.lane.b32.xlu0 %v7255_v54, %s9895_s19  ;;  %v6495_v54 = vld [vmem:[#allocation2 + $0x202] sm:$0xff] }
 0x935   :  { %v6625_v10 = vpop.permute.xlu1 %6624 }
 0x936   :  { %v7773_v28 = vpop.permute.xlu0 %7772  ;;  %6797 = vst.msk [vmem:[#allocation3 + $0x98] sm:$0xff] %vm2253_vm6, %v6625_v10 }
 0x937   :  { %7947 = vst.msk [vmem:[#allocation3 + $0x88] sm:$0xff] %vm3409_vm10, %v7773_v28  ;;  %6648 = vrot.lane.b32.xlu1 %v6489_v19, %s9896_s20  ;;  %v6879_v28 = vld [vmem:[#allocation2 + $0x218] sm:$0xff] }
 0x938   :  { %7796 = vrot.lane.b32.xlu0 %v6489_v19, %s9899_s1  ;;  %v6878_v19 = vld [vmem:[#allocation2 + $0x210] sm:$0xff] }
 0x939   :  { %v7009_v25 = vpop.permute.xlu1 %7008 }
 0x93a   :  { %v7007_v7 = vpop.permute.xlu0 %7006  ;;  %v8010_v12 = vld [vmem:[#allocation3 + $0x80] sm:$0xff]  ;;  %7181 = vst.msk [vmem:[#allocation3 + $0x98] sm:$0xff] %vm2639_vm7, %v7009_v25  ;;  %v6112_v25 = vld [vmem:[#allocation2 + $0x211] sm:$0xff] }
 0x93b   :  { %7180 = vst.msk [vmem:[#allocation3 + $0x90] sm:$0xff] %vm2639_vm7, %v7007_v7  ;;  %9790 = vmatprep.mubr.msk.f32.mxu1 %vm3543_vm11, %v8010_v12  ;;  %7032 = vrot.lane.b32.xlu1 %v6873_v24, %s9897_s21 }
 0x93c   :  { %7030 = vrot.lane.b32.xlu0 %v6872_v4, %s9897_s21 }
 0x93d   :  { %v7393_v35 = vpop.permute.xlu1 %7392 }
 0x93e   :  { %v7391_v21 = vpop.permute.xlu0 %7390  ;;  %v8011_v13 = vld [vmem:[#allocation3 + $0x88] sm:$0xff]  ;;  %7565 = vst.msk [vmem:[#allocation3 + $0x98] sm:$0xff] %vm3024_vm9, %v7393_v35  ;;  %v7263_v35 = vld [vmem:[#allocation2 + $0x219] sm:$0xff] }
 0x93f   :  { %7564 = vst.msk [vmem:[#allocation3 + $0x90] sm:$0xff] %vm3024_vm9, %v7391_v21  ;;  %9791 = vmatmul.mubr.msk.f32.gmra.mrb[16].mxu1 %vm3543_vm11, %v8011_v13  ;;  %6266 = vrot.lane.b32.xlu1 %v6106_v11, %s9895_s19 }
 0x940   :  { %7414 = vrot.lane.b32.xlu0 %v7256_v32, %s9898_s23  ;;  %v7646_v32 = vld [vmem:[#allocation2 + $0x212] sm:$0xff] }
 0x941   :  { %v6627_v1 = vpop.permute.xlu1 %6626 }
 0x942   :  { %v7775_v39 = vpop.permute.xlu0 %7774  ;;  %6798 = vst.msk [vmem:[#allocation3 + $0xa0] sm:$0xff] %vm2253_vm6, %v6627_v1  ;;  %v6497_v1 = vld [vmem:[#allocation2 + $0x21a] sm:$0xff] }
 0x943   :  { %7948 = vst.msk [vmem:[#allocation3 + $0x90] sm:$0xff] %vm3409_vm10, %v7775_v39  ;;  %7798 = vrot.lane.b32.xlu1 %v7640_v26, %s9899_s1 }
 0x944   :  { %7416 = vrot.lane.b32.xlu0 %v7257_v34, %s9898_s23 }
 0x945   :  { %v6629_v8 = vpop.permute.xlu1 %6628 }
 0x946   :  { %v7777_v16 = vpop.permute.xlu0 %7776  ;;  %6799 = vst.msk [vmem:[#allocation3 + $0xa8] sm:$0xff] %vm2253_vm6, %v6629_v8 }
 0x947   :  { %7949 = vst.msk [vmem:[#allocation3 + $0x98] sm:$0xff] %vm3409_vm10, %v7777_v16  ;;  %6650 = vrot.lane.b32.xlu1 %v6490_v55, %s9896_s20  ;;  %v6881_v55 = vld [vmem:[#allocation2 + $0x230] sm:$0xff] }
 0x948   :  { %6268 = vrot.lane.b32.xlu0 %v6107_v49, %s9895_s19  ;;  %v6880_v49 = vld [vmem:[#allocation2 + $0x228] sm:$0xff] }
 0x949   :  { %v7013_v3 = vpop.permute.xlu1 %7012 }
 0x94a   :  { %v7011_v14 = vpop.permute.xlu0 %7010  ;;  %v8012_v59 = vld [vmem:[#allocation3 + $0x90] sm:$0xff]  ;;  %7183 = vst.msk [vmem:[#allocation3 + $0xa8] sm:$0xff] %vm2639_vm7, %v7013_v3 }
 0x94b   :  { %7182 = vst.msk [vmem:[#allocation3 + $0xa0] sm:$0xff] %vm2639_vm7, %v7011_v14  ;;  %9793 = vmatprep.mubr.msk.f32.mxu1 %vm3543_vm11, %v8012_v59  ;;  %6652 = vrot.lane.b32.xlu1 %v6491_v15, %s9896_s20  ;;  %v6114_v14 = vld [vmem:[#allocation2 + $0x229] sm:$0xff] }
 0x94c   :  { %7800 = vrot.lane.b32.xlu0 %v7641_v53, %s9899_s1 }
 0x94d   :  { %v6247_v58 = vpop.permute.xlu1 %6246 }
 0x94e   :  { %v7395_v47 = vpop.permute.xlu0 %7394  ;;  %v8013_v31 = vld [vmem:[#allocation3 + $0x98] sm:$0xff]  ;;  %6416 = vst.msk [vmem:[#allocation3 + $0xb0] sm:$0xff] %vm1868_vm5, %v6247_v58 }
 0x94f   :  { %7566 = vst.msk [vmem:[#allocation3 + $0xa0] sm:$0xff] %vm3024_vm9, %v7395_v47  ;;  %9794 = vmatmul.mubr.msk.f32.gmra.mrb[18].mxu1 %vm3543_vm11, %v8013_v31  ;;  %7036 = vrot.lane.b32.xlu1 %v6875_v50, %s9897_s21  ;;  %v7648_v50 = vld [vmem:[#allocation2 + $0x22a] sm:$0xff] }
 0x950   :  { %7034 = vrot.lane.b32.xlu0 %v6874_v20, %s9897_s21  ;;  %v7265_v20 = vld [vmem:[#allocation2 + $0x231] sm:$0xff] }
 0x951   :  { %v7779_v27 = vpop.permute.xlu1 %7778 }
 0x952   :  { %v7397_v30 = vpop.permute.xlu0 %7396  ;;  %7950 = vst.msk [vmem:[#allocation3 + $0xa0] sm:$0xff] %vm3409_vm10, %v7779_v27 }
 0x953   :  { %7567 = vst.msk [vmem:[#allocation3 + $0xa8] sm:$0xff] %vm3024_vm9, %v7397_v30  ;;  %6270 = vrot.lane.b32.xlu1 %v6108_v40, %s9895_s19 }
 0x954   :  { %7418 = vrot.lane.b32.xlu0 %v6108_v40, %s9898_s23 }
 0x955   :  { %v6631_v46 = vpop.permute.xlu1 %6630 }
 0x956   :  { %v6249_v6 = vpop.permute.xlu0 %6248  ;;  %6800 = vst.msk [vmem:[#allocation3 + $0xb0] sm:$0xff] %vm2253_vm6, %v6631_v46 }
 0x957   :  { %6417 = vst.msk [vmem:[#allocation3 + $0xb8] sm:$0xff] %vm1868_vm5, %v6249_v6  ;;  %7802 = vrot.lane.b32.xlu1 %v7642_v44, %s9899_s1 }
 0x958   :  { %7420 = vrot.lane.b32.xlu0 %v7259_v42, %s9898_s23 }
 0x959   :  { %v6633_v48 = vpop.permute.xlu1 %6632  ;;  %v8014_v52 = vld [vmem:[#allocation3 + $0xa0] sm:$0xff] }
 0x95a   :  { %v7781_v61 = vpop.permute.xlu0 %7780  ;;  %6801 = vst.msk [vmem:[#allocation3 + $0xb8] sm:$0xff] %vm2253_vm6, %v6633_v48  ;;  %9796 = vmatprep.mubr.msk.f32.mxu1 %vm3543_vm11, %v8014_v52  ;;  %v6499_v48 = vld [vmem:[#allocation2 + $0x232] sm:$0xff] }
 0x95b   :  { %7951 = vst.msk [vmem:[#allocation3 + $0xa8] sm:$0xff] %vm3409_vm10, %v7781_v61  ;;  %6654 = vrot.lane.b32.xlu1 %v7642_v44, %s9896_s20 }
 0x95c   :  { %6272 = vrot.lane.b32.xlu0 %v7259_v42, %s9895_s19 }
 0x95d   :  { %v7017_v18 = vpop.permute.xlu1 %7016 }
 0x95e   :  { %v7015_v51 = vpop.permute.xlu0 %7014  ;;  %7185 = vst.msk [vmem:[#allocation3 + $0xb8] sm:$0xff] %vm2639_vm7, %v7017_v18 }
 0x95f   :  { %7184 = vst.msk [vmem:[#allocation3 + $0xb0] sm:$0xff] %vm2639_vm7, %v7015_v51  ;;  %6656 = vrot.lane.b32.xlu1 %v6493_v37, %s9896_s20  ;;  %v6883_v51 = vld [vmem:[#allocation2 + $0x248] sm:$0xff] }
 0x960   :  { %7804 = vrot.lane.b32.xlu0 %v6493_v37, %s9899_s1  ;;  %v6882_v37 = vld [vmem:[#allocation2 + $0x240] sm:$0xff] }
 0x961   :  { %v6251_v41 = vpop.permute.xlu1 %6250 }
 0x962   :  { %v7399_v33 = vpop.permute.xlu0 %7398  ;;  %v8015_v23 = vld [vmem:[#allocation3 + $0xa8] sm:$0xff]  ;;  %6418 = vst.msk [vmem:[#allocation3 + $0xc0] sm:$0xff] %vm1868_vm5, %v6251_v41 }
 0x963   :  { %7568 = vst.msk [vmem:[#allocation3 + $0xb0] sm:$0xff] %vm3024_vm9, %v7399_v33  ;;  %9797 = vmatmul.mubr.msk.f32.gmra.mrb[20].mxu1 %vm3543_vm11, %v8015_v23  ;;  %7040 = vrot.lane.b32.xlu1 %v6877_v9, %s9897_s21 }
 0x964   :  { %7038 = vrot.lane.b32.xlu0 %v6876_v36, %s9897_s21  ;;  %v6116_v36 = vld [vmem:[#allocation2 + $0x241] sm:$0xff] }
 0x965   :  { %v7783_v29 = vpop.permute.xlu1 %7782 }
 0x966   :  { %v7401_v60 = vpop.permute.xlu0 %7400  ;;  %7952 = vst.msk [vmem:[#allocation3 + $0xb0] sm:$0xff] %vm3409_vm10, %v7783_v29 }
 0x967   :  { %7569 = vst.msk [vmem:[#allocation3 + $0xb8] sm:$0xff] %vm3024_vm9, %v7401_v60  ;;  %6274 = vrot.lane.b32.xlu1 %v6110_v63, %s9895_s19 }
 0x968   :  { %7422 = vrot.lane.b32.xlu0 %v6110_v63, %s9898_s23 }
 0x969   :  { %v6635_v22 = vpop.permute.xlu1 %6634 }
 0x96a   :  { %v6253_v56 = vpop.permute.xlu0 %6252  ;;  %6802 = vst.msk [vmem:[#allocation3 + $0xc0] sm:$0xff] %vm2253_vm6, %v6635_v22 }
 0x96b   :  { %6419 = vst.msk [vmem:[#allocation3 + $0xc8] sm:$0xff] %vm1868_vm5, %v6253_v56  ;;  %7806 = vrot.lane.b32.xlu1 %v7644_v0, %s9899_s1 }
 0x96c   :  { %7424 = vrot.lane.b32.xlu0 %v7261_v43, %s9898_s23 }
 0x96d   :  { %v6637_v45 = vpop.permute.xlu1 %6636  ;;  %v8016_v57 = vld [vmem:[#allocation3 + $0xb0] sm:$0xff] }
 0x96e   :  { %v7785_v17 = vpop.permute.xlu0 %7784  ;;  %6803 = vst.msk [vmem:[#allocation3 + $0xc8] sm:$0xff] %vm2253_vm6, %v6637_v45  ;;  %9799 = vmatprep.mubr.msk.f32.mxu1 %vm3543_vm11, %v8016_v57  ;;  %v7267_v45 = vld [vmem:[#allocation2 + $0x249] sm:$0xff] }
 0x96f   :  { %7953 = vst.msk [vmem:[#allocation3 + $0xb8] sm:$0xff] %vm3409_vm10, %v7785_v17  ;;  %6658 = vrot.lane.b32.xlu1 %v7644_v0, %s9896_s20 }
 0x970   :  { %6276 = vrot.lane.b32.xlu0 %v7261_v43, %s9895_s19  ;;  %v7650_v43 = vld [vmem:[#allocation2 + $0x242] sm:$0xff] }
 0x971   :  { %v7021_v38 = vpop.permute.xlu1 %7020 }
 0x972   :  { %v7019_v2 = vpop.permute.xlu0 %7018  ;;  %7187 = vst.msk [vmem:[#allocation3 + $0xc8] sm:$0xff] %vm2639_vm7, %v7021_v38 }
 0x973   :  { %7186 = vst.msk [vmem:[#allocation3 + $0xc0] sm:$0xff] %vm2639_vm7, %v7019_v2  ;;  %6660 = vrot.lane.b32.xlu1 %v6495_v54, %s9896_s20 }
 0x974   :  { %7808 = vrot.lane.b32.xlu0 %v6495_v54, %s9899_s1 }
 0x975   :  { %v6255_v5 = vpop.permute.xlu1 %6254 }
 0x976   :  { %v7403_v62 = vpop.permute.xlu0 %7402  ;;  %v8017_v10 = vld [vmem:[#allocation3 + $0xb8] sm:$0xff]  ;;  %6420 = vst.msk [vmem:[#allocation3 + $0xd0] sm:$0xff] %vm1868_vm5, %v6255_v5  ;;  %v6501_v5 = vld [vmem:[#allocation2 + $0x24a] sm:$0xff] }
 0x977   :  { %7570 = vst.msk [vmem:[#allocation3 + $0xc0] sm:$0xff] %vm3024_vm9, %v7403_v62  ;;  %9800 = vmatmul.mubr.msk.f32.gmra.mrb[22].mxu1 %vm3543_vm11, %v8017_v10  ;;  %7044 = vrot.lane.b32.xlu1 %v6879_v28, %s9897_s21 }
 0x978   :  { %7042 = vrot.lane.b32.xlu0 %v6878_v19, %s9897_s21 }
 0x979   :  { %v7787_v24 = vpop.permute.xlu1 %7786 }
 0x97a   :  { %v7405_v4 = vpop.permute.xlu0 %7404  ;;  %7954 = vst.msk [vmem:[#allocation3 + $0xc0] sm:$0xff] %vm3409_vm10, %v7787_v24 }
 0x97b   :  { %7571 = vst.msk [vmem:[#allocation3 + $0xc8] sm:$0xff] %vm3024_vm9, %v7405_v4  ;;  %6278 = vrot.lane.b32.xlu1 %v6112_v25, %s9895_s19  ;;  %v6885_v4 = vld [vmem:[#allocation2 + $0x260] sm:$0xff] }
 0x97c   :  { %7426 = vrot.lane.b32.xlu0 %v6112_v25, %s9898_s23 }
 0x97d   :  { %v6639_v7 = vpop.permute.xlu1 %6638 }
 0x97e   :  { %v6257_v12 = vpop.permute.xlu0 %6256  ;;  %6804 = vst.msk [vmem:[#allocation3 + $0xd0] sm:$0xff] %vm2253_vm6, %v6639_v7  ;;  %v6884_v7 = vld [vmem:[#allocation2 + $0x258] sm:$0xff] }
 0x97f   :  { %6421 = vst.msk [vmem:[#allocation3 + $0xd8] sm:$0xff] %vm1868_vm5, %v6257_v12  ;;  %7810 = vrot.lane.b32.xlu1 %v7646_v32, %s9899_s1 }
 0x980   :  { %7428 = vrot.lane.b32.xlu0 %v7263_v35, %s9898_s23 }
 0x981   :  { %v6641_v21 = vpop.permute.xlu1 %6640  ;;  %v8018_v11 = vld [vmem:[#allocation3 + $0xc0] sm:$0xff] }
 0x982   :  { %v7789_v13 = vpop.permute.xlu0 %7788  ;;  %6805 = vst.msk [vmem:[#allocation3 + $0xd8] sm:$0xff] %vm2253_vm6, %v6641_v21  ;;  %9802 = vmatprep.mubr.msk.f32.mxu1 %vm3543_vm11, %v8018_v11 }
 0x983   :  { %7955 = vst.msk [vmem:[#allocation3 + $0xc8] sm:$0xff] %vm3409_vm10, %v7789_v13  ;;  %6662 = vrot.lane.b32.xlu1 %v7646_v32, %s9896_s20  ;;  %v6118_v13 = vld [vmem:[#allocation2 + $0x259] sm:$0xff] }
 0x984   :  { %6280 = vrot.lane.b32.xlu0 %v7263_v35, %s9895_s19 }
 0x985   :  { %v7025_v26 = vpop.permute.xlu1 %7024 }
 0x986   :  { %v7023_v34 = vpop.permute.xlu0 %7022  ;;  %7189 = vst.msk [vmem:[#allocation3 + $0xd8] sm:$0xff] %vm2639_vm7, %v7025_v26 }
 0x987   :  { %7188 = vst.msk [vmem:[#allocation3 + $0xd0] sm:$0xff] %vm2639_vm7, %v7023_v34  ;;  %6664 = vrot.lane.b32.xlu1 %v6497_v1, %s9896_s20 }
 0x988   :  { %7812 = vrot.lane.b32.xlu0 %v6497_v1, %s9899_s1  ;;  %v7652_v1 = vld [vmem:[#allocation2 + $0x25a] sm:$0xff] }
 0x989   :  { %v6259_v39 = vpop.permute.xlu1 %6258 }
 0x98a   :  { %v7407_v8 = vpop.permute.xlu0 %7406  ;;  %v8019_v16 = vld [vmem:[#allocation3 + $0xc8] sm:$0xff]  ;;  %6422 = vst.msk [vmem:[#allocation3 + $0xe0] sm:$0xff] %vm1868_vm5, %v6259_v39 }
 0x98b   :  { %7572 = vst.msk [vmem:[#allocation3 + $0xd0] sm:$0xff] %vm3024_vm9, %v7407_v8  ;;  %9803 = vmatmul.mubr.msk.f32.gmra.mrb[24].mxu1 %vm3543_vm11, %v8019_v16  ;;  %7048 = vrot.lane.b32.xlu1 %v6881_v55, %s9897_s21  ;;  %v7269_v39 = vld [vmem:[#allocation2 + $0x261] sm:$0xff] }
 0x98c   :  { %7046 = vrot.lane.b32.xlu0 %v6880_v49, %s9897_s21 }
 0x98d   :  { %v7791_v53 = vpop.permute.xlu1 %7790 }
 0x98e   :  { %v7409_v3 = vpop.permute.xlu0 %7408  ;;  %7956 = vst.msk [vmem:[#allocation3 + $0xd0] sm:$0xff] %vm3409_vm10, %v7791_v53 }
 0x98f   :  { %7573 = vst.msk [vmem:[#allocation3 + $0xd8] sm:$0xff] %vm3024_vm9, %v7409_v3  ;;  %6282 = vrot.lane.b32.xlu1 %v6114_v14, %s9895_s19 }
 0x990   :  { %7430 = vrot.lane.b32.xlu0 %v6114_v14, %s9898_s23 }
 0x991   :  { %v6643_v59 = vpop.permute.xlu1 %6642 }
 0x992   :  { %v14517_v15 = vpop.f32.mrb[0].mxu1  ;;  %6806 = vst.msk [vmem:[#allocation3 + $0xe0] sm:$0xff] %vm2253_vm6, %v6643_v59  ;;  %v6261_v47 = vpop.permute.xlu0 %6260  ;;  %v6503_v59 = vld [vmem:[#allocation2 + $0x262] sm:$0xff] }
 0x993   :  { %v8644_v58 = vsel %vm26_vm0, %v14517_v15, 0.0  ;;  %v14522_v31 = vpop.f32.mrb[1].mxu1  ;;  %6423 = vst.msk [vmem:[#allocation3 + $0xe8] sm:$0xff] %vm1868_vm5, %v6261_v47  ;;  %7814 = vrot.lane.b32.xlu1 %v7648_v50, %s9899_s1 }
 0x994   :  { %v8643_v27 = vsel %vm26_vm0, %v14522_v31, 0.0  ;;  %7432 = vrot.lane.b32.xlu0 %v7265_v20, %s9898_s23 }
 0x995   :  { %v8645_v30 = vadd.f32 %v8644_v58, %v8643_v27  ;;  %v6645_v40 = vpop.permute.xlu1 %6644  ;;  %v8020_v46 = vld [vmem:[#allocation3 + $0xd0] sm:$0xff] }
 0x996   :  { %6807 = vst.msk [vmem:[#allocation3 + $0xe8] sm:$0xff] %vm2253_vm6, %v6645_v40  ;;  %v7793_v6 = vpop.permute.xlu0 %7792  ;;  %9805 = vmatprep.mubr.msk.f32.mxu1 %vm3543_vm11, %v8020_v46  ;;  %v6887_v40 = vld [vmem:[#allocation2 + $0x278] sm:$0xff] }
 0x997   :  { %7957 = vst.msk [vmem:[#allocation3 + $0xd8] sm:$0xff] %vm3409_vm10, %v7793_v6  ;;  %6666 = vrot.lane.b32.xlu1 %v7648_v50, %s9896_s20  ;;  %v6886_v6 = vld [vmem:[#allocation2 + $0x270] sm:$0xff] }
 0x998   :  { %6284 = vrot.lane.b32.xlu0 %v7265_v20, %s9895_s19 }
 0x999   :  { %v7029_v44 = vpop.permute.xlu1 %7028 }
 0x99a   :  { %7191 = vst.msk [vmem:[#allocation3 + $0xe8] sm:$0xff] %vm2639_vm7, %v7029_v44  ;;  %v7027_v42 = vpop.permute.xlu0 %7026 }
 0x99b   :  { %7190 = vst.msk [vmem:[#allocation3 + $0xe0] sm:$0xff] %vm2639_vm7, %v7027_v42  ;;  %6668 = vrot.lane.b32.xlu1 %v6499_v48, %s9896_s20 }
 0x99c   :  { %7816 = vrot.lane.b32.xlu0 %v6499_v48, %s9899_s1  ;;  %v6120_v48 = vld [vmem:[#allocation2 + $0x271] sm:$0xff] }
 0x99d   :  { %v6263_v61 = vpop.permute.xlu1 %6262 }
 0x99e   :  { %6424 = vst.msk [vmem:[#allocation3 + $0xf0] sm:$0xff] %vm1868_vm5, %v6263_v61  ;;  %v7411_v52 = vpop.permute.xlu0 %7410  ;;  %v8021_v18 = vld [vmem:[#allocation3 + $0xd8] sm:$0xff] }
 0x99f   :  { %7574 = vst.msk [vmem:[#allocation3 + $0xe0] sm:$0xff] %vm3024_vm9, %v7411_v52  ;;  %9806 = vmatmul.mubr.msk.f32.gmra.mrb[26].mxu1 %vm3543_vm11, %v8021_v18  ;;  %7052 = vrot.lane.b32.xlu1 %v6883_v51, %s9897_s21  ;;  %v7654_v18 = vld [vmem:[#allocation2 + $0x272] sm:$0xff] }
 0x9a0   :  { %7050 = vrot.lane.b32.xlu0 %v6882_v37, %s9897_s21  ;;  %v7271_v51 = vld [vmem:[#allocation2 + $0x279] sm:$0xff] }
 0x9a1   :  { %v7795_v41 = vpop.permute.xlu1 %7794 }
 0x9a2   :  { %v14543_v33 = vpop.f32.mrb[2].mxu1  ;;  %7958 = vst.msk [vmem:[#allocation3 + $0xe0] sm:$0xff] %vm3409_vm10, %v7795_v41  ;;  %v7413_v23 = vpop.permute.xlu0 %7412 }
 0x9a3   :  { %v14546_v9 = vpop.f32.mrb[3].mxu1  ;;  %7575 = vst.msk [vmem:[#allocation3 + $0xe8] sm:$0xff] %vm3024_vm9, %v7413_v23  ;;  %6286 = vrot.lane.b32.xlu1 %v6116_v36, %s9895_s19  ;;  %v8648_v63 = vsel %vm26_vm0, %v14543_v33, 0.0 }
 0x9a4   :  { %v8646_v29 = vsel %vm26_vm0, %v14546_v9, 0.0  ;;  %7434 = vrot.lane.b32.xlu0 %v6116_v36, %s9898_s23 }
 0x9a5   :  { %v8647_v60 = vadd.f32 %v8646_v29, %v8645_v30  ;;  %v6647_v22 = vpop.permute.xlu1 %6646 }
 0x9a6   :  { %6808 = vst.msk [vmem:[#allocation3 + $0xf0] sm:$0xff] %vm2253_vm6, %v6647_v22  ;;  %v6265_v0 = vpop.permute.xlu0 %6264 }
 0x9a7   :  { %v8649_v56 = vadd.f32 %v8648_v63, %v8647_v60  ;;  %6425 = vst.msk [vmem:[#allocation3 + $0xf8] sm:$0xff] %vm1868_vm5, %v6265_v0  ;;  %7818 = vrot.lane.b32.xlu1 %v7650_v43, %s9899_s1 }
 0x9a8   :  { %7436 = vrot.lane.b32.xlu0 %v7267_v45, %s9898_s23 }
 0x9a9   :  { %v6649_v17 = vpop.permute.xlu1 %6648  ;;  %v8022_v57 = vld [vmem:[#allocation3 + $0xe0] sm:$0xff] }
 0x9aa   :  { %6809 = vst.msk [vmem:[#allocation3 + $0xf8] sm:$0xff] %vm2253_vm6, %v6649_v17  ;;  %v7797_v38 = vpop.permute.xlu0 %7796  ;;  %9808 = vmatprep.mubr.msk.f32.mxu1 %vm3543_vm11, %v8022_v57 }
 0x9ab   :  { %7959 = vst.msk [vmem:[#allocation3 + $0xe8] sm:$0xff] %vm3409_vm10, %v7797_v38  ;;  %6670 = vrot.lane.b32.xlu1 %v7650_v43, %s9896_s20  ;;  %v6505_v43 = vld [vmem:[#allocation2 + $0x27a] sm:$0xff] }
 0x9ac   :  { %6288 = vrot.lane.b32.xlu0 %v7267_v45, %s9895_s19 }
 0x9ad   :  { %v7033_v2 = vpop.permute.xlu1 %7032 }
 0x9ae   :  { %7193 = vst.msk [vmem:[#allocation3 + $0xf8] sm:$0xff] %vm2639_vm7, %v7033_v2  ;;  %v7031_v54 = vpop.permute.xlu0 %7030  ;;  %v6889_v2 = vld [vmem:[#allocation2 + $0x290] sm:$0xff] }
 0x9af   :  { %7192 = vst.msk [vmem:[#allocation3 + $0xf0] sm:$0xff] %vm2639_vm7, %v7031_v54  ;;  %6672 = vrot.lane.b32.xlu1 %v6501_v5, %s9896_s20  ;;  %v6888_v54 = vld [vmem:[#allocation2 + $0x288] sm:$0xff] }
 0x9b0   :  { %7820 = vrot.lane.b32.xlu0 %v6501_v5, %s9899_s1 }
 0x9b1   :  { %v6267_v62 = vpop.permute.xlu1 %6266 }
 0x9b2   :  { %v14568_v10 = vpop.f32.mrb[4].mxu1  ;;  %6426 = vst.msk [vmem:[#allocation3 + $0x100] sm:$0xff] %vm1868_vm5, %v6267_v62  ;;  %v7415_v28 = vpop.permute.xlu0 %7414  ;;  %v8023_v24 = vld [vmem:[#allocation3 + $0xe8] sm:$0xff] }
 0x9b3   :  { %v14571_v19 = vpop.f32.mrb[5].mxu1  ;;  %7576 = vst.msk [vmem:[#allocation3 + $0xf0] sm:$0xff] %vm3024_vm9, %v7415_v28  ;;  %9809 = vmatmul.mubr.msk.f32.gmra.mrb[28].mxu1 %vm3543_vm11, %v8023_v24  ;;  %7056 = vrot.lane.b32.xlu1 %v6885_v4, %s9897_s21  ;;  %v8652_v32 = vsel %vm26_vm0, %v14568_v10, 0.0  ;;  %v6122_v28 = vld [vmem:[#allocation2 + $0x289] sm:$0xff] }
 0x9b4   :  { %v8650_v25 = vsel %vm26_vm0, %v14571_v19, 0.0  ;;  %7054 = vrot.lane.b32.xlu0 %v6884_v7, %s9897_s21 }
 0x9b5   :  { %v8651_v12 = vadd.f32 %v8650_v25, %v8649_v56  ;;  %v7799_v35 = vpop.permute.xlu1 %7798 }
 0x9b6   :  { %7960 = vst.msk [vmem:[#allocation3 + $0xf0] sm:$0xff] %vm3409_vm10, %v7799_v35  ;;  %v7417_v21 = vpop.permute.xlu0 %7416  ;;  %v7273_v35 = vld [vmem:[#allocation2 + $0x291] sm:$0xff] }
 0x9b7   :  { %v8653_v11 = vadd.f32 %v8652_v32, %v8651_v12  ;;  %7577 = vst.msk [vmem:[#allocation3 + $0xf8] sm:$0xff] %vm3024_vm9, %v7417_v21  ;;  %6290 = vrot.lane.b32.xlu1 %v6118_v13, %s9895_s19  ;;  %v7656_v12 = vld [vmem:[#allocation2 + $0x28a] sm:$0xff] }
 0x9b8   :  { %7438 = vrot.lane.b32.xlu0 %v6118_v13, %s9898_s23 }
 0x9b9   :  { %v6651_v26 = vpop.permute.xlu1 %6650 }
 0x9ba   :  { %6810 = vst.msk [vmem:[#allocation3 + $0x100] sm:$0xff] %vm2253_vm6, %v6651_v26  ;;  %v6269_v34 = vpop.permute.xlu0 %6268 }
 0x9bb   :  { %6427 = vst.msk [vmem:[#allocation3 + $0x108] sm:$0xff] %vm1868_vm5, %v6269_v34  ;;  %7822 = vrot.lane.b32.xlu1 %v7652_v1, %s9899_s1 }
 0x9bc   :  { %7440 = vrot.lane.b32.xlu0 %v7269_v39, %s9898_s23 }
 0x9bd   :  { %v6653_v8 = vpop.permute.xlu1 %6652  ;;  %v8024_v16 = vld [vmem:[#allocation3 + $0xf0] sm:$0xff] }
 0x9be   :  { %6811 = vst.msk [vmem:[#allocation3 + $0x108] sm:$0xff] %vm2253_vm6, %v6653_v8  ;;  %v7801_v55 = vpop.permute.xlu0 %7800  ;;  %9811 = vmatprep.mubr.msk.f32.mxu1 %vm3543_vm11, %v8024_v16  ;;  %v6507_v16 = vld [vmem:[#allocation2 + $0x292] sm:$0xff] }
 0x9bf   :  { %7961 = vst.msk [vmem:[#allocation3 + $0xf8] sm:$0xff] %vm3409_vm10, %v7801_v55  ;;  %6674 = vrot.lane.b32.xlu1 %v7652_v1, %s9896_s20 }
 0x9c0   :  { %6292 = vrot.lane.b32.xlu0 %v7269_v39, %s9895_s19 }
 0x9c1   :  { %v7037_v49 = vpop.permute.xlu1 %7036 }
 0x9c2   :  { %v14594_v53 = vpop.f32.mrb[6].mxu1  ;;  %7195 = vst.msk [vmem:[#allocation3 + $0x108] sm:$0xff] %vm2639_vm7, %v7037_v49  ;;  %v7035_v3 = vpop.permute.xlu0 %7034 }
 0x9c3   :  { %v14597_v14 = vpop.f32.mrb[7].mxu1  ;;  %7194 = vst.msk [vmem:[#allocation3 + $0x100] sm:$0xff] %vm2639_vm7, %v7035_v3  ;;  %6676 = vrot.lane.b32.xlu1 %v6503_v59, %s9896_s20  ;;  %v8656_v50 = vsel %vm26_vm0, %v14594_v53, 0.0 }
 0x9c4   :  { %v8654_v58 = vsel %vm26_vm0, %v14597_v14, 0.0  ;;  %7824 = vrot.lane.b32.xlu0 %v6503_v59, %s9899_s1  ;;  %v6891_v59 = vld [vmem:[#allocation2 + $0x2a8] sm:$0xff] }
 0x9c5   :  { %v8655_v47 = vadd.f32 %v8654_v58, %v8653_v11  ;;  %v6271_v20 = vpop.permute.xlu1 %6270  ;;  %v6890_v58 = vld [vmem:[#allocation2 + $0x2a0] sm:$0xff] }
 0x9c6   :  { %6428 = vst.msk [vmem:[#allocation3 + $0x110] sm:$0xff] %vm1868_vm5, %v6271_v20  ;;  %v7419_v27 = vpop.permute.xlu0 %7418  ;;  %v8025_v30 = vld [vmem:[#allocation3 + $0xf8] sm:$0xff] }
 0x9c7   :  { %v8657_v46 = vadd.f32 %v8656_v50, %v8655_v47  ;;  %7578 = vst.msk [vmem:[#allocation3 + $0x100] sm:$0xff] %vm3024_vm9, %v7419_v27  ;;  %9812 = vmatmul.mubr.msk.f32.gmra.mrb[30].mxu1 %vm3543_vm11, %v8025_v30  ;;  %7060 = vrot.lane.b32.xlu1 %v6887_v40, %s9897_s21  ;;  %v6124_v30 = vld [vmem:[#allocation2 + $0x2a1] sm:$0xff] }
 0x9c8   :  { %7058 = vrot.lane.b32.xlu0 %v6886_v6, %s9897_s21 }
 0x9c9   :  { %v7803_v44 = vpop.permute.xlu1 %7802 }
 0x9ca   :  { %7962 = vst.msk [vmem:[#allocation3 + $0x100] sm:$0xff] %vm3409_vm10, %v7803_v44  ;;  %v7421_v42 = vpop.permute.xlu0 %7420 }
 0x9cb   :  { %7579 = vst.msk [vmem:[#allocation3 + $0x108] sm:$0xff] %vm3024_vm9, %v7421_v42  ;;  %6294 = vrot.lane.b32.xlu1 %v6120_v48, %s9895_s19 }
 0x9cc   :  { %7442 = vrot.lane.b32.xlu0 %v6120_v48, %s9898_s23  ;;  %v7658_v48 = vld [vmem:[#allocation2 + $0x2a2] sm:$0xff] }
 0x9cd   :  { %v6655_v61 = vpop.permute.xlu1 %6654 }
 0x9ce   :  { %6812 = vst.msk [vmem:[#allocation3 + $0x110] sm:$0xff] %vm2253_vm6, %v6655_v61  ;;  %v6273_v52 = vpop.permute.xlu0 %6272 }
 0x9cf   :  { %6429 = vst.msk [vmem:[#allocation3 + $0x118] sm:$0xff] %vm1868_vm5, %v6273_v52  ;;  %7826 = vrot.lane.b32.xlu1 %v7654_v18, %s9899_s1  ;;  %v7275_v52 = vld [vmem:[#allocation2 + $0x2a9] sm:$0xff] }
 0x9d0   :  { %7444 = vrot.lane.b32.xlu0 %v7271_v51, %s9898_s23 }
 0x9d1   :  { %v6657_v37 = vpop.permute.xlu1 %6656  ;;  %v8026_v23 = vld [vmem:[#allocation3 + $0x100] sm:$0xff] }
 0x9d2   :  { %v14619_v41 = vpop.f32.mrb[8].mxu1  ;;  %6813 = vst.msk [vmem:[#allocation3 + $0x118] sm:$0xff] %vm2253_vm6, %v6657_v37  ;;  %v7805_v36 = vpop.permute.xlu0 %7804  ;;  %9814 = vmatprep.mubr.msk.f32.mxu1 %vm3543_vm11, %v8026_v23 }
 0x9d3   :  { %v14622_v29 = vpop.f32.mrb[9].mxu1  ;;  %7963 = vst.msk [vmem:[#allocation3 + $0x108] sm:$0xff] %vm3409_vm10, %v7805_v36  ;;  %6678 = vrot.lane.b32.xlu1 %v7654_v18, %s9896_s20  ;;  %v8660_v22 = vsel %vm26_vm0, %v14619_v41, 0.0 }
 0x9d4   :  { %v8658_v60 = vsel %vm26_vm0, %v14622_v29, 0.0  ;;  %6296 = vrot.lane.b32.xlu0 %v7271_v51, %s9895_s19 }
 0x9d5   :  { %v8659_v63 = vadd.f32 %v8658_v60, %v8657_v46  ;;  %v7041_v56 = vpop.permute.xlu1 %7040  ;;  %v6509_v60 = vld [vmem:[#allocation2 + $0x2aa] sm:$0xff] }
 0x9d6   :  { %7197 = vst.msk [vmem:[#allocation3 + $0x118] sm:$0xff] %vm2639_vm7, %v7041_v56  ;;  %v7039_v0 = vpop.permute.xlu0 %7038 }
 0x9d7   :  { %v8661_v45 = vadd.f32 %v8660_v22, %v8659_v63  ;;  %7196 = vst.msk [vmem:[#allocation3 + $0x110] sm:$0xff] %vm2639_vm7, %v7039_v0  ;;  %6680 = vrot.lane.b32.xlu1 %v6505_v43, %s9896_s20 }
 0x9d8   :  { %7828 = vrot.lane.b32.xlu0 %v6505_v43, %s9899_s1 }
 0x9d9   :  { %v6275_v17 = vpop.permute.xlu1 %6274 }
 0x9da   :  { %6430 = vst.msk [vmem:[#allocation3 + $0x120] sm:$0xff] %vm1868_vm5, %v6275_v17  ;;  %v7423_v57 = vpop.permute.xlu0 %7422  ;;  %v8027_v38 = vld [vmem:[#allocation3 + $0x108] sm:$0xff] }
 0x9db   :  { %7580 = vst.msk [vmem:[#allocation3 + $0x110] sm:$0xff] %vm3024_vm9, %v7423_v57  ;;  %9815 = vmatmul.mubr.msk.f32.gmra.mrb[32].mxu1 %vm3543_vm11, %v8027_v38  ;;  %7064 = vrot.lane.b32.xlu1 %v6889_v2, %s9897_s21  ;;  %v6892_v57 = vld [vmem:[#allocation2 + $0x2b8] sm:$0xff] }
 0x9dc   :  { %7062 = vrot.lane.b32.xlu0 %v6888_v54, %s9897_s21 }
 0x9dd   :  { %v7807_v5 = vpop.permute.xlu1 %7806 }
 0x9de   :  { %7964 = vst.msk [vmem:[#allocation3 + $0x110] sm:$0xff] %vm3409_vm10, %v7807_v5  ;;  %v7425_v62 = vpop.permute.xlu0 %7424 }
 0x9df   :  { %7581 = vst.msk [vmem:[#allocation3 + $0x118] sm:$0xff] %vm3024_vm9, %v7425_v62  ;;  %6298 = vrot.lane.b32.xlu1 %v6122_v28, %s9895_s19  ;;  %v6126_v62 = vld [vmem:[#allocation2 + $0x2b9] sm:$0xff] }
 0x9e0   :  { %7446 = vrot.lane.b32.xlu0 %v6122_v28, %s9898_s23 }
 0x9e1   :  { %v6659_v24 = vpop.permute.xlu1 %6658 }
 0x9e2   :  { %v14645_v4 = vpop.f32.mrb[10].mxu1  ;;  %6814 = vst.msk [vmem:[#allocation3 + $0x120] sm:$0xff] %vm2253_vm6, %v6659_v24  ;;  %v6277_v25 = vpop.permute.xlu0 %6276 }
 0x9e3   :  { %v14648_v7 = vpop.f32.mrb[11].mxu1  ;;  %6431 = vst.msk [vmem:[#allocation3 + $0x128] sm:$0xff] %vm1868_vm5, %v6277_v25  ;;  %7830 = vrot.lane.b32.xlu1 %v7656_v12, %s9899_s1  ;;  %v8664_v13 = vsel %vm26_vm0, %v14645_v4, 0.0 }
 0x9e4   :  { %v8662_v32 = vsel %vm26_vm0, %v14648_v7, 0.0  ;;  %7448 = vrot.lane.b32.xlu0 %v7273_v35, %s9898_s23 }
 0x9e5   :  { %v8663_v21 = vadd.f32 %v8662_v32, %v8661_v45  ;;  %v6661_v11 = vpop.permute.xlu1 %6660  ;;  %v8028_v26 = vld [vmem:[#allocation3 + $0x110] sm:$0xff]  ;;  %v6893_v45 = vld [vmem:[#allocation2 + $0x2c0] sm:$0xff] }
 0x9e6   :  { %6815 = vst.msk [vmem:[#allocation3 + $0x128] sm:$0xff] %vm2253_vm6, %v6661_v11  ;;  %v7809_v34 = vpop.permute.xlu0 %7808  ;;  %9817 = vmatprep.mubr.msk.f32.mxu1 %vm3543_vm11, %v8028_v26  ;;  %v7277_v32 = vld [vmem:[#allocation2 + $0x2c1] sm:$0xff] }
 0x9e7   :  { %v8665_v1 = vadd.f32 %v8664_v13, %v8663_v21  ;;  %7965 = vst.msk [vmem:[#allocation3 + $0x118] sm:$0xff] %vm3409_vm10, %v7809_v34  ;;  %6682 = vrot.lane.b32.xlu1 %v7656_v12, %s9896_s20  ;;  %v7660_v12 = vld [vmem:[#allocation2 + $0x2ba] sm:$0xff] }
 0x9e8   :  { %6300 = vrot.lane.b32.xlu0 %v7273_v35, %s9895_s19 }
 0x9e9   :  { %v7045_v39 = vpop.permute.xlu1 %7044 }
 0x9ea   :  { %7199 = vst.msk [vmem:[#allocation3 + $0x128] sm:$0xff] %vm2639_vm7, %v7045_v39  ;;  %v7043_v8 = vpop.permute.xlu0 %7042  ;;  %v6511_v39 = vld [vmem:[#allocation2 + $0x2c2] sm:$0xff] }
 0x9eb   :  { %7198 = vst.msk [vmem:[#allocation3 + $0x120] sm:$0xff] %vm2639_vm7, %v7043_v8  ;;  %6684 = vrot.lane.b32.xlu1 %v6507_v16, %s9896_s20 }
 0x9ec   :  { %7832 = vrot.lane.b32.xlu0 %v6507_v16, %s9899_s1 }
 0x9ed   :  { %v6279_v55 = vpop.permute.xlu1 %6278 }
 0x9ee   :  { %6432 = vst.msk [vmem:[#allocation3 + $0x130] sm:$0xff] %vm1868_vm5, %v6279_v55  ;;  %v7427_v49 = vpop.permute.xlu0 %7426  ;;  %v8029_v3 = vld [vmem:[#allocation3 + $0x118] sm:$0xff] }
 0x9ef   :  { %7582 = vst.msk [vmem:[#allocation3 + $0x120] sm:$0xff] %vm3024_vm9, %v7427_v49  ;;  %9818 = vmatmul.mubr.msk.f32.gmra.mrb[34].mxu1 %vm3543_vm11, %v8029_v3  ;;  %7068 = vrot.lane.b32.xlu1 %v6891_v59, %s9897_s21 }
 0x9f0   :  { %7066 = vrot.lane.b32.xlu0 %v6890_v58, %s9897_s21  ;;  %v6895_v58 = vld [vmem:[#allocation2 + $0x2d8] sm:$0xff] }
 0x9f1   :  { %v7811_v47 = vpop.permute.xlu1 %7810 }
 0x9f2   :  { %v14671_v50 = vpop.f32.mrb[12].mxu1  ;;  %7966 = vst.msk [vmem:[#allocation3 + $0x120] sm:$0xff] %vm3409_vm10, %v7811_v47  ;;  %v7429_v20 = vpop.permute.xlu0 %7428 }
 0x9f3   :  { %v14674_v27 = vpop.f32.mrb[13].mxu1  ;;  %7583 = vst.msk [vmem:[#allocation3 + $0x128] sm:$0xff] %vm3024_vm9, %v7429_v20  ;;  %6302 = vrot.lane.b32.xlu1 %v6124_v30, %s9895_s19  ;;  %v8668_v6 = vsel %vm26_vm0, %v14671_v50, 0.0  ;;  %v6894_v20 = vld [vmem:[#allocation2 + $0x2d0] sm:$0xff] }
 0x9f4   :  { %v8666_v40 = vsel %vm26_vm0, %v14674_v27, 0.0  ;;  %7450 = vrot.lane.b32.xlu0 %v6124_v30, %s9898_s23 }
 0x9f5   :  { %v8667_v46 = vadd.f32 %v8666_v40, %v8665_v1  ;;  %v6663_v44 = vpop.permute.xlu1 %6662 }
 0x9f6   :  { %6816 = vst.msk [vmem:[#allocation3 + $0x130] sm:$0xff] %vm2253_vm6, %v6663_v44  ;;  %v6281_v42 = vpop.permute.xlu0 %6280 }
 0x9f7   :  { %v8669_v61 = vadd.f32 %v8668_v6, %v8667_v46  ;;  %6433 = vst.msk [vmem:[#allocation3 + $0x138] sm:$0xff] %vm1868_vm5, %v6281_v42  ;;  %7834 = vrot.lane.b32.xlu1 %v7658_v48, %s9899_s1  ;;  %v6128_v46 = vld [vmem:[#allocation2 + $0x2d1] sm:$0xff] }
 0x9f8   :  { %7452 = vrot.lane.b32.xlu0 %v7275_v52, %s9898_s23  ;;  %v7662_v42 = vld [vmem:[#allocation2 + $0x2d2] sm:$0xff] }
 0x9f9   :  { %v6665_v18 = vpop.permute.xlu1 %6664  ;;  %v8030_v51 = vld [vmem:[#allocation3 + $0x120] sm:$0xff] }
 0x9fa   :  { %6817 = vst.msk [vmem:[#allocation3 + $0x138] sm:$0xff] %vm2253_vm6, %v6665_v18  ;;  %v7813_v37 = vpop.permute.xlu0 %7812  ;;  %9820 = vmatprep.mubr.msk.f32.mxu1 %vm3543_vm11, %v8030_v51 }
 0x9fb   :  { %7967 = vst.msk [vmem:[#allocation3 + $0x128] sm:$0xff] %vm3409_vm10, %v7813_v37  ;;  %6686 = vrot.lane.b32.xlu1 %v7658_v48, %s9896_s20  ;;  %v7279_v48 = vld [vmem:[#allocation2 + $0x2d9] sm:$0xff] }
 0x9fc   :  { %6304 = vrot.lane.b32.xlu0 %v7275_v52, %s9895_s19 }
 0x9fd   :  { %v7049_v23 = vpop.permute.xlu1 %7048 }
 0x9fe   :  { %7201 = vst.msk [vmem:[#allocation3 + $0x138] sm:$0xff] %vm2639_vm7, %v7049_v23  ;;  %v7047_v36 = vpop.permute.xlu0 %7046 }
 0x9ff   :  { %7200 = vst.msk [vmem:[#allocation3 + $0x130] sm:$0xff] %vm2639_vm7, %v7047_v36  ;;  %6688 = vrot.lane.b32.xlu1 %v6509_v60, %s9896_s20 }
 0xa00   :  { %7836 = vrot.lane.b32.xlu0 %v6509_v60, %s9899_s1 }
 0xa01   :  { %v6283_v63 = vpop.permute.xlu1 %6282 }
 0xa02   :  { %v14696_v22 = vpop.f32.mrb[14].mxu1  ;;  %6434 = vst.msk [vmem:[#allocation3 + $0x140] sm:$0xff] %vm1868_vm5, %v6283_v63  ;;  %v7431_v56 = vpop.permute.xlu0 %7430  ;;  %v8031_v43 = vld [vmem:[#allocation3 + $0x128] sm:$0xff] }
 0xa03   :  { %v14699_v0 = vpop.f32.mrb[15].mxu1  ;;  %7584 = vst.msk [vmem:[#allocation3 + $0x130] sm:$0xff] %vm3024_vm9, %v7431_v56  ;;  %9821 = vmatmul.mubr.msk.f32.gmra.mrb[36].mxu1 %vm3543_vm11, %v8031_v43  ;;  %7072 = vrot.lane.b32.xlu1 %v6893_v45, %s9897_s21  ;;  %v8672_v2 = vsel %vm26_vm0, %v14696_v22, 0.0  ;;  %v6513_v43 = vld [vmem:[#allocation2 + $0x2da] sm:$0xff] }
 0xa04   :  { %v8670_v17 = vsel %vm26_vm0, %v14699_v0, 0.0  ;;  %7070 = vrot.lane.b32.xlu0 %v6892_v57, %s9897_s21 }
 0xa05   :  { %v8671_v38 = vadd.f32 %v8670_v17, %v8669_v61  ;;  %v7815_v54 = vpop.permute.xlu1 %7814 }
 0xa06   :  { %7968 = vst.msk [vmem:[#allocation3 + $0x130] sm:$0xff] %vm3409_vm10, %v7815_v54  ;;  %v7433_v5 = vpop.permute.xlu0 %7432  ;;  %v6896_v54 = vld [vmem:[#allocation2 + $0x2e8] sm:$0xff] }
 0xa07   :  { %v8673_v28 = vadd.f32 %v8672_v2, %v8671_v38  ;;  %7585 = vst.msk [vmem:[#allocation3 + $0x138] sm:$0xff] %vm3024_vm9, %v7433_v5  ;;  %6306 = vrot.lane.b32.xlu1 %v6126_v62, %s9895_s19  ;;  %v6897_v2 = vld [vmem:[#allocation2 + $0x2f0] sm:$0xff] }
 0xa08   :  { %7454 = vrot.lane.b32.xlu0 %v6126_v62, %s9898_s23 }
 0xa09   :  { %v6667_v24 = vpop.permute.xlu1 %6666 }
 0xa0a   :  { %6818 = vst.msk [vmem:[#allocation3 + $0x140] sm:$0xff] %vm2253_vm6, %v6667_v24  ;;  %v6285_v25 = vpop.permute.xlu0 %6284 }
 0xa0b   :  { %6435 = vst.msk [vmem:[#allocation3 + $0x148] sm:$0xff] %vm1868_vm5, %v6285_v25  ;;  %7838 = vrot.lane.b32.xlu1 %v7660_v12, %s9899_s1 }
 0xa0c   :  { %7456 = vrot.lane.b32.xlu0 %v7277_v32, %s9898_s23 }
 0xa0d   :  { %v6669_v35 = vpop.permute.xlu1 %6668  ;;  %v8032_v21 = vld [vmem:[#allocation3 + $0x130] sm:$0xff] }
 0xa0e   :  { %6819 = vst.msk [vmem:[#allocation3 + $0x148] sm:$0xff] %vm2253_vm6, %v6669_v35  ;;  %v7817_v13 = vpop.permute.xlu0 %7816  ;;  %9823 = vmatprep.mubr.msk.f32.mxu1 %vm3543_vm11, %v8032_v21 }
 0xa0f   :  { %7969 = vst.msk [vmem:[#allocation3 + $0x138] sm:$0xff] %vm3409_vm10, %v7817_v13  ;;  %6690 = vrot.lane.b32.xlu1 %v7660_v12, %s9896_s20  ;;  %v7664_v12 = vld [vmem:[#allocation2 + $0x2ea] sm:$0xff] }
 0xa10   :  { %6308 = vrot.lane.b32.xlu0 %v7277_v32, %s9895_s19  ;;  %v7281_v32 = vld [vmem:[#allocation2 + $0x2f1] sm:$0xff] }
 0xa11   :  { %v7053_v11 = vpop.permute.xlu1 %7052 }
 0xa12   :  { %v14722_v26 = vpop.f32.mrb[16].mxu1  ;;  %7203 = vst.msk [vmem:[#allocation3 + $0x148] sm:$0xff] %vm2639_vm7, %v7053_v11  ;;  %v7051_v34 = vpop.permute.xlu0 %7050 }
 0xa13   :  { %v14725_v1 = vpop.f32.mrb[17].mxu1  ;;  %7202 = vst.msk [vmem:[#allocation3 + $0x140] sm:$0xff] %vm2639_vm7, %v7051_v34  ;;  %6692 = vrot.lane.b32.xlu1 %v6511_v39, %s9896_s20  ;;  %v8676_v55 = vsel %vm26_vm0, %v14722_v26, 0.0 }
 0xa14   :  { %v8674_v8 = vsel %vm26_vm0, %v14725_v1, 0.0  ;;  %7840 = vrot.lane.b32.xlu0 %v6511_v39, %s9899_s1 }
 0xa15   :  { %v8675_v16 = vadd.f32 %v8674_v8, %v8673_v28  ;;  %v6287_v49 = vpop.permute.xlu1 %6286  ;;  %v6130_v28 = vld [vmem:[#allocation2 + $0x2e9] sm:$0xff] }
 0xa16   :  { %6436 = vst.msk [vmem:[#allocation3 + $0x150] sm:$0xff] %vm1868_vm5, %v6287_v49  ;;  %v7435_v3 = vpop.permute.xlu0 %7434  ;;  %v8033_v59 = vld [vmem:[#allocation3 + $0x138] sm:$0xff] }
 0xa17   :  { %v8677_v47 = vadd.f32 %v8676_v55, %v8675_v16  ;;  %7586 = vst.msk [vmem:[#allocation3 + $0x140] sm:$0xff] %vm3024_vm9, %v7435_v3  ;;  %9824 = vmatmul.mubr.msk.f32.gmra.mrb[38].mxu1 %vm3543_vm11, %v8033_v59  ;;  %7076 = vrot.lane.b32.xlu1 %v6895_v58, %s9897_s21  ;;  %v6515_v3 = vld [vmem:[#allocation2 + $0x2f2] sm:$0xff] }
 0xa18   :  { %7074 = vrot.lane.b32.xlu0 %v6894_v20, %s9897_s21 }
 0xa19   :  { %v7819_v30 = vpop.permute.xlu1 %7818 }
 0xa1a   :  { %7970 = vst.msk [vmem:[#allocation3 + $0x140] sm:$0xff] %vm3409_vm10, %v7819_v30  ;;  %v7437_v40 = vpop.permute.xlu0 %7436  ;;  %v6899_v30 = vld [vmem:[#allocation2 + $0x308] sm:$0xff] }
 0xa1b   :  { %7587 = vst.msk [vmem:[#allocation3 + $0x148] sm:$0xff] %vm3024_vm9, %v7437_v40  ;;  %6310 = vrot.lane.b32.xlu1 %v6128_v46, %s9895_s19  ;;  %v6898_v40 = vld [vmem:[#allocation2 + $0x300] sm:$0xff] }
 0xa1c   :  { %7458 = vrot.lane.b32.xlu0 %v6128_v46, %s9898_s23 }
 0xa1d   :  { %v6671_v6 = vpop.permute.xlu1 %6670 }
 0xa1e   :  { %6820 = vst.msk [vmem:[#allocation3 + $0x150] sm:$0xff] %vm2253_vm6, %v6671_v6  ;;  %v6289_v44 = vpop.permute.xlu0 %6288 }
 0xa1f   :  { %6437 = vst.msk [vmem:[#allocation3 + $0x158] sm:$0xff] %vm1868_vm5, %v6289_v44  ;;  %7842 = vrot.lane.b32.xlu1 %v7662_v42, %s9899_s1  ;;  %v6132_v44 = vld [vmem:[#allocation2 + $0x301] sm:$0xff] }
 0xa20   :  { %7460 = vrot.lane.b32.xlu0 %v7279_v48, %s9898_s23 }
 0xa21   :  { %v6673_v61 = vpop.permute.xlu1 %6672  ;;  %v8034_v18 = vld [vmem:[#allocation3 + $0x140] sm:$0xff] }
 0xa22   :  { %v14747_v52 = vpop.f32.mrb[18].mxu1  ;;  %6821 = vst.msk [vmem:[#allocation3 + $0x158] sm:$0xff] %vm2253_vm6, %v6673_v61  ;;  %v7821_v51 = vpop.permute.xlu0 %7820  ;;  %9826 = vmatprep.mubr.msk.f32.mxu1 %vm3543_vm11, %v8034_v18  ;;  %v7666_v61 = vld [vmem:[#allocation2 + $0x302] sm:$0xff] }
 0xa23   :  { %v14750_v37 = vpop.f32.mrb[19].mxu1  ;;  %7971 = vst.msk [vmem:[#allocation3 + $0x148] sm:$0xff] %vm3409_vm10, %v7821_v51  ;;  %6694 = vrot.lane.b32.xlu1 %v7662_v42, %s9896_s20  ;;  %v8680_v60 = vsel %vm26_vm0, %v14747_v52, 0.0  ;;  %v7283_v18 = vld [vmem:[#allocation2 + $0x309] sm:$0xff] }
 0xa24   :  { %v8678_v23 = vsel %vm26_vm0, %v14750_v37, 0.0  ;;  %6312 = vrot.lane.b32.xlu0 %v7279_v48, %s9895_s19 }
 0xa25   :  { %v8679_v36 = vadd.f32 %v8678_v23, %v8677_v47  ;;  %v7057_v63 = vpop.permute.xlu1 %7056 }
 0xa26   :  { %7205 = vst.msk [vmem:[#allocation3 + $0x158] sm:$0xff] %vm2639_vm7, %v7057_v63  ;;  %v7055_v56 = vpop.permute.xlu0 %7054 }
 0xa27   :  { %v8681_v45 = vadd.f32 %v8680_v60, %v8679_v36  ;;  %7204 = vst.msk [vmem:[#allocation3 + $0x150] sm:$0xff] %vm2639_vm7, %v7055_v56  ;;  %6696 = vrot.lane.b32.xlu1 %v6513_v43, %s9896_s20 }
 0xa28   :  { %7844 = vrot.lane.b32.xlu0 %v6513_v43, %s9899_s1 }
 0xa29   :  { %v6291_v17 = vpop.permute.xlu1 %6290 }
 0xa2a   :  { %6438 = vst.msk [vmem:[#allocation3 + $0x160] sm:$0xff] %vm1868_vm5, %v6291_v17  ;;  %v7439_v57 = vpop.permute.xlu0 %7438  ;;  %v8035_v38 = vld [vmem:[#allocation3 + $0x148] sm:$0xff] }
 0xa2b   :  { %7588 = vst.msk [vmem:[#allocation3 + $0x150] sm:$0xff] %vm3024_vm9, %v7439_v57  ;;  %9827 = vmatmul.mubr.msk.f32.gmra.mrb[40].mxu1 %vm3543_vm11, %v8035_v38  ;;  %7080 = vrot.lane.b32.xlu1 %v6897_v2, %s9897_s21  ;;  %v6517_v38 = vld [vmem:[#allocation2 + $0x30a] sm:$0xff] }
 0xa2c   :  { %7078 = vrot.lane.b32.xlu0 %v6896_v54, %s9897_s21 }
 0xa2d   :  { %v7823_v5 = vpop.permute.xlu1 %7822 }
 0xa2e   :  { %7972 = vst.msk [vmem:[#allocation3 + $0x150] sm:$0xff] %vm3409_vm10, %v7823_v5  ;;  %v7441_v62 = vpop.permute.xlu0 %7440 }
 0xa2f   :  { %7589 = vst.msk [vmem:[#allocation3 + $0x158] sm:$0xff] %vm3024_vm9, %v7441_v62  ;;  %6314 = vrot.lane.b32.xlu1 %v6130_v28, %s9895_s19 }
 0xa30   :  { %7462 = vrot.lane.b32.xlu0 %v6130_v28, %s9898_s23  ;;  %v6901_v28 = vld [vmem:[#allocation2 + $0x320] sm:$0xff] }
 0xa31   :  { %v6675_v24 = vpop.permute.xlu1 %6674 }
 0xa32   :  { %6822 = vst.msk [vmem:[#allocation3 + $0x160] sm:$0xff] %vm2253_vm6, %v6675_v24  ;;  %v6293_v25 = vpop.permute.xlu0 %6292  ;;  %v6900_v24 = vld [vmem:[#allocation2 + $0x318] sm:$0xff] }
 0xa33   :  { %6439 = vst.msk [vmem:[#allocation3 + $0x168] sm:$0xff] %vm1868_vm5, %v6293_v25  ;;  %7846 = vrot.lane.b32.xlu1 %v7664_v12, %s9899_s1 }
 0xa34   :  { %7464 = vrot.lane.b32.xlu0 %v7281_v32, %s9898_s23 }
 0xa35   :  { %v6677_v35 = vpop.permute.xlu1 %6676  ;;  %v8036_v13 = vld [vmem:[#allocation3 + $0x150] sm:$0xff] }
 0xa36   :  { %v14777_v21 = vpop.f32.mrb[20].mxu1  ;;  %6823 = vst.msk [vmem:[#allocation3 + $0x168] sm:$0xff] %vm2253_vm6, %v6677_v35  ;;  %v7825_v11 = vpop.permute.xlu0 %7824  ;;  %9829 = vmatprep.mubr.msk.f32.mxu1 %vm3543_vm11, %v8036_v13 }
 0xa37   :  { %v14780_v34 = vpop.f32.mrb[21].mxu1  ;;  %7973 = vst.msk [vmem:[#allocation3 + $0x158] sm:$0xff] %vm3409_vm10, %v7825_v11  ;;  %6698 = vrot.lane.b32.xlu1 %v7664_v12, %s9896_s20  ;;  %v8684_v16 = vsel %vm26_vm0, %v14777_v21, 0.0  ;;  %v7668_v11 = vld [vmem:[#allocation2 + $0x31a] sm:$0xff] }
 0xa38   :  { %v8682_v39 = vsel %vm26_vm0, %v14780_v34, 0.0  ;;  %6316 = vrot.lane.b32.xlu0 %v7281_v32, %s9895_s19  ;;  %v6134_v32 = vld [vmem:[#allocation2 + $0x319] sm:$0xff] }
 0xa39   :  { %v8683_v8 = vadd.f32 %v8682_v39, %v8681_v45  ;;  %v7061_v55 = vpop.permute.xlu1 %7060  ;;  %v7285_v39 = vld [vmem:[#allocation2 + $0x321] sm:$0xff] }
 0xa3a   :  { %7207 = vst.msk [vmem:[#allocation3 + $0x168] sm:$0xff] %vm2639_vm7, %v7061_v55  ;;  %v7059_v49 = vpop.permute.xlu0 %7058 }
 0xa3b   :  { %v8685_v59 = vadd.f32 %v8684_v16, %v8683_v8  ;;  %7206 = vst.msk [vmem:[#allocation3 + $0x160] sm:$0xff] %vm2639_vm7, %v7059_v49  ;;  %6700 = vrot.lane.b32.xlu1 %v6515_v3, %s9896_s20 }
 0xa3c   :  { %7848 = vrot.lane.b32.xlu0 %v6515_v3, %s9899_s1 }
 0xa3d   :  { %v6295_v58 = vpop.permute.xlu1 %6294 }
 0xa3e   :  { %6440 = vst.msk [vmem:[#allocation3 + $0x170] sm:$0xff] %vm1868_vm5, %v6295_v58  ;;  %v7443_v47 = vpop.permute.xlu0 %7442  ;;  %v8037_v20 = vld [vmem:[#allocation3 + $0x158] sm:$0xff] }
 0xa3f   :  { %7590 = vst.msk [vmem:[#allocation3 + $0x160] sm:$0xff] %vm3024_vm9, %v7443_v47  ;;  %9830 = vmatmul.mubr.msk.f32.gmra.mrb[42].mxu1 %vm3543_vm11, %v8037_v20  ;;  %7084 = vrot.lane.b32.xlu1 %v6899_v30, %s9897_s21 }
 0xa40   :  { %7082 = vrot.lane.b32.xlu0 %v6898_v40, %s9897_s21  ;;  %v6519_v40 = vld [vmem:[#allocation2 + $0x322] sm:$0xff] }
 0xa41   :  { %v7827_v46 = vpop.permute.xlu1 %7826 }
 0xa42   :  { %7974 = vst.msk [vmem:[#allocation3 + $0x160] sm:$0xff] %vm3409_vm10, %v7827_v46  ;;  %v7445_v6 = vpop.permute.xlu0 %7444 }
 0xa43   :  { %7591 = vst.msk [vmem:[#allocation3 + $0x168] sm:$0xff] %vm3024_vm9, %v7445_v6  ;;  %6318 = vrot.lane.b32.xlu1 %v6132_v44, %s9895_s19 }
 0xa44   :  { %7466 = vrot.lane.b32.xlu0 %v6132_v44, %s9898_s23 }
 0xa45   :  { %v6679_v42 = vpop.permute.xlu1 %6678 }
 0xa46   :  { %6824 = vst.msk [vmem:[#allocation3 + $0x170] sm:$0xff] %vm2253_vm6, %v6679_v42  ;;  %v6297_v48 = vpop.permute.xlu0 %6296 }
 0xa47   :  { %6441 = vst.msk [vmem:[#allocation3 + $0x178] sm:$0xff] %vm1868_vm5, %v6297_v48  ;;  %7850 = vrot.lane.b32.xlu1 %v7666_v61, %s9899_s1  ;;  %v6903_v48 = vld [vmem:[#allocation2 + $0x338] sm:$0xff] }
 0xa48   :  { %7468 = vrot.lane.b32.xlu0 %v7283_v18, %s9898_s23 }
 0xa49   :  { %v6681_v51 = vpop.permute.xlu1 %6680  ;;  %v8038_v36 = vld [vmem:[#allocation3 + $0x160] sm:$0xff] }
 0xa4a   :  { %v14807_v23 = vpop.f32.mrb[22].mxu1  ;;  %6825 = vst.msk [vmem:[#allocation3 + $0x178] sm:$0xff] %vm2253_vm6, %v6681_v51  ;;  %v7829_v60 = vpop.permute.xlu0 %7828  ;;  %9832 = vmatprep.mubr.msk.f32.mxu1 %vm3543_vm11, %v8038_v36  ;;  %v6136_v36 = vld [vmem:[#allocation2 + $0x331] sm:$0xff] }
 0xa4b   :  { %v14810_v63 = vpop.f32.mrb[23].mxu1  ;;  %7975 = vst.msk [vmem:[#allocation3 + $0x168] sm:$0xff] %vm3409_vm10, %v7829_v60  ;;  %6702 = vrot.lane.b32.xlu1 %v7666_v61, %s9896_s20  ;;  %v8688_v45 = vsel %vm26_vm0, %v14807_v23, 0.0  ;;  %v6902_v61 = vld [vmem:[#allocation2 + $0x330] sm:$0xff] }
 0xa4c   :  { %v8686_v56 = vsel %vm26_vm0, %v14810_v63, 0.0  ;;  %6320 = vrot.lane.b32.xlu0 %v7283_v18, %s9895_s19 }
 0xa4d   :  { %v8687_v43 = vadd.f32 %v8686_v56, %v8685_v59  ;;  %v7065_v17 = vpop.permute.xlu1 %7064 }
 0xa4e   :  { %7209 = vst.msk [vmem:[#allocation3 + $0x178] sm:$0xff] %vm2639_vm7, %v7065_v17  ;;  %v7063_v57 = vpop.permute.xlu0 %7062 }
 0xa4f   :  { %v8689_v2 = vadd.f32 %v8688_v45, %v8687_v43  ;;  %7208 = vst.msk [vmem:[#allocation3 + $0x170] sm:$0xff] %vm2639_vm7, %v7063_v57  ;;  %6704 = vrot.lane.b32.xlu1 %v6517_v38, %s9896_s20  ;;  %v7670_v43 = vld [vmem:[#allocation2 + $0x332] sm:$0xff] }
 0xa50   :  { %7852 = vrot.lane.b32.xlu0 %v6517_v38, %s9899_s1  ;;  %v7287_v45 = vld [vmem:[#allocation2 + $0x339] sm:$0xff] }
 0xa51   :  { %v6299_v54 = vpop.permute.xlu1 %6298 }
 0xa52   :  { %6442 = vst.msk [vmem:[#allocation3 + $0x180] sm:$0xff] %vm1868_vm5, %v6299_v54  ;;  %v7447_v5 = vpop.permute.xlu0 %7446  ;;  %v8039_v62 = vld [vmem:[#allocation3 + $0x168] sm:$0xff] }
 0xa53   :  { %7592 = vst.msk [vmem:[#allocation3 + $0x170] sm:$0xff] %vm3024_vm9, %v7447_v5  ;;  %9833 = vmatmul.mubr.msk.f32.gmra.mrb[44].mxu1 %vm3543_vm11, %v8039_v62  ;;  %7088 = vrot.lane.b32.xlu1 %v6901_v28, %s9897_s21 }
 0xa54   :  { %7086 = vrot.lane.b32.xlu0 %v6900_v24, %s9897_s21 }
 0xa55   :  { %v7831_v25 = vpop.permute.xlu1 %7830 }
 0xa56   :  { %7976 = vst.msk [vmem:[#allocation3 + $0x170] sm:$0xff] %vm3409_vm10, %v7831_v25  ;;  %v7449_v12 = vpop.permute.xlu0 %7448 }
 0xa57   :  { %7593 = vst.msk [vmem:[#allocation3 + $0x178] sm:$0xff] %vm3024_vm9, %v7449_v12  ;;  %6322 = vrot.lane.b32.xlu1 %v6134_v32, %s9895_s19  ;;  %v6521_v12 = vld [vmem:[#allocation2 + $0x33a] sm:$0xff] }
 0xa58   :  { %7470 = vrot.lane.b32.xlu0 %v6134_v32, %s9898_s23 }
 0xa59   :  { %v6683_v35 = vpop.permute.xlu1 %6682 }
 0xa5a   :  { %6826 = vst.msk [vmem:[#allocation3 + $0x180] sm:$0xff] %vm2253_vm6, %v6683_v35  ;;  %v6301_v13 = vpop.permute.xlu0 %6300  ;;  %v6905_v35 = vld [vmem:[#allocation2 + $0x350] sm:$0xff] }
 0xa5b   :  { %6443 = vst.msk [vmem:[#allocation3 + $0x188] sm:$0xff] %vm1868_vm5, %v6301_v13  ;;  %7854 = vrot.lane.b32.xlu1 %v7668_v11, %s9899_s1 }
 0xa5c   :  { %7472 = vrot.lane.b32.xlu0 %v7285_v39, %s9898_s23 }
 0xa5d   :  { %v6685_v8 = vpop.permute.xlu1 %6684  ;;  %v8040_v55 = vld [vmem:[#allocation3 + $0x170] sm:$0xff] }
 0xa5e   :  { %v14837_v16 = vpop.f32.mrb[24].mxu1  ;;  %6827 = vst.msk [vmem:[#allocation3 + $0x188] sm:$0xff] %vm2253_vm6, %v6685_v8  ;;  %v7833_v49 = vpop.permute.xlu0 %7832  ;;  %9835 = vmatprep.mubr.msk.f32.mxu1 %vm3543_vm11, %v8040_v55  ;;  %v7289_v55 = vld [vmem:[#allocation2 + $0x351] sm:$0xff] }
 0xa5f   :  { %v14840_v3 = vpop.f32.mrb[25].mxu1  ;;  %7977 = vst.msk [vmem:[#allocation3 + $0x178] sm:$0xff] %vm3409_vm10, %v7833_v49  ;;  %6706 = vrot.lane.b32.xlu1 %v7668_v11, %s9896_s20  ;;  %v8692_v47 = vsel %vm26_vm0, %v14837_v16, 0.0  ;;  %v6904_v11 = vld [vmem:[#allocation2 + $0x348] sm:$0xff] }
 0xa60   :  { %v8690_v59 = vsel %vm26_vm0, %v14840_v3, 0.0  ;;  %6324 = vrot.lane.b32.xlu0 %v7285_v39, %s9895_s19 }
 0xa61   :  { %v8691_v58 = vadd.f32 %v8690_v59, %v8689_v2  ;;  %v7069_v20 = vpop.permute.xlu1 %7068  ;;  %v7288_v59 = vld [vmem:[#allocation2 + $0x349] sm:$0xff] }
 0xa62   :  { %7211 = vst.msk [vmem:[#allocation3 + $0x188] sm:$0xff] %vm2639_vm7, %v7069_v20  ;;  %v7067_v30 = vpop.permute.xlu0 %7066 }
 0xa63   :  { %v8693_v46 = vadd.f32 %v8692_v47, %v8691_v58  ;;  %7210 = vst.msk [vmem:[#allocation3 + $0x180] sm:$0xff] %vm2639_vm7, %v7067_v30  ;;  %6708 = vrot.lane.b32.xlu1 %v6519_v40, %s9896_s20  ;;  %v7673_v47 = vld [vmem:[#allocation2 + $0x352] sm:$0xff]  ;;  %v7672_v30 = vld [vmem:[#allocation2 + $0x34a] sm:$0xff] }
 0xa64   :  { %7856 = vrot.lane.b32.xlu0 %v6519_v40, %s9899_s1 }
 0xa65   :  { %v6303_v6 = vpop.permute.xlu1 %6302 }
 0xa66   :  { %6444 = vst.msk [vmem:[#allocation3 + $0x190] sm:$0xff] %vm1868_vm5, %v6303_v6  ;;  %v7451_v44 = vpop.permute.xlu0 %7450  ;;  %v8041_v42 = vld [vmem:[#allocation3 + $0x178] sm:$0xff] }
 0xa67   :  { %7594 = vst.msk [vmem:[#allocation3 + $0x180] sm:$0xff] %vm3024_vm9, %v7451_v44  ;;  %9836 = vmatmul.mubr.msk.f32.gmra.mrb[46].mxu1 %vm3543_vm11, %v8041_v42  ;;  %7092 = vrot.lane.b32.xlu1 %v6903_v48, %s9897_s21 }
 0xa68   :  { %7090 = vrot.lane.b32.xlu0 %v6902_v61, %s9897_s21 }
 0xa69   :  { %v7835_v18 = vpop.permute.xlu1 %7834 }
 0xa6a   :  { %7978 = vst.msk [vmem:[#allocation3 + $0x180] sm:$0xff] %vm3409_vm10, %v7835_v18  ;;  %v7453_v51 = vpop.permute.xlu0 %7452 }
 0xa6b   :  { %7595 = vst.msk [vmem:[#allocation3 + $0x188] sm:$0xff] %vm3024_vm9, %v7453_v51  ;;  %6326 = vrot.lane.b32.xlu1 %v6136_v36, %s9895_s19 }
 0xa6c   :  { %7474 = vrot.lane.b32.xlu0 %v6136_v36, %s9898_s23 }
 0xa6d   :  { %v6687_v60 = vpop.permute.xlu1 %6686 }
 0xa6e   :  { %6828 = vst.msk [vmem:[#allocation3 + $0x190] sm:$0xff] %vm2253_vm6, %v6687_v60  ;;  %v6305_v56 = vpop.permute.xlu0 %6304 }
 0xa6f   :  { %6445 = vst.msk [vmem:[#allocation3 + $0x198] sm:$0xff] %vm1868_vm5, %v6305_v56  ;;  %7858 = vrot.lane.b32.xlu1 %v7670_v43, %s9899_s1 }
 0xa70   :  { %7476 = vrot.lane.b32.xlu0 %v7287_v45, %s9898_s23 }
 0xa71   :  { %v6689_v17 = vpop.permute.xlu1 %6688  ;;  %v8042_v57 = vld [vmem:[#allocation3 + $0x180] sm:$0xff] }
 0xa72   :  { %6829 = vst.msk [vmem:[#allocation3 + $0x198] sm:$0xff] %vm2253_vm6, %v6689_v17  ;;  %v7837_v38 = vpop.permute.xlu0 %7836  ;;  %v14868_v2 = vpop.f32.mrb[26].mxu1  ;;  %9838 = vmatprep.mubr.msk.f32.mxu1 %vm3543_vm11, %v8042_v57 }
 0xa73   :  { %7979 = vst.msk [vmem:[#allocation3 + $0x188] sm:$0xff] %vm3409_vm10, %v7837_v38  ;;  %v14872_v54 = vpop.f32.mrb[27].mxu1  ;;  %6710 = vrot.lane.b32.xlu1 %v7670_v43, %s9896_s20  ;;  %v8696_v24 = vsel %vm26_vm0, %v14868_v2, 0.0 }
 0xa74   :  { %v8694_v5 = vsel %vm26_vm0, %v14872_v54, 0.0  ;;  %6328 = vrot.lane.b32.xlu0 %v7287_v45, %s9895_s19 }
 0xa75   :  { %v8695_v62 = vadd.f32 %v8694_v5, %v8693_v46  ;;  %v7073_v28 = vpop.permute.xlu1 %7072 }
 0xa76   :  { %7213 = vst.msk [vmem:[#allocation3 + $0x198] sm:$0xff] %vm2639_vm7, %v7073_v28  ;;  %v7071_v25 = vpop.permute.xlu0 %7070 }
 0xa77   :  { %7212 = vst.msk [vmem:[#allocation3 + $0x190] sm:$0xff] %vm2639_vm7, %v7071_v25  ;;  %6712 = vrot.lane.b32.xlu1 %v6521_v12, %s9896_s20  ;;  %v8697_v32 = vadd.f32 %v8696_v24, %v8695_v62 }
 0xa78   :  { %7860 = vrot.lane.b32.xlu0 %v6521_v12, %s9899_s1 }
 0xa79   :  { %v6307_v13 = vpop.permute.xlu1 %6306 }
 0xa7a   :  { %6446 = vst.msk [vmem:[#allocation3 + $0x1a0] sm:$0xff] %vm1868_vm5, %v6307_v13  ;;  %v7455_v39 = vpop.permute.xlu0 %7454  ;;  %v8043_v8 = vld [vmem:[#allocation3 + $0x188] sm:$0xff] }
 0xa7b   :  { %7596 = vst.msk [vmem:[#allocation3 + $0x190] sm:$0xff] %vm3024_vm9, %v7455_v39  ;;  %9839 = vmatmul.mubr.msk.f32.gmra.mrb[48].mxu1 %vm3543_vm11, %v8043_v8  ;;  %7096 = vrot.lane.b32.xlu1 %v6905_v35, %s9897_s21 }
 0xa7c   :  { %7094 = vrot.lane.b32.xlu0 %v6904_v11, %s9897_s21 }
 0xa7d   :  { %v7839_v49 = vpop.permute.xlu1 %7838 }
 0xa7e   :  { %7980 = vst.msk [vmem:[#allocation3 + $0x190] sm:$0xff] %vm3409_vm10, %v7839_v49  ;;  %v7457_v58 = vpop.permute.xlu0 %7456 }
 0xa7f   :  { %7597 = vst.msk [vmem:[#allocation3 + $0x198] sm:$0xff] %vm3024_vm9, %v7457_v58  ;;  %7480 = vrot.lane.b32.xlu1 %v7289_v55, %s9898_s23 }
 0xa80   :  { %7478 = vrot.lane.b32.xlu0 %v7288_v59, %s9898_s23 }
 0xa81   :  { %v6691_v20 = vpop.permute.xlu1 %6690 }
 0xa82   :  { %6830 = vst.msk [vmem:[#allocation3 + $0x1a0] sm:$0xff] %vm2253_vm6, %v6691_v20  ;;  %v6309_v40 = vpop.permute.xlu0 %6308 }
 0xa83   :  { %6447 = vst.msk [vmem:[#allocation3 + $0x1a8] sm:$0xff] %vm1868_vm5, %v6309_v40  ;;  %7864 = vrot.lane.b32.xlu1 %v7673_v47, %s9899_s1 }
 0xa84   :  { %7862 = vrot.lane.b32.xlu0 %v7672_v30, %s9899_s1 }
 0xa85   :  { %v6693_v46 = vpop.permute.xlu1 %6692  ;;  %v8044_v6 = vld [vmem:[#allocation3 + $0x190] sm:$0xff] }
 0xa86   :  { %6831 = vst.msk [vmem:[#allocation3 + $0x1a8] sm:$0xff] %vm2253_vm6, %v6693_v46  ;;  %v7841_v44 = vpop.permute.xlu0 %7840  ;;  %v14898_v42 = vpop.f32.mrb[28].mxu1  ;;  %9841 = vmatprep.mubr.msk.f32.mxu1 %vm3543_vm11, %v8044_v6 }
 0xa87   :  { %7981 = vst.msk [vmem:[#allocation3 + $0x198] sm:$0xff] %vm3409_vm10, %v7841_v44  ;;  %v14902_v48 = vpop.f32.mrb[29].mxu1  ;;  %v8700_v36 = vsel %vm26_vm0, %v14898_v42, 0.0 }
 0xa88   :  { %v8698_v61 = vsel %vm26_vm0, %v14902_v48, 0.0 }
 0xa89   :  { %v8699_v18 = vadd.f32 %v8698_v61, %v8697_v32  ;;  %v7077_v51 = vpop.permute.xlu1 %7076 }
 0xa8a   :  { %7215 = vst.msk [vmem:[#allocation3 + $0x1a8] sm:$0xff] %vm2639_vm7, %v7077_v51  ;;  %v7075_v60 = vpop.permute.xlu0 %7074 }
 0xa8b   :  { %7214 = vst.msk [vmem:[#allocation3 + $0x1a0] sm:$0xff] %vm2639_vm7, %v7075_v60  ;;  %v8701_v56 = vadd.f32 %v8700_v36, %v8699_v18 }
 0xa8d   :  { %v6311_v43 = vpop.permute.xlu1 %6310 }
 0xa8e   :  { %6448 = vst.msk [vmem:[#allocation3 + $0x1b0] sm:$0xff] %vm1868_vm5, %v6311_v43  ;;  %v7459_v45 = vpop.permute.xlu0 %7458  ;;  %v8045_v17 = vld [vmem:[#allocation3 + $0x198] sm:$0xff] }
 0xa8f   :  { %7598 = vst.msk [vmem:[#allocation3 + $0x1a0] sm:$0xff] %vm3024_vm9, %v7459_v45  ;;  %9842 = vmatmul.mubr.msk.f32.gmra.mrb[50].mxu1 %vm3543_vm11, %v8045_v17 }
 0xa91   :  { %v7843_v57 = vpop.permute.xlu1 %7842 }
 0xa92   :  { %7982 = vst.msk [vmem:[#allocation3 + $0x1a0] sm:$0xff] %vm3409_vm10, %v7843_v57  ;;  %v7461_v38 = vpop.permute.xlu0 %7460 }
 0xa93   :  { %7599 = vst.msk [vmem:[#allocation3 + $0x1a8] sm:$0xff] %vm3024_vm9, %v7461_v38 }
 0xa95   :  { %v6695_v5 = vpop.permute.xlu1 %6694 }
 0xa96   :  { %6832 = vst.msk [vmem:[#allocation3 + $0x1b0] sm:$0xff] %vm2253_vm6, %v6695_v5  ;;  %v6313_v62 = vpop.permute.xlu0 %6312 }
 0xa97   :  { %6449 = vst.msk [vmem:[#allocation3 + $0x1b8] sm:$0xff] %vm1868_vm5, %v6313_v62 }
 0xa99   :  { %v6697_v28 = vpop.permute.xlu1 %6696  ;;  %v8046_v24 = vld [vmem:[#allocation3 + $0x1a0] sm:$0xff] }
 0xa9a   :  { %6833 = vst.msk [vmem:[#allocation3 + $0x1b8] sm:$0xff] %vm2253_vm6, %v6697_v28  ;;  %v7845_v25 = vpop.permute.xlu0 %7844  ;;  %v14918_v12 = vpop.f32.mrb[30].mxu1  ;;  %9844 = vmatprep.mubr.msk.f32.mxu1 %vm3543_vm11, %v8046_v24 }
 0xa9b   :  { %7983 = vst.msk [vmem:[#allocation3 + $0x1a8] sm:$0xff] %vm3409_vm10, %v7845_v25  ;;  %v14922_v32 = vpop.f32.mrb[31].mxu1  ;;  %v8704_v39 = vsel %vm26_vm0, %v14918_v12, 0.0 }
 0xa9c   :  { %v8702_v35 = vsel %vm26_vm0, %v14922_v32, 0.0 }
 0xa9d   :  { %v8703_v13 = vadd.f32 %v8702_v35, %v8701_v56  ;;  %v7081_v11 = vpop.permute.xlu1 %7080 }
 0xa9e   :  { %7217 = vst.msk [vmem:[#allocation3 + $0x1b8] sm:$0xff] %vm2639_vm7, %v7081_v11  ;;  %v7079_v8 = vpop.permute.xlu0 %7078 }
 0xa9f   :  { %7216 = vst.msk [vmem:[#allocation3 + $0x1b0] sm:$0xff] %vm2639_vm7, %v7079_v8  ;;  %v8705_v55 = vadd.f32 %v8704_v39, %v8703_v13 }
 0xaa1   :  { %v6315_v49 = vpop.permute.xlu1 %6314 }
 0xaa2   :  { %6450 = vst.msk [vmem:[#allocation3 + $0x1c0] sm:$0xff] %vm1868_vm5, %v6315_v49  ;;  %v7463_v59 = vpop.permute.xlu0 %7462  ;;  %v8047_v58 = vld [vmem:[#allocation3 + $0x1a8] sm:$0xff] }
 0xaa3   :  { %7600 = vst.msk [vmem:[#allocation3 + $0x1b0] sm:$0xff] %vm3024_vm9, %v7463_v59  ;;  %9845 = vmatmul.mubr.msk.f32.gmra.mrb[52].mxu1 %vm3543_vm11, %v8047_v58 }
 0xaa5   :  { %v7847_v47 = vpop.permute.xlu1 %7846 }
 0xaa6   :  { %7984 = vst.msk [vmem:[#allocation3 + $0x1b0] sm:$0xff] %vm3409_vm10, %v7847_v47  ;;  %v7465_v20 = vpop.permute.xlu0 %7464 }
 0xaa7   :  { %7601 = vst.msk [vmem:[#allocation3 + $0x1b8] sm:$0xff] %vm3024_vm9, %v7465_v20 }
 0xaa9   :  { %v6699_v30 = vpop.permute.xlu1 %6698 }
 0xaaa   :  { %6834 = vst.msk [vmem:[#allocation3 + $0x1c0] sm:$0xff] %vm2253_vm6, %v6699_v30  ;;  %v6317_v40 = vpop.permute.xlu0 %6316 }
 0xaab   :  { %6451 = vst.msk [vmem:[#allocation3 + $0x1c8] sm:$0xff] %vm1868_vm5, %v6317_v40 }
 0xaad   :  { %v6701_v46 = vpop.permute.xlu1 %6700  ;;  %v8048_v6 = vld [vmem:[#allocation3 + $0x1b0] sm:$0xff] }
 0xaae   :  { %6835 = vst.msk [vmem:[#allocation3 + $0x1c8] sm:$0xff] %vm2253_vm6, %v6701_v46  ;;  %v7849_v44 = vpop.permute.xlu0 %7848  ;;  %v14938_v61 = vpop.f32.mrb[32].mxu1  ;;  %9847 = vmatprep.mubr.msk.f32.mxu1 %vm3543_vm11, %v8048_v6 }
 0xaaf   :  { %7985 = vst.msk [vmem:[#allocation3 + $0x1b8] sm:$0xff] %vm3409_vm10, %v7849_v44  ;;  %v14942_v18 = vpop.f32.mrb[33].mxu1  ;;  %v8708_v56 = vsel %vm26_vm0, %v14938_v61, 0.0 }
 0xab0   :  { %v8706_v51 = vsel %vm26_vm0, %v14942_v18, 0.0 }
 0xab1   :  { %v8707_v36 = vadd.f32 %v8706_v51, %v8705_v55  ;;  %v7085_v60 = vpop.permute.xlu1 %7084 }
 0xab2   :  { %7219 = vst.msk [vmem:[#allocation3 + $0x1c8] sm:$0xff] %vm2639_vm7, %v7085_v60  ;;  %v7083_v43 = vpop.permute.xlu0 %7082 }
 0xab3   :  { %7218 = vst.msk [vmem:[#allocation3 + $0x1c0] sm:$0xff] %vm2639_vm7, %v7083_v43  ;;  %v8709_v45 = vadd.f32 %v8708_v56, %v8707_v36 }
 0xab5   :  { %v6319_v17 = vpop.permute.xlu1 %6318 }
 0xab6   :  { %6452 = vst.msk [vmem:[#allocation3 + $0x1d0] sm:$0xff] %vm1868_vm5, %v6319_v17  ;;  %v7467_v57 = vpop.permute.xlu0 %7466  ;;  %v8049_v38 = vld [vmem:[#allocation3 + $0x1b8] sm:$0xff] }
 0xab7   :  { %7602 = vst.msk [vmem:[#allocation3 + $0x1c0] sm:$0xff] %vm3024_vm9, %v7467_v57  ;;  %9848 = vmatmul.mubr.msk.f32.gmra.mrb[54].mxu1 %vm3543_vm11, %v8049_v38 }
 0xab9   :  { %v7851_v5 = vpop.permute.xlu1 %7850 }
 0xaba   :  { %7986 = vst.msk [vmem:[#allocation3 + $0x1c0] sm:$0xff] %vm3409_vm10, %v7851_v5  ;;  %v7469_v62 = vpop.permute.xlu0 %7468 }
 0xabb   :  { %7603 = vst.msk [vmem:[#allocation3 + $0x1c8] sm:$0xff] %vm3024_vm9, %v7469_v62 }
 0xabd   :  { %v6703_v28 = vpop.permute.xlu1 %6702 }
 0xabe   :  { %6836 = vst.msk [vmem:[#allocation3 + $0x1d0] sm:$0xff] %vm2253_vm6, %v6703_v28  ;;  %v6321_v24 = vpop.permute.xlu0 %6320 }
 0xabf   :  { %6453 = vst.msk [vmem:[#allocation3 + $0x1d8] sm:$0xff] %vm1868_vm5, %v6321_v24 }
 0xac1   :  { %v6705_v25 = vpop.permute.xlu1 %6704  ;;  %v8050_v35 = vld [vmem:[#allocation3 + $0x1c0] sm:$0xff] }
 0xac2   :  { %6837 = vst.msk [vmem:[#allocation3 + $0x1d8] sm:$0xff] %vm2253_vm6, %v6705_v25  ;;  %v7853_v13 = vpop.permute.xlu0 %7852  ;;  %v14958_v11 = vpop.f32.mrb[34].mxu1  ;;  %9850 = vmatprep.mubr.msk.f32.mxu1 %vm3543_vm11, %v8050_v35 }
 0xac3   :  { %7987 = vst.msk [vmem:[#allocation3 + $0x1c8] sm:$0xff] %vm3409_vm10, %v7853_v13  ;;  %v14962_v39 = vpop.f32.mrb[35].mxu1  ;;  %v8712_v59 = vsel %vm26_vm0, %v14958_v11, 0.0 }
 0xac4   :  { %v8710_v8 = vsel %vm26_vm0, %v14962_v39, 0.0 }
 0xac5   :  { %v8711_v55 = vadd.f32 %v8710_v8, %v8709_v45  ;;  %v7089_v49 = vpop.permute.xlu1 %7088 }
 0xac6   :  { %7221 = vst.msk [vmem:[#allocation3 + $0x1d8] sm:$0xff] %vm2639_vm7, %v7089_v49  ;;  %v7087_v58 = vpop.permute.xlu0 %7086 }
 0xac7   :  { %7220 = vst.msk [vmem:[#allocation3 + $0x1d0] sm:$0xff] %vm2639_vm7, %v7087_v58  ;;  %v8713_v47 = vadd.f32 %v8712_v59, %v8711_v55 }
 0xac9   :  { %v6323_v20 = vpop.permute.xlu1 %6322 }
 0xaca   :  { %6454 = vst.msk [vmem:[#allocation3 + $0x1e0] sm:$0xff] %vm1868_vm5, %v6323_v20  ;;  %v7471_v30 = vpop.permute.xlu0 %7470  ;;  %v8051_v40 = vld [vmem:[#allocation3 + $0x1c8] sm:$0xff] }
 0xacb   :  { %7604 = vst.msk [vmem:[#allocation3 + $0x1d0] sm:$0xff] %vm3024_vm9, %v7471_v30  ;;  %9851 = vmatmul.mubr.msk.f32.gmra.mrb[56].mxu1 %vm3543_vm11, %v8051_v40 }
 0xacd   :  { %v7855_v46 = vpop.permute.xlu1 %7854 }
 0xace   :  { %7988 = vst.msk [vmem:[#allocation3 + $0x1d0] sm:$0xff] %vm3409_vm10, %v7855_v46  ;;  %v7473_v6 = vpop.permute.xlu0 %7472 }
 0xacf   :  { %7605 = vst.msk [vmem:[#allocation3 + $0x1d8] sm:$0xff] %vm3024_vm9, %v7473_v6 }
 0xad1   :  { %v6707_v44 = vpop.permute.xlu1 %6706 }
 0xad2   :  { %6838 = vst.msk [vmem:[#allocation3 + $0x1e0] sm:$0xff] %vm2253_vm6, %v6707_v44  ;;  %v6325_v51 = vpop.permute.xlu0 %6324 }
 0xad3   :  { %6455 = vst.msk [vmem:[#allocation3 + $0x1e8] sm:$0xff] %vm1868_vm5, %v6325_v51 }
 0xad5   :  { %v6709_v36 = vpop.permute.xlu1 %6708  ;;  %v8052_v60 = vld [vmem:[#allocation3 + $0x1d0] sm:$0xff] }
 0xad6   :  { %6839 = vst.msk [vmem:[#allocation3 + $0x1e8] sm:$0xff] %vm2253_vm6, %v6709_v36  ;;  %v7857_v56 = vpop.permute.xlu0 %7856  ;;  %v14978_v43 = vpop.f32.mrb[36].mxu1  ;;  %9853 = vmatprep.mubr.msk.f32.mxu1 %vm3543_vm11, %v8052_v60 }
 0xad7   :  { %7989 = vst.msk [vmem:[#allocation3 + $0x1d8] sm:$0xff] %vm3409_vm10, %v7857_v56  ;;  %v14982_v45 = vpop.f32.mrb[37].mxu1  ;;  %v8716_v5 = vsel %vm26_vm0, %v14978_v43, 0.0 }
 0xad8   :  { %v8714_v17 = vsel %vm26_vm0, %v14982_v45, 0.0 }
 0xad9   :  { %v8715_v57 = vadd.f32 %v8714_v17, %v8713_v47  ;;  %v7093_v38 = vpop.permute.xlu1 %7092 }
 0xada   :  { %7223 = vst.msk [vmem:[#allocation3 + $0x1e8] sm:$0xff] %vm2639_vm7, %v7093_v38  ;;  %v7091_v62 = vpop.permute.xlu0 %7090 }
 0xadb   :  { %7222 = vst.msk [vmem:[#allocation3 + $0x1e0] sm:$0xff] %vm2639_vm7, %v7091_v62  ;;  %v8717_v28 = vadd.f32 %v8716_v5, %v8715_v57 }
 0xadd   :  { %v6327_v24 = vpop.permute.xlu1 %6326 }
 0xade   :  { %6456 = vst.msk [vmem:[#allocation3 + $0x1f0] sm:$0xff] %vm1868_vm5, %v6327_v24  ;;  %v7475_v25 = vpop.permute.xlu0 %7474  ;;  %v8053_v35 = vld [vmem:[#allocation3 + $0x1d8] sm:$0xff] }
 0xadf   :  { %7606 = vst.msk [vmem:[#allocation3 + $0x1e0] sm:$0xff] %vm3024_vm9, %v7475_v25  ;;  %9854 = vmatmul.mubr.msk.f32.gmra.mrb[58].mxu1 %vm3543_vm11, %v8053_v35 }
 0xae1   :  { %v7859_v13 = vpop.permute.xlu1 %7858 }
 0xae2   :  { %7990 = vst.msk [vmem:[#allocation3 + $0x1e0] sm:$0xff] %vm3409_vm10, %v7859_v13  ;;  %v7477_v8 = vpop.permute.xlu0 %7476 }
 0xae3   :  { %7607 = vst.msk [vmem:[#allocation3 + $0x1e8] sm:$0xff] %vm3024_vm9, %v7477_v8 }
 0xae5   :  { %v6711_v55 = vpop.permute.xlu1 %6710 }
 0xae6   :  { %6840 = vst.msk [vmem:[#allocation3 + $0x1f0] sm:$0xff] %vm2253_vm6, %v6711_v55  ;;  %v6329_v49 = vpop.permute.xlu0 %6328 }
 0xae7   :  { %6457 = vst.msk [vmem:[#allocation3 + $0x1f8] sm:$0xff] %vm1868_vm5, %v6329_v49 }
 0xae9   :  { %v6713_v59 = vpop.permute.xlu1 %6712  ;;  %v8054_v58 = vld [vmem:[#allocation3 + $0x1e0] sm:$0xff] }
 0xaea   :  { %6841 = vst.msk [vmem:[#allocation3 + $0x1f8] sm:$0xff] %vm2253_vm6, %v6713_v59  ;;  %v7861_v47 = vpop.permute.xlu0 %7860  ;;  %v14998_v20 = vpop.f32.mrb[38].mxu1  ;;  %9856 = vmatprep.mubr.msk.f32.mxu1 %vm3543_vm11, %v8054_v58 }
 0xaeb   :  { %7991 = vst.msk [vmem:[#allocation3 + $0x1e8] sm:$0xff] %vm3409_vm10, %v7861_v47  ;;  %v15002_v30 = vpop.f32.mrb[39].mxu1  ;;  %v8720_v44 = vsel %vm26_vm0, %v14998_v20, 0.0 }
 0xaec   :  { %v8718_v40 = vsel %vm26_vm0, %v15002_v30, 0.0 }
 0xaed   :  { %v8719_v46 = vadd.f32 %v8718_v40, %v8717_v28  ;;  %v7097_v6 = vpop.permute.xlu1 %7096 }
 0xaee   :  { %v7095_v51 = vpop.permute.xlu0 %7094  ;;  %7225 = vst.msk [vmem:[#allocation3 + $0x1f8] sm:$0xff] %vm2639_vm7, %v7097_v6 }
 0xaef   :  { %7224 = vst.msk [vmem:[#allocation3 + $0x1f0] sm:$0xff] %vm2639_vm7, %v7095_v51  ;;  %v8721_v36 = vadd.f32 %v8720_v44, %v8719_v46 }
 0xaf1   :  { %v7481_v60 = vpop.permute.xlu1 %7480 }
 0xaf2   :  { %v7479_v56 = vpop.permute.xlu0 %7478  ;;  %7609 = vst.msk [vmem:[#allocation3 + $0x1f8] sm:$0xff] %vm3024_vm9, %v7481_v60  ;;  %v8055_v17 = vld [vmem:[#allocation3 + $0x1e8] sm:$0xff] }
 0xaf3   :  { %7608 = vst.msk [vmem:[#allocation3 + $0x1f0] sm:$0xff] %vm3024_vm9, %v7479_v56  ;;  %9857 = vmatmul.mubr.msk.f32.gmra.mrb[60].mxu1 %vm3543_vm11, %v8055_v17 }
 0xaf5   :  { %v7865_v57 = vpop.permute.xlu1 %7864 }
 0xaf6   :  { %v7863_v38 = vpop.permute.xlu0 %7862  ;;  %7993 = vst.msk [vmem:[#allocation3 + $0x1f8] sm:$0xff] %vm3409_vm10, %v7865_v57 }
 0xaf7   :  { %7992 = vst.msk [vmem:[#allocation3 + $0x1f0] sm:$0xff] %vm3409_vm10, %v7863_v38 }
 0xafd   :  { %v8057_v5 = vld [vmem:[#allocation3 + $0x1f8] sm:$0xff] }
 0xafe   :  { %v15015_v62 = vpop.f32.mrb[40].mxu1  ;;  %v8056_v28 = vld [vmem:[#allocation3 + $0x1f0] sm:$0xff] }
 0xaff   :  { %v15017_v24 = vpop.f32.mrb[41].mxu1  ;;  %9859 = vmatprep.mubr.msk.f32.mxu1 %vm3543_vm11, %v8056_v28  ;;  %v8724_v13 = vsel %vm26_vm0, %v15015_v62, 0.0 }
 0xb00   :  { %v8722_v25 = vsel %vm26_vm0, %v15017_v24, 0.0  ;;  %9860 = vmatmul.mubr.msk.f32.gmra.mrb[62].mxu1 %vm3543_vm11, %v8057_v5 }
 0xb01   :  { %v8723_v35 = vadd.f32 %v8722_v25, %v8721_v36 }
 0xb03   :  { %v8725_v8 = vadd.f32 %v8724_v13, %v8723_v35 }
 0xb12   :  { %v15025_v55 = vpop.f32.mrb[42].mxu1 }
 0xb13   :  { %v15027_v49 = vpop.f32.mrb[43].mxu1  ;;  %v8728_v47 = vsel %vm26_vm0, %v15025_v55, 0.0 }
 0xb14   :  { %v8726_v59 = vsel %vm26_vm0, %v15027_v49, 0.0 }
 0xb15   :  { %v8727_v58 = vadd.f32 %v8726_v59, %v8725_v8 }
 0xb17   :  { %v8729_v40 = vadd.f32 %v8728_v47, %v8727_v58 }
 0xb26   :  { %v15033_v46 = vpop.f32.mrb[44].mxu1 }
 0xb27   :  { %v15035_v6 = vpop.f32.mrb[45].mxu1  ;;  %v8732_v36 = vsel %vm26_vm0, %v15033_v46, 0.0 }
 0xb28   :  { %v8730_v44 = vsel %vm26_vm0, %v15035_v6, 0.0 }
 0xb29   :  { %v8731_v51 = vadd.f32 %v8730_v44, %v8729_v40 }
 0xb2b   :  { %v8733_v60 = vadd.f32 %v8732_v36, %v8731_v51 }
 0xb3a   :  { %v15041_v56 = vpop.f32.mrb[46].mxu1 }
 0xb3b   :  { %v15043_v17 = vpop.f32.mrb[47].mxu1  ;;  %v8736_v5 = vsel %vm26_vm0, %v15041_v56, 0.0 }
 0xb3c   :  { %v8734_v57 = vsel %vm26_vm0, %v15043_v17, 0.0 }
 0xb3d   :  { %v8735_v38 = vadd.f32 %v8734_v57, %v8733_v60 }
 0xb3f   :  { %v8737_v28 = vadd.f32 %v8736_v5, %v8735_v38 }
 0xb4e   :  { %v15049_v25 = vpop.f32.mrb[48].mxu1 }
 0xb4f   :  { %17020 = vst [vmem:[#allocation84_spill] sm:$0xff] %v15049_v25  ;;  %v15051_v35 = vpop.f32.mrb[49].mxu1  ;;  %v8740_v59 = vsel %vm26_vm0, %v15049_v25, 0.0 }
 0xb50   :  { %17021 = vst [vmem:[#allocation85_spill] sm:$0xff] %v15051_v35  ;;  %v8738_v13 = vsel %vm26_vm0, %v15051_v35, 0.0 }
 0xb51   :  { %v8739_v8 = vadd.f32 %v8738_v13, %v8737_v28 }
 0xb53   :  { %v8741_v58 = vadd.f32 %v8740_v59, %v8739_v8 }
 0xb62   :  { %v15057_v47 = vpop.f32.mrb[50].mxu1 }
 0xb63   :  { %17022 = vst [vmem:[#allocation86_spill] sm:$0xff] %v15057_v47  ;;  %v15059_v40 = vpop.f32.mrb[51].mxu1  ;;  %v8744_v36 = vsel %vm26_vm0, %v15057_v47, 0.0 }
 0xb64   :  { %17023 = vst [vmem:[#allocation65_spill] sm:$0xff] %v15059_v40  ;;  %v8742_v44 = vsel %vm26_vm0, %v15059_v40, 0.0 }
 0xb65   :  { %v8743_v51 = vadd.f32 %v8742_v44, %v8741_v58 }
 0xb67   :  { %v8745_v60 = vadd.f32 %v8744_v36, %v8743_v51 }
 0xb76   :  { %v15065_v57 = vpop.f32.mrb[52].mxu1 }
 0xb77   :  { %17024 = vst [vmem:[#allocation64_spill] sm:$0xff] %v15065_v57  ;;  %v15067_v38 = vpop.f32.mrb[53].mxu1  ;;  %v8748_v13 = vsel %vm26_vm0, %v15065_v57, 0.0 }
 0xb78   :  { %17025 = vst [vmem:[#allocation67_spill] sm:$0xff] %v15067_v38  ;;  %v8746_v5 = vsel %vm26_vm0, %v15067_v38, 0.0 }
 0xb79   :  { %v8747_v28 = vadd.f32 %v8746_v5, %v8745_v60 }
 0xb7b   :  { %v8749_v8 = vadd.f32 %v8748_v13, %v8747_v28 }
 0xb8a   :  { %v15073_v59 = vpop.f32.mrb[54].mxu1 }
 0xb8b   :  { %17026 = vst [vmem:[#allocation66_spill] sm:$0xff] %v15073_v59  ;;  %v15075_v40 = vpop.f32.mrb[55].mxu1  ;;  %v8752_v51 = vsel %vm26_vm0, %v15073_v59, 0.0 }
 0xb8c   :  { %17027 = vst [vmem:[#allocation69_spill] sm:$0xff] %v15075_v40  ;;  %v8750_v58 = vsel %vm26_vm0, %v15075_v40, 0.0 }
 0xb8d   :  { %v8751_v44 = vadd.f32 %v8750_v58, %v8749_v8 }
 0xb8f   :  { %v8753_v36 = vadd.f32 %v8752_v51, %v8751_v44 }
 0xb9e   :  { %v15081_v47 = vpop.f32.mrb[56].mxu1 }
 0xb9f   :  { %17028 = vst [vmem:[#allocation68_spill] sm:$0xff] %v15081_v47  ;;  %v15083_v38 = vpop.f32.mrb[57].mxu1  ;;  %v8756_v28 = vsel %vm26_vm0, %v15081_v47, 0.0 }
 0xba0   :  { %17029 = vst [vmem:[#allocation75_spill] sm:$0xff] %v15083_v38  ;;  %v8754_v60 = vsel %vm26_vm0, %v15083_v38, 0.0 }
 0xba1   :  { %v8755_v5 = vadd.f32 %v8754_v60, %v8753_v36 }
 0xba3   :  { %v8757_v13 = vadd.f32 %v8756_v28, %v8755_v5 }
 0xbb2   :  { %v15089_v57 = vpop.f32.mrb[58].mxu1 }
 0xbb3   :  { %17030 = vst [vmem:[#allocation74_spill] sm:$0xff] %v15089_v57  ;;  %v15091_v40 = vpop.f32.mrb[59].mxu1  ;;  %v8760_v44 = vsel %vm26_vm0, %v15089_v57, 0.0 }
 0xbb4   :  { %17031 = vst [vmem:[#allocation77_spill] sm:$0xff] %v15091_v40  ;;  %v8758_v8 = vsel %vm26_vm0, %v15091_v40, 0.0 }
 0xbb5   :  { %v8759_v58 = vadd.f32 %v8758_v8, %v8757_v13 }
 0xbb7   :  { %v8761_v51 = vadd.f32 %v8760_v44, %v8759_v58 }
 0xbc6   :  { %v15097_v59 = vpop.f32.mrb[60].mxu1 }
 0xbc7   :  { %17032 = vst [vmem:[#allocation76_spill] sm:$0xff] %v15097_v59  ;;  %v15099_v38 = vpop.f32.mrb[61].mxu1  ;;  %v8764_v5 = vsel %vm26_vm0, %v15097_v59, 0.0 }
 0xbc8   :  { %17033 = vst [vmem:[#allocation79_spill] sm:$0xff] %v15099_v38  ;;  %v8762_v36 = vsel %vm26_vm0, %v15099_v38, 0.0 }
 0xbc9   :  { %v8763_v60 = vadd.f32 %v8762_v36, %v8761_v51 }
 0xbcb   :  { %v8765_v28 = vadd.f32 %v8764_v5, %v8763_v60 }
 0xbd3   :  { %v15105_v47 = vpop.f32.mrb[62].mxu1 }
 0xbd4   :  { %v15107_v40 = vpop.f32.mrb[63].mxu1  ;;  %v8768_v58 = vsel %vm26_vm0, %v15105_v47, 0.0 }
 0xbd5   :  { %v8766_v13 = vsel %vm26_vm0, %v15107_v40, 0.0 }
 0xbd6   :  { %v8767_v8 = vadd.f32 %v8766_v13, %v8765_v28  ;;  %v17043_v13 = vld [vmem:[#allocation65_spill] sm:$0xff] }
 0xbd8   :  { %v8769_v44 = vadd.f32 %v8768_v58, %v8767_v8  ;;  %v17045_v8 = vld [vmem:[#allocation86_spill] sm:$0xff]  ;;  %v17047_v58 = vld [vmem:[#allocation67_spill] sm:$0xff] }
 0xbda   :  { %v8770_v57 = vrot.slane %v8769_v44, 4 }
 0xbdc   :  { %v8771_v25 = vadd.f32 %v8770_v57, %v8769_v44  ;;  %v17049_v44 = vld [vmem:[#allocation64_spill] sm:$0xff] }
 0xbde   :  { %v8772_v38 = vrot.slane %v8771_v25, 2 }
 0xbe0   :  { %v8773_v51 = vadd.f32 %v8772_v38, %v8771_v25  ;;  %v17041_v38 = vld [vmem:[#allocation84_spill] sm:$0xff] }
 0xbe2   :  { %v8774_v36 = vrot.slane %v8773_v51, 1 }
 0xbe4   :  { %v8775_v35 = vadd.f32 %v8774_v36, %v8773_v51  ;;  %v17051_v36 = vld [vmem:[#allocation69_spill] sm:$0xff] }
 0xbe6   :  { %v15113_v59 = vmul.f32 0.001953125, %v8775_v35  ;;  %v17039_v35 = vld [vmem:[#allocation85_spill] sm:$0xff] }
 0xbe8   :  { %v15117_v60 = vsub.f32 %v14522_v31, %v15113_v59  ;;  %v15121_v5 = vsub.f32 %v14517_v15, %v15113_v59  ;;  %v15125_v28 = vsub.f32 %v14546_v9, %v15113_v59  ;;  %v15129_v57 = vsub.f32 %v14543_v33, %v15113_v59 }
 0xbe9   :  { %v15133_v25 = vsub.f32 %v14571_v19, %v15113_v59  ;;  %v15137_v31 = vsub.f32 %v14568_v10, %v15113_v59  ;;  %v15141_v15 = vsub.f32 %v14597_v14, %v15113_v59  ;;  %v15145_v9 = vsub.f32 %v14594_v53, %v15113_v59 }
 0xbea   :  { %17034 = vst [vmem:[#allocation78_spill] sm:$0xff] %v15117_v60  ;;  %17035 = vst [vmem:[#allocation81_spill] sm:$0xff] %v15121_v5  ;;  %v15149_v33 = vsub.f32 %v14622_v29, %v15113_v59  ;;  %v15153_v19 = vsub.f32 %v14619_v41, %v15113_v59  ;;  %v15157_v10 = vsub.f32 %v14648_v7, %v15113_v59 }
 0xbeb   :  { %17036 = vst [vmem:[#allocation80_spill] sm:$0xff] %v15125_v28  ;;  %17037 = vst [vmem:[#allocation88_spill] sm:$0xff] %v15129_v57  ;;  %v15161_v14 = vsub.f32 %v14645_v4, %v15113_v59  ;;  %v15165_v53 = vsub.f32 %v14674_v27, %v15113_v59  ;;  %v15169_v29 = vsub.f32 %v14671_v50, %v15113_v59 }
 0xbec   :  { %v15173_v41 = vsub.f32 %v14699_v0, %v15113_v59  ;;  %v15177_v7 = vsub.f32 %v14696_v22, %v15113_v59  ;;  %v15181_v4 = vsub.f32 %v14725_v1, %v15113_v59  ;;  %v15185_v27 = vsub.f32 %v14722_v26, %v15113_v59 }
 0xbed   :  { %v15189_v50 = vsub.f32 %v14750_v37, %v15113_v59  ;;  %v15193_v0 = vsub.f32 %v14747_v52, %v15113_v59  ;;  %v15197_v22 = vsub.f32 %v14780_v34, %v15113_v59  ;;  %v15201_v1 = vsub.f32 %v14777_v21, %v15113_v59 }
 0xbee   :  { %v15205_v26 = vsub.f32 %v14810_v63, %v15113_v59  ;;  %v15209_v37 = vsub.f32 %v14807_v23, %v15113_v59  ;;  %v15213_v52 = vsub.f32 %v14840_v3, %v15113_v59  ;;  %v15217_v34 = vsub.f32 %v14837_v16, %v15113_v59 }
 0xbef   :  { %v15221_v21 = vsub.f32 %v14872_v54, %v15113_v59  ;;  %v15225_v63 = vsub.f32 %v14868_v2, %v15113_v59  ;;  %v15229_v23 = vsub.f32 %v14902_v48, %v15113_v59  ;;  %v15233_v3 = vsub.f32 %v14898_v42, %v15113_v59 }
 0xbf0   :  { %v15237_v16 = vsub.f32 %v14922_v32, %v15113_v59  ;;  %v15241_v54 = vsub.f32 %v14918_v12, %v15113_v59  ;;  %v15245_v2 = vsub.f32 %v14942_v18, %v15113_v59  ;;  %v15249_v48 = vsub.f32 %v14938_v61, %v15113_v59 }
 0xbf1   :  { %v15253_v42 = vsub.f32 %v14962_v39, %v15113_v59  ;;  %v15257_v32 = vsub.f32 %v14958_v11, %v15113_v59  ;;  %v15261_v12 = vsub.f32 %v14982_v45, %v15113_v59  ;;  %v15265_v18 = vsub.f32 %v14978_v43, %v15113_v59 }
 0xbf2   :  { %v15269_v61 = vsub.f32 %v15002_v30, %v15113_v59  ;;  %v15273_v39 = vsub.f32 %v14998_v20, %v15113_v59  ;;  %v15277_v11 = vsub.f32 %v15017_v24, %v15113_v59  ;;  %v15281_v45 = vsub.f32 %v15015_v62, %v15113_v59 }
 0xbf3   :  { %v15285_v43 = vsub.f32 %v15027_v49, %v15113_v59  ;;  %v15289_v30 = vsub.f32 %v15025_v55, %v15113_v59  ;;  %v15293_v20 = vsub.f32 %v15035_v6, %v15113_v59  ;;  %v15297_v24 = vsub.f32 %v15033_v46, %v15113_v59 }
 0xbf4   :  { %v15301_v62 = vsub.f32 %v15043_v17, %v15113_v59  ;;  %v15305_v49 = vsub.f32 %v15041_v56, %v15113_v59  ;;  %v15309_v55 = vsub.f32 %v17039_v35, %v15113_v59  ;;  %v15313_v6 = vsub.f32 %v17041_v38, %v15113_v59  ;;  %v17053_v38 = vld [vmem:[#allocation66_spill] sm:$0xff] }
 0xbf5   :  { %v15317_v46 = vsub.f32 %v17043_v13, %v15113_v59  ;;  %v15321_v17 = vsub.f32 %v17045_v8, %v15113_v59  ;;  %v15325_v56 = vsub.f32 %v17047_v58, %v15113_v59  ;;  %v15329_v51 = vsub.f32 %v17049_v44, %v15113_v59 }
 0xbf6   :  { %17038 = vst [vmem:[#allocation82_spill] sm:$0xff] %v15305_v49  ;;  %17040 = vst [vmem:[#allocation83_spill] sm:$0xff] %v15309_v55  ;;  %v15333_v35 = vsub.f32 %v17051_v36, %v15113_v59  ;;  %v15337_v13 = vsub.f32 %v17053_v38, %v15113_v59 }
 0xbf7   :  { %17042 = vst [vmem:[#allocation85_spill] sm:$0xff] %v15313_v6  ;;  %17044 = vst [vmem:[#allocation84_spill] sm:$0xff] %v15317_v46  ;;  %v17055_v46 = vld [vmem:[#allocation75_spill] sm:$0xff] }
 0xbf8   :  { %17046 = vst [vmem:[#allocation65_spill] sm:$0xff] %v15321_v17  ;;  %17048 = vst [vmem:[#allocation86_spill] sm:$0xff] %v15325_v56  ;;  %v15341_v8 = vsub.f32 %v17055_v46, %v15113_v59  ;;  %v17057_v17 = vld [vmem:[#allocation68_spill] sm:$0xff]  ;;  %v17059_v56 = vld [vmem:[#allocation77_spill] sm:$0xff] }
 0xbf9   :  { %17050 = vst [vmem:[#allocation67_spill] sm:$0xff] %v15329_v51  ;;  %17052 = vst [vmem:[#allocation64_spill] sm:$0xff] %v15333_v35  ;;  %v15345_v58 = vsub.f32 %v17057_v17, %v15113_v59  ;;  %v15349_v44 = vsub.f32 %v17059_v56, %v15113_v59  ;;  %v17061_v51 = vld [vmem:[#allocation74_spill] sm:$0xff]  ;;  %v17063_v35 = vld [vmem:[#allocation79_spill] sm:$0xff]  ;;  %v15365_v17 = vsub.f32 %v15107_v40, %v15113_v59 }
 0xbfa   :  { %17054 = vst [vmem:[#allocation69_spill] sm:$0xff] %v15337_v13  ;;  %17056 = vst [vmem:[#allocation66_spill] sm:$0xff] %v15341_v8  ;;  %v15353_v36 = vsub.f32 %v17061_v51, %v15113_v59  ;;  %v15357_v38 = vsub.f32 %v17063_v35, %v15113_v59  ;;  %v17065_v13 = vld [vmem:[#allocation76_spill] sm:$0xff]  ;;  %v15369_v56 = vsub.f32 %v15105_v47, %v15113_v59 }
 0xbfb   :  { %17058 = vst [vmem:[#allocation75_spill] sm:$0xff] %v15345_v58  ;;  %17060 = vst [vmem:[#allocation68_spill] sm:$0xff] %v15349_v44  ;;  %v15361_v46 = vsub.f32 %v17065_v13, %v15113_v59  ;;  %v8841_v51 = vmul.f32 %v15117_v60, %v15117_v60  ;;  %v8843_v35 = vmul.f32 %v15125_v28, %v15125_v28 }
 0xbfc   :  { %17062 = vst [vmem:[#allocation77_spill] sm:$0xff] %v15353_v36  ;;  %17064 = vst [vmem:[#allocation74_spill] sm:$0xff] %v15357_v38  ;;  %v8842_v36 = vmul.f32 %v15121_v5, %v15121_v5  ;;  %v8844_v13 = vmul.f32 %v15129_v57, %v15129_v57  ;;  %v8845_v47 = vmul.f32 %v15133_v25, %v15133_v25 }
 0xbfd   :  { %17066 = vst [vmem:[#allocation79_spill] sm:$0xff] %v15361_v46  ;;  %17067 = vst [vmem:[#allocation76_spill] sm:$0xff] %v15365_v17  ;;  %v8905_v46 = vsel %vm26_vm0, %v8841_v51, 0.0  ;;  %v8908_v59 = vsel %vm26_vm0, %v8843_v35, 0.0  ;;  %v8846_v5 = vmul.f32 %v15137_v31, %v15137_v31  ;;  %v8847_v57 = vmul.f32 %v15141_v15, %v15141_v15 }
 0xbfe   :  { %17068 = vst [vmem:[#allocation89_spill] sm:$0xff] %v15369_v56  ;;  %v8906_v40 = vsel %vm26_vm0, %v8842_v36, 0.0  ;;  %v8910_v56 = vsel %vm26_vm0, %v8844_v13, 0.0  ;;  %v8912_v51 = vsel %vm26_vm0, %v8845_v47, 0.0  ;;  %v8848_v36 = vmul.f32 %v15145_v9, %v15145_v9 }
 0xbff   :  { %v8907_v17 = vadd.f32 %v8906_v40, %v8905_v46  ;;  %v8914_v46 = vsel %vm26_vm0, %v8846_v5, 0.0  ;;  %v8916_v35 = vsel %vm26_vm0, %v8847_v57, 0.0  ;;  %v8852_v5 = vmul.f32 %v15161_v14, %v15161_v14 }
 0xc00   :  { %v8853_v57 = vmul.f32 %v15165_v53, %v15165_v53 }
 0xc01   :  { %v8909_v60 = vadd.f32 %v8908_v59, %v8907_v17  ;;  %v8849_v17 = vmul.f32 %v15149_v33, %v15149_v33 }
 0xc03   :  { %v8911_v28 = vadd.f32 %v8910_v56, %v8909_v60  ;;  %v8850_v60 = vmul.f32 %v15153_v19, %v15153_v19  ;;  %v8918_v56 = vsel %vm26_vm0, %v8848_v36, 0.0  ;;  %v8920_v47 = vsel %vm26_vm0, %v8849_v17, 0.0 }
 0xc04   :  { %v8854_v36 = vmul.f32 %v15169_v29, %v15169_v29  ;;  %v8855_v17 = vmul.f32 %v15173_v41, %v15173_v41 }
 0xc05   :  { %v8913_v38 = vadd.f32 %v8912_v51, %v8911_v28  ;;  %v8851_v28 = vmul.f32 %v15157_v10, %v15157_v10 }
 0xc07   :  { %v8915_v40 = vadd.f32 %v8914_v46, %v8913_v38  ;;  %v8922_v38 = vsel %vm26_vm0, %v8850_v60, 0.0  ;;  %v8856_v60 = vmul.f32 %v15177_v7, %v15177_v7 }
 0xc09   :  { %v8917_v59 = vadd.f32 %v8916_v35, %v8915_v40  ;;  %v8924_v40 = vsel %vm26_vm0, %v8851_v28, 0.0  ;;  %v8857_v28 = vmul.f32 %v15181_v4, %v15181_v4 }
 0xc0b   :  { %v8919_v13 = vadd.f32 %v8918_v56, %v8917_v59  ;;  %v8926_v59 = vsel %vm26_vm0, %v8852_v5, 0.0  ;;  %v8858_v5 = vmul.f32 %v15185_v27, %v15185_v27 }
 0xc0d   :  { %v8921_v51 = vadd.f32 %v8920_v47, %v8919_v13  ;;  %v8928_v13 = vsel %vm26_vm0, %v8853_v57, 0.0  ;;  %v8859_v57 = vmul.f32 %v15189_v50, %v15189_v50 }
 0xc0f   :  { %v8923_v46 = vadd.f32 %v8922_v38, %v8921_v51  ;;  %v8930_v51 = vsel %vm26_vm0, %v8854_v36, 0.0  ;;  %v8860_v36 = vmul.f32 %v15193_v0, %v15193_v0 }
 0xc11   :  { %v8925_v35 = vadd.f32 %v8924_v40, %v8923_v46  ;;  %v8932_v46 = vsel %vm26_vm0, %v8855_v17, 0.0  ;;  %v8861_v17 = vmul.f32 %v15197_v22, %v15197_v22 }
 0xc13   :  { %v8927_v56 = vadd.f32 %v8926_v59, %v8925_v35  ;;  %v8934_v35 = vsel %vm26_vm0, %v8856_v60, 0.0  ;;  %v8862_v60 = vmul.f32 %v15201_v1, %v15201_v1 }
 0xc15   :  { %v8929_v47 = vadd.f32 %v8928_v13, %v8927_v56  ;;  %v8936_v56 = vsel %vm26_vm0, %v8857_v28, 0.0  ;;  %v8863_v28 = vmul.f32 %v15205_v26, %v15205_v26 }
 0xc17   :  { %v8931_v38 = vadd.f32 %v8930_v51, %v8929_v47  ;;  %v8938_v47 = vsel %vm26_vm0, %v8858_v5, 0.0  ;;  %v8864_v5 = vmul.f32 %v15209_v37, %v15209_v37 }
 0xc19   :  { %v8933_v40 = vadd.f32 %v8932_v46, %v8931_v38  ;;  %v8940_v38 = vsel %vm26_vm0, %v8859_v57, 0.0  ;;  %v8865_v57 = vmul.f32 %v15213_v52, %v15213_v52 }
 0xc1b   :  { %v8935_v59 = vadd.f32 %v8934_v35, %v8933_v40  ;;  %v8942_v40 = vsel %vm26_vm0, %v8860_v36, 0.0  ;;  %v8866_v36 = vmul.f32 %v15217_v34, %v15217_v34 }
 0xc1d   :  { %v8937_v13 = vadd.f32 %v8936_v56, %v8935_v59  ;;  %v8944_v59 = vsel %vm26_vm0, %v8861_v17, 0.0  ;;  %v8867_v17 = vmul.f32 %v15221_v21, %v15221_v21 }
 0xc1f   :  { %v8939_v51 = vadd.f32 %v8938_v47, %v8937_v13  ;;  %v8946_v13 = vsel %vm26_vm0, %v8862_v60, 0.0  ;;  %v8868_v60 = vmul.f32 %v15225_v63, %v15225_v63 }
 0xc21   :  { %v8941_v46 = vadd.f32 %v8940_v38, %v8939_v51  ;;  %v8948_v51 = vsel %vm26_vm0, %v8863_v28, 0.0  ;;  %v8869_v28 = vmul.f32 %v15229_v23, %v15229_v23 }
 0xc23   :  { %v8943_v35 = vadd.f32 %v8942_v40, %v8941_v46  ;;  %v8950_v46 = vsel %vm26_vm0, %v8864_v5, 0.0  ;;  %v8870_v5 = vmul.f32 %v15233_v3, %v15233_v3 }
 0xc25   :  { %v8945_v56 = vadd.f32 %v8944_v59, %v8943_v35  ;;  %v8952_v35 = vsel %vm26_vm0, %v8865_v57, 0.0  ;;  %v8871_v57 = vmul.f32 %v15237_v16, %v15237_v16 }
 0xc27   :  { %v8947_v47 = vadd.f32 %v8946_v13, %v8945_v56  ;;  %v8954_v56 = vsel %vm26_vm0, %v8866_v36, 0.0  ;;  %v8872_v36 = vmul.f32 %v15241_v54, %v15241_v54 }
 0xc29   :  { %v8949_v38 = vadd.f32 %v8948_v51, %v8947_v47  ;;  %v8956_v47 = vsel %vm26_vm0, %v8867_v17, 0.0  ;;  %v8873_v17 = vmul.f32 %v15245_v2, %v15245_v2 }
 0xc2b   :  { %v8951_v40 = vadd.f32 %v8950_v46, %v8949_v38  ;;  %v8958_v38 = vsel %vm26_vm0, %v8868_v60, 0.0  ;;  %v8874_v60 = vmul.f32 %v15249_v48, %v15249_v48 }
 0xc2d   :  { %v8953_v59 = vadd.f32 %v8952_v35, %v8951_v40  ;;  %v8960_v40 = vsel %vm26_vm0, %v8869_v28, 0.0  ;;  %v8875_v28 = vmul.f32 %v15253_v42, %v15253_v42 }
 0xc2f   :  { %v8955_v13 = vadd.f32 %v8954_v56, %v8953_v59  ;;  %v8962_v59 = vsel %vm26_vm0, %v8870_v5, 0.0  ;;  %v8876_v5 = vmul.f32 %v15257_v32, %v15257_v32 }
 0xc31   :  { %v8957_v51 = vadd.f32 %v8956_v47, %v8955_v13  ;;  %v8964_v13 = vsel %vm26_vm0, %v8871_v57, 0.0  ;;  %v8877_v57 = vmul.f32 %v15261_v12, %v15261_v12 }
 0xc33   :  { %v8959_v46 = vadd.f32 %v8958_v38, %v8957_v51  ;;  %v8966_v51 = vsel %vm26_vm0, %v8872_v36, 0.0  ;;  %v8878_v36 = vmul.f32 %v15265_v18, %v15265_v18 }
 0xc35   :  { %v8961_v35 = vadd.f32 %v8960_v40, %v8959_v46  ;;  %v8968_v46 = vsel %vm26_vm0, %v8873_v17, 0.0  ;;  %v8879_v17 = vmul.f32 %v15269_v61, %v15269_v61 }
 0xc37   :  { %v8963_v56 = vadd.f32 %v8962_v59, %v8961_v35  ;;  %v8970_v35 = vsel %vm26_vm0, %v8874_v60, 0.0  ;;  %v8880_v60 = vmul.f32 %v15273_v39, %v15273_v39 }
 0xc39   :  { %v8965_v47 = vadd.f32 %v8964_v13, %v8963_v56  ;;  %v8972_v56 = vsel %vm26_vm0, %v8875_v28, 0.0  ;;  %v8881_v28 = vmul.f32 %v15277_v11, %v15277_v11 }
 0xc3b   :  { %v8967_v38 = vadd.f32 %v8966_v51, %v8965_v47  ;;  %v8974_v47 = vsel %vm26_vm0, %v8876_v5, 0.0  ;;  %v8882_v5 = vmul.f32 %v15281_v45, %v15281_v45 }
 0xc3d   :  { %v8969_v40 = vadd.f32 %v8968_v46, %v8967_v38  ;;  %v8976_v38 = vsel %vm26_vm0, %v8877_v57, 0.0  ;;  %v8883_v57 = vmul.f32 %v15285_v43, %v15285_v43 }
 0xc3f   :  { %v8971_v59 = vadd.f32 %v8970_v35, %v8969_v40  ;;  %v8978_v40 = vsel %vm26_vm0, %v8878_v36, 0.0  ;;  %v8884_v36 = vmul.f32 %v15289_v30, %v15289_v30 }
 0xc41   :  { %v8973_v13 = vadd.f32 %v8972_v56, %v8971_v59  ;;  %v8980_v59 = vsel %vm26_vm0, %v8879_v17, 0.0  ;;  %v8885_v17 = vmul.f32 %v15293_v20, %v15293_v20 }
 0xc43   :  { %v8975_v51 = vadd.f32 %v8974_v47, %v8973_v13  ;;  %v8982_v13 = vsel %vm26_vm0, %v8880_v60, 0.0  ;;  %v8886_v60 = vmul.f32 %v15297_v24, %v15297_v24 }
 0xc45   :  { %v8977_v46 = vadd.f32 %v8976_v38, %v8975_v51  ;;  %v8984_v51 = vsel %vm26_vm0, %v8881_v28, 0.0  ;;  %v8887_v28 = vmul.f32 %v15301_v62, %v15301_v62 }
 0xc47   :  { %v8979_v35 = vadd.f32 %v8978_v40, %v8977_v46  ;;  %v8986_v46 = vsel %vm26_vm0, %v8882_v5, 0.0  ;;  %v8888_v5 = vmul.f32 %v15305_v49, %v15305_v49 }
 0xc49   :  { %v8981_v56 = vadd.f32 %v8980_v59, %v8979_v35  ;;  %v8988_v35 = vsel %vm26_vm0, %v8883_v57, 0.0  ;;  %v8889_v57 = vmul.f32 %v15309_v55, %v15309_v55 }
 0xc4b   :  { %v8983_v47 = vadd.f32 %v8982_v13, %v8981_v56  ;;  %v8990_v56 = vsel %vm26_vm0, %v8884_v36, 0.0  ;;  %v8890_v36 = vmul.f32 %v15313_v6, %v15313_v6 }
 0xc4d   :  { %v8985_v38 = vadd.f32 %v8984_v51, %v8983_v47  ;;  %v8992_v47 = vsel %vm26_vm0, %v8885_v17, 0.0  ;;  %v17069_v17 = vld [vmem:[#allocation84_spill] sm:$0xff] }
 0xc4f   :  { %v8987_v40 = vadd.f32 %v8986_v46, %v8985_v38  ;;  %v8994_v38 = vsel %vm26_vm0, %v8886_v60, 0.0  ;;  %v17070_v60 = vld [vmem:[#allocation65_spill] sm:$0xff] }
 0xc51   :  { %v8989_v59 = vadd.f32 %v8988_v35, %v8987_v40  ;;  %v8996_v40 = vsel %vm26_vm0, %v8887_v28, 0.0  ;;  %v17071_v28 = vld [vmem:[#allocation86_spill] sm:$0xff] }
 0xc53   :  { %v8991_v13 = vadd.f32 %v8990_v56, %v8989_v59  ;;  %v8998_v59 = vsel %vm26_vm0, %v8888_v5, 0.0  ;;  %v17072_v5 = vld [vmem:[#allocation67_spill] sm:$0xff] }
 0xc55   :  { %v8993_v51 = vadd.f32 %v8992_v47, %v8991_v13  ;;  %v8891_v13 = vmul.f32 %v17069_v17, %v17069_v17  ;;  %v9000_v47 = vsel %vm26_vm0, %v8889_v57, 0.0  ;;  %v17073_v57 = vld [vmem:[#allocation64_spill] sm:$0xff] }
 0xc57   :  { %v8995_v46 = vadd.f32 %v8994_v38, %v8993_v51  ;;  %v8892_v51 = vmul.f32 %v17070_v60, %v17070_v60  ;;  %v9002_v38 = vsel %vm26_vm0, %v8890_v36, 0.0  ;;  %v17074_v36 = vld [vmem:[#allocation69_spill] sm:$0xff] }
 0xc59   :  { %v8997_v35 = vadd.f32 %v8996_v40, %v8995_v46  ;;  %v8893_v46 = vmul.f32 %v17071_v28, %v17071_v28  ;;  %v9004_v40 = vsel %vm26_vm0, %v8891_v13, 0.0 }
 0xc5b   :  { %v8999_v56 = vadd.f32 %v8998_v59, %v8997_v35  ;;  %v8894_v35 = vmul.f32 %v17072_v5, %v17072_v5  ;;  %v9006_v59 = vsel %vm26_vm0, %v8892_v51, 0.0 }
 0xc5d   :  { %v9001_v49 = vadd.f32 %v9000_v47, %v8999_v56  ;;  %v8895_v56 = vmul.f32 %v17073_v57, %v17073_v57  ;;  %v9008_v47 = vsel %vm26_vm0, %v8893_v46, 0.0 }
 0xc5f   :  { %v9003_v55 = vadd.f32 %v9002_v38, %v9001_v49  ;;  %v8896_v49 = vmul.f32 %v17074_v36, %v17074_v36  ;;  %v9010_v38 = vsel %vm26_vm0, %v8894_v35, 0.0  ;;  %v9012_v13 = vsel %vm26_vm0, %v8895_v56, 0.0  ;;  %v17075_v35 = vld [vmem:[#allocation77_spill] sm:$0xff]  ;;  %v17076_v56 = vld [vmem:[#allocation74_spill] sm:$0xff] }
 0xc61   :  { %v9005_v6 = vadd.f32 %v9004_v40, %v9003_v55  ;;  %v8897_v55 = vmul.f32 %v15341_v8, %v15341_v8  ;;  %v9014_v51 = vsel %vm26_vm0, %v8896_v49, 0.0  ;;  %v17077_v49 = vld [vmem:[#allocation79_spill] sm:$0xff] }
 0xc63   :  { %v9007_v17 = vadd.f32 %v9006_v59, %v9005_v6  ;;  %v8898_v6 = vmul.f32 %v15345_v58, %v15345_v58  ;;  %v9016_v46 = vsel %vm26_vm0, %v8897_v55, 0.0  ;;  %v17078_v55 = vld [vmem:[#allocation76_spill] sm:$0xff] }
 0xc65   :  { %v9009_v60 = vadd.f32 %v9008_v47, %v9007_v17  ;;  %v8899_v17 = vmul.f32 %v15349_v44, %v15349_v44 }
 0xc67   :  { %v9011_v28 = vadd.f32 %v9010_v38, %v9009_v60  ;;  %v8900_v60 = vmul.f32 %v17075_v35, %v17075_v35  ;;  %v9018_v38 = vsel %vm26_vm0, %v8898_v6, 0.0  ;;  %v17079_v6 = vld [vmem:[#allocation89_spill] sm:$0xff] }
 0xc69   :  { %v9013_v40 = vadd.f32 %v9012_v13, %v9011_v28  ;;  %v8901_v28 = vmul.f32 %v17076_v56, %v17076_v56  ;;  %v9020_v13 = vsel %vm26_vm0, %v8899_v17, 0.0 }
 0xc6b   :  { %v9015_v59 = vadd.f32 %v9014_v51, %v9013_v40  ;;  %v8902_v40 = vmul.f32 %v17077_v49, %v17077_v49  ;;  %v9022_v51 = vsel %vm26_vm0, %v8900_v60, 0.0 }
 0xc6d   :  { %v9017_v47 = vadd.f32 %v9016_v46, %v9015_v59  ;;  %v8903_v59 = vmul.f32 %v17078_v55, %v17078_v55  ;;  %v9024_v46 = vsel %vm26_vm0, %v8901_v28, 0.0 }
 0xc6f   :  { %v9019_v8 = vadd.f32 %v9018_v38, %v9017_v47  ;;  %v8904_v47 = vmul.f32 %v17079_v6, %v17079_v6  ;;  %v9026_v38 = vsel %vm26_vm0, %v8902_v40, 0.0  ;;  %v9039_v40 = vld [vmem:[%s16668_s5] sm:$0x1] }
 0xc71   :  { %v9021_v58 = vadd.f32 %v9020_v13, %v9019_v8  ;;  %v9028_v8 = vsel %vm26_vm0, %v8903_v59, 0.0  ;;  %v9030_v13 = vsel %vm26_vm0, %v8904_v47, 0.0  ;;  %v17080_v59 = vld [vmem:[#allocation87_spill] sm:$0xff]  ;;  %v17082_v47 = vld [vmem:[#allocation78_spill] sm:$0xff] }
 0xc73   :  { %v9023_v44 = vadd.f32 %v9022_v51, %v9021_v58 }
 0xc75   :  { %v9025_v35 = vadd.f32 %v9024_v46, %v9023_v44 }
 0xc77   :  { %v9027_v56 = vadd.f32 %v9026_v38, %v9025_v35 }
 0xc79   :  { %v9029_v17 = vadd.f32 %v9028_v8, %v9027_v56  ;;  %v17081_v56 = vsub.s32 0, %v17080_v59  ;;  %v17083_v8 = vld [vmem:[#allocation81_spill] sm:$0xff]  ;;  %v17089_v59 = vld [vmem:[#allocation84_spill] sm:$0xff] }
 0xc7b   :  { %v9031_v49 = vadd.f32 %v9030_v13, %v9029_v17  ;;  %v17085_v17 = vld [vmem:[#allocation88_spill] sm:$0xff] }
 0xc7d   :  { %v9032_v60 = vrot.slane %v9031_v49, 4 }
 0xc7f   :  { %v9033_v58 = vadd.f32 %v9032_v60, %v9031_v49 }
 0xc81   :  { %v9034_v51 = vrot.slane %v9033_v58, 2 }
 0xc83   :  { %v9035_v36 = vadd.f32 %v9034_v51, %v9033_v58 }
 0xc85   :  { %v9036_v55 = vrot.slane %v9035_v36, 1 }
 0xc87   :  { %v9037_v57 = vadd.f32 %v9036_v55, %v9035_v36 }
 0xc89   :  { %v9038_v28 = vmul.f32 0.001953125, %v9037_v57  ;;  %v17084_v57 = vld [vmem:[#allocation80_spill] sm:$0xff] }
 0xc8b   :  { %v9040_v44 = vadd.f32 1e-05, %v9038_v28 }
 0xc8d   :  { %9889 = vrsqrt.f32 %v9040_v44 }
 0xc97   :  { %v9890_v35 = vpop.eup %9889 }
 0xc98   :  { %v9042_v46 = vmul.f32 %v9890_v35, %v9039_v40  ;;  %v17086_v40 = vld [vmem:[#allocation82_spill] sm:$0xff]  ;;  %v17087_v35 = vld [vmem:[#allocation83_spill] sm:$0xff] }
 0xc9a   :  { %v15568_v38 = vrot.slane %v9042_v46, %v17081_v56  ;;  %v17088_v46 = vld [vmem:[#allocation85_spill] sm:$0xff] }
 0xc9b   :  { %v17091_v56 = vld [vmem:[#allocation65_spill] sm:$0xff] }
 0xc9c   :  { %v15572_v49 = vmul.f32 %v15568_v38, %v17082_v47  ;;  %v15576_v36 = vmul.f32 %v15568_v38, %v17083_v8  ;;  %v15580_v55 = vmul.f32 %v15568_v38, %v17084_v57  ;;  %v15584_v13 = vmul.f32 %v15568_v38, %v17085_v17  ;;  %v17093_v47 = vld [vmem:[#allocation86_spill] sm:$0xff]  ;;  %v17096_v17 = vld [vmem:[#allocation64_spill] sm:$0xff] }
 0xc9d   :  { %v15588_v60 = vmul.f32 %v15568_v38, %v15133_v25  ;;  %v15592_v58 = vmul.f32 %v15568_v38, %v15137_v31  ;;  %v15596_v51 = vmul.f32 %v15568_v38, %v15141_v15  ;;  %v15600_v28 = vmul.f32 %v15568_v38, %v15145_v9 }
 0xc9e   :  { %v15604_v44 = vmul.f32 %v15568_v38, %v15149_v33  ;;  %v15608_v25 = vmul.f32 %v15568_v38, %v15153_v19  ;;  %v15612_v31 = vmul.f32 %v15568_v38, %v15157_v10  ;;  %v15616_v15 = vmul.f32 %v15568_v38, %v15161_v14 }
 0xc9f   :  { %v15620_v9 = vmul.f32 %v15568_v38, %v15165_v53  ;;  %v15624_v33 = vmul.f32 %v15568_v38, %v15169_v29  ;;  %v15628_v19 = vmul.f32 %v15568_v38, %v15173_v41  ;;  %v15632_v10 = vmul.f32 %v15568_v38, %v15177_v7 }
 0xca0   :  { %v15636_v14 = vmul.f32 %v15568_v38, %v15181_v4  ;;  %v15640_v53 = vmul.f32 %v15568_v38, %v15185_v27  ;;  %v15644_v29 = vmul.f32 %v15568_v38, %v15189_v50  ;;  %v15648_v41 = vmul.f32 %v15568_v38, %v15193_v0 }
 0xca1   :  { %v15652_v7 = vmul.f32 %v15568_v38, %v15197_v22  ;;  %v15656_v4 = vmul.f32 %v15568_v38, %v15201_v1  ;;  %v15660_v27 = vmul.f32 %v15568_v38, %v15205_v26  ;;  %v15664_v50 = vmul.f32 %v15568_v38, %v15209_v37 }
 0xca2   :  { %v15668_v0 = vmul.f32 %v15568_v38, %v15213_v52  ;;  %v15672_v22 = vmul.f32 %v15568_v38, %v15217_v34  ;;  %v15676_v1 = vmul.f32 %v15568_v38, %v15221_v21  ;;  %v15680_v26 = vmul.f32 %v15568_v38, %v15225_v63 }
 0xca3   :  { %v15684_v37 = vmul.f32 %v15568_v38, %v15229_v23  ;;  %v15688_v52 = vmul.f32 %v15568_v38, %v15233_v3  ;;  %v15692_v34 = vmul.f32 %v15568_v38, %v15237_v16  ;;  %v15696_v21 = vmul.f32 %v15568_v38, %v15241_v54 }
 0xca4   :  { %v15700_v63 = vmul.f32 %v15568_v38, %v15245_v2  ;;  %v15704_v23 = vmul.f32 %v15568_v38, %v15249_v48  ;;  %v15708_v3 = vmul.f32 %v15568_v38, %v15253_v42  ;;  %v15712_v16 = vmul.f32 %v15568_v38, %v15257_v32 }
 0xca5   :  { %v15716_v54 = vmul.f32 %v15568_v38, %v15261_v12  ;;  %v15720_v2 = vmul.f32 %v15568_v38, %v15265_v18  ;;  %v15724_v48 = vmul.f32 %v15568_v38, %v15269_v61  ;;  %v15728_v42 = vmul.f32 %v15568_v38, %v15273_v39 }
 0xca6   :  { %v15732_v32 = vmul.f32 %v15568_v38, %v15277_v11  ;;  %v15736_v12 = vmul.f32 %v15568_v38, %v15281_v45  ;;  %v15740_v18 = vmul.f32 %v15568_v38, %v15285_v43  ;;  %v15744_v61 = vmul.f32 %v15568_v38, %v15289_v30 }
 0xca7   :  { %v15748_v39 = vmul.f32 %v15568_v38, %v15293_v20  ;;  %v15752_v11 = vmul.f32 %v15568_v38, %v15297_v24  ;;  %v15756_v45 = vmul.f32 %v15568_v38, %v15301_v62  ;;  %v15760_v43 = vmul.f32 %v15568_v38, %v17086_v40 }
 0xca8   :  { %v15764_v30 = vmul.f32 %v15568_v38, %v17087_v35  ;;  %v15768_v20 = vmul.f32 %v15568_v38, %v17088_v46  ;;  %v15772_v24 = vmul.f32 %v15568_v38, %v17089_v59  ;;  %v15776_v62 = vmul.f32 %v15568_v38, %v17091_v56  ;;  %v17098_v35 = vld [vmem:[#allocation69_spill] sm:$0xff]  ;;  %v15797_v59 = vld [vmem:[%s16669_s6] ss:$0 sm:$0xff]  ;;  %v17100_v56 = vld [vmem:[#allocation66_spill] sm:$0xff] }
 0xca9   :  { %v15780_v8 = vmul.f32 %v15568_v38, %v17093_v47  ;;  %v15784_v57 = vmul.f32 %v15568_v38, %v17072_v5  ;;  %v15788_v40 = vmul.f32 %v15568_v38, %v17096_v17  ;;  %v15792_v46 = vmul.f32 %v15568_v38, %v17098_v35 }
 0xcaa   :  { %17090 = vst [vmem:[#allocation67_spill] sm:$0xff] %v15772_v24  ;;  %17092 = vst [vmem:[#allocation89_spill] sm:$0xff] %v15776_v62  ;;  %v15801_v47 = vmul.f32 %v15568_v38, %v17100_v56  ;;  %v17106_v24 = vld [vmem:[#allocation79_spill] sm:$0xff] }
 0xcab   :  { %17094 = vst [vmem:[#allocation87_spill] sm:$0xff] %v15780_v8  ;;  %17095 = vst [vmem:[#allocation78_spill] sm:$0xff] %v15784_v57  ;;  %v17102_v8 = vld [vmem:[#allocation75_spill] sm:$0xff]  ;;  %v17103_v57 = vld [vmem:[#allocation68_spill] sm:$0xff]  ;;  %v15821_v56 = vmul.f32 %v15568_v38, %v17106_v24  ;;  %v15841_v24 = vadd.f32 %v15797_v59, %v15580_v55  ;;  %v15865_v55 = vadd.f32 %v15797_v59, %v15604_v44 }
 0xcac   :  { %17097 = vst [vmem:[#allocation81_spill] sm:$0xff] %v15788_v40  ;;  %17099 = vst [vmem:[#allocation80_spill] sm:$0xff] %v15792_v46  ;;  %v15805_v5 = vmul.f32 %v15568_v38, %v17102_v8  ;;  %v15809_v17 = vmul.f32 %v15568_v38, %v17103_v57  ;;  %v17104_v40 = vld [vmem:[#allocation77_spill] sm:$0xff]  ;;  %v17105_v46 = vld [vmem:[#allocation74_spill] sm:$0xff]  ;;  %v15829_v57 = vmul.f32 %v15568_v38, %v17079_v6 }
 0xcad   :  { %17101 = vst [vmem:[#allocation88_spill] sm:$0xff] %v15801_v47  ;;  %v15813_v35 = vmul.f32 %v15568_v38, %v17104_v40  ;;  %v15817_v62 = vmul.f32 %v15568_v38, %v17105_v46  ;;  %v17107_v47 = vld [vmem:[#allocation76_spill] sm:$0xff]  ;;  %v15833_v40 = vadd.f32 %v15797_v59, %v15572_v49  ;;  %v15837_v46 = vadd.f32 %v15797_v59, %v15576_v36 }
 0xcae   :  { %v15825_v8 = vmul.f32 %v15568_v38, %v17107_v47  ;;  %v15845_v47 = vadd.f32 %v15797_v59, %v15584_v13  ;;  %v15849_v6 = vadd.f32 %v15797_v59, %v15588_v60  ;;  %v15853_v38 = vadd.f32 %v15797_v59, %v15592_v58 }
 0xcaf   :  { %v15857_v49 = vadd.f32 %v15797_v59, %v15596_v51  ;;  %v15861_v36 = vadd.f32 %v15797_v59, %v15600_v28  ;;  %v15869_v13 = vadd.f32 %v15797_v59, %v15608_v25  ;;  %v15873_v60 = vadd.f32 %v15797_v59, %v15612_v31 }
 0xcb0   :  { %v15877_v58 = vadd.f32 %v15797_v59, %v15616_v15  ;;  %v15881_v51 = vadd.f32 %v15797_v59, %v15620_v9  ;;  %v15885_v28 = vadd.f32 %v15797_v59, %v15624_v33  ;;  %v15889_v44 = vadd.f32 %v15797_v59, %v15628_v19 }
 0xcb1   :  { %v15893_v25 = vadd.f32 %v15797_v59, %v15632_v10  ;;  %v15897_v31 = vadd.f32 %v15797_v59, %v15636_v14  ;;  %v15901_v15 = vadd.f32 %v15797_v59, %v15640_v53  ;;  %v15905_v9 = vadd.f32 %v15797_v59, %v15644_v29 }
 0xcb2   :  { %v15909_v33 = vadd.f32 %v15797_v59, %v15648_v41  ;;  %v15913_v19 = vadd.f32 %v15797_v59, %v15652_v7  ;;  %v15917_v10 = vadd.f32 %v15797_v59, %v15656_v4  ;;  %v15921_v14 = vadd.f32 %v15797_v59, %v15660_v27 }
 0xcb3   :  { %v15925_v53 = vadd.f32 %v15797_v59, %v15664_v50  ;;  %v15929_v29 = vadd.f32 %v15797_v59, %v15668_v0  ;;  %v15933_v41 = vadd.f32 %v15797_v59, %v15672_v22  ;;  %v15937_v7 = vadd.f32 %v15797_v59, %v15676_v1 }
 0xcb4   :  { %v15941_v4 = vadd.f32 %v15797_v59, %v15680_v26  ;;  %v15945_v27 = vadd.f32 %v15797_v59, %v15684_v37  ;;  %v15949_v50 = vadd.f32 %v15797_v59, %v15688_v52  ;;  %v15953_v0 = vadd.f32 %v15797_v59, %v15692_v34 }
 0xcb5   :  { %v15957_v22 = vadd.f32 %v15797_v59, %v15696_v21  ;;  %v15961_v1 = vadd.f32 %v15797_v59, %v15700_v63  ;;  %v15965_v26 = vadd.f32 %v15797_v59, %v15704_v23  ;;  %v15969_v37 = vadd.f32 %v15797_v59, %v15708_v3 }
 0xcb6   :  { %v15973_v52 = vadd.f32 %v15797_v59, %v15712_v16  ;;  %v15977_v34 = vadd.f32 %v15797_v59, %v15716_v54  ;;  %v15981_v21 = vadd.f32 %v15797_v59, %v15720_v2  ;;  %v15985_v63 = vadd.f32 %v15797_v59, %v15724_v48 }
 0xcb7   :  { %v15989_v23 = vadd.f32 %v15797_v59, %v15728_v42  ;;  %v15993_v3 = vadd.f32 %v15797_v59, %v15732_v32  ;;  %v15997_v16 = vadd.f32 %v15797_v59, %v15736_v12  ;;  %v16001_v54 = vadd.f32 %v15797_v59, %v15740_v18 }
 0xcb8   :  { %v16005_v2 = vadd.f32 %v15797_v59, %v15744_v61  ;;  %v16009_v48 = vadd.f32 %v15797_v59, %v15748_v39  ;;  %v16013_v42 = vadd.f32 %v15797_v59, %v15752_v11  ;;  %v16017_v32 = vadd.f32 %v15797_v59, %v15756_v45  ;;  %v17113_v39 = vld [vmem:[#allocation67_spill] sm:$0xff] }
 0xcb9   :  { %v16021_v12 = vadd.f32 %v15797_v59, %v15760_v43  ;;  %v16025_v18 = vadd.f32 %v15797_v59, %v15764_v30  ;;  %v16029_v61 = vadd.f32 %v15797_v59, %v15768_v20  ;;  %v16033_v11 = vadd.f32 %v15797_v59, %v17113_v39 }
 0xcba   :  { %17108 = vst [vmem:[#allocation82_spill] sm:$0xff] %v16013_v42  ;;  %17109 = vst [vmem:[#allocation83_spill] sm:$0xff] %v16017_v32  ;;  %v17115_v42 = vld [vmem:[#allocation89_spill] sm:$0xff]  ;;  %v17116_v32 = vld [vmem:[#allocation87_spill] sm:$0xff] }
 0xcbb   :  { %17110 = vst [vmem:[#allocation85_spill] sm:$0xff] %v16021_v12  ;;  %17111 = vst [vmem:[#allocation84_spill] sm:$0xff] %v16025_v18  ;;  %v16037_v45 = vadd.f32 %v15797_v59, %v17115_v42  ;;  %v16041_v43 = vadd.f32 %v15797_v59, %v17116_v32  ;;  %v17117_v12 = vld [vmem:[#allocation78_spill] sm:$0xff]  ;;  %v17118_v18 = vld [vmem:[#allocation81_spill] sm:$0xff]  ;;  %v16061_v32 = vadd.f32 %v15797_v59, %v15805_v5 }
 0xcbc   :  { %17112 = vst [vmem:[#allocation65_spill] sm:$0xff] %v16029_v61  ;;  %17114 = vst [vmem:[#allocation86_spill] sm:$0xff] %v16033_v11  ;;  %v16045_v30 = vadd.f32 %v15797_v59, %v17117_v12  ;;  %v16049_v20 = vadd.f32 %v15797_v59, %v17118_v18  ;;  %v17119_v61 = vld [vmem:[#allocation80_spill] sm:$0xff]  ;;  %v16065_v12 = vadd.f32 %v15797_v59, %v15809_v17 }
 0xcbd   :  { %v16053_v39 = vadd.f32 %v15797_v59, %v17119_v61  ;;  %v17120_v11 = vld [vmem:[#allocation88_spill] sm:$0xff]  ;;  %v16069_v18 = vadd.f32 %v15797_v59, %v15813_v35  ;;  %v16073_v61 = vadd.f32 %v15797_v59, %v15817_v62  ;;  %v16081_v5 = vadd.f32 %v15797_v59, %v15825_v8 }
 0xcbe   :  { %v16057_v42 = vadd.f32 %v15797_v59, %v17120_v11  ;;  %17121 = vst [vmem:[#allocation64_spill] sm:$0xff] %v16065_v12  ;;  %v16077_v11 = vadd.f32 %v15797_v59, %v15821_v56  ;;  %v16085_v17 = vadd.f32 %v15797_v59, %v15829_v57  ;;  %v17126_v12 = vld [vmem:[#allocation4_spill] sm:$0xff]  ;;  %v17131_v57 = vld [vmem:[#allocation9_spill] sm:$0xff] }
 0xcbf   :  { %17122 = vst [vmem:[#allocation69_spill] sm:$0xff] %v16069_v18  ;;  %17123 = vst [vmem:[#allocation66_spill] sm:$0xff] %v16073_v61  ;;  %v16089_v35 = vadd.f32 %v15833_v40, %v17126_v12  ;;  %v17127_v18 = vld [vmem:[#allocation5_spill] sm:$0xff]  ;;  %v17128_v61 = vld [vmem:[#allocation6_spill] sm:$0xff]  ;;  %v16109_v40 = vadd.f32 %v15853_v38, %v17131_v57 }
 0xcc0   :  { %17124 = vst [vmem:[#allocation75_spill] sm:$0xff] %v16077_v11  ;;  %17125 = vst [vmem:[#allocation68_spill] sm:$0xff] %v16081_v5  ;;  %v16093_v62 = vadd.f32 %v15837_v46, %v17127_v18  ;;  %v16097_v56 = vadd.f32 %v15841_v24, %v17128_v61  ;;  %v17129_v11 = vld [vmem:[#allocation7_spill] sm:$0xff]  ;;  %v17130_v5 = vld [vmem:[#allocation8_spill] sm:$0xff] }
 0xcc1   :  { %v16101_v8 = vadd.f32 %v15845_v47, %v17129_v11  ;;  %v16105_v59 = vadd.f32 %v15849_v6, %v17130_v5  ;;  %v17132_v12 = vld [vmem:[#allocation10_spill] sm:$0xff]  ;;  %v17133_v18 = vld [vmem:[#allocation11_spill] sm:$0xff]  ;;  %v17134_v61 = vld [vmem:[#allocation12_spill] sm:$0xff] }
 0xcc2   :  { %v16113_v46 = vadd.f32 %v15857_v49, %v17132_v12  ;;  %v16117_v24 = vadd.f32 %v15861_v36, %v17133_v18  ;;  %v16121_v47 = vadd.f32 %v15865_v55, %v17134_v61  ;;  %v17135_v11 = vld [vmem:[#allocation13_spill] sm:$0xff]  ;;  %v17136_v5 = vld [vmem:[#allocation14_spill] sm:$0xff]  ;;  %v17137_v57 = vld [vmem:[#allocation15_spill] sm:$0xff] }
 0xcc3   :  { %v16125_v6 = vadd.f32 %v15869_v13, %v17135_v11  ;;  %v16129_v38 = vadd.f32 %v15873_v60, %v17136_v5  ;;  %v16133_v49 = vadd.f32 %v15877_v58, %v17137_v57  ;;  %v17138_v12 = vld [vmem:[#allocation16_spill] sm:$0xff]  ;;  %v17139_v18 = vld [vmem:[#allocation17_spill] sm:$0xff]  ;;  %v17140_v61 = vld [vmem:[#allocation18_spill] sm:$0xff] }
 0xcc4   :  { %v16137_v36 = vadd.f32 %v15881_v51, %v17138_v12  ;;  %v16141_v55 = vadd.f32 %v15885_v28, %v17139_v18  ;;  %v16145_v13 = vadd.f32 %v15889_v44, %v17140_v61  ;;  %v17141_v11 = vld [vmem:[#allocation19_spill] sm:$0xff]  ;;  %v17142_v5 = vld [vmem:[#allocation20_spill] sm:$0xff]  ;;  %v17143_v57 = vld [vmem:[#allocation21_spill] sm:$0xff] }
 0xcc5   :  { %v16149_v60 = vadd.f32 %v15893_v25, %v17141_v11  ;;  %v16153_v58 = vadd.f32 %v15897_v31, %v17142_v5  ;;  %v16157_v51 = vadd.f32 %v15901_v15, %v17143_v57  ;;  %v17144_v12 = vld [vmem:[#allocation22_spill] sm:$0xff]  ;;  %v17145_v18 = vld [vmem:[#allocation23_spill] sm:$0xff]  ;;  %v17146_v61 = vld [vmem:[#allocation24_spill] sm:$0xff] }
 0xcc6   :  { %v16161_v28 = vadd.f32 %v15905_v9, %v17144_v12  ;;  %v16165_v44 = vadd.f32 %v15909_v33, %v17145_v18  ;;  %v16169_v25 = vadd.f32 %v15913_v19, %v17146_v61  ;;  %v17147_v11 = vld [vmem:[#allocation25_spill] sm:$0xff]  ;;  %v17148_v5 = vld [vmem:[#allocation26_spill] sm:$0xff]  ;;  %v17149_v57 = vld [vmem:[#allocation27_spill] sm:$0xff] }
 0xcc7   :  { %v16173_v31 = vadd.f32 %v15917_v10, %v17147_v11  ;;  %v16177_v15 = vadd.f32 %v15921_v14, %v17148_v5  ;;  %v16181_v9 = vadd.f32 %v15925_v53, %v17149_v57  ;;  %v17150_v12 = vld [vmem:[#allocation28_spill] sm:$0xff]  ;;  %v17151_v18 = vld [vmem:[#allocation29_spill] sm:$0xff]  ;;  %v17152_v61 = vld [vmem:[#allocation30_spill] sm:$0xff] }
 0xcc8   :  { %v16185_v33 = vadd.f32 %v15929_v29, %v17150_v12  ;;  %v16189_v19 = vadd.f32 %v15933_v41, %v17151_v18  ;;  %v16193_v10 = vadd.f32 %v15937_v7, %v17152_v61  ;;  %v17153_v11 = vld [vmem:[#allocation31_spill] sm:$0xff]  ;;  %v17154_v5 = vld [vmem:[#allocation32_spill] sm:$0xff]  ;;  %v17155_v57 = vld [vmem:[#allocation33_spill] sm:$0xff] }
 0xcc9   :  { %v16197_v14 = vadd.f32 %v15941_v4, %v17153_v11  ;;  %v16201_v53 = vadd.f32 %v15945_v27, %v17154_v5  ;;  %v16205_v29 = vadd.f32 %v15949_v50, %v17155_v57  ;;  %v17156_v12 = vld [vmem:[#allocation70_spill] sm:$0xff]  ;;  %v17157_v18 = vld [vmem:[#allocation71_spill] sm:$0xff]  ;;  %v17160_v5 = vld [vmem:[#allocation36_spill] sm:$0xff] }
 0xcca   :  { %v16209_v41 = vadd.f32 %v15953_v0, %v17156_v12  ;;  %v16213_v7 = vadd.f32 %v15957_v22, %v17157_v18  ;;  %v17158_v61 = vld [vmem:[#allocation34_spill] sm:$0xff]  ;;  %v17159_v11 = vld [vmem:[#allocation35_spill] sm:$0xff]  ;;  %v16225_v50 = vadd.f32 %v15969_v37, %v17160_v5  ;;  %v17161_v57 = vld [vmem:[#allocation37_spill] sm:$0xff] }
 0xccb   :  { %v16217_v4 = vadd.f32 %v15961_v1, %v17158_v61  ;;  %v16221_v27 = vadd.f32 %v15965_v26, %v17159_v11  ;;  %v16229_v0 = vadd.f32 %v15973_v52, %v17161_v57  ;;  %v17162_v12 = vld [vmem:[#allocation38_spill] sm:$0xff]  ;;  %v17163_v18 = vld [vmem:[#allocation39_spill] sm:$0xff]  ;;  %v17164_v61 = vld [vmem:[#allocation40_spill] sm:$0xff] }
 0xccc   :  { %v16233_v22 = vadd.f32 %v15977_v34, %v17162_v12  ;;  %v16237_v1 = vadd.f32 %v15981_v21, %v17163_v18  ;;  %v16241_v26 = vadd.f32 %v15985_v63, %v17164_v61  ;;  %v17165_v11 = vld [vmem:[#allocation41_spill] sm:$0xff]  ;;  %v17167_v5 = vld [vmem:[#allocation42_spill] sm:$0xff]  ;;  %v17169_v57 = vld [vmem:[#allocation43_spill] sm:$0xff] }
 0xccd   :  { %v16245_v37 = vadd.f32 %v15989_v23, %v17165_v11  ;;  %v16249_v52 = vadd.f32 %v15993_v3, %v17167_v5  ;;  %v16253_v34 = vadd.f32 %v15997_v16, %v17169_v57  ;;  %v17171_v12 = vld [vmem:[#allocation44_spill] sm:$0xff]  ;;  %v17173_v18 = vld [vmem:[#allocation45_spill] sm:$0xff]  ;;  %v17175_v61 = vld [vmem:[#allocation46_spill] sm:$0xff] }
 0xcce   :  { %v16257_v21 = vadd.f32 %v16001_v54, %v17171_v12  ;;  %v16261_v63 = vadd.f32 %v16005_v2, %v17173_v18  ;;  %v16265_v23 = vadd.f32 %v16009_v48, %v17175_v61  ;;  %v17177_v11 = vld [vmem:[#allocation47_spill] sm:$0xff]  ;;  %v17179_v5 = vld [vmem:[#allocation48_spill] sm:$0xff]  ;;  %v17181_v57 = vld [vmem:[#allocation49_spill] sm:$0xff] }
 0xccf   :  { %17166 = vst [vmem:[#allocation77_spill] sm:$0xff] %v16245_v37  ;;  %17168 = vst [vmem:[#allocation74_spill] sm:$0xff] %v16249_v52  ;;  %v17178_v37 = vld [vmem:[#allocation82_spill] sm:$0xff]  ;;  %v17180_v52 = vld [vmem:[#allocation83_spill] sm:$0xff] }
 0xcd0   :  { %17170 = vst [vmem:[#allocation79_spill] sm:$0xff] %v16253_v34  ;;  %17172 = vst [vmem:[#allocation76_spill] sm:$0xff] %v16257_v21  ;;  %v16269_v3 = vadd.f32 %v17178_v37, %v17177_v11  ;;  %v16273_v16 = vadd.f32 %v17180_v52, %v17179_v5  ;;  %v17182_v34 = vld [vmem:[#allocation85_spill] sm:$0xff]  ;;  %v17183_v12 = vld [vmem:[#allocation50_spill] sm:$0xff] }
 0xcd1   :  { %17174 = vst [vmem:[#allocation67_spill] sm:$0xff] %v16261_v63  ;;  %17176 = vst [vmem:[#allocation89_spill] sm:$0xff] %v16265_v23  ;;  %v16277_v54 = vadd.f32 %v17182_v34, %v17181_v57  ;;  %v17184_v21 = vld [vmem:[#allocation84_spill] sm:$0xff]  ;;  %v17185_v18 = vld [vmem:[#allocation51_spill] sm:$0xff] }
 0xcd2   :  { %v16281_v2 = vadd.f32 %v17184_v21, %v17183_v12  ;;  %v17186_v63 = vld [vmem:[#allocation65_spill] sm:$0xff]  ;;  %v17187_v61 = vld [vmem:[#allocation52_spill] sm:$0xff]  ;;  %v17188_v23 = vld [vmem:[#allocation86_spill] sm:$0xff] }
 0xcd3   :  { %v16285_v48 = vadd.f32 %v17186_v63, %v17185_v18  ;;  %v16289_v37 = vadd.f32 %v17188_v23, %v17187_v61  ;;  %v17189_v11 = vld [vmem:[#allocation53_spill] sm:$0xff]  ;;  %v17190_v5 = vld [vmem:[#allocation54_spill] sm:$0xff]  ;;  %v17192_v57 = vld [vmem:[#allocation55_spill] sm:$0xff] }
 0xcd4   :  { %v16293_v52 = vadd.f32 %v16037_v45, %v17189_v11  ;;  %v16297_v34 = vadd.f32 %v16041_v43, %v17190_v5  ;;  %v16301_v21 = vadd.f32 %v16045_v30, %v17192_v57  ;;  %v17194_v12 = vld [vmem:[#allocation56_spill] sm:$0xff]  ;;  %v17196_v18 = vld [vmem:[#allocation57_spill] sm:$0xff]  ;;  %v17198_v61 = vld [vmem:[#allocation58_spill] sm:$0xff] }
 0xcd5   :  { %v16305_v63 = vadd.f32 %v16049_v20, %v17194_v12  ;;  %v16309_v23 = vadd.f32 %v16053_v39, %v17196_v18  ;;  %v16313_v45 = vadd.f32 %v16057_v42, %v17198_v61  ;;  %v17200_v11 = vld [vmem:[#allocation59_spill] sm:$0xff]  ;;  %v17201_v5 = vld [vmem:[#allocation60_spill] sm:$0xff]  ;;  %v17203_v57 = vld [vmem:[#allocation61_spill] sm:$0xff] }
 0xcd6   :  { %17191 = vst [vmem:[#allocation87_spill] sm:$0xff] %v16297_v34  ;;  %17193 = vst [vmem:[#allocation78_spill] sm:$0xff] %v16301_v21  ;;  %v16317_v43 = vadd.f32 %v16061_v32, %v17200_v11  ;;  %v17202_v34 = vld [vmem:[#allocation64_spill] sm:$0xff]  ;;  %v17204_v21 = vld [vmem:[#allocation69_spill] sm:$0xff] }
 0xcd7   :  { %17195 = vst [vmem:[#allocation81_spill] sm:$0xff] %v16305_v63  ;;  %17197 = vst [vmem:[#allocation80_spill] sm:$0xff] %v16309_v23  ;;  %v16321_v30 = vadd.f32 %v17202_v34, %v17201_v5  ;;  %v16325_v20 = vadd.f32 %v17204_v21, %v17203_v57  ;;  %v17205_v12 = vld [vmem:[#allocation62_spill] sm:$0xff]  ;;  %v17207_v18 = vld [vmem:[#allocation63_spill] sm:$0xff]  ;;  %v9248_v5 = vmax.f32 %v16089_v35, 0.0  ;;  %v9249_v21 = vmax.f32 %v16093_v62, 0.0 }
 0xcd8   :  { %17199 = vst [vmem:[#allocation88_spill] sm:$0xff] %v16313_v45  ;;  %v17206_v63 = vld [vmem:[#allocation66_spill] sm:$0xff]  ;;  %v17208_v23 = vld [vmem:[#allocation75_spill] sm:$0xff]  ;;  %v17209_v61 = vld [vmem:[#allocation72_spill] sm:$0xff]  ;;  %v9250_v57 = vmax.f32 %v16097_v56, 0.0  ;;  %v9258_v35 = vmax.f32 %v16129_v38, 0.0 }
 0xcd9   :  { %v16329_v39 = vadd.f32 %v17206_v63, %v17205_v12  ;;  %v16333_v42 = vadd.f32 %v17208_v23, %v17207_v18  ;;  %v17210_v45 = vld [vmem:[#allocation68_spill] sm:$0xff]  ;;  %v17211_v11 = vld [vmem:[#allocation73_spill] sm:$0xff]  ;;  %v9251_v63 = vmax.f32 %v16101_v8, 0.0  ;;  %v9252_v12 = vmax.f32 %v16105_v59, 0.0  ;;  %9312 = vst.msk [vmem:[%s16670_s7] sm:$0xff] %vm26_vm0, %v9248_v5  ;;  %9313 = vst.msk [vmem:[%s16670_s7 + $0x8] sm:$0xff] %vm26_vm0, %v9249_v21 }
 0xcda   :  { %v16337_v32 = vadd.f32 %v17210_v45, %v17209_v61  ;;  %v16341_v34 = vadd.f32 %v16085_v17, %v17211_v11  ;;  %v9253_v23 = vmax.f32 %v16109_v40, 0.0  ;;  %v9254_v18 = vmax.f32 %v16113_v46, 0.0  ;;  %9314 = vst.msk [vmem:[%s16670_s7 + $0x10] sm:$0xff] %vm26_vm0, %v9250_v57  ;;  %9322 = vst.msk [vmem:[%s16670_s7 + $0x50] sm:$0xff] %vm26_vm0, %v9258_v35  ;;  %v17217_v11 = vld [vmem:[#allocation89_spill] sm:$0xff] }
 0xcdb   :  { %v9255_v45 = vmax.f32 %v16117_v24, 0.0  ;;  %v9256_v61 = vmax.f32 %v16121_v47, 0.0  ;;  %v9257_v17 = vmax.f32 %v16125_v6, 0.0  ;;  %v9259_v62 = vmax.f32 %v16133_v49, 0.0  ;;  %9315 = vst.msk [vmem:[%s16670_s7 + $0x18] sm:$0xff] %vm26_vm0, %v9251_v63  ;;  %9316 = vst.msk [vmem:[%s16670_s7 + $0x20] sm:$0xff] %vm26_vm0, %v9252_v12 }
 0xcdc   :  { %v9260_v56 = vmax.f32 %v16137_v36, 0.0  ;;  %v9261_v8 = vmax.f32 %v16141_v55, 0.0  ;;  %v9262_v59 = vmax.f32 %v16145_v13, 0.0  ;;  %v9263_v40 = vmax.f32 %v16149_v60, 0.0  ;;  %9317 = vst.msk [vmem:[%s16670_s7 + $0x28] sm:$0xff] %vm26_vm0, %v9253_v23  ;;  %9318 = vst.msk [vmem:[%s16670_s7 + $0x30] sm:$0xff] %vm26_vm0, %v9254_v18 }
 0xcdd   :  { %9319 = vst.msk [vmem:[%s16670_s7 + $0x38] sm:$0xff] %vm26_vm0, %v9255_v45  ;;  %v9264_v46 = vmax.f32 %v16153_v58, 0.0  ;;  %v9265_v24 = vmax.f32 %v16157_v51, 0.0  ;;  %v9266_v47 = vmax.f32 %v16161_v28, 0.0  ;;  %v9267_v6 = vmax.f32 %v16165_v44, 0.0  ;;  %9320 = vst.msk [vmem:[%s16670_s7 + $0x40] sm:$0xff] %vm26_vm0, %v9256_v61 }
 0xcde   :  { %9321 = vst.msk [vmem:[%s16670_s7 + $0x48] sm:$0xff] %vm26_vm0, %v9257_v17  ;;  %9323 = vst.msk [vmem:[%s16670_s7 + $0x58] sm:$0xff] %vm26_vm0, %v9259_v62  ;;  %v9268_v38 = vmax.f32 %v16169_v25, 0.0  ;;  %v9269_v49 = vmax.f32 %v16173_v31, 0.0  ;;  %v9270_v36 = vmax.f32 %v16177_v15, 0.0  ;;  %v9271_v55 = vmax.f32 %v16181_v9, 0.0 }
 0xcdf   :  { %9324 = vst.msk [vmem:[%s16670_s7 + $0x60] sm:$0xff] %vm26_vm0, %v9260_v56  ;;  %9325 = vst.msk [vmem:[%s16670_s7 + $0x68] sm:$0xff] %vm26_vm0, %v9261_v8  ;;  %v9272_v13 = vmax.f32 %v16185_v33, 0.0  ;;  %v9273_v60 = vmax.f32 %v16189_v19, 0.0  ;;  %v9274_v58 = vmax.f32 %v16193_v10, 0.0  ;;  %v9275_v51 = vmax.f32 %v16197_v14, 0.0 }
 0xce0   :  { %9326 = vst.msk [vmem:[%s16670_s7 + $0x70] sm:$0xff] %vm26_vm0, %v9262_v59  ;;  %9327 = vst.msk [vmem:[%s16670_s7 + $0x78] sm:$0xff] %vm26_vm0, %v9263_v40  ;;  %v9276_v28 = vmax.f32 %v16201_v53, 0.0  ;;  %v9277_v44 = vmax.f32 %v16205_v29, 0.0  ;;  %v9278_v25 = vmax.f32 %v16209_v41, 0.0  ;;  %v9279_v31 = vmax.f32 %v16213_v7, 0.0 }
 0xce1   :  { %9328 = vst.msk [vmem:[%s16670_s7 + $0x80] sm:$0xff] %vm26_vm0, %v9264_v46  ;;  %9329 = vst.msk [vmem:[%s16670_s7 + $0x88] sm:$0xff] %vm26_vm0, %v9265_v24  ;;  %v9280_v15 = vmax.f32 %v16217_v4, 0.0  ;;  %v9281_v9 = vmax.f32 %v16221_v27, 0.0  ;;  %v9282_v33 = vmax.f32 %v16225_v50, 0.0  ;;  %v9283_v19 = vmax.f32 %v16229_v0, 0.0 }
 0xce2   :  { %9330 = vst.msk [vmem:[%s16670_s7 + $0x90] sm:$0xff] %vm26_vm0, %v9266_v47  ;;  %9331 = vst.msk [vmem:[%s16670_s7 + $0x98] sm:$0xff] %vm26_vm0, %v9267_v6  ;;  %v9284_v10 = vmax.f32 %v16233_v22, 0.0  ;;  %v9285_v14 = vmax.f32 %v16237_v1, 0.0  ;;  %v9286_v53 = vmax.f32 %v16241_v26, 0.0  ;;  %v17212_v29 = vld [vmem:[#allocation77_spill] sm:$0xff] }
 0xce3   :  { %9332 = vst.msk [vmem:[%s16670_s7 + $0xa0] sm:$0xff] %vm26_vm0, %v9268_v38  ;;  %9333 = vst.msk [vmem:[%s16670_s7 + $0xa8] sm:$0xff] %vm26_vm0, %v9269_v49  ;;  %v9287_v41 = vmax.f32 %v17212_v29, 0.0  ;;  %v17213_v7 = vld [vmem:[#allocation74_spill] sm:$0xff]  ;;  %v17214_v27 = vld [vmem:[#allocation79_spill] sm:$0xff]  ;;  %v9292_v5 = vmax.f32 %v17217_v11, 0.0 }
 0xce4   :  { %9334 = vst.msk [vmem:[%s16670_s7 + $0xb0] sm:$0xff] %vm26_vm0, %v9270_v36  ;;  %9335 = vst.msk [vmem:[%s16670_s7 + $0xb8] sm:$0xff] %vm26_vm0, %v9271_v55  ;;  %v9288_v4 = vmax.f32 %v17213_v7, 0.0  ;;  %v9289_v50 = vmax.f32 %v17214_v27, 0.0  ;;  %v17215_v0 = vld [vmem:[#allocation76_spill] sm:$0xff]  ;;  %v17216_v1 = vld [vmem:[#allocation67_spill] sm:$0xff] }
 0xce5   :  { %9336 = vst.msk [vmem:[%s16670_s7 + $0xc0] sm:$0xff] %vm26_vm0, %v9272_v13  ;;  %9337 = vst.msk [vmem:[%s16670_s7 + $0xc8] sm:$0xff] %vm26_vm0, %v9273_v60  ;;  %v9290_v22 = vmax.f32 %v17215_v0, 0.0  ;;  %v9291_v26 = vmax.f32 %v17216_v1, 0.0  ;;  %v9293_v21 = vmax.f32 %v16269_v3, 0.0  ;;  %v9294_v57 = vmax.f32 %v16273_v16, 0.0 }
 0xce6   :  { %9338 = vst.msk [vmem:[%s16670_s7 + $0xd0] sm:$0xff] %vm26_vm0, %v9274_v58  ;;  %9339 = vst.msk [vmem:[%s16670_s7 + $0xd8] sm:$0xff] %vm26_vm0, %v9275_v51  ;;  %v9295_v63 = vmax.f32 %v16277_v54, 0.0  ;;  %v9296_v3 = vmax.f32 %v16281_v2, 0.0  ;;  %v9297_v16 = vmax.f32 %v16285_v48, 0.0  ;;  %v9298_v54 = vmax.f32 %v16289_v37, 0.0 }
 0xce7   :  { %9340 = vst.msk [vmem:[%s16670_s7 + $0xe0] sm:$0xff] %vm26_vm0, %v9276_v28  ;;  %9341 = vst.msk [vmem:[%s16670_s7 + $0xe8] sm:$0xff] %vm26_vm0, %v9277_v44  ;;  %v9299_v12 = vmax.f32 %v16293_v52, 0.0  ;;  %v17218_v2 = vld [vmem:[#allocation87_spill] sm:$0xff]  ;;  %v17219_v37 = vld [vmem:[#allocation78_spill] sm:$0xff]  ;;  %v9305_v62 = vmax.f32 %v16317_v43, 0.0 }
 0xce8   :  { %9342 = vst.msk [vmem:[%s16670_s7 + $0xf0] sm:$0xff] %vm26_vm0, %v9278_v25  ;;  %9343 = vst.msk [vmem:[%s16670_s7 + $0xf8] sm:$0xff] %vm26_vm0, %v9279_v31  ;;  %v9300_v48 = vmax.f32 %v17218_v2, 0.0  ;;  %v9301_v52 = vmax.f32 %v17219_v37, 0.0  ;;  %v17220_v23 = vld [vmem:[#allocation81_spill] sm:$0xff]  ;;  %v17221_v45 = vld [vmem:[#allocation80_spill] sm:$0xff] }
 0xce9   :  { %9344 = vst.msk [vmem:[%s16670_s7 + $0x100] sm:$0xff] %vm26_vm0, %v9280_v15  ;;  %9345 = vst.msk [vmem:[%s16670_s7 + $0x108] sm:$0xff] %vm26_vm0, %v9281_v9  ;;  %v9302_v18 = vmax.f32 %v17220_v23, 0.0  ;;  %v9303_v61 = vmax.f32 %v17221_v45, 0.0  ;;  %v17222_v17 = vld [vmem:[#allocation88_spill] sm:$0xff]  ;;  %v9306_v56 = vmax.f32 %v16321_v30, 0.0 }
 0xcea   :  { %9346 = vst.msk [vmem:[%s16670_s7 + $0x110] sm:$0xff] %vm26_vm0, %v9282_v33  ;;  %9347 = vst.msk [vmem:[%s16670_s7 + $0x118] sm:$0xff] %vm26_vm0, %v9283_v19  ;;  %v9304_v35 = vmax.f32 %v17222_v17, 0.0  ;;  %v9307_v8 = vmax.f32 %v16325_v20, 0.0  ;;  %v9308_v43 = vmax.f32 %v16329_v39, 0.0  ;;  %v9309_v30 = vmax.f32 %v16333_v42, 0.0 }
 0xceb   :  { %9348 = vst.msk [vmem:[%s16670_s7 + $0x120] sm:$0xff] %vm26_vm0, %v9284_v10  ;;  %9349 = vst.msk [vmem:[%s16670_s7 + $0x128] sm:$0xff] %vm26_vm0, %v9285_v14  ;;  %v9310_v20 = vmax.f32 %v16337_v32, 0.0  ;;  %v9311_v59 = vmax.f32 %v16341_v34, 0.0 }
 0xcec   :  { %9350 = vst.msk [vmem:[%s16670_s7 + $0x130] sm:$0xff] %vm26_vm0, %v9286_v53  ;;  %9351 = vst.msk [vmem:[%s16670_s7 + $0x138] sm:$0xff] %vm26_vm0, %v9287_v41 }
 0xced   :  { %9352 = vst.msk [vmem:[%s16670_s7 + $0x140] sm:$0xff] %vm26_vm0, %v9288_v4  ;;  %9353 = vst.msk [vmem:[%s16670_s7 + $0x148] sm:$0xff] %vm26_vm0, %v9289_v50 }
 0xcee   :  { %9354 = vst.msk [vmem:[%s16670_s7 + $0x150] sm:$0xff] %vm26_vm0, %v9290_v22  ;;  %9355 = vst.msk [vmem:[%s16670_s7 + $0x158] sm:$0xff] %vm26_vm0, %v9291_v26 }
 0xcef   :  { %9356 = vst.msk [vmem:[%s16670_s7 + $0x160] sm:$0xff] %vm26_vm0, %v9292_v5  ;;  %9357 = vst.msk [vmem:[%s16670_s7 + $0x168] sm:$0xff] %vm26_vm0, %v9293_v21 }
 0xcf0   :  { %9358 = vst.msk [vmem:[%s16670_s7 + $0x170] sm:$0xff] %vm26_vm0, %v9294_v57  ;;  %9359 = vst.msk [vmem:[%s16670_s7 + $0x178] sm:$0xff] %vm26_vm0, %v9295_v63 }
 0xcf1   :  { %9360 = vst.msk [vmem:[%s16670_s7 + $0x180] sm:$0xff] %vm26_vm0, %v9296_v3  ;;  %9361 = vst.msk [vmem:[%s16670_s7 + $0x188] sm:$0xff] %vm26_vm0, %v9297_v16 }
 0xcf2   :  { %9362 = vst.msk [vmem:[%s16670_s7 + $0x190] sm:$0xff] %vm26_vm0, %v9298_v54  ;;  %9363 = vst.msk [vmem:[%s16670_s7 + $0x198] sm:$0xff] %vm26_vm0, %v9299_v12 }
 0xcf3   :  { %9364 = vst.msk [vmem:[%s16670_s7 + $0x1a0] sm:$0xff] %vm26_vm0, %v9300_v48  ;;  %9365 = vst.msk [vmem:[%s16670_s7 + $0x1a8] sm:$0xff] %vm26_vm0, %v9301_v52 }
 0xcf4   :  { %9366 = vst.msk [vmem:[%s16670_s7 + $0x1b0] sm:$0xff] %vm26_vm0, %v9302_v18  ;;  %9367 = vst.msk [vmem:[%s16670_s7 + $0x1b8] sm:$0xff] %vm26_vm0, %v9303_v61 }
 0xcf5   :  { %9368 = vst.msk [vmem:[%s16670_s7 + $0x1c0] sm:$0xff] %vm26_vm0, %v9304_v35  ;;  %9369 = vst.msk [vmem:[%s16670_s7 + $0x1c8] sm:$0xff] %vm26_vm0, %v9305_v62 }
 0xcf6   :  { %9370 = vst.msk [vmem:[%s16670_s7 + $0x1d0] sm:$0xff] %vm26_vm0, %v9306_v56  ;;  %9371 = vst.msk [vmem:[%s16670_s7 + $0x1d8] sm:$0xff] %vm26_vm0, %v9307_v8 }
 0xcf7   :  { %9372 = vst.msk [vmem:[%s16670_s7 + $0x1e0] sm:$0xff] %vm26_vm0, %v9308_v43  ;;  %9373 = vst.msk [vmem:[%s16670_s7 + $0x1e8] sm:$0xff] %vm26_vm0, %v9309_v30 }
 0xcf8   :  { %9374 = vst.msk [vmem:[%s16670_s7 + $0x1f0] sm:$0xff] %vm26_vm0, %v9310_v20  ;;  %9375 = vst.msk [vmem:[%s16670_s7 + $0x1f8] sm:$0xff] %vm26_vm0, %v9311_v59 }

</bundles_post_ra>
